<compile_context>
chip_gen: v7x
topology: tpu7x:2x2x1
jax: 0.10.0
libtpu: 0.0.40
codegen_flags: <defaults>
</compile_context>

<pallas_src>
import jax
import jax.numpy as jnp
import numpy as np
from jax.experimental import pallas as pl
from jax.experimental.pallas import tpu as pltpu

# LeNet geometry implied by the PyTorch module (fc1 = 16*7*7 -> 28x28 input).
H1 = W1 = 28
H2 = W2 = 14
H3 = W3 = 7
C1, C2 = 6, 16
FC1, FC2 = 120, 84
NUM_CLASSES = 10

CIN_PAD = 8                   # lane width of the conv2 input buffer
CPAD = 128                    # lane width of conv outputs / fc features
K1_PAD = 16                   # conv1 tap lanes (9 real taps, cin = 1)

W1P, H1P = W1 + 2, H1 + 2     # 30x30 zero-padded conv1 grid
W2P, H2P = W2 + 2, H2 + 2     # 16x16 zero-padded conv2 grid
NPAD1 = H1P * W1P             # 900
NPAD2 = H2P * W2P             # 256
MARG2 = 8                     # zero-row margin around the conv2 grid in buf2

CONV1_LO = W1P                # first padded-grid row conv1 computes (30)
CONV1_ROWS = NPAD1 - 2 * W1P  # 840 rows, covers every interior row
TILE1 = 168                   # 5 row tiles, f32 accumulator = 84 KiB
CONV2_LO = W2P                # 16
CONV2_ROWS = NPAD2 - 2 * W2P  # 224
TILE2 = 112                   # 2 row tiles


# ---------------------------------------------------------------------------
# Fused kernel: one image per grid step.
# ---------------------------------------------------------------------------
def _lenet_kernel(x_ref, w1_ref, b1_ref, w2_ref, b2_ref,
                  wf1_ref, bf1_ref, wf2_ref, bf2_ref, wf3_ref, bf3_ref,
                  out_ref, buf1, buf2, buf3):
    f32 = jnp.float32
    bf16 = jnp.bfloat16

    # ---- conv1 (1 -> 6, 3x3, pad 1) + ReLU --------------------------------
    # x_ref rows = zero-padded 30x30 grid (row = hp*30 + wp); the 9 taps are
    # pre-packed into lanes, so each row tile is ONE K=16 matmul, no shifts.
    for t in range(CONV1_ROWS // TILE1):
        r0 = CONV1_LO + t * TILE1
        lhs = x_ref[pl.ds(r0, TILE1), :]                         # (168,16) bf16
        acc = jnp.dot(lhs, w1_ref[...], preferred_element_type=f32)
        buf1[pl.ds(t * TILE1, TILE1), :] = jnp.maximum(acc + b1_ref[...], 0.0)

    # ---- pool1 (2x2 max) -> zero-padded 16x16 grid for conv2 --------------
    buf2[...] = jnp.zeros(buf2.shape, f32)     # borders / margins stay zero
    for h2 in range(H2):
        base = 2 * h2 * W1P + 1                # buf1 row of pixel (2*h2, 0)
        m = jnp.maximum(
            jnp.maximum(buf1[pl.ds(base, W2, stride=2), :],
                        buf1[pl.ds(base + 1, W2, stride=2), :]),
            jnp.maximum(buf1[pl.ds(base + W1P, W2, stride=2), :],
                        buf1[pl.ds(base + W1P + 1, W2, stride=2), :]))
        buf2[pl.ds(MARG2 + (h2 + 1) * W2P + 1, W2), :] = m[:, :CIN_PAD]

    # ---- conv2 (6 -> 16, 3x3, pad 1) + ReLU --------------------------------
    for t in range(CONV2_ROWS // TILE2):
        r0 = CONV2_LO + t * TILE2              # padded-grid row of tile start
        acc = jnp.zeros((TILE2, CPAD), f32)
        for k in range(9):
            off = (k // 3 - 1) * W2P + (k % 3 - 1)
            piece = buf2[pl.ds(MARG2 + r0 + off, TILE2), :].astype(bf16)
            acc = acc + jnp.dot(piece, w2_ref[pl.ds(k * CIN_PAD, CIN_PAD), :],
                                preferred_element_type=f32)
        buf3[pl.ds(t * TILE2, TILE2), :] = jnp.maximum(acc + b2_ref[...], 0.0)

    # ---- pool2 (2x2 max) + fc1 (flatten folded into weight packing) -------
    acc = jnp.zeros((1, CPAD), f32)
    for h2 in range(H3):
        base = 2 * h2 * W2P + 1                # buf3 row of pixel (2*h2, 0)
        g = jnp.maximum(
            jnp.maximum(buf3[pl.ds(base, W3, stride=2), :],
                        buf3[pl.ds(base + 1, W3, stride=2), :]),
            jnp.maximum(buf3[pl.ds(base + W2P, W3, stride=2), :],
                        buf3[pl.ds(base + W2P + 1, W3, stride=2), :]))
        for w in range(W3):
            s = h2 * W3 + w
            acc = acc + jnp.dot(g[w:w + 1, :C2].astype(bf16),
                                wf1_ref[pl.ds(s * C2, C2), :],
                                preferred_element_type=f32)
    y = jnp.maximum(acc + bf1_ref[...], 0.0)

    # ---- fc2 + ReLU, fc3 ----------------------------------------------------
    y = jnp.maximum(jnp.dot(y.astype(bf16), wf2_ref[...],
                            preferred_element_type=f32) + bf2_ref[...], 0.0)
    y = jnp.dot(y.astype(bf16), wf3_ref[...],
                preferred_element_type=f32) + bf3_ref[...]
    out_ref[...] = y


# ---------------------------------------------------------------------------
# Parameters (PyTorch layout, PyTorch-style uniform fan-in init) + packing.
# ---------------------------------------------------------------------------
def init_params(key, num_classes=NUM_CLASSES):
    ks = jax.random.split(key, 10)

    def u(k, shape, fan_in):
        bound = 1.0 / np.sqrt(float(fan_in))
        return jax.random.uniform(k, shape, jnp.float32, -bound, bound)

    return dict(
        conv1_w=u(ks[0], (C1, 1, 3, 3), 9), conv1_b=u(ks[1], (C1,), 9),
        conv2_w=u(ks[2], (C2, C1, 3, 3), C1 * 9), conv2_b=u(ks[3], (C2,), C1 * 9),
        fc1_w=u(ks[4], (FC1, C2 * H3 * W3), C2 * H3 * W3),
        fc1_b=u(ks[5], (FC1,), C2 * H3 * W3),
        fc2_w=u(ks[6], (FC2, FC1), FC1), fc2_b=u(ks[7], (FC2,), FC1),
        fc3_w=u(ks[8], (num_classes, FC2), FC2), fc3_b=u(ks[9], (num_classes,), FC2),
    )


def pack_params(params):
    """One-time repack of PyTorch-layout parameters into the kernel layout."""
    bf16 = jnp.bfloat16

    def pad_lane(v):
        out = np.zeros((1, CPAD), np.float32)
        v = np.asarray(v)
        out[0, :v.shape[0]] = v
        return jnp.asarray(out)                       # biases stay f32

    # conv1: tap k at lane k of the packed input -> weight row k.
    cw1 = np.asarray(params["conv1_w"])               # (6,1,3,3)
    w1 = np.zeros((K1_PAD, CPAD), np.float32)
    for k in range(9):
        w1[k, :C1] = cw1[:, 0, k // 3, k % 3]
    # conv2: 9 taps stacked on the K axis, CIN_PAD rows per tap.
    cw2 = np.asarray(params["conv2_w"])               # (16,6,3,3)
    w2 = np.zeros((9 * CIN_PAD, CPAD), np.float32)
    for k in range(9):
        w2[k * CIN_PAD:k * CIN_PAD + C1, :C2] = cw2[:, :, k // 3, k % 3].T
    # fc1: kernel flatten order is s*16 + c (s = h2*7 + w2); torch is c*49 + s.
    f1 = np.asarray(params["fc1_w"]).reshape(FC1, C2, H3 * W3)     # (120,16,49)
    f1 = f1.transpose(2, 1, 0).reshape(H3 * W3 * C2, FC1)          # row s*16+c
    wf1 = np.zeros((H3 * W3 * C2, CPAD), np.float32)
    wf1[:, :FC1] = f1

    def fc(w):                                        # torch (out,in) -> [in,out]
        w = np.asarray(w)
        m = np.zeros((CPAD, CPAD), np.float32)
        m[:w.shape[1], :w.shape[0]] = w.T
        return m

    return dict(
        w1=jnp.asarray(w1, bf16), b1=pad_lane(params["conv1_b"]),
        w2=jnp.asarray(w2, bf16), b2=pad_lane(params["conv2_b"]),
        wf1=jnp.asarray(wf1, bf16), bf1=pad_lane(params["fc1_b"]),
        wf2=jnp.asarray(fc(params["fc2_w"]), bf16), bf2=pad_lane(params["fc2_b"]),
        wf3=jnp.asarray(fc(params["fc3_w"]), bf16), bf3=pad_lane(params["fc3_b"]),
    )


# ---------------------------------------------------------------------------
# Forward pass (mirrors LeNetWithoutBN.forward) — one pallas_call.
# ---------------------------------------------------------------------------
def _pack_input(x):
    """(B,1,28,28) f32 -> (B, 900, 16) bf16: rows = zero-padded 30x30 grid
    (row = hp*30 + wp), lanes = the 9 conv1 taps of that position.  With
    cin == 1 this is ~29 KiB/image and removes all in-kernel conv1 shifts."""
    b = x.shape[0]
    xp = jnp.pad(x[:, 0], ((0, 0), (2, 2), (2, 2)))          # (B,32,32)
    taps = [xp[:, 1 + dh:1 + dh + H1P, 1 + dw:1 + dw + W1P]
            for dh in (-1, 0, 1) for dw in (-1, 0, 1)]
    xw = jnp.stack(taps, axis=-1).reshape(b, NPAD1, 9)
    xw = jnp.pad(xw, ((0, 0), (0, 0), (0, K1_PAD - 9)))
    return xw.astype(jnp.bfloat16)


def lenet_forward(packed, x, *, num_classes=NUM_CLASSES):
    B = x.shape[0]
    assert x.shape[1:] == (1, H1, W1), x.shape
    xw = _pack_input(x)

    def _full(shape):
        return pl.BlockSpec(shape, lambda b: (0,) * len(shape))

    grid_spec = pltpu.PrefetchScalarGridSpec(
        num_scalar_prefetch=0,
        grid=(B,),
        in_specs=[
            pl.BlockSpec((None, NPAD1, K1_PAD), lambda b: (b, 0, 0)),  # image
            _full((K1_PAD, CPAD)), _full((1, CPAD)),                   # conv1
            _full((9 * CIN_PAD, CPAD)), _full((1, CPAD)),              # conv2
            _full((H3 * W3 * C2, CPAD)), _full((1, CPAD)),             # fc1
            _full((CPAD, CPAD)), _full((1, CPAD)),                     # fc2
            _full((CPAD, CPAD)), _full((1, CPAD)),                     # fc3
        ],
        out_specs=pl.BlockSpec((None, 1, CPAD), lambda b: (b, 0, 0)),
        scratch_shapes=[
            pltpu.VMEM((CONV1_ROWS, CPAD), jnp.float32),          # conv1 output
            pltpu.VMEM((NPAD2 + 2 * MARG2, CIN_PAD), jnp.float32),  # conv2 input
            pltpu.VMEM((CONV2_ROWS, CPAD), jnp.float32),          # conv2 output
        ],
    )
    out = pl.pallas_call(
        _lenet_kernel,
        out_shape=jax.ShapeDtypeStruct((B, 1, CPAD), jnp.float32),
        grid_spec=grid_spec,
        compiler_params=pltpu.CompilerParams(
            dimension_semantics=("parallel",),
            vmem_limit_bytes=32 * 1024 * 1024,
        ),
    )(xw, packed["w1"], packed["b1"], packed["w2"], packed["b2"],
      packed["wf1"], packed["bf1"], packed["wf2"], packed["bf2"],
      packed["wf3"], packed["bf3"])
    return out[:, 0, :num_classes]


# ---------------------------------------------------------------------------
# Pure-JAX reference (matches the PyTorch module, f32 end to end).
# ---------------------------------------------------------------------------
def _reference_forward(params, x):
    def conv(v, w, b):
        y = jax.lax.conv_general_dilated(
            v, w, (1, 1), ((1, 1), (1, 1)),
            dimension_numbers=("NCHW", "OIHW", "NCHW"))
        return y + b[None, :, None, None]

    def pool(v):
        return jax.lax.reduce_window(v, -jnp.inf, jax.lax.max,
                                     (1, 1, 2, 2), (1, 1, 2, 2), "VALID")

    y = pool(jax.nn.relu(conv(x, params["conv1_w"], params["conv1_b"])))
    y = pool(jax.nn.relu(conv(y, params["conv2_w"], params["conv2_b"])))
    y = y.reshape(y.shape[0], -1)
    y = jax.nn.relu(y @ params["fc1_w"].T + params["fc1_b"])
    y = jax.nn.relu(y @ params["fc2_w"].T + params["fc2_b"])
    return y @ params["fc3_w"].T + params["fc3_b"]


if __name__ == "__main__":
    key = jax.random.PRNGKey(0)
    pkey, xkey = jax.random.split(key)
    params = init_params(pkey, num_classes=NUM_CLASSES)
    packed = pack_params(params)          # one-time weight repack

    # fc1 expects 16*7*7 features => 28x28 single-channel input, batch = 2.
    x = jax.random.normal(xkey, (2, 1, H1, W1), dtype=jnp.float32)

    fwd = jax.jit(lenet_forward)
    out = jax.block_until_ready(fwd(packed, x))
    assert out.shape == (2, NUM_CLASSES), out.shape

    ref = _reference_forward(params, x)
    np.testing.assert_allclose(np.asarray(out), np.asarray(ref),
                               rtol=5e-2, atol=5e-2)
    print("KERNEL_OK")
</pallas_src>

<mosaic_0001>
module attributes {stable_mosaic.version = 11 : i64} {
  func.func @_lenet_kernel(%arg0: i32, %arg1: memref<1x900x16xbf16, #tpu.memory_space<vmem>>, %arg2: memref<16x128xbf16, #tpu.memory_space<vmem>>, %arg3: memref<1x128xf32, #tpu.memory_space<vmem>>, %arg4: memref<72x128xbf16, #tpu.memory_space<vmem>>, %arg5: memref<1x128xf32, #tpu.memory_space<vmem>>, %arg6: memref<784x128xbf16, #tpu.memory_space<vmem>>, %arg7: memref<1x128xf32, #tpu.memory_space<vmem>>, %arg8: memref<128x128xbf16, #tpu.memory_space<vmem>>, %arg9: memref<1x128xf32, #tpu.memory_space<vmem>>, %arg10: memref<128x128xbf16, #tpu.memory_space<vmem>>, %arg11: memref<1x128xf32, #tpu.memory_space<vmem>>, %arg12: memref<1x1x128xf32, #tpu.memory_space<vmem>>, %arg13: memref<840x128xf32, #tpu.memory_space<vmem>>, %arg14: memref<272x8xf32, #tpu.memory_space<vmem>>, %arg15: memref<224x128xf32, #tpu.memory_space<vmem>>) attributes {dimension_semantics = [#tpu.dimension_semantics<parallel>], iteration_bounds = array<i64: 2>, scalar_prefetch = 0 : i64, scratch_operands = 3 : i64, tpu.core_type = #tpu.core_type<tc>, window_params = [{transform_indices = @transform_0, window_bounds = array<i64: 1, 900, 16>}, {pipeline_mode = #tpu.pipeline_mode<synchronous>, transform_indices = @transform_1, window_bounds = array<i64: 16, 128>}, {pipeline_mode = #tpu.pipeline_mode<synchronous>, transform_indices = @transform_2, window_bounds = array<i64: 1, 128>}, {pipeline_mode = #tpu.pipeline_mode<synchronous>, transform_indices = @transform_3, window_bounds = array<i64: 72, 128>}, {pipeline_mode = #tpu.pipeline_mode<synchronous>, transform_indices = @transform_4, window_bounds = array<i64: 1, 128>}, {pipeline_mode = #tpu.pipeline_mode<synchronous>, transform_indices = @transform_5, window_bounds = array<i64: 784, 128>}, {pipeline_mode = #tpu.pipeline_mode<synchronous>, transform_indices = @transform_6, window_bounds = array<i64: 1, 128>}, {pipeline_mode = #tpu.pipeline_mode<synchronous>, transform_indices = @transform_7, window_bounds = array<i64: 128, 128>}, {pipeline_mode = #tpu.pipeline_mode<synchronous>, transform_indices = @transform_8, window_bounds = array<i64: 1, 128>}, {pipeline_mode = #tpu.pipeline_mode<synchronous>, transform_indices = @transform_9, window_bounds = array<i64: 128, 128>}, {pipeline_mode = #tpu.pipeline_mode<synchronous>, transform_indices = @transform_10, window_bounds = array<i64: 1, 128>}, {transform_indices = @transform_11, window_bounds = array<i64: 1, 1, 128>}]} {
    %c0 = arith.constant 0 : index
    %c30 = arith.constant 30 : index
    %c0_0 = arith.constant 0 : index
    %0 = vector.load %arg1[%c0, %c30, %c0_0] : memref<1x900x16xbf16, #tpu.memory_space<vmem>>, vector<1x168x16xbf16>
    %1 = vector.shape_cast %0 : vector<1x168x16xbf16> to vector<168x16xbf16>
    %c0_1 = arith.constant 0 : index
    %c0_2 = arith.constant 0 : index
    %2 = vector.load %arg2[%c0_1, %c0_2] : memref<16x128xbf16, #tpu.memory_space<vmem>>, vector<16x128xbf16>
    %cst = arith.constant dense<0.000000e+00> : vector<168x128xf32>
    %3 = tpu.matmul %1, %2, %cst {dimension_numbers = #tpu.dot_dimension_numbers<[1], [0], [0], [1], [0, 0, 1, 1], [], []>} : vector<168x16xbf16>, vector<16x128xbf16>, vector<168x128xf32> -> vector<168x128xf32>
    %c0_3 = arith.constant 0 : index
    %c0_4 = arith.constant 0 : index
    %4 = vector.load %arg3[%c0_3, %c0_4] : memref<1x128xf32, #tpu.memory_space<vmem>>, vector<1x128xf32>
    %5 = vector.broadcast %4 : vector<1x128xf32> to vector<168x128xf32>
    %6 = arith.addf %3, %5 : vector<168x128xf32>
    %cst_5 = arith.constant 0.000000e+00 : f32
    %7 = vector.broadcast %cst_5 : f32 to vector<168x128xf32>
    %8 = arith.maximumf %6, %7 : vector<168x128xf32>
    %c0_6 = arith.constant 0 : index
    %c0_7 = arith.constant 0 : index
    %9 = vector.load %arg13[%c0_6, %c0_7] : memref<840x128xf32, #tpu.memory_space<vmem>>, vector<168x128xf32>
    tpu.vector_store %arg13[%c0_6, %c0_7], %8 {strides = array<i32>} : memref<840x128xf32, #tpu.memory_space<vmem>>, vector<168x128xf32>,
    %c0_8 = arith.constant 0 : index
    %c198 = arith.constant 198 : index
    %c0_9 = arith.constant 0 : index
    %10 = vector.load %arg1[%c0_8, %c198, %c0_9] : memref<1x900x16xbf16, #tpu.memory_space<vmem>>, vector<1x168x16xbf16>
    %11 = vector.shape_cast %10 : vector<1x168x16xbf16> to vector<168x16xbf16>
    %c0_10 = arith.constant 0 : index
    %c0_11 = arith.constant 0 : index
    %12 = vector.load %arg2[%c0_10, %c0_11] : memref<16x128xbf16, #tpu.memory_space<vmem>>, vector<16x128xbf16>
    %cst_12 = arith.constant dense<0.000000e+00> : vector<168x128xf32>
    %13 = tpu.matmul %11, %12, %cst_12 {dimension_numbers = #tpu.dot_dimension_numbers<[1], [0], [0], [1], [0, 0, 1, 1], [], []>} : vector<168x16xbf16>, vector<16x128xbf16>, vector<168x128xf32> -> vector<168x128xf32>
    %c0_13 = arith.constant 0 : index
    %c0_14 = arith.constant 0 : index
    %14 = vector.load %arg3[%c0_13, %c0_14] : memref<1x128xf32, #tpu.memory_space<vmem>>, vector<1x128xf32>
    %15 = vector.broadcast %14 : vector<1x128xf32> to vector<168x128xf32>
    %16 = arith.addf %13, %15 : vector<168x128xf32>
    %cst_15 = arith.constant 0.000000e+00 : f32
    %17 = vector.broadcast %cst_15 : f32 to vector<168x128xf32>
    %18 = arith.maximumf %16, %17 : vector<168x128xf32>
    %c168 = arith.constant 168 : index
    %c0_16 = arith.constant 0 : index
    %19 = vector.load %arg13[%c168, %c0_16] : memref<840x128xf32, #tpu.memory_space<vmem>>, vector<168x128xf32>
    tpu.vector_store %arg13[%c168, %c0_16], %18 {strides = array<i32>} : memref<840x128xf32, #tpu.memory_space<vmem>>, vector<168x128xf32>,
    %c0_17 = arith.constant 0 : index
    %c366 = arith.constant 366 : index
    %c0_18 = arith.constant 0 : index
    %20 = vector.load %arg1[%c0_17, %c366, %c0_18] : memref<1x900x16xbf16, #tpu.memory_space<vmem>>, vector<1x168x16xbf16>
    %21 = vector.shape_cast %20 : vector<1x168x16xbf16> to vector<168x16xbf16>
    %c0_19 = arith.constant 0 : index
    %c0_20 = arith.constant 0 : index
    %22 = vector.load %arg2[%c0_19, %c0_20] : memref<16x128xbf16, #tpu.memory_space<vmem>>, vector<16x128xbf16>
    %cst_21 = arith.constant dense<0.000000e+00> : vector<168x128xf32>
    %23 = tpu.matmul %21, %22, %cst_21 {dimension_numbers = #tpu.dot_dimension_numbers<[1], [0], [0], [1], [0, 0, 1, 1], [], []>} : vector<168x16xbf16>, vector<16x128xbf16>, vector<168x128xf32> -> vector<168x128xf32>
    %c0_22 = arith.constant 0 : index
    %c0_23 = arith.constant 0 : index
    %24 = vector.load %arg3[%c0_22, %c0_23] : memref<1x128xf32, #tpu.memory_space<vmem>>, vector<1x128xf32>
    %25 = vector.broadcast %24 : vector<1x128xf32> to vector<168x128xf32>
    %26 = arith.addf %23, %25 : vector<168x128xf32>
    %cst_24 = arith.constant 0.000000e+00 : f32
    %27 = vector.broadcast %cst_24 : f32 to vector<168x128xf32>
    %28 = arith.maximumf %26, %27 : vector<168x128xf32>
    %c336 = arith.constant 336 : index
    %c0_25 = arith.constant 0 : index
    %29 = vector.load %arg13[%c336, %c0_25] : memref<840x128xf32, #tpu.memory_space<vmem>>, vector<168x128xf32>
    tpu.vector_store %arg13[%c336, %c0_25], %28 {strides = array<i32>} : memref<840x128xf32, #tpu.memory_space<vmem>>, vector<168x128xf32>,
    %c0_26 = arith.constant 0 : index
    %c534 = arith.constant 534 : index
    %c0_27 = arith.constant 0 : index
    %30 = vector.load %arg1[%c0_26, %c534, %c0_27] : memref<1x900x16xbf16, #tpu.memory_space<vmem>>, vector<1x168x16xbf16>
    %31 = vector.shape_cast %30 : vector<1x168x16xbf16> to vector<168x16xbf16>
    %c0_28 = arith.constant 0 : index
    %c0_29 = arith.constant 0 : index
    %32 = vector.load %arg2[%c0_28, %c0_29] : memref<16x128xbf16, #tpu.memory_space<vmem>>, vector<16x128xbf16>
    %cst_30 = arith.constant dense<0.000000e+00> : vector<168x128xf32>
    %33 = tpu.matmul %31, %32, %cst_30 {dimension_numbers = #tpu.dot_dimension_numbers<[1], [0], [0], [1], [0, 0, 1, 1], [], []>} : vector<168x16xbf16>, vector<16x128xbf16>, vector<168x128xf32> -> vector<168x128xf32>
    %c0_31 = arith.constant 0 : index
    %c0_32 = arith.constant 0 : index
    %34 = vector.load %arg3[%c0_31, %c0_32] : memref<1x128xf32, #tpu.memory_space<vmem>>, vector<1x128xf32>
    %35 = vector.broadcast %34 : vector<1x128xf32> to vector<168x128xf32>
    %36 = arith.addf %33, %35 : vector<168x128xf32>
    %cst_33 = arith.constant 0.000000e+00 : f32
    %37 = vector.broadcast %cst_33 : f32 to vector<168x128xf32>
    %38 = arith.maximumf %36, %37 : vector<168x128xf32>
    %c504 = arith.constant 504 : index
    %c0_34 = arith.constant 0 : index
    %39 = vector.load %arg13[%c504, %c0_34] : memref<840x128xf32, #tpu.memory_space<vmem>>, vector<168x128xf32>
    tpu.vector_store %arg13[%c504, %c0_34], %38 {strides = array<i32>} : memref<840x128xf32, #tpu.memory_space<vmem>>, vector<168x128xf32>,
    %c0_35 = arith.constant 0 : index
    %c702 = arith.constant 702 : index
    %c0_36 = arith.constant 0 : index
    %40 = vector.load %arg1[%c0_35, %c702, %c0_36] : memref<1x900x16xbf16, #tpu.memory_space<vmem>>, vector<1x168x16xbf16>
    %41 = vector.shape_cast %40 : vector<1x168x16xbf16> to vector<168x16xbf16>
    %c0_37 = arith.constant 0 : index
    %c0_38 = arith.constant 0 : index
    %42 = vector.load %arg2[%c0_37, %c0_38] : memref<16x128xbf16, #tpu.memory_space<vmem>>, vector<16x128xbf16>
    %cst_39 = arith.constant dense<0.000000e+00> : vector<168x128xf32>
    %43 = tpu.matmul %41, %42, %cst_39 {dimension_numbers = #tpu.dot_dimension_numbers<[1], [0], [0], [1], [0, 0, 1, 1], [], []>} : vector<168x16xbf16>, vector<16x128xbf16>, vector<168x128xf32> -> vector<168x128xf32>
    %c0_40 = arith.constant 0 : index
    %c0_41 = arith.constant 0 : index
    %44 = vector.load %arg3[%c0_40, %c0_41] : memref<1x128xf32, #tpu.memory_space<vmem>>, vector<1x128xf32>
    %45 = vector.broadcast %44 : vector<1x128xf32> to vector<168x128xf32>
    %46 = arith.addf %43, %45 : vector<168x128xf32>
    %cst_42 = arith.constant 0.000000e+00 : f32
    %47 = vector.broadcast %cst_42 : f32 to vector<168x128xf32>
    %48 = arith.maximumf %46, %47 : vector<168x128xf32>
    %c672 = arith.constant 672 : index
    %c0_43 = arith.constant 0 : index
    %49 = vector.load %arg13[%c672, %c0_43] : memref<840x128xf32, #tpu.memory_space<vmem>>, vector<168x128xf32>
    tpu.vector_store %arg13[%c672, %c0_43], %48 {strides = array<i32>} : memref<840x128xf32, #tpu.memory_space<vmem>>, vector<168x128xf32>,
    %cst_44 = arith.constant 0.000000e+00 : f32
    %50 = vector.broadcast %cst_44 : f32 to vector<272x8xf32>
    %c0_45 = arith.constant 0 : index
    %c0_46 = arith.constant 0 : index
    %51 = vector.load %arg14[%c0_45, %c0_46] : memref<272x8xf32, #tpu.memory_space<vmem>>, vector<272x8xf32>
    tpu.vector_store %arg14[%c0_45, %c0_46], %50 {strides = array<i32>} : memref<272x8xf32, #tpu.memory_space<vmem>>, vector<272x8xf32>,
    %c1 = arith.constant 1 : index
    %c0_47 = arith.constant 0 : index
    %52 = tpu.strided_load %arg13[%c1, %c0_47] {strides = array<i32: 2, 1>} : memref<840x128xf32, #tpu.memory_space<vmem>>, vector<14x128xf32>
    %c2 = arith.constant 2 : index
    %c0_48 = arith.constant 0 : index
    %53 = tpu.strided_load %arg13[%c2, %c0_48] {strides = array<i32: 2, 1>} : memref<840x128xf32, #tpu.memory_space<vmem>>, vector<14x128xf32>
    %54 = arith.maximumf %52, %53 : vector<14x128xf32>
    %c31 = arith.constant 31 : index
    %c0_49 = arith.constant 0 : index
    %55 = tpu.strided_load %arg13[%c31, %c0_49] {strides = array<i32: 2, 1>} : memref<840x128xf32, #tpu.memory_space<vmem>>, vector<14x128xf32>
    %c32 = arith.constant 32 : index
    %c0_50 = arith.constant 0 : index
    %56 = tpu.strided_load %arg13[%c32, %c0_50] {strides = array<i32: 2, 1>} : memref<840x128xf32, #tpu.memory_space<vmem>>, vector<14x128xf32>
    %57 = arith.maximumf %55, %56 : vector<14x128xf32>
    %58 = arith.maximumf %54, %57 : vector<14x128xf32>
    %59 = vector.extract_strided_slice %58 {offsets = [0, 0], sizes = [14, 8], strides = [1, 1]} : vector<14x128xf32> to vector<14x8xf32>
    %c25 = arith.constant 25 : index
    %c0_51 = arith.constant 0 : index
    %60 = vector.load %arg14[%c25, %c0_51] : memref<272x8xf32, #tpu.memory_space<vmem>>, vector<14x8xf32>
    tpu.vector_store %arg14[%c25, %c0_51], %59 {strides = array<i32>} : memref<272x8xf32, #tpu.memory_space<vmem>>, vector<14x8xf32>,
    %c61 = arith.constant 61 : index
    %c0_52 = arith.constant 0 : index
    %61 = tpu.strided_load %arg13[%c61, %c0_52] {strides = array<i32: 2, 1>} : memref<840x128xf32, #tpu.memory_space<vmem>>, vector<14x128xf32>
    %c62 = arith.constant 62 : index
    %c0_53 = arith.constant 0 : index
    %62 = tpu.strided_load %arg13[%c62, %c0_53] {strides = array<i32: 2, 1>} : memref<840x128xf32, #tpu.memory_space<vmem>>, vector<14x128xf32>
    %63 = arith.maximumf %61, %62 : vector<14x128xf32>
    %c91 = arith.constant 91 : index
    %c0_54 = arith.constant 0 : index
    %64 = tpu.strided_load %arg13[%c91, %c0_54] {strides = array<i32: 2, 1>} : memref<840x128xf32, #tpu.memory_space<vmem>>, vector<14x128xf32>
    %c92 = arith.constant 92 : index
    %c0_55 = arith.constant 0 : index
    %65 = tpu.strided_load %arg13[%c92, %c0_55] {strides = array<i32: 2, 1>} : memref<840x128xf32, #tpu.memory_space<vmem>>, vector<14x128xf32>
    %66 = arith.maximumf %64, %65 : vector<14x128xf32>
    %67 = arith.maximumf %63, %66 : vector<14x128xf32>
    %68 = vector.extract_strided_slice %67 {offsets = [0, 0], sizes = [14, 8], strides = [1, 1]} : vector<14x128xf32> to vector<14x8xf32>
    %c41 = arith.constant 41 : index
    %c0_56 = arith.constant 0 : index
    %69 = vector.load %arg14[%c41, %c0_56] : memref<272x8xf32, #tpu.memory_space<vmem>>, vector<14x8xf32>
    tpu.vector_store %arg14[%c41, %c0_56], %68 {strides = array<i32>} : memref<272x8xf32, #tpu.memory_space<vmem>>, vector<14x8xf32>,
    %c121 = arith.constant 121 : index
    %c0_57 = arith.constant 0 : index
    %70 = tpu.strided_load %arg13[%c121, %c0_57] {strides = array<i32: 2, 1>} : memref<840x128xf32, #tpu.memory_space<vmem>>, vector<14x128xf32>
    %c122 = arith.constant 122 : index
    %c0_58 = arith.constant 0 : index
    %71 = tpu.strided_load %arg13[%c122, %c0_58] {strides = array<i32: 2, 1>} : memref<840x128xf32, #tpu.memory_space<vmem>>, vector<14x128xf32>
    %72 = arith.maximumf %70, %71 : vector<14x128xf32>
    %c151 = arith.constant 151 : index
    %c0_59 = arith.constant 0 : index
    %73 = tpu.strided_load %arg13[%c151, %c0_59] {strides = array<i32: 2, 1>} : memref<840x128xf32, #tpu.memory_space<vmem>>, vector<14x128xf32>
    %c152 = arith.constant 152 : index
    %c0_60 = arith.constant 0 : index
    %74 = tpu.strided_load %arg13[%c152, %c0_60] {strides = array<i32: 2, 1>} : memref<840x128xf32, #tpu.memory_space<vmem>>, vector<14x128xf32>
    %75 = arith.maximumf %73, %74 : vector<14x128xf32>
    %76 = arith.maximumf %72, %75 : vector<14x128xf32>
    %77 = vector.extract_strided_slice %76 {offsets = [0, 0], sizes = [14, 8], strides = [1, 1]} : vector<14x128xf32> to vector<14x8xf32>
    %c57 = arith.constant 57 : index
    %c0_61 = arith.constant 0 : index
    %78 = vector.load %arg14[%c57, %c0_61] : memref<272x8xf32, #tpu.memory_space<vmem>>, vector<14x8xf32>
    tpu.vector_store %arg14[%c57, %c0_61], %77 {strides = array<i32>} : memref<272x8xf32, #tpu.memory_space<vmem>>, vector<14x8xf32>,
    %c181 = arith.constant 181 : index
    %c0_62 = arith.constant 0 : index
    %79 = tpu.strided_load %arg13[%c181, %c0_62] {strides = array<i32: 2, 1>} : memref<840x128xf32, #tpu.memory_space<vmem>>, vector<14x128xf32>
    %c182 = arith.constant 182 : index
    %c0_63 = arith.constant 0 : index
    %80 = tpu.strided_load %arg13[%c182, %c0_63] {strides = array<i32: 2, 1>} : memref<840x128xf32, #tpu.memory_space<vmem>>, vector<14x128xf32>
    %81 = arith.maximumf %79, %80 : vector<14x128xf32>
    %c211 = arith.constant 211 : index
    %c0_64 = arith.constant 0 : index
    %82 = tpu.strided_load %arg13[%c211, %c0_64] {strides = array<i32: 2, 1>} : memref<840x128xf32, #tpu.memory_space<vmem>>, vector<14x128xf32>
    %c212 = arith.constant 212 : index
    %c0_65 = arith.constant 0 : index
    %83 = tpu.strided_load %arg13[%c212, %c0_65] {strides = array<i32: 2, 1>} : memref<840x128xf32, #tpu.memory_space<vmem>>, vector<14x128xf32>
    %84 = arith.maximumf %82, %83 : vector<14x128xf32>
    %85 = arith.maximumf %81, %84 : vector<14x128xf32>
    %86 = vector.extract_strided_slice %85 {offsets = [0, 0], sizes = [14, 8], strides = [1, 1]} : vector<14x128xf32> to vector<14x8xf32>
    %c73 = arith.constant 73 : index
    %c0_66 = arith.constant 0 : index
    %87 = vector.load %arg14[%c73, %c0_66] : memref<272x8xf32, #tpu.memory_space<vmem>>, vector<14x8xf32>
    tpu.vector_store %arg14[%c73, %c0_66], %86 {strides = array<i32>} : memref<272x8xf32, #tpu.memory_space<vmem>>, vector<14x8xf32>,
    %c241 = arith.constant 241 : index
    %c0_67 = arith.constant 0 : index
    %88 = tpu.strided_load %arg13[%c241, %c0_67] {strides = array<i32: 2, 1>} : memref<840x128xf32, #tpu.memory_space<vmem>>, vector<14x128xf32>
    %c242 = arith.constant 242 : index
    %c0_68 = arith.constant 0 : index
    %89 = tpu.strided_load %arg13[%c242, %c0_68] {strides = array<i32: 2, 1>} : memref<840x128xf32, #tpu.memory_space<vmem>>, vector<14x128xf32>
    %90 = arith.maximumf %88, %89 : vector<14x128xf32>
    %c271 = arith.constant 271 : index
    %c0_69 = arith.constant 0 : index
    %91 = tpu.strided_load %arg13[%c271, %c0_69] {strides = array<i32: 2, 1>} : memref<840x128xf32, #tpu.memory_space<vmem>>, vector<14x128xf32>
    %c272 = arith.constant 272 : index
    %c0_70 = arith.constant 0 : index
    %92 = tpu.strided_load %arg13[%c272, %c0_70] {strides = array<i32: 2, 1>} : memref<840x128xf32, #tpu.memory_space<vmem>>, vector<14x128xf32>
    %93 = arith.maximumf %91, %92 : vector<14x128xf32>
    %94 = arith.maximumf %90, %93 : vector<14x128xf32>
    %95 = vector.extract_strided_slice %94 {offsets = [0, 0], sizes = [14, 8], strides = [1, 1]} : vector<14x128xf32> to vector<14x8xf32>
    %c89 = arith.constant 89 : index
    %c0_71 = arith.constant 0 : index
    %96 = vector.load %arg14[%c89, %c0_71] : memref<272x8xf32, #tpu.memory_space<vmem>>, vector<14x8xf32>
    tpu.vector_store %arg14[%c89, %c0_71], %95 {strides = array<i32>} : memref<272x8xf32, #tpu.memory_space<vmem>>, vector<14x8xf32>,
    %c301 = arith.constant 301 : index
    %c0_72 = arith.constant 0 : index
    %97 = tpu.strided_load %arg13[%c301, %c0_72] {strides = array<i32: 2, 1>} : memref<840x128xf32, #tpu.memory_space<vmem>>, vector<14x128xf32>
    %c302 = arith.constant 302 : index
    %c0_73 = arith.constant 0 : index
    %98 = tpu.strided_load %arg13[%c302, %c0_73] {strides = array<i32: 2, 1>} : memref<840x128xf32, #tpu.memory_space<vmem>>, vector<14x128xf32>
    %99 = arith.maximumf %97, %98 : vector<14x128xf32>
    %c331 = arith.constant 331 : index
    %c0_74 = arith.constant 0 : index
    %100 = tpu.strided_load %arg13[%c331, %c0_74] {strides = array<i32: 2, 1>} : memref<840x128xf32, #tpu.memory_space<vmem>>, vector<14x128xf32>
    %c332 = arith.constant 332 : index
    %c0_75 = arith.constant 0 : index
    %101 = tpu.strided_load %arg13[%c332, %c0_75] {strides = array<i32: 2, 1>} : memref<840x128xf32, #tpu.memory_space<vmem>>, vector<14x128xf32>
    %102 = arith.maximumf %100, %101 : vector<14x128xf32>
    %103 = arith.maximumf %99, %102 : vector<14x128xf32>
    %104 = vector.extract_strided_slice %103 {offsets = [0, 0], sizes = [14, 8], strides = [1, 1]} : vector<14x128xf32> to vector<14x8xf32>
    %c105 = arith.constant 105 : index
    %c0_76 = arith.constant 0 : index
    %105 = vector.load %arg14[%c105, %c0_76] : memref<272x8xf32, #tpu.memory_space<vmem>>, vector<14x8xf32>
    tpu.vector_store %arg14[%c105, %c0_76], %104 {strides = array<i32>} : memref<272x8xf32, #tpu.memory_space<vmem>>, vector<14x8xf32>,
    %c361 = arith.constant 361 : index
    %c0_77 = arith.constant 0 : index
    %106 = tpu.strided_load %arg13[%c361, %c0_77] {strides = array<i32: 2, 1>} : memref<840x128xf32, #tpu.memory_space<vmem>>, vector<14x128xf32>
    %c362 = arith.constant 362 : index
    %c0_78 = arith.constant 0 : index
    %107 = tpu.strided_load %arg13[%c362, %c0_78] {strides = array<i32: 2, 1>} : memref<840x128xf32, #tpu.memory_space<vmem>>, vector<14x128xf32>
    %108 = arith.maximumf %106, %107 : vector<14x128xf32>
    %c391 = arith.constant 391 : index
    %c0_79 = arith.constant 0 : index
    %109 = tpu.strided_load %arg13[%c391, %c0_79] {strides = array<i32: 2, 1>} : memref<840x128xf32, #tpu.memory_space<vmem>>, vector<14x128xf32>
    %c392 = arith.constant 392 : index
    %c0_80 = arith.constant 0 : index
    %110 = tpu.strided_load %arg13[%c392, %c0_80] {strides = array<i32: 2, 1>} : memref<840x128xf32, #tpu.memory_space<vmem>>, vector<14x128xf32>
    %111 = arith.maximumf %109, %110 : vector<14x128xf32>
    %112 = arith.maximumf %108, %111 : vector<14x128xf32>
    %113 = vector.extract_strided_slice %112 {offsets = [0, 0], sizes = [14, 8], strides = [1, 1]} : vector<14x128xf32> to vector<14x8xf32>
    %c121_81 = arith.constant 121 : index
    %c0_82 = arith.constant 0 : index
    %114 = vector.load %arg14[%c121_81, %c0_82] : memref<272x8xf32, #tpu.memory_space<vmem>>, vector<14x8xf32>
    tpu.vector_store %arg14[%c121_81, %c0_82], %113 {strides = array<i32>} : memref<272x8xf32, #tpu.memory_space<vmem>>, vector<14x8xf32>,
    %c421 = arith.constant 421 : index
    %c0_83 = arith.constant 0 : index
    %115 = tpu.strided_load %arg13[%c421, %c0_83] {strides = array<i32: 2, 1>} : memref<840x128xf32, #tpu.memory_space<vmem>>, vector<14x128xf32>
    %c422 = arith.constant 422 : index
    %c0_84 = arith.constant 0 : index
    %116 = tpu.strided_load %arg13[%c422, %c0_84] {strides = array<i32: 2, 1>} : memref<840x128xf32, #tpu.memory_space<vmem>>, vector<14x128xf32>
    %117 = arith.maximumf %115, %116 : vector<14x128xf32>
    %c451 = arith.constant 451 : index
    %c0_85 = arith.constant 0 : index
    %118 = tpu.strided_load %arg13[%c451, %c0_85] {strides = array<i32: 2, 1>} : memref<840x128xf32, #tpu.memory_space<vmem>>, vector<14x128xf32>
    %c452 = arith.constant 452 : index
    %c0_86 = arith.constant 0 : index
    %119 = tpu.strided_load %arg13[%c452, %c0_86] {strides = array<i32: 2, 1>} : memref<840x128xf32, #tpu.memory_space<vmem>>, vector<14x128xf32>
    %120 = arith.maximumf %118, %119 : vector<14x128xf32>
    %121 = arith.maximumf %117, %120 : vector<14x128xf32>
    %122 = vector.extract_strided_slice %121 {offsets = [0, 0], sizes = [14, 8], strides = [1, 1]} : vector<14x128xf32> to vector<14x8xf32>
    %c137 = arith.constant 137 : index
    %c0_87 = arith.constant 0 : index
    %123 = vector.load %arg14[%c137, %c0_87] : memref<272x8xf32, #tpu.memory_space<vmem>>, vector<14x8xf32>
    tpu.vector_store %arg14[%c137, %c0_87], %122 {strides = array<i32>} : memref<272x8xf32, #tpu.memory_space<vmem>>, vector<14x8xf32>,
    %c481 = arith.constant 481 : index
    %c0_88 = arith.constant 0 : index
    %124 = tpu.strided_load %arg13[%c481, %c0_88] {strides = array<i32: 2, 1>} : memref<840x128xf32, #tpu.memory_space<vmem>>, vector<14x128xf32>
    %c482 = arith.constant 482 : index
    %c0_89 = arith.constant 0 : index
    %125 = tpu.strided_load %arg13[%c482, %c0_89] {strides = array<i32: 2, 1>} : memref<840x128xf32, #tpu.memory_space<vmem>>, vector<14x128xf32>
    %126 = arith.maximumf %124, %125 : vector<14x128xf32>
    %c511 = arith.constant 511 : index
    %c0_90 = arith.constant 0 : index
    %127 = tpu.strided_load %arg13[%c511, %c0_90] {strides = array<i32: 2, 1>} : memref<840x128xf32, #tpu.memory_space<vmem>>, vector<14x128xf32>
    %c512 = arith.constant 512 : index
    %c0_91 = arith.constant 0 : index
    %128 = tpu.strided_load %arg13[%c512, %c0_91] {strides = array<i32: 2, 1>} : memref<840x128xf32, #tpu.memory_space<vmem>>, vector<14x128xf32>
    %129 = arith.maximumf %127, %128 : vector<14x128xf32>
    %130 = arith.maximumf %126, %129 : vector<14x128xf32>
    %131 = vector.extract_strided_slice %130 {offsets = [0, 0], sizes = [14, 8], strides = [1, 1]} : vector<14x128xf32> to vector<14x8xf32>
    %c153 = arith.constant 153 : index
    %c0_92 = arith.constant 0 : index
    %132 = vector.load %arg14[%c153, %c0_92] : memref<272x8xf32, #tpu.memory_space<vmem>>, vector<14x8xf32>
    tpu.vector_store %arg14[%c153, %c0_92], %131 {strides = array<i32>} : memref<272x8xf32, #tpu.memory_space<vmem>>, vector<14x8xf32>,
    %c541 = arith.constant 541 : index
    %c0_93 = arith.constant 0 : index
    %133 = tpu.strided_load %arg13[%c541, %c0_93] {strides = array<i32: 2, 1>} : memref<840x128xf32, #tpu.memory_space<vmem>>, vector<14x128xf32>
    %c542 = arith.constant 542 : index
    %c0_94 = arith.constant 0 : index
    %134 = tpu.strided_load %arg13[%c542, %c0_94] {strides = array<i32: 2, 1>} : memref<840x128xf32, #tpu.memory_space<vmem>>, vector<14x128xf32>
    %135 = arith.maximumf %133, %134 : vector<14x128xf32>
    %c571 = arith.constant 571 : index
    %c0_95 = arith.constant 0 : index
    %136 = tpu.strided_load %arg13[%c571, %c0_95] {strides = array<i32: 2, 1>} : memref<840x128xf32, #tpu.memory_space<vmem>>, vector<14x128xf32>
    %c572 = arith.constant 572 : index
    %c0_96 = arith.constant 0 : index
    %137 = tpu.strided_load %arg13[%c572, %c0_96] {strides = array<i32: 2, 1>} : memref<840x128xf32, #tpu.memory_space<vmem>>, vector<14x128xf32>
    %138 = arith.maximumf %136, %137 : vector<14x128xf32>
    %139 = arith.maximumf %135, %138 : vector<14x128xf32>
    %140 = vector.extract_strided_slice %139 {offsets = [0, 0], sizes = [14, 8], strides = [1, 1]} : vector<14x128xf32> to vector<14x8xf32>
    %c169 = arith.constant 169 : index
    %c0_97 = arith.constant 0 : index
    %141 = vector.load %arg14[%c169, %c0_97] : memref<272x8xf32, #tpu.memory_space<vmem>>, vector<14x8xf32>
    tpu.vector_store %arg14[%c169, %c0_97], %140 {strides = array<i32>} : memref<272x8xf32, #tpu.memory_space<vmem>>, vector<14x8xf32>,
    %c601 = arith.constant 601 : index
    %c0_98 = arith.constant 0 : index
    %142 = tpu.strided_load %arg13[%c601, %c0_98] {strides = array<i32: 2, 1>} : memref<840x128xf32, #tpu.memory_space<vmem>>, vector<14x128xf32>
    %c602 = arith.constant 602 : index
    %c0_99 = arith.constant 0 : index
    %143 = tpu.strided_load %arg13[%c602, %c0_99] {strides = array<i32: 2, 1>} : memref<840x128xf32, #tpu.memory_space<vmem>>, vector<14x128xf32>
    %144 = arith.maximumf %142, %143 : vector<14x128xf32>
    %c631 = arith.constant 631 : index
    %c0_100 = arith.constant 0 : index
    %145 = tpu.strided_load %arg13[%c631, %c0_100] {strides = array<i32: 2, 1>} : memref<840x128xf32, #tpu.memory_space<vmem>>, vector<14x128xf32>
    %c632 = arith.constant 632 : index
    %c0_101 = arith.constant 0 : index
    %146 = tpu.strided_load %arg13[%c632, %c0_101] {strides = array<i32: 2, 1>} : memref<840x128xf32, #tpu.memory_space<vmem>>, vector<14x128xf32>
    %147 = arith.maximumf %145, %146 : vector<14x128xf32>
    %148 = arith.maximumf %144, %147 : vector<14x128xf32>
    %149 = vector.extract_strided_slice %148 {offsets = [0, 0], sizes = [14, 8], strides = [1, 1]} : vector<14x128xf32> to vector<14x8xf32>
    %c185 = arith.constant 185 : index
    %c0_102 = arith.constant 0 : index
    %150 = vector.load %arg14[%c185, %c0_102] : memref<272x8xf32, #tpu.memory_space<vmem>>, vector<14x8xf32>
    tpu.vector_store %arg14[%c185, %c0_102], %149 {strides = array<i32>} : memref<272x8xf32, #tpu.memory_space<vmem>>, vector<14x8xf32>,
    %c661 = arith.constant 661 : index
    %c0_103 = arith.constant 0 : index
    %151 = tpu.strided_load %arg13[%c661, %c0_103] {strides = array<i32: 2, 1>} : memref<840x128xf32, #tpu.memory_space<vmem>>, vector<14x128xf32>
    %c662 = arith.constant 662 : index
    %c0_104 = arith.constant 0 : index
    %152 = tpu.strided_load %arg13[%c662, %c0_104] {strides = array<i32: 2, 1>} : memref<840x128xf32, #tpu.memory_space<vmem>>, vector<14x128xf32>
    %153 = arith.maximumf %151, %152 : vector<14x128xf32>
    %c691 = arith.constant 691 : index
    %c0_105 = arith.constant 0 : index
    %154 = tpu.strided_load %arg13[%c691, %c0_105] {strides = array<i32: 2, 1>} : memref<840x128xf32, #tpu.memory_space<vmem>>, vector<14x128xf32>
    %c692 = arith.constant 692 : index
    %c0_106 = arith.constant 0 : index
    %155 = tpu.strided_load %arg13[%c692, %c0_106] {strides = array<i32: 2, 1>} : memref<840x128xf32, #tpu.memory_space<vmem>>, vector<14x128xf32>
    %156 = arith.maximumf %154, %155 : vector<14x128xf32>
    %157 = arith.maximumf %153, %156 : vector<14x128xf32>
    %158 = vector.extract_strided_slice %157 {offsets = [0, 0], sizes = [14, 8], strides = [1, 1]} : vector<14x128xf32> to vector<14x8xf32>
    %c201 = arith.constant 201 : index
    %c0_107 = arith.constant 0 : index
    %159 = vector.load %arg14[%c201, %c0_107] : memref<272x8xf32, #tpu.memory_space<vmem>>, vector<14x8xf32>
    tpu.vector_store %arg14[%c201, %c0_107], %158 {strides = array<i32>} : memref<272x8xf32, #tpu.memory_space<vmem>>, vector<14x8xf32>,
    %c721 = arith.constant 721 : index
    %c0_108 = arith.constant 0 : index
    %160 = tpu.strided_load %arg13[%c721, %c0_108] {strides = array<i32: 2, 1>} : memref<840x128xf32, #tpu.memory_space<vmem>>, vector<14x128xf32>
    %c722 = arith.constant 722 : index
    %c0_109 = arith.constant 0 : index
    %161 = tpu.strided_load %arg13[%c722, %c0_109] {strides = array<i32: 2, 1>} : memref<840x128xf32, #tpu.memory_space<vmem>>, vector<14x128xf32>
    %162 = arith.maximumf %160, %161 : vector<14x128xf32>
    %c751 = arith.constant 751 : index
    %c0_110 = arith.constant 0 : index
    %163 = tpu.strided_load %arg13[%c751, %c0_110] {strides = array<i32: 2, 1>} : memref<840x128xf32, #tpu.memory_space<vmem>>, vector<14x128xf32>
    %c752 = arith.constant 752 : index
    %c0_111 = arith.constant 0 : index
    %164 = tpu.strided_load %arg13[%c752, %c0_111] {strides = array<i32: 2, 1>} : memref<840x128xf32, #tpu.memory_space<vmem>>, vector<14x128xf32>
    %165 = arith.maximumf %163, %164 : vector<14x128xf32>
    %166 = arith.maximumf %162, %165 : vector<14x128xf32>
    %167 = vector.extract_strided_slice %166 {offsets = [0, 0], sizes = [14, 8], strides = [1, 1]} : vector<14x128xf32> to vector<14x8xf32>
    %c217 = arith.constant 217 : index
    %c0_112 = arith.constant 0 : index
    %168 = vector.load %arg14[%c217, %c0_112] : memref<272x8xf32, #tpu.memory_space<vmem>>, vector<14x8xf32>
    tpu.vector_store %arg14[%c217, %c0_112], %167 {strides = array<i32>} : memref<272x8xf32, #tpu.memory_space<vmem>>, vector<14x8xf32>,
    %c781 = arith.constant 781 : index
    %c0_113 = arith.constant 0 : index
    %169 = tpu.strided_load %arg13[%c781, %c0_113] {strides = array<i32: 2, 1>} : memref<840x128xf32, #tpu.memory_space<vmem>>, vector<14x128xf32>
    %c782 = arith.constant 782 : index
    %c0_114 = arith.constant 0 : index
    %170 = tpu.strided_load %arg13[%c782, %c0_114] {strides = array<i32: 2, 1>} : memref<840x128xf32, #tpu.memory_space<vmem>>, vector<14x128xf32>
    %171 = arith.maximumf %169, %170 : vector<14x128xf32>
    %c811 = arith.constant 811 : index
    %c0_115 = arith.constant 0 : index
    %172 = tpu.strided_load %arg13[%c811, %c0_115] {strides = array<i32: 2, 1>} : memref<840x128xf32, #tpu.memory_space<vmem>>, vector<14x128xf32>
    %c812 = arith.constant 812 : index
    %c0_116 = arith.constant 0 : index
    %173 = tpu.strided_load %arg13[%c812, %c0_116] {strides = array<i32: 2, 1>} : memref<840x128xf32, #tpu.memory_space<vmem>>, vector<14x128xf32>
    %174 = arith.maximumf %172, %173 : vector<14x128xf32>
    %175 = arith.maximumf %171, %174 : vector<14x128xf32>
    %176 = vector.extract_strided_slice %175 {offsets = [0, 0], sizes = [14, 8], strides = [1, 1]} : vector<14x128xf32> to vector<14x8xf32>
    %c233 = arith.constant 233 : index
    %c0_117 = arith.constant 0 : index
    %177 = vector.load %arg14[%c233, %c0_117] : memref<272x8xf32, #tpu.memory_space<vmem>>, vector<14x8xf32>
    tpu.vector_store %arg14[%c233, %c0_117], %176 {strides = array<i32>} : memref<272x8xf32, #tpu.memory_space<vmem>>, vector<14x8xf32>,
    %cst_118 = arith.constant 0.000000e+00 : f32
    %178 = vector.broadcast %cst_118 : f32 to vector<112x128xf32>
    %c7 = arith.constant 7 : index
    %c0_119 = arith.constant 0 : index
    %179 = vector.load %arg14[%c7, %c0_119] : memref<272x8xf32, #tpu.memory_space<vmem>>, vector<112x8xf32>
    %180 = arith.truncf %179 : vector<112x8xf32> to vector<112x8xbf16>
    %c0_120 = arith.constant 0 : index
    %c0_121 = arith.constant 0 : index
    %181 = vector.load %arg4[%c0_120, %c0_121] : memref<72x128xbf16, #tpu.memory_space<vmem>>, vector<8x128xbf16>
    %cst_122 = arith.constant dense<0.000000e+00> : vector<112x128xf32>
    %182 = tpu.matmul %180, %181, %cst_122 {dimension_numbers = #tpu.dot_dimension_numbers<[1], [0], [0], [1], [0, 0, 1, 1], [], []>} : vector<112x8xbf16>, vector<8x128xbf16>, vector<112x128xf32> -> vector<112x128xf32>
    %183 = arith.addf %178, %182 : vector<112x128xf32>
    %c8 = arith.constant 8 : index
    %c0_123 = arith.constant 0 : index
    %184 = vector.load %arg14[%c8, %c0_123] : memref<272x8xf32, #tpu.memory_space<vmem>>, vector<112x8xf32>
    %185 = arith.truncf %184 : vector<112x8xf32> to vector<112x8xbf16>
    %c8_124 = arith.constant 8 : index
    %c0_125 = arith.constant 0 : index
    %186 = vector.load %arg4[%c8_124, %c0_125] : memref<72x128xbf16, #tpu.memory_space<vmem>>, vector<8x128xbf16>
    %cst_126 = arith.constant dense<0.000000e+00> : vector<112x128xf32>
    %187 = tpu.matmul %185, %186, %cst_126 {dimension_numbers = #tpu.dot_dimension_numbers<[1], [0], [0], [1], [0, 0, 1, 1], [], []>} : vector<112x8xbf16>, vector<8x128xbf16>, vector<112x128xf32> -> vector<112x128xf32>
    %188 = arith.addf %183, %187 : vector<112x128xf32>
    %c9 = arith.constant 9 : index
    %c0_127 = arith.constant 0 : index
    %189 = vector.load %arg14[%c9, %c0_127] : memref<272x8xf32, #tpu.memory_space<vmem>>, vector<112x8xf32>
    %190 = arith.truncf %189 : vector<112x8xf32> to vector<112x8xbf16>
    %c16 = arith.constant 16 : index
    %c0_128 = arith.constant 0 : index
    %191 = vector.load %arg4[%c16, %c0_128] : memref<72x128xbf16, #tpu.memory_space<vmem>>, vector<8x128xbf16>
    %cst_129 = arith.constant dense<0.000000e+00> : vector<112x128xf32>
    %192 = tpu.matmul %190, %191, %cst_129 {dimension_numbers = #tpu.dot_dimension_numbers<[1], [0], [0], [1], [0, 0, 1, 1], [], []>} : vector<112x8xbf16>, vector<8x128xbf16>, vector<112x128xf32> -> vector<112x128xf32>
    %193 = arith.addf %188, %192 : vector<112x128xf32>
    %c23 = arith.constant 23 : index
    %c0_130 = arith.constant 0 : index
    %194 = vector.load %arg14[%c23, %c0_130] : memref<272x8xf32, #tpu.memory_space<vmem>>, vector<112x8xf32>
    %195 = arith.truncf %194 : vector<112x8xf32> to vector<112x8xbf16>
    %c24 = arith.constant 24 : index
    %c0_131 = arith.constant 0 : index
    %196 = vector.load %arg4[%c24, %c0_131] : memref<72x128xbf16, #tpu.memory_space<vmem>>, vector<8x128xbf16>
    %cst_132 = arith.constant dense<0.000000e+00> : vector<112x128xf32>
    %197 = tpu.matmul %195, %196, %cst_132 {dimension_numbers = #tpu.dot_dimension_numbers<[1], [0], [0], [1], [0, 0, 1, 1], [], []>} : vector<112x8xbf16>, vector<8x128xbf16>, vector<112x128xf32> -> vector<112x128xf32>
    %198 = arith.addf %193, %197 : vector<112x128xf32>
    %c24_133 = arith.constant 24 : index
    %c0_134 = arith.constant 0 : index
    %199 = vector.load %arg14[%c24_133, %c0_134] : memref<272x8xf32, #tpu.memory_space<vmem>>, vector<112x8xf32>
    %200 = arith.truncf %199 : vector<112x8xf32> to vector<112x8xbf16>
    %c32_135 = arith.constant 32 : index
    %c0_136 = arith.constant 0 : index
    %201 = vector.load %arg4[%c32_135, %c0_136] : memref<72x128xbf16, #tpu.memory_space<vmem>>, vector<8x128xbf16>
    %cst_137 = arith.constant dense<0.000000e+00> : vector<112x128xf32>
    %202 = tpu.matmul %200, %201, %cst_137 {dimension_numbers = #tpu.dot_dimension_numbers<[1], [0], [0], [1], [0, 0, 1, 1], [], []>} : vector<112x8xbf16>, vector<8x128xbf16>, vector<112x128xf32> -> vector<112x128xf32>
    %203 = arith.addf %198, %202 : vector<112x128xf32>
    %c25_138 = arith.constant 25 : index
    %c0_139 = arith.constant 0 : index
    %204 = vector.load %arg14[%c25_138, %c0_139] : memref<272x8xf32, #tpu.memory_space<vmem>>, vector<112x8xf32>
    %205 = arith.truncf %204 : vector<112x8xf32> to vector<112x8xbf16>
    %c40 = arith.constant 40 : index
    %c0_140 = arith.constant 0 : index
    %206 = vector.load %arg4[%c40, %c0_140] : memref<72x128xbf16, #tpu.memory_space<vmem>>, vector<8x128xbf16>
    %cst_141 = arith.constant dense<0.000000e+00> : vector<112x128xf32>
    %207 = tpu.matmul %205, %206, %cst_141 {dimension_numbers = #tpu.dot_dimension_numbers<[1], [0], [0], [1], [0, 0, 1, 1], [], []>} : vector<112x8xbf16>, vector<8x128xbf16>, vector<112x128xf32> -> vector<112x128xf32>
    %208 = arith.addf %203, %207 : vector<112x128xf32>
    %c39 = arith.constant 39 : index
    %c0_142 = arith.constant 0 : index
    %209 = vector.load %arg14[%c39, %c0_142] : memref<272x8xf32, #tpu.memory_space<vmem>>, vector<112x8xf32>
    %210 = arith.truncf %209 : vector<112x8xf32> to vector<112x8xbf16>
    %c48 = arith.constant 48 : index
    %c0_143 = arith.constant 0 : index
    %211 = vector.load %arg4[%c48, %c0_143] : memref<72x128xbf16, #tpu.memory_space<vmem>>, vector<8x128xbf16>
    %cst_144 = arith.constant dense<0.000000e+00> : vector<112x128xf32>
    %212 = tpu.matmul %210, %211, %cst_144 {dimension_numbers = #tpu.dot_dimension_numbers<[1], [0], [0], [1], [0, 0, 1, 1], [], []>} : vector<112x8xbf16>, vector<8x128xbf16>, vector<112x128xf32> -> vector<112x128xf32>
    %213 = arith.addf %208, %212 : vector<112x128xf32>
    %c40_145 = arith.constant 40 : index
    %c0_146 = arith.constant 0 : index
    %214 = vector.load %arg14[%c40_145, %c0_146] : memref<272x8xf32, #tpu.memory_space<vmem>>, vector<112x8xf32>
    %215 = arith.truncf %214 : vector<112x8xf32> to vector<112x8xbf16>
    %c56 = arith.constant 56 : index
    %c0_147 = arith.constant 0 : index
    %216 = vector.load %arg4[%c56, %c0_147] : memref<72x128xbf16, #tpu.memory_space<vmem>>, vector<8x128xbf16>
    %cst_148 = arith.constant dense<0.000000e+00> : vector<112x128xf32>
    %217 = tpu.matmul %215, %216, %cst_148 {dimension_numbers = #tpu.dot_dimension_numbers<[1], [0], [0], [1], [0, 0, 1, 1], [], []>} : vector<112x8xbf16>, vector<8x128xbf16>, vector<112x128xf32> -> vector<112x128xf32>
    %218 = arith.addf %213, %217 : vector<112x128xf32>
    %c41_149 = arith.constant 41 : index
    %c0_150 = arith.constant 0 : index
    %219 = vector.load %arg14[%c41_149, %c0_150] : memref<272x8xf32, #tpu.memory_space<vmem>>, vector<112x8xf32>
    %220 = arith.truncf %219 : vector<112x8xf32> to vector<112x8xbf16>
    %c64 = arith.constant 64 : index
    %c0_151 = arith.constant 0 : index
    %221 = vector.load %arg4[%c64, %c0_151] : memref<72x128xbf16, #tpu.memory_space<vmem>>, vector<8x128xbf16>
    %cst_152 = arith.constant dense<0.000000e+00> : vector<112x128xf32>
    %222 = tpu.matmul %220, %221, %cst_152 {dimension_numbers = #tpu.dot_dimension_numbers<[1], [0], [0], [1], [0, 0, 1, 1], [], []>} : vector<112x8xbf16>, vector<8x128xbf16>, vector<112x128xf32> -> vector<112x128xf32>
    %223 = arith.addf %218, %222 : vector<112x128xf32>
    %c0_153 = arith.constant 0 : index
    %c0_154 = arith.constant 0 : index
    %224 = vector.load %arg5[%c0_153, %c0_154] : memref<1x128xf32, #tpu.memory_space<vmem>>, vector<1x128xf32>
    %225 = vector.broadcast %224 : vector<1x128xf32> to vector<112x128xf32>
    %226 = arith.addf %223, %225 : vector<112x128xf32>
    %cst_155 = arith.constant 0.000000e+00 : f32
    %227 = vector.broadcast %cst_155 : f32 to vector<112x128xf32>
    %228 = arith.maximumf %226, %227 : vector<112x128xf32>
    %c0_156 = arith.constant 0 : index
    %c0_157 = arith.constant 0 : index
    %229 = vector.load %arg15[%c0_156, %c0_157] : memref<224x128xf32, #tpu.memory_space<vmem>>, vector<112x128xf32>
    tpu.vector_store %arg15[%c0_156, %c0_157], %228 {strides = array<i32>} : memref<224x128xf32, #tpu.memory_space<vmem>>, vector<112x128xf32>,
    %cst_158 = arith.constant 0.000000e+00 : f32
    %230 = vector.broadcast %cst_158 : f32 to vector<112x128xf32>
    %c119 = arith.constant 119 : index
    %c0_159 = arith.constant 0 : index
    %231 = vector.load %arg14[%c119, %c0_159] : memref<272x8xf32, #tpu.memory_space<vmem>>, vector<112x8xf32>
    %232 = arith.truncf %231 : vector<112x8xf32> to vector<112x8xbf16>
    %c0_160 = arith.constant 0 : index
    %c0_161 = arith.constant 0 : index
    %233 = vector.load %arg4[%c0_160, %c0_161] : memref<72x128xbf16, #tpu.memory_space<vmem>>, vector<8x128xbf16>
    %cst_162 = arith.constant dense<0.000000e+00> : vector<112x128xf32>
    %234 = tpu.matmul %232, %233, %cst_162 {dimension_numbers = #tpu.dot_dimension_numbers<[1], [0], [0], [1], [0, 0, 1, 1], [], []>} : vector<112x8xbf16>, vector<8x128xbf16>, vector<112x128xf32> -> vector<112x128xf32>
    %235 = arith.addf %230, %234 : vector<112x128xf32>
    %c120 = arith.constant 120 : index
    %c0_163 = arith.constant 0 : index
    %236 = vector.load %arg14[%c120, %c0_163] : memref<272x8xf32, #tpu.memory_space<vmem>>, vector<112x8xf32>
    %237 = arith.truncf %236 : vector<112x8xf32> to vector<112x8xbf16>
    %c8_164 = arith.constant 8 : index
    %c0_165 = arith.constant 0 : index
    %238 = vector.load %arg4[%c8_164, %c0_165] : memref<72x128xbf16, #tpu.memory_space<vmem>>, vector<8x128xbf16>
    %cst_166 = arith.constant dense<0.000000e+00> : vector<112x128xf32>
    %239 = tpu.matmul %237, %238, %cst_166 {dimension_numbers = #tpu.dot_dimension_numbers<[1], [0], [0], [1], [0, 0, 1, 1], [], []>} : vector<112x8xbf16>, vector<8x128xbf16>, vector<112x128xf32> -> vector<112x128xf32>
    %240 = arith.addf %235, %239 : vector<112x128xf32>
    %c121_167 = arith.constant 121 : index
    %c0_168 = arith.constant 0 : index
    %241 = vector.load %arg14[%c121_167, %c0_168] : memref<272x8xf32, #tpu.memory_space<vmem>>, vector<112x8xf32>
    %242 = arith.truncf %241 : vector<112x8xf32> to vector<112x8xbf16>
    %c16_169 = arith.constant 16 : index
    %c0_170 = arith.constant 0 : index
    %243 = vector.load %arg4[%c16_169, %c0_170] : memref<72x128xbf16, #tpu.memory_space<vmem>>, vector<8x128xbf16>
    %cst_171 = arith.constant dense<0.000000e+00> : vector<112x128xf32>
    %244 = tpu.matmul %242, %243, %cst_171 {dimension_numbers = #tpu.dot_dimension_numbers<[1], [0], [0], [1], [0, 0, 1, 1], [], []>} : vector<112x8xbf16>, vector<8x128xbf16>, vector<112x128xf32> -> vector<112x128xf32>
    %245 = arith.addf %240, %244 : vector<112x128xf32>
    %c135 = arith.constant 135 : index
    %c0_172 = arith.constant 0 : index
    %246 = vector.load %arg14[%c135, %c0_172] : memref<272x8xf32, #tpu.memory_space<vmem>>, vector<112x8xf32>
    %247 = arith.truncf %246 : vector<112x8xf32> to vector<112x8xbf16>
    %c24_173 = arith.constant 24 : index
    %c0_174 = arith.constant 0 : index
    %248 = vector.load %arg4[%c24_173, %c0_174] : memref<72x128xbf16, #tpu.memory_space<vmem>>, vector<8x128xbf16>
    %cst_175 = arith.constant dense<0.000000e+00> : vector<112x128xf32>
    %249 = tpu.matmul %247, %248, %cst_175 {dimension_numbers = #tpu.dot_dimension_numbers<[1], [0], [0], [1], [0, 0, 1, 1], [], []>} : vector<112x8xbf16>, vector<8x128xbf16>, vector<112x128xf32> -> vector<112x128xf32>
    %250 = arith.addf %245, %249 : vector<112x128xf32>
    %c136 = arith.constant 136 : index
    %c0_176 = arith.constant 0 : index
    %251 = vector.load %arg14[%c136, %c0_176] : memref<272x8xf32, #tpu.memory_space<vmem>>, vector<112x8xf32>
    %252 = arith.truncf %251 : vector<112x8xf32> to vector<112x8xbf16>
    %c32_177 = arith.constant 32 : index
    %c0_178 = arith.constant 0 : index
    %253 = vector.load %arg4[%c32_177, %c0_178] : memref<72x128xbf16, #tpu.memory_space<vmem>>, vector<8x128xbf16>
    %cst_179 = arith.constant dense<0.000000e+00> : vector<112x128xf32>
    %254 = tpu.matmul %252, %253, %cst_179 {dimension_numbers = #tpu.dot_dimension_numbers<[1], [0], [0], [1], [0, 0, 1, 1], [], []>} : vector<112x8xbf16>, vector<8x128xbf16>, vector<112x128xf32> -> vector<112x128xf32>
    %255 = arith.addf %250, %254 : vector<112x128xf32>
    %c137_180 = arith.constant 137 : index
    %c0_181 = arith.constant 0 : index
    %256 = vector.load %arg14[%c137_180, %c0_181] : memref<272x8xf32, #tpu.memory_space<vmem>>, vector<112x8xf32>
    %257 = arith.truncf %256 : vector<112x8xf32> to vector<112x8xbf16>
    %c40_182 = arith.constant 40 : index
    %c0_183 = arith.constant 0 : index
    %258 = vector.load %arg4[%c40_182, %c0_183] : memref<72x128xbf16, #tpu.memory_space<vmem>>, vector<8x128xbf16>
    %cst_184 = arith.constant dense<0.000000e+00> : vector<112x128xf32>
    %259 = tpu.matmul %257, %258, %cst_184 {dimension_numbers = #tpu.dot_dimension_numbers<[1], [0], [0], [1], [0, 0, 1, 1], [], []>} : vector<112x8xbf16>, vector<8x128xbf16>, vector<112x128xf32> -> vector<112x128xf32>
    %260 = arith.addf %255, %259 : vector<112x128xf32>
    %c151_185 = arith.constant 151 : index
    %c0_186 = arith.constant 0 : index
    %261 = vector.load %arg14[%c151_185, %c0_186] : memref<272x8xf32, #tpu.memory_space<vmem>>, vector<112x8xf32>
    %262 = arith.truncf %261 : vector<112x8xf32> to vector<112x8xbf16>
    %c48_187 = arith.constant 48 : index
    %c0_188 = arith.constant 0 : index
    %263 = vector.load %arg4[%c48_187, %c0_188] : memref<72x128xbf16, #tpu.memory_space<vmem>>, vector<8x128xbf16>
    %cst_189 = arith.constant dense<0.000000e+00> : vector<112x128xf32>
    %264 = tpu.matmul %262, %263, %cst_189 {dimension_numbers = #tpu.dot_dimension_numbers<[1], [0], [0], [1], [0, 0, 1, 1], [], []>} : vector<112x8xbf16>, vector<8x128xbf16>, vector<112x128xf32> -> vector<112x128xf32>
    %265 = arith.addf %260, %264 : vector<112x128xf32>
    %c152_190 = arith.constant 152 : index
    %c0_191 = arith.constant 0 : index
    %266 = vector.load %arg14[%c152_190, %c0_191] : memref<272x8xf32, #tpu.memory_space<vmem>>, vector<112x8xf32>
    %267 = arith.truncf %266 : vector<112x8xf32> to vector<112x8xbf16>
    %c56_192 = arith.constant 56 : index
    %c0_193 = arith.constant 0 : index
    %268 = vector.load %arg4[%c56_192, %c0_193] : memref<72x128xbf16, #tpu.memory_space<vmem>>, vector<8x128xbf16>
    %cst_194 = arith.constant dense<0.000000e+00> : vector<112x128xf32>
    %269 = tpu.matmul %267, %268, %cst_194 {dimension_numbers = #tpu.dot_dimension_numbers<[1], [0], [0], [1], [0, 0, 1, 1], [], []>} : vector<112x8xbf16>, vector<8x128xbf16>, vector<112x128xf32> -> vector<112x128xf32>
    %270 = arith.addf %265, %269 : vector<112x128xf32>
    %c153_195 = arith.constant 153 : index
    %c0_196 = arith.constant 0 : index
    %271 = vector.load %arg14[%c153_195, %c0_196] : memref<272x8xf32, #tpu.memory_space<vmem>>, vector<112x8xf32>
    %272 = arith.truncf %271 : vector<112x8xf32> to vector<112x8xbf16>
    %c64_197 = arith.constant 64 : index
    %c0_198 = arith.constant 0 : index
    %273 = vector.load %arg4[%c64_197, %c0_198] : memref<72x128xbf16, #tpu.memory_space<vmem>>, vector<8x128xbf16>
    %cst_199 = arith.constant dense<0.000000e+00> : vector<112x128xf32>
    %274 = tpu.matmul %272, %273, %cst_199 {dimension_numbers = #tpu.dot_dimension_numbers<[1], [0], [0], [1], [0, 0, 1, 1], [], []>} : vector<112x8xbf16>, vector<8x128xbf16>, vector<112x128xf32> -> vector<112x128xf32>
    %275 = arith.addf %270, %274 : vector<112x128xf32>
    %c0_200 = arith.constant 0 : index
    %c0_201 = arith.constant 0 : index
    %276 = vector.load %arg5[%c0_200, %c0_201] : memref<1x128xf32, #tpu.memory_space<vmem>>, vector<1x128xf32>
    %277 = vector.broadcast %276 : vector<1x128xf32> to vector<112x128xf32>
    %278 = arith.addf %275, %277 : vector<112x128xf32>
    %cst_202 = arith.constant 0.000000e+00 : f32
    %279 = vector.broadcast %cst_202 : f32 to vector<112x128xf32>
    %280 = arith.maximumf %278, %279 : vector<112x128xf32>
    %c112 = arith.constant 112 : index
    %c0_203 = arith.constant 0 : index
    %281 = vector.load %arg15[%c112, %c0_203] : memref<224x128xf32, #tpu.memory_space<vmem>>, vector<112x128xf32>
    tpu.vector_store %arg15[%c112, %c0_203], %280 {strides = array<i32>} : memref<224x128xf32, #tpu.memory_space<vmem>>, vector<112x128xf32>,
    %cst_204 = arith.constant 0.000000e+00 : f32
    %282 = vector.broadcast %cst_204 : f32 to vector<1x128xf32>
    %c1_205 = arith.constant 1 : index
    %c0_206 = arith.constant 0 : index
    %283 = tpu.strided_load %arg15[%c1_205, %c0_206] {strides = array<i32: 2, 1>} : memref<224x128xf32, #tpu.memory_space<vmem>>, vector<7x128xf32>
    %c2_207 = arith.constant 2 : index
    %c0_208 = arith.constant 0 : index
    %284 = tpu.strided_load %arg15[%c2_207, %c0_208] {strides = array<i32: 2, 1>} : memref<224x128xf32, #tpu.memory_space<vmem>>, vector<7x128xf32>
    %285 = arith.maximumf %283, %284 : vector<7x128xf32>
    %c17 = arith.constant 17 : index
    %c0_209 = arith.constant 0 : index
    %286 = tpu.strided_load %arg15[%c17, %c0_209] {strides = array<i32: 2, 1>} : memref<224x128xf32, #tpu.memory_space<vmem>>, vector<7x128xf32>
    %c18 = arith.constant 18 : index
    %c0_210 = arith.constant 0 : index
    %287 = tpu.strided_load %arg15[%c18, %c0_210] {strides = array<i32: 2, 1>} : memref<224x128xf32, #tpu.memory_space<vmem>>, vector<7x128xf32>
    %288 = arith.maximumf %286, %287 : vector<7x128xf32>
    %289 = arith.maximumf %285, %288 : vector<7x128xf32>
    %290 = vector.extract_strided_slice %289 {offsets = [0, 0], sizes = [1, 16], strides = [1, 1]} : vector<7x128xf32> to vector<1x16xf32>
    %291 = arith.truncf %290 : vector<1x16xf32> to vector<1x16xbf16>
    %c0_211 = arith.constant 0 : index
    %c0_212 = arith.constant 0 : index
    %292 = vector.load %arg6[%c0_211, %c0_212] : memref<784x128xbf16, #tpu.memory_space<vmem>>, vector<16x128xbf16>
    %cst_213 = arith.constant dense<0.000000e+00> : vector<1x128xf32>
    %293 = tpu.matmul %291, %292, %cst_213 {dimension_numbers = #tpu.dot_dimension_numbers<[1], [0], [0], [1], [0, 0, 1, 1], [], []>} : vector<1x16xbf16>, vector<16x128xbf16>, vector<1x128xf32> -> vector<1x128xf32>
    %294 = arith.addf %282, %293 : vector<1x128xf32>
    %295 = vector.extract_strided_slice %289 {offsets = [1, 0], sizes = [1, 16], strides = [1, 1]} : vector<7x128xf32> to vector<1x16xf32>
    %296 = arith.truncf %295 : vector<1x16xf32> to vector<1x16xbf16>
    %c16_214 = arith.constant 16 : index
    %c0_215 = arith.constant 0 : index
    %297 = vector.load %arg6[%c16_214, %c0_215] : memref<784x128xbf16, #tpu.memory_space<vmem>>, vector<16x128xbf16>
    %cst_216 = arith.constant dense<0.000000e+00> : vector<1x128xf32>
    %298 = tpu.matmul %296, %297, %cst_216 {dimension_numbers = #tpu.dot_dimension_numbers<[1], [0], [0], [1], [0, 0, 1, 1], [], []>} : vector<1x16xbf16>, vector<16x128xbf16>, vector<1x128xf32> -> vector<1x128xf32>
    %299 = arith.addf %294, %298 : vector<1x128xf32>
    %300 = vector.extract_strided_slice %289 {offsets = [2, 0], sizes = [1, 16], strides = [1, 1]} : vector<7x128xf32> to vector<1x16xf32>
    %301 = arith.truncf %300 : vector<1x16xf32> to vector<1x16xbf16>
    %c32_217 = arith.constant 32 : index
    %c0_218 = arith.constant 0 : index
    %302 = vector.load %arg6[%c32_217, %c0_218] : memref<784x128xbf16, #tpu.memory_space<vmem>>, vector<16x128xbf16>
    %cst_219 = arith.constant dense<0.000000e+00> : vector<1x128xf32>
    %303 = tpu.matmul %301, %302, %cst_219 {dimension_numbers = #tpu.dot_dimension_numbers<[1], [0], [0], [1], [0, 0, 1, 1], [], []>} : vector<1x16xbf16>, vector<16x128xbf16>, vector<1x128xf32> -> vector<1x128xf32>
    %304 = arith.addf %299, %303 : vector<1x128xf32>
    %305 = vector.extract_strided_slice %289 {offsets = [3, 0], sizes = [1, 16], strides = [1, 1]} : vector<7x128xf32> to vector<1x16xf32>
    %306 = arith.truncf %305 : vector<1x16xf32> to vector<1x16xbf16>
    %c48_220 = arith.constant 48 : index
    %c0_221 = arith.constant 0 : index
    %307 = vector.load %arg6[%c48_220, %c0_221] : memref<784x128xbf16, #tpu.memory_space<vmem>>, vector<16x128xbf16>
    %cst_222 = arith.constant dense<0.000000e+00> : vector<1x128xf32>
    %308 = tpu.matmul %306, %307, %cst_222 {dimension_numbers = #tpu.dot_dimension_numbers<[1], [0], [0], [1], [0, 0, 1, 1], [], []>} : vector<1x16xbf16>, vector<16x128xbf16>, vector<1x128xf32> -> vector<1x128xf32>
    %309 = arith.addf %304, %308 : vector<1x128xf32>
    %310 = vector.extract_strided_slice %289 {offsets = [4, 0], sizes = [1, 16], strides = [1, 1]} : vector<7x128xf32> to vector<1x16xf32>
    %311 = arith.truncf %310 : vector<1x16xf32> to vector<1x16xbf16>
    %c64_223 = arith.constant 64 : index
    %c0_224 = arith.constant 0 : index
    %312 = vector.load %arg6[%c64_223, %c0_224] : memref<784x128xbf16, #tpu.memory_space<vmem>>, vector<16x128xbf16>
    %cst_225 = arith.constant dense<0.000000e+00> : vector<1x128xf32>
    %313 = tpu.matmul %311, %312, %cst_225 {dimension_numbers = #tpu.dot_dimension_numbers<[1], [0], [0], [1], [0, 0, 1, 1], [], []>} : vector<1x16xbf16>, vector<16x128xbf16>, vector<1x128xf32> -> vector<1x128xf32>
    %314 = arith.addf %309, %313 : vector<1x128xf32>
    %315 = vector.extract_strided_slice %289 {offsets = [5, 0], sizes = [1, 16], strides = [1, 1]} : vector<7x128xf32> to vector<1x16xf32>
    %316 = arith.truncf %315 : vector<1x16xf32> to vector<1x16xbf16>
    %c80 = arith.constant 80 : index
    %c0_226 = arith.constant 0 : index
    %317 = vector.load %arg6[%c80, %c0_226] : memref<784x128xbf16, #tpu.memory_space<vmem>>, vector<16x128xbf16>
    %cst_227 = arith.constant dense<0.000000e+00> : vector<1x128xf32>
    %318 = tpu.matmul %316, %317, %cst_227 {dimension_numbers = #tpu.dot_dimension_numbers<[1], [0], [0], [1], [0, 0, 1, 1], [], []>} : vector<1x16xbf16>, vector<16x128xbf16>, vector<1x128xf32> -> vector<1x128xf32>
    %319 = arith.addf %314, %318 : vector<1x128xf32>
    %320 = vector.extract_strided_slice %289 {offsets = [6, 0], sizes = [1, 16], strides = [1, 1]} : vector<7x128xf32> to vector<1x16xf32>
    %321 = arith.truncf %320 : vector<1x16xf32> to vector<1x16xbf16>
    %c96 = arith.constant 96 : index
    %c0_228 = arith.constant 0 : index
    %322 = vector.load %arg6[%c96, %c0_228] : memref<784x128xbf16, #tpu.memory_space<vmem>>, vector<16x128xbf16>
    %cst_229 = arith.constant dense<0.000000e+00> : vector<1x128xf32>
    %323 = tpu.matmul %321, %322, %cst_229 {dimension_numbers = #tpu.dot_dimension_numbers<[1], [0], [0], [1], [0, 0, 1, 1], [], []>} : vector<1x16xbf16>, vector<16x128xbf16>, vector<1x128xf32> -> vector<1x128xf32>
    %324 = arith.addf %319, %323 : vector<1x128xf32>
    %c33 = arith.constant 33 : index
    %c0_230 = arith.constant 0 : index
    %325 = tpu.strided_load %arg15[%c33, %c0_230] {strides = array<i32: 2, 1>} : memref<224x128xf32, #tpu.memory_space<vmem>>, vector<7x128xf32>
    %c34 = arith.constant 34 : index
    %c0_231 = arith.constant 0 : index
    %326 = tpu.strided_load %arg15[%c34, %c0_231] {strides = array<i32: 2, 1>} : memref<224x128xf32, #tpu.memory_space<vmem>>, vector<7x128xf32>
    %327 = arith.maximumf %325, %326 : vector<7x128xf32>
    %c49 = arith.constant 49 : index
    %c0_232 = arith.constant 0 : index
    %328 = tpu.strided_load %arg15[%c49, %c0_232] {strides = array<i32: 2, 1>} : memref<224x128xf32, #tpu.memory_space<vmem>>, vector<7x128xf32>
    %c50 = arith.constant 50 : index
    %c0_233 = arith.constant 0 : index
    %329 = tpu.strided_load %arg15[%c50, %c0_233] {strides = array<i32: 2, 1>} : memref<224x128xf32, #tpu.memory_space<vmem>>, vector<7x128xf32>
    %330 = arith.maximumf %328, %329 : vector<7x128xf32>
    %331 = arith.maximumf %327, %330 : vector<7x128xf32>
    %332 = vector.extract_strided_slice %331 {offsets = [0, 0], sizes = [1, 16], strides = [1, 1]} : vector<7x128xf32> to vector<1x16xf32>
    %333 = arith.truncf %332 : vector<1x16xf32> to vector<1x16xbf16>
    %c112_234 = arith.constant 112 : index
    %c0_235 = arith.constant 0 : index
    %334 = vector.load %arg6[%c112_234, %c0_235] : memref<784x128xbf16, #tpu.memory_space<vmem>>, vector<16x128xbf16>
    %cst_236 = arith.constant dense<0.000000e+00> : vector<1x128xf32>
    %335 = tpu.matmul %333, %334, %cst_236 {dimension_numbers = #tpu.dot_dimension_numbers<[1], [0], [0], [1], [0, 0, 1, 1], [], []>} : vector<1x16xbf16>, vector<16x128xbf16>, vector<1x128xf32> -> vector<1x128xf32>
    %336 = arith.addf %324, %335 : vector<1x128xf32>
    %337 = vector.extract_strided_slice %331 {offsets = [1, 0], sizes = [1, 16], strides = [1, 1]} : vector<7x128xf32> to vector<1x16xf32>
    %338 = arith.truncf %337 : vector<1x16xf32> to vector<1x16xbf16>
    %c128 = arith.constant 128 : index
    %c0_237 = arith.constant 0 : index
    %339 = vector.load %arg6[%c128, %c0_237] : memref<784x128xbf16, #tpu.memory_space<vmem>>, vector<16x128xbf16>
    %cst_238 = arith.constant dense<0.000000e+00> : vector<1x128xf32>
    %340 = tpu.matmul %338, %339, %cst_238 {dimension_numbers = #tpu.dot_dimension_numbers<[1], [0], [0], [1], [0, 0, 1, 1], [], []>} : vector<1x16xbf16>, vector<16x128xbf16>, vector<1x128xf32> -> vector<1x128xf32>
    %341 = arith.addf %336, %340 : vector<1x128xf32>
    %342 = vector.extract_strided_slice %331 {offsets = [2, 0], sizes = [1, 16], strides = [1, 1]} : vector<7x128xf32> to vector<1x16xf32>
    %343 = arith.truncf %342 : vector<1x16xf32> to vector<1x16xbf16>
    %c144 = arith.constant 144 : index
    %c0_239 = arith.constant 0 : index
    %344 = vector.load %arg6[%c144, %c0_239] : memref<784x128xbf16, #tpu.memory_space<vmem>>, vector<16x128xbf16>
    %cst_240 = arith.constant dense<0.000000e+00> : vector<1x128xf32>
    %345 = tpu.matmul %343, %344, %cst_240 {dimension_numbers = #tpu.dot_dimension_numbers<[1], [0], [0], [1], [0, 0, 1, 1], [], []>} : vector<1x16xbf16>, vector<16x128xbf16>, vector<1x128xf32> -> vector<1x128xf32>
    %346 = arith.addf %341, %345 : vector<1x128xf32>
    %347 = vector.extract_strided_slice %331 {offsets = [3, 0], sizes = [1, 16], strides = [1, 1]} : vector<7x128xf32> to vector<1x16xf32>
    %348 = arith.truncf %347 : vector<1x16xf32> to vector<1x16xbf16>
    %c160 = arith.constant 160 : index
    %c0_241 = arith.constant 0 : index
    %349 = vector.load %arg6[%c160, %c0_241] : memref<784x128xbf16, #tpu.memory_space<vmem>>, vector<16x128xbf16>
    %cst_242 = arith.constant dense<0.000000e+00> : vector<1x128xf32>
    %350 = tpu.matmul %348, %349, %cst_242 {dimension_numbers = #tpu.dot_dimension_numbers<[1], [0], [0], [1], [0, 0, 1, 1], [], []>} : vector<1x16xbf16>, vector<16x128xbf16>, vector<1x128xf32> -> vector<1x128xf32>
    %351 = arith.addf %346, %350 : vector<1x128xf32>
    %352 = vector.extract_strided_slice %331 {offsets = [4, 0], sizes = [1, 16], strides = [1, 1]} : vector<7x128xf32> to vector<1x16xf32>
    %353 = arith.truncf %352 : vector<1x16xf32> to vector<1x16xbf16>
    %c176 = arith.constant 176 : index
    %c0_243 = arith.constant 0 : index
    %354 = vector.load %arg6[%c176, %c0_243] : memref<784x128xbf16, #tpu.memory_space<vmem>>, vector<16x128xbf16>
    %cst_244 = arith.constant dense<0.000000e+00> : vector<1x128xf32>
    %355 = tpu.matmul %353, %354, %cst_244 {dimension_numbers = #tpu.dot_dimension_numbers<[1], [0], [0], [1], [0, 0, 1, 1], [], []>} : vector<1x16xbf16>, vector<16x128xbf16>, vector<1x128xf32> -> vector<1x128xf32>
    %356 = arith.addf %351, %355 : vector<1x128xf32>
    %357 = vector.extract_strided_slice %331 {offsets = [5, 0], sizes = [1, 16], strides = [1, 1]} : vector<7x128xf32> to vector<1x16xf32>
    %358 = arith.truncf %357 : vector<1x16xf32> to vector<1x16xbf16>
    %c192 = arith.constant 192 : index
    %c0_245 = arith.constant 0 : index
    %359 = vector.load %arg6[%c192, %c0_245] : memref<784x128xbf16, #tpu.memory_space<vmem>>, vector<16x128xbf16>
    %cst_246 = arith.constant dense<0.000000e+00> : vector<1x128xf32>
    %360 = tpu.matmul %358, %359, %cst_246 {dimension_numbers = #tpu.dot_dimension_numbers<[1], [0], [0], [1], [0, 0, 1, 1], [], []>} : vector<1x16xbf16>, vector<16x128xbf16>, vector<1x128xf32> -> vector<1x128xf32>
    %361 = arith.addf %356, %360 : vector<1x128xf32>
    %362 = vector.extract_strided_slice %331 {offsets = [6, 0], sizes = [1, 16], strides = [1, 1]} : vector<7x128xf32> to vector<1x16xf32>
    %363 = arith.truncf %362 : vector<1x16xf32> to vector<1x16xbf16>
    %c208 = arith.constant 208 : index
    %c0_247 = arith.constant 0 : index
    %364 = vector.load %arg6[%c208, %c0_247] : memref<784x128xbf16, #tpu.memory_space<vmem>>, vector<16x128xbf16>
    %cst_248 = arith.constant dense<0.000000e+00> : vector<1x128xf32>
    %365 = tpu.matmul %363, %364, %cst_248 {dimension_numbers = #tpu.dot_dimension_numbers<[1], [0], [0], [1], [0, 0, 1, 1], [], []>} : vector<1x16xbf16>, vector<16x128xbf16>, vector<1x128xf32> -> vector<1x128xf32>
    %366 = arith.addf %361, %365 : vector<1x128xf32>
    %c65 = arith.constant 65 : index
    %c0_249 = arith.constant 0 : index
    %367 = tpu.strided_load %arg15[%c65, %c0_249] {strides = array<i32: 2, 1>} : memref<224x128xf32, #tpu.memory_space<vmem>>, vector<7x128xf32>
    %c66 = arith.constant 66 : index
    %c0_250 = arith.constant 0 : index
    %368 = tpu.strided_load %arg15[%c66, %c0_250] {strides = array<i32: 2, 1>} : memref<224x128xf32, #tpu.memory_space<vmem>>, vector<7x128xf32>
    %369 = arith.maximumf %367, %368 : vector<7x128xf32>
    %c81 = arith.constant 81 : index
    %c0_251 = arith.constant 0 : index
    %370 = tpu.strided_load %arg15[%c81, %c0_251] {strides = array<i32: 2, 1>} : memref<224x128xf32, #tpu.memory_space<vmem>>, vector<7x128xf32>
    %c82 = arith.constant 82 : index
    %c0_252 = arith.constant 0 : index
    %371 = tpu.strided_load %arg15[%c82, %c0_252] {strides = array<i32: 2, 1>} : memref<224x128xf32, #tpu.memory_space<vmem>>, vector<7x128xf32>
    %372 = arith.maximumf %370, %371 : vector<7x128xf32>
    %373 = arith.maximumf %369, %372 : vector<7x128xf32>
    %374 = vector.extract_strided_slice %373 {offsets = [0, 0], sizes = [1, 16], strides = [1, 1]} : vector<7x128xf32> to vector<1x16xf32>
    %375 = arith.truncf %374 : vector<1x16xf32> to vector<1x16xbf16>
    %c224 = arith.constant 224 : index
    %c0_253 = arith.constant 0 : index
    %376 = vector.load %arg6[%c224, %c0_253] : memref<784x128xbf16, #tpu.memory_space<vmem>>, vector<16x128xbf16>
    %cst_254 = arith.constant dense<0.000000e+00> : vector<1x128xf32>
    %377 = tpu.matmul %375, %376, %cst_254 {dimension_numbers = #tpu.dot_dimension_numbers<[1], [0], [0], [1], [0, 0, 1, 1], [], []>} : vector<1x16xbf16>, vector<16x128xbf16>, vector<1x128xf32> -> vector<1x128xf32>
    %378 = arith.addf %366, %377 : vector<1x128xf32>
    %379 = vector.extract_strided_slice %373 {offsets = [1, 0], sizes = [1, 16], strides = [1, 1]} : vector<7x128xf32> to vector<1x16xf32>
    %380 = arith.truncf %379 : vector<1x16xf32> to vector<1x16xbf16>
    %c240 = arith.constant 240 : index
    %c0_255 = arith.constant 0 : index
    %381 = vector.load %arg6[%c240, %c0_255] : memref<784x128xbf16, #tpu.memory_space<vmem>>, vector<16x128xbf16>
    %cst_256 = arith.constant dense<0.000000e+00> : vector<1x128xf32>
    %382 = tpu.matmul %380, %381, %cst_256 {dimension_numbers = #tpu.dot_dimension_numbers<[1], [0], [0], [1], [0, 0, 1, 1], [], []>} : vector<1x16xbf16>, vector<16x128xbf16>, vector<1x128xf32> -> vector<1x128xf32>
    %383 = arith.addf %378, %382 : vector<1x128xf32>
    %384 = vector.extract_strided_slice %373 {offsets = [2, 0], sizes = [1, 16], strides = [1, 1]} : vector<7x128xf32> to vector<1x16xf32>
    %385 = arith.truncf %384 : vector<1x16xf32> to vector<1x16xbf16>
    %c256 = arith.constant 256 : index
    %c0_257 = arith.constant 0 : index
    %386 = vector.load %arg6[%c256, %c0_257] : memref<784x128xbf16, #tpu.memory_space<vmem>>, vector<16x128xbf16>
    %cst_258 = arith.constant dense<0.000000e+00> : vector<1x128xf32>
    %387 = tpu.matmul %385, %386, %cst_258 {dimension_numbers = #tpu.dot_dimension_numbers<[1], [0], [0], [1], [0, 0, 1, 1], [], []>} : vector<1x16xbf16>, vector<16x128xbf16>, vector<1x128xf32> -> vector<1x128xf32>
    %388 = arith.addf %383, %387 : vector<1x128xf32>
    %389 = vector.extract_strided_slice %373 {offsets = [3, 0], sizes = [1, 16], strides = [1, 1]} : vector<7x128xf32> to vector<1x16xf32>
    %390 = arith.truncf %389 : vector<1x16xf32> to vector<1x16xbf16>
    %c272_259 = arith.constant 272 : index
    %c0_260 = arith.constant 0 : index
    %391 = vector.load %arg6[%c272_259, %c0_260] : memref<784x128xbf16, #tpu.memory_space<vmem>>, vector<16x128xbf16>
    %cst_261 = arith.constant dense<0.000000e+00> : vector<1x128xf32>
    %392 = tpu.matmul %390, %391, %cst_261 {dimension_numbers = #tpu.dot_dimension_numbers<[1], [0], [0], [1], [0, 0, 1, 1], [], []>} : vector<1x16xbf16>, vector<16x128xbf16>, vector<1x128xf32> -> vector<1x128xf32>
    %393 = arith.addf %388, %392 : vector<1x128xf32>
    %394 = vector.extract_strided_slice %373 {offsets = [4, 0], sizes = [1, 16], strides = [1, 1]} : vector<7x128xf32> to vector<1x16xf32>
    %395 = arith.truncf %394 : vector<1x16xf32> to vector<1x16xbf16>
    %c288 = arith.constant 288 : index
    %c0_262 = arith.constant 0 : index
    %396 = vector.load %arg6[%c288, %c0_262] : memref<784x128xbf16, #tpu.memory_space<vmem>>, vector<16x128xbf16>
    %cst_263 = arith.constant dense<0.000000e+00> : vector<1x128xf32>
    %397 = tpu.matmul %395, %396, %cst_263 {dimension_numbers = #tpu.dot_dimension_numbers<[1], [0], [0], [1], [0, 0, 1, 1], [], []>} : vector<1x16xbf16>, vector<16x128xbf16>, vector<1x128xf32> -> vector<1x128xf32>
    %398 = arith.addf %393, %397 : vector<1x128xf32>
    %399 = vector.extract_strided_slice %373 {offsets = [5, 0], sizes = [1, 16], strides = [1, 1]} : vector<7x128xf32> to vector<1x16xf32>
    %400 = arith.truncf %399 : vector<1x16xf32> to vector<1x16xbf16>
    %c304 = arith.constant 304 : index
    %c0_264 = arith.constant 0 : index
    %401 = vector.load %arg6[%c304, %c0_264] : memref<784x128xbf16, #tpu.memory_space<vmem>>, vector<16x128xbf16>
    %cst_265 = arith.constant dense<0.000000e+00> : vector<1x128xf32>
    %402 = tpu.matmul %400, %401, %cst_265 {dimension_numbers = #tpu.dot_dimension_numbers<[1], [0], [0], [1], [0, 0, 1, 1], [], []>} : vector<1x16xbf16>, vector<16x128xbf16>, vector<1x128xf32> -> vector<1x128xf32>
    %403 = arith.addf %398, %402 : vector<1x128xf32>
    %404 = vector.extract_strided_slice %373 {offsets = [6, 0], sizes = [1, 16], strides = [1, 1]} : vector<7x128xf32> to vector<1x16xf32>
    %405 = arith.truncf %404 : vector<1x16xf32> to vector<1x16xbf16>
    %c320 = arith.constant 320 : index
    %c0_266 = arith.constant 0 : index
    %406 = vector.load %arg6[%c320, %c0_266] : memref<784x128xbf16, #tpu.memory_space<vmem>>, vector<16x128xbf16>
    %cst_267 = arith.constant dense<0.000000e+00> : vector<1x128xf32>
    %407 = tpu.matmul %405, %406, %cst_267 {dimension_numbers = #tpu.dot_dimension_numbers<[1], [0], [0], [1], [0, 0, 1, 1], [], []>} : vector<1x16xbf16>, vector<16x128xbf16>, vector<1x128xf32> -> vector<1x128xf32>
    %408 = arith.addf %403, %407 : vector<1x128xf32>
    %c97 = arith.constant 97 : index
    %c0_268 = arith.constant 0 : index
    %409 = tpu.strided_load %arg15[%c97, %c0_268] {strides = array<i32: 2, 1>} : memref<224x128xf32, #tpu.memory_space<vmem>>, vector<7x128xf32>
    %c98 = arith.constant 98 : index
    %c0_269 = arith.constant 0 : index
    %410 = tpu.strided_load %arg15[%c98, %c0_269] {strides = array<i32: 2, 1>} : memref<224x128xf32, #tpu.memory_space<vmem>>, vector<7x128xf32>
    %411 = arith.maximumf %409, %410 : vector<7x128xf32>
    %c113 = arith.constant 113 : index
    %c0_270 = arith.constant 0 : index
    %412 = tpu.strided_load %arg15[%c113, %c0_270] {strides = array<i32: 2, 1>} : memref<224x128xf32, #tpu.memory_space<vmem>>, vector<7x128xf32>
    %c114 = arith.constant 114 : index
    %c0_271 = arith.constant 0 : index
    %413 = tpu.strided_load %arg15[%c114, %c0_271] {strides = array<i32: 2, 1>} : memref<224x128xf32, #tpu.memory_space<vmem>>, vector<7x128xf32>
    %414 = arith.maximumf %412, %413 : vector<7x128xf32>
    %415 = arith.maximumf %411, %414 : vector<7x128xf32>
    %416 = vector.extract_strided_slice %415 {offsets = [0, 0], sizes = [1, 16], strides = [1, 1]} : vector<7x128xf32> to vector<1x16xf32>
    %417 = arith.truncf %416 : vector<1x16xf32> to vector<1x16xbf16>
    %c336_272 = arith.constant 336 : index
    %c0_273 = arith.constant 0 : index
    %418 = vector.load %arg6[%c336_272, %c0_273] : memref<784x128xbf16, #tpu.memory_space<vmem>>, vector<16x128xbf16>
    %cst_274 = arith.constant dense<0.000000e+00> : vector<1x128xf32>
    %419 = tpu.matmul %417, %418, %cst_274 {dimension_numbers = #tpu.dot_dimension_numbers<[1], [0], [0], [1], [0, 0, 1, 1], [], []>} : vector<1x16xbf16>, vector<16x128xbf16>, vector<1x128xf32> -> vector<1x128xf32>
    %420 = arith.addf %408, %419 : vector<1x128xf32>
    %421 = vector.extract_strided_slice %415 {offsets = [1, 0], sizes = [1, 16], strides = [1, 1]} : vector<7x128xf32> to vector<1x16xf32>
    %422 = arith.truncf %421 : vector<1x16xf32> to vector<1x16xbf16>
    %c352 = arith.constant 352 : index
    %c0_275 = arith.constant 0 : index
    %423 = vector.load %arg6[%c352, %c0_275] : memref<784x128xbf16, #tpu.memory_space<vmem>>, vector<16x128xbf16>
    %cst_276 = arith.constant dense<0.000000e+00> : vector<1x128xf32>
    %424 = tpu.matmul %422, %423, %cst_276 {dimension_numbers = #tpu.dot_dimension_numbers<[1], [0], [0], [1], [0, 0, 1, 1], [], []>} : vector<1x16xbf16>, vector<16x128xbf16>, vector<1x128xf32> -> vector<1x128xf32>
    %425 = arith.addf %420, %424 : vector<1x128xf32>
    %426 = vector.extract_strided_slice %415 {offsets = [2, 0], sizes = [1, 16], strides = [1, 1]} : vector<7x128xf32> to vector<1x16xf32>
    %427 = arith.truncf %426 : vector<1x16xf32> to vector<1x16xbf16>
    %c368 = arith.constant 368 : index
    %c0_277 = arith.constant 0 : index
    %428 = vector.load %arg6[%c368, %c0_277] : memref<784x128xbf16, #tpu.memory_space<vmem>>, vector<16x128xbf16>
    %cst_278 = arith.constant dense<0.000000e+00> : vector<1x128xf32>
    %429 = tpu.matmul %427, %428, %cst_278 {dimension_numbers = #tpu.dot_dimension_numbers<[1], [0], [0], [1], [0, 0, 1, 1], [], []>} : vector<1x16xbf16>, vector<16x128xbf16>, vector<1x128xf32> -> vector<1x128xf32>
    %430 = arith.addf %425, %429 : vector<1x128xf32>
    %431 = vector.extract_strided_slice %415 {offsets = [3, 0], sizes = [1, 16], strides = [1, 1]} : vector<7x128xf32> to vector<1x16xf32>
    %432 = arith.truncf %431 : vector<1x16xf32> to vector<1x16xbf16>
    %c384 = arith.constant 384 : index
    %c0_279 = arith.constant 0 : index
    %433 = vector.load %arg6[%c384, %c0_279] : memref<784x128xbf16, #tpu.memory_space<vmem>>, vector<16x128xbf16>
    %cst_280 = arith.constant dense<0.000000e+00> : vector<1x128xf32>
    %434 = tpu.matmul %432, %433, %cst_280 {dimension_numbers = #tpu.dot_dimension_numbers<[1], [0], [0], [1], [0, 0, 1, 1], [], []>} : vector<1x16xbf16>, vector<16x128xbf16>, vector<1x128xf32> -> vector<1x128xf32>
    %435 = arith.addf %430, %434 : vector<1x128xf32>
    %436 = vector.extract_strided_slice %415 {offsets = [4, 0], sizes = [1, 16], strides = [1, 1]} : vector<7x128xf32> to vector<1x16xf32>
    %437 = arith.truncf %436 : vector<1x16xf32> to vector<1x16xbf16>
    %c400 = arith.constant 400 : index
    %c0_281 = arith.constant 0 : index
    %438 = vector.load %arg6[%c400, %c0_281] : memref<784x128xbf16, #tpu.memory_space<vmem>>, vector<16x128xbf16>
    %cst_282 = arith.constant dense<0.000000e+00> : vector<1x128xf32>
    %439 = tpu.matmul %437, %438, %cst_282 {dimension_numbers = #tpu.dot_dimension_numbers<[1], [0], [0], [1], [0, 0, 1, 1], [], []>} : vector<1x16xbf16>, vector<16x128xbf16>, vector<1x128xf32> -> vector<1x128xf32>
    %440 = arith.addf %435, %439 : vector<1x128xf32>
    %441 = vector.extract_strided_slice %415 {offsets = [5, 0], sizes = [1, 16], strides = [1, 1]} : vector<7x128xf32> to vector<1x16xf32>
    %442 = arith.truncf %441 : vector<1x16xf32> to vector<1x16xbf16>
    %c416 = arith.constant 416 : index
    %c0_283 = arith.constant 0 : index
    %443 = vector.load %arg6[%c416, %c0_283] : memref<784x128xbf16, #tpu.memory_space<vmem>>, vector<16x128xbf16>
    %cst_284 = arith.constant dense<0.000000e+00> : vector<1x128xf32>
    %444 = tpu.matmul %442, %443, %cst_284 {dimension_numbers = #tpu.dot_dimension_numbers<[1], [0], [0], [1], [0, 0, 1, 1], [], []>} : vector<1x16xbf16>, vector<16x128xbf16>, vector<1x128xf32> -> vector<1x128xf32>
    %445 = arith.addf %440, %444 : vector<1x128xf32>
    %446 = vector.extract_strided_slice %415 {offsets = [6, 0], sizes = [1, 16], strides = [1, 1]} : vector<7x128xf32> to vector<1x16xf32>
    %447 = arith.truncf %446 : vector<1x16xf32> to vector<1x16xbf16>
    %c432 = arith.constant 432 : index
    %c0_285 = arith.constant 0 : index
    %448 = vector.load %arg6[%c432, %c0_285] : memref<784x128xbf16, #tpu.memory_space<vmem>>, vector<16x128xbf16>
    %cst_286 = arith.constant dense<0.000000e+00> : vector<1x128xf32>
    %449 = tpu.matmul %447, %448, %cst_286 {dimension_numbers = #tpu.dot_dimension_numbers<[1], [0], [0], [1], [0, 0, 1, 1], [], []>} : vector<1x16xbf16>, vector<16x128xbf16>, vector<1x128xf32> -> vector<1x128xf32>
    %450 = arith.addf %445, %449 : vector<1x128xf32>
    %c129 = arith.constant 129 : index
    %c0_287 = arith.constant 0 : index
    %451 = tpu.strided_load %arg15[%c129, %c0_287] {strides = array<i32: 2, 1>} : memref<224x128xf32, #tpu.memory_space<vmem>>, vector<7x128xf32>
    %c130 = arith.constant 130 : index
    %c0_288 = arith.constant 0 : index
    %452 = tpu.strided_load %arg15[%c130, %c0_288] {strides = array<i32: 2, 1>} : memref<224x128xf32, #tpu.memory_space<vmem>>, vector<7x128xf32>
    %453 = arith.maximumf %451, %452 : vector<7x128xf32>
    %c145 = arith.constant 145 : index
    %c0_289 = arith.constant 0 : index
    %454 = tpu.strided_load %arg15[%c145, %c0_289] {strides = array<i32: 2, 1>} : memref<224x128xf32, #tpu.memory_space<vmem>>, vector<7x128xf32>
    %c146 = arith.constant 146 : index
    %c0_290 = arith.constant 0 : index
    %455 = tpu.strided_load %arg15[%c146, %c0_290] {strides = array<i32: 2, 1>} : memref<224x128xf32, #tpu.memory_space<vmem>>, vector<7x128xf32>
    %456 = arith.maximumf %454, %455 : vector<7x128xf32>
    %457 = arith.maximumf %453, %456 : vector<7x128xf32>
    %458 = vector.extract_strided_slice %457 {offsets = [0, 0], sizes = [1, 16], strides = [1, 1]} : vector<7x128xf32> to vector<1x16xf32>
    %459 = arith.truncf %458 : vector<1x16xf32> to vector<1x16xbf16>
    %c448 = arith.constant 448 : index
    %c0_291 = arith.constant 0 : index
    %460 = vector.load %arg6[%c448, %c0_291] : memref<784x128xbf16, #tpu.memory_space<vmem>>, vector<16x128xbf16>
    %cst_292 = arith.constant dense<0.000000e+00> : vector<1x128xf32>
    %461 = tpu.matmul %459, %460, %cst_292 {dimension_numbers = #tpu.dot_dimension_numbers<[1], [0], [0], [1], [0, 0, 1, 1], [], []>} : vector<1x16xbf16>, vector<16x128xbf16>, vector<1x128xf32> -> vector<1x128xf32>
    %462 = arith.addf %450, %461 : vector<1x128xf32>
    %463 = vector.extract_strided_slice %457 {offsets = [1, 0], sizes = [1, 16], strides = [1, 1]} : vector<7x128xf32> to vector<1x16xf32>
    %464 = arith.truncf %463 : vector<1x16xf32> to vector<1x16xbf16>
    %c464 = arith.constant 464 : index
    %c0_293 = arith.constant 0 : index
    %465 = vector.load %arg6[%c464, %c0_293] : memref<784x128xbf16, #tpu.memory_space<vmem>>, vector<16x128xbf16>
    %cst_294 = arith.constant dense<0.000000e+00> : vector<1x128xf32>
    %466 = tpu.matmul %464, %465, %cst_294 {dimension_numbers = #tpu.dot_dimension_numbers<[1], [0], [0], [1], [0, 0, 1, 1], [], []>} : vector<1x16xbf16>, vector<16x128xbf16>, vector<1x128xf32> -> vector<1x128xf32>
    %467 = arith.addf %462, %466 : vector<1x128xf32>
    %468 = vector.extract_strided_slice %457 {offsets = [2, 0], sizes = [1, 16], strides = [1, 1]} : vector<7x128xf32> to vector<1x16xf32>
    %469 = arith.truncf %468 : vector<1x16xf32> to vector<1x16xbf16>
    %c480 = arith.constant 480 : index
    %c0_295 = arith.constant 0 : index
    %470 = vector.load %arg6[%c480, %c0_295] : memref<784x128xbf16, #tpu.memory_space<vmem>>, vector<16x128xbf16>
    %cst_296 = arith.constant dense<0.000000e+00> : vector<1x128xf32>
    %471 = tpu.matmul %469, %470, %cst_296 {dimension_numbers = #tpu.dot_dimension_numbers<[1], [0], [0], [1], [0, 0, 1, 1], [], []>} : vector<1x16xbf16>, vector<16x128xbf16>, vector<1x128xf32> -> vector<1x128xf32>
    %472 = arith.addf %467, %471 : vector<1x128xf32>
    %473 = vector.extract_strided_slice %457 {offsets = [3, 0], sizes = [1, 16], strides = [1, 1]} : vector<7x128xf32> to vector<1x16xf32>
    %474 = arith.truncf %473 : vector<1x16xf32> to vector<1x16xbf16>
    %c496 = arith.constant 496 : index
    %c0_297 = arith.constant 0 : index
    %475 = vector.load %arg6[%c496, %c0_297] : memref<784x128xbf16, #tpu.memory_space<vmem>>, vector<16x128xbf16>
    %cst_298 = arith.constant dense<0.000000e+00> : vector<1x128xf32>
    %476 = tpu.matmul %474, %475, %cst_298 {dimension_numbers = #tpu.dot_dimension_numbers<[1], [0], [0], [1], [0, 0, 1, 1], [], []>} : vector<1x16xbf16>, vector<16x128xbf16>, vector<1x128xf32> -> vector<1x128xf32>
    %477 = arith.addf %472, %476 : vector<1x128xf32>
    %478 = vector.extract_strided_slice %457 {offsets = [4, 0], sizes = [1, 16], strides = [1, 1]} : vector<7x128xf32> to vector<1x16xf32>
    %479 = arith.truncf %478 : vector<1x16xf32> to vector<1x16xbf16>
    %c512_299 = arith.constant 512 : index
    %c0_300 = arith.constant 0 : index
    %480 = vector.load %arg6[%c512_299, %c0_300] : memref<784x128xbf16, #tpu.memory_space<vmem>>, vector<16x128xbf16>
    %cst_301 = arith.constant dense<0.000000e+00> : vector<1x128xf32>
    %481 = tpu.matmul %479, %480, %cst_301 {dimension_numbers = #tpu.dot_dimension_numbers<[1], [0], [0], [1], [0, 0, 1, 1], [], []>} : vector<1x16xbf16>, vector<16x128xbf16>, vector<1x128xf32> -> vector<1x128xf32>
    %482 = arith.addf %477, %481 : vector<1x128xf32>
    %483 = vector.extract_strided_slice %457 {offsets = [5, 0], sizes = [1, 16], strides = [1, 1]} : vector<7x128xf32> to vector<1x16xf32>
    %484 = arith.truncf %483 : vector<1x16xf32> to vector<1x16xbf16>
    %c528 = arith.constant 528 : index
    %c0_302 = arith.constant 0 : index
    %485 = vector.load %arg6[%c528, %c0_302] : memref<784x128xbf16, #tpu.memory_space<vmem>>, vector<16x128xbf16>
    %cst_303 = arith.constant dense<0.000000e+00> : vector<1x128xf32>
    %486 = tpu.matmul %484, %485, %cst_303 {dimension_numbers = #tpu.dot_dimension_numbers<[1], [0], [0], [1], [0, 0, 1, 1], [], []>} : vector<1x16xbf16>, vector<16x128xbf16>, vector<1x128xf32> -> vector<1x128xf32>
    %487 = arith.addf %482, %486 : vector<1x128xf32>
    %488 = vector.extract_strided_slice %457 {offsets = [6, 0], sizes = [1, 16], strides = [1, 1]} : vector<7x128xf32> to vector<1x16xf32>
    %489 = arith.truncf %488 : vector<1x16xf32> to vector<1x16xbf16>
    %c544 = arith.constant 544 : index
    %c0_304 = arith.constant 0 : index
    %490 = vector.load %arg6[%c544, %c0_304] : memref<784x128xbf16, #tpu.memory_space<vmem>>, vector<16x128xbf16>
    %cst_305 = arith.constant dense<0.000000e+00> : vector<1x128xf32>
    %491 = tpu.matmul %489, %490, %cst_305 {dimension_numbers = #tpu.dot_dimension_numbers<[1], [0], [0], [1], [0, 0, 1, 1], [], []>} : vector<1x16xbf16>, vector<16x128xbf16>, vector<1x128xf32> -> vector<1x128xf32>
    %492 = arith.addf %487, %491 : vector<1x128xf32>
    %c161 = arith.constant 161 : index
    %c0_306 = arith.constant 0 : index
    %493 = tpu.strided_load %arg15[%c161, %c0_306] {strides = array<i32: 2, 1>} : memref<224x128xf32, #tpu.memory_space<vmem>>, vector<7x128xf32>
    %c162 = arith.constant 162 : index
    %c0_307 = arith.constant 0 : index
    %494 = tpu.strided_load %arg15[%c162, %c0_307] {strides = array<i32: 2, 1>} : memref<224x128xf32, #tpu.memory_space<vmem>>, vector<7x128xf32>
    %495 = arith.maximumf %493, %494 : vector<7x128xf32>
    %c177 = arith.constant 177 : index
    %c0_308 = arith.constant 0 : index
    %496 = tpu.strided_load %arg15[%c177, %c0_308] {strides = array<i32: 2, 1>} : memref<224x128xf32, #tpu.memory_space<vmem>>, vector<7x128xf32>
    %c178 = arith.constant 178 : index
    %c0_309 = arith.constant 0 : index
    %497 = tpu.strided_load %arg15[%c178, %c0_309] {strides = array<i32: 2, 1>} : memref<224x128xf32, #tpu.memory_space<vmem>>, vector<7x128xf32>
    %498 = arith.maximumf %496, %497 : vector<7x128xf32>
    %499 = arith.maximumf %495, %498 : vector<7x128xf32>
    %500 = vector.extract_strided_slice %499 {offsets = [0, 0], sizes = [1, 16], strides = [1, 1]} : vector<7x128xf32> to vector<1x16xf32>
    %501 = arith.truncf %500 : vector<1x16xf32> to vector<1x16xbf16>
    %c560 = arith.constant 560 : index
    %c0_310 = arith.constant 0 : index
    %502 = vector.load %arg6[%c560, %c0_310] : memref<784x128xbf16, #tpu.memory_space<vmem>>, vector<16x128xbf16>
    %cst_311 = arith.constant dense<0.000000e+00> : vector<1x128xf32>
    %503 = tpu.matmul %501, %502, %cst_311 {dimension_numbers = #tpu.dot_dimension_numbers<[1], [0], [0], [1], [0, 0, 1, 1], [], []>} : vector<1x16xbf16>, vector<16x128xbf16>, vector<1x128xf32> -> vector<1x128xf32>
    %504 = arith.addf %492, %503 : vector<1x128xf32>
    %505 = vector.extract_strided_slice %499 {offsets = [1, 0], sizes = [1, 16], strides = [1, 1]} : vector<7x128xf32> to vector<1x16xf32>
    %506 = arith.truncf %505 : vector<1x16xf32> to vector<1x16xbf16>
    %c576 = arith.constant 576 : index
    %c0_312 = arith.constant 0 : index
    %507 = vector.load %arg6[%c576, %c0_312] : memref<784x128xbf16, #tpu.memory_space<vmem>>, vector<16x128xbf16>
    %cst_313 = arith.constant dense<0.000000e+00> : vector<1x128xf32>
    %508 = tpu.matmul %506, %507, %cst_313 {dimension_numbers = #tpu.dot_dimension_numbers<[1], [0], [0], [1], [0, 0, 1, 1], [], []>} : vector<1x16xbf16>, vector<16x128xbf16>, vector<1x128xf32> -> vector<1x128xf32>
    %509 = arith.addf %504, %508 : vector<1x128xf32>
    %510 = vector.extract_strided_slice %499 {offsets = [2, 0], sizes = [1, 16], strides = [1, 1]} : vector<7x128xf32> to vector<1x16xf32>
    %511 = arith.truncf %510 : vector<1x16xf32> to vector<1x16xbf16>
    %c592 = arith.constant 592 : index
    %c0_314 = arith.constant 0 : index
    %512 = vector.load %arg6[%c592, %c0_314] : memref<784x128xbf16, #tpu.memory_space<vmem>>, vector<16x128xbf16>
    %cst_315 = arith.constant dense<0.000000e+00> : vector<1x128xf32>
    %513 = tpu.matmul %511, %512, %cst_315 {dimension_numbers = #tpu.dot_dimension_numbers<[1], [0], [0], [1], [0, 0, 1, 1], [], []>} : vector<1x16xbf16>, vector<16x128xbf16>, vector<1x128xf32> -> vector<1x128xf32>
    %514 = arith.addf %509, %513 : vector<1x128xf32>
    %515 = vector.extract_strided_slice %499 {offsets = [3, 0], sizes = [1, 16], strides = [1, 1]} : vector<7x128xf32> to vector<1x16xf32>
    %516 = arith.truncf %515 : vector<1x16xf32> to vector<1x16xbf16>
    %c608 = arith.constant 608 : index
    %c0_316 = arith.constant 0 : index
    %517 = vector.load %arg6[%c608, %c0_316] : memref<784x128xbf16, #tpu.memory_space<vmem>>, vector<16x128xbf16>
    %cst_317 = arith.constant dense<0.000000e+00> : vector<1x128xf32>
    %518 = tpu.matmul %516, %517, %cst_317 {dimension_numbers = #tpu.dot_dimension_numbers<[1], [0], [0], [1], [0, 0, 1, 1], [], []>} : vector<1x16xbf16>, vector<16x128xbf16>, vector<1x128xf32> -> vector<1x128xf32>
    %519 = arith.addf %514, %518 : vector<1x128xf32>
    %520 = vector.extract_strided_slice %499 {offsets = [4, 0], sizes = [1, 16], strides = [1, 1]} : vector<7x128xf32> to vector<1x16xf32>
    %521 = arith.truncf %520 : vector<1x16xf32> to vector<1x16xbf16>
    %c624 = arith.constant 624 : index
    %c0_318 = arith.constant 0 : index
    %522 = vector.load %arg6[%c624, %c0_318] : memref<784x128xbf16, #tpu.memory_space<vmem>>, vector<16x128xbf16>
    %cst_319 = arith.constant dense<0.000000e+00> : vector<1x128xf32>
    %523 = tpu.matmul %521, %522, %cst_319 {dimension_numbers = #tpu.dot_dimension_numbers<[1], [0], [0], [1], [0, 0, 1, 1], [], []>} : vector<1x16xbf16>, vector<16x128xbf16>, vector<1x128xf32> -> vector<1x128xf32>
    %524 = arith.addf %519, %523 : vector<1x128xf32>
    %525 = vector.extract_strided_slice %499 {offsets = [5, 0], sizes = [1, 16], strides = [1, 1]} : vector<7x128xf32> to vector<1x16xf32>
    %526 = arith.truncf %525 : vector<1x16xf32> to vector<1x16xbf16>
    %c640 = arith.constant 640 : index
    %c0_320 = arith.constant 0 : index
    %527 = vector.load %arg6[%c640, %c0_320] : memref<784x128xbf16, #tpu.memory_space<vmem>>, vector<16x128xbf16>
    %cst_321 = arith.constant dense<0.000000e+00> : vector<1x128xf32>
    %528 = tpu.matmul %526, %527, %cst_321 {dimension_numbers = #tpu.dot_dimension_numbers<[1], [0], [0], [1], [0, 0, 1, 1], [], []>} : vector<1x16xbf16>, vector<16x128xbf16>, vector<1x128xf32> -> vector<1x128xf32>
    %529 = arith.addf %524, %528 : vector<1x128xf32>
    %530 = vector.extract_strided_slice %499 {offsets = [6, 0], sizes = [1, 16], strides = [1, 1]} : vector<7x128xf32> to vector<1x16xf32>
    %531 = arith.truncf %530 : vector<1x16xf32> to vector<1x16xbf16>
    %c656 = arith.constant 656 : index
    %c0_322 = arith.constant 0 : index
    %532 = vector.load %arg6[%c656, %c0_322] : memref<784x128xbf16, #tpu.memory_space<vmem>>, vector<16x128xbf16>
    %cst_323 = arith.constant dense<0.000000e+00> : vector<1x128xf32>
    %533 = tpu.matmul %531, %532, %cst_323 {dimension_numbers = #tpu.dot_dimension_numbers<[1], [0], [0], [1], [0, 0, 1, 1], [], []>} : vector<1x16xbf16>, vector<16x128xbf16>, vector<1x128xf32> -> vector<1x128xf32>
    %534 = arith.addf %529, %533 : vector<1x128xf32>
    %c193 = arith.constant 193 : index
    %c0_324 = arith.constant 0 : index
    %535 = tpu.strided_load %arg15[%c193, %c0_324] {strides = array<i32: 2, 1>} : memref<224x128xf32, #tpu.memory_space<vmem>>, vector<7x128xf32>
    %c194 = arith.constant 194 : index
    %c0_325 = arith.constant 0 : index
    %536 = tpu.strided_load %arg15[%c194, %c0_325] {strides = array<i32: 2, 1>} : memref<224x128xf32, #tpu.memory_space<vmem>>, vector<7x128xf32>
    %537 = arith.maximumf %535, %536 : vector<7x128xf32>
    %c209 = arith.constant 209 : index
    %c0_326 = arith.constant 0 : index
    %538 = tpu.strided_load %arg15[%c209, %c0_326] {strides = array<i32: 2, 1>} : memref<224x128xf32, #tpu.memory_space<vmem>>, vector<7x128xf32>
    %c210 = arith.constant 210 : index
    %c0_327 = arith.constant 0 : index
    %539 = tpu.strided_load %arg15[%c210, %c0_327] {strides = array<i32: 2, 1>} : memref<224x128xf32, #tpu.memory_space<vmem>>, vector<7x128xf32>
    %540 = arith.maximumf %538, %539 : vector<7x128xf32>
    %541 = arith.maximumf %537, %540 : vector<7x128xf32>
    %542 = vector.extract_strided_slice %541 {offsets = [0, 0], sizes = [1, 16], strides = [1, 1]} : vector<7x128xf32> to vector<1x16xf32>
    %543 = arith.truncf %542 : vector<1x16xf32> to vector<1x16xbf16>
    %c672_328 = arith.constant 672 : index
    %c0_329 = arith.constant 0 : index
    %544 = vector.load %arg6[%c672_328, %c0_329] : memref<784x128xbf16, #tpu.memory_space<vmem>>, vector<16x128xbf16>
    %cst_330 = arith.constant dense<0.000000e+00> : vector<1x128xf32>
    %545 = tpu.matmul %543, %544, %cst_330 {dimension_numbers = #tpu.dot_dimension_numbers<[1], [0], [0], [1], [0, 0, 1, 1], [], []>} : vector<1x16xbf16>, vector<16x128xbf16>, vector<1x128xf32> -> vector<1x128xf32>
    %546 = arith.addf %534, %545 : vector<1x128xf32>
    %547 = vector.extract_strided_slice %541 {offsets = [1, 0], sizes = [1, 16], strides = [1, 1]} : vector<7x128xf32> to vector<1x16xf32>
    %548 = arith.truncf %547 : vector<1x16xf32> to vector<1x16xbf16>
    %c688 = arith.constant 688 : index
    %c0_331 = arith.constant 0 : index
    %549 = vector.load %arg6[%c688, %c0_331] : memref<784x128xbf16, #tpu.memory_space<vmem>>, vector<16x128xbf16>
    %cst_332 = arith.constant dense<0.000000e+00> : vector<1x128xf32>
    %550 = tpu.matmul %548, %549, %cst_332 {dimension_numbers = #tpu.dot_dimension_numbers<[1], [0], [0], [1], [0, 0, 1, 1], [], []>} : vector<1x16xbf16>, vector<16x128xbf16>, vector<1x128xf32> -> vector<1x128xf32>
    %551 = arith.addf %546, %550 : vector<1x128xf32>
    %552 = vector.extract_strided_slice %541 {offsets = [2, 0], sizes = [1, 16], strides = [1, 1]} : vector<7x128xf32> to vector<1x16xf32>
    %553 = arith.truncf %552 : vector<1x16xf32> to vector<1x16xbf16>
    %c704 = arith.constant 704 : index
    %c0_333 = arith.constant 0 : index
    %554 = vector.load %arg6[%c704, %c0_333] : memref<784x128xbf16, #tpu.memory_space<vmem>>, vector<16x128xbf16>
    %cst_334 = arith.constant dense<0.000000e+00> : vector<1x128xf32>
    %555 = tpu.matmul %553, %554, %cst_334 {dimension_numbers = #tpu.dot_dimension_numbers<[1], [0], [0], [1], [0, 0, 1, 1], [], []>} : vector<1x16xbf16>, vector<16x128xbf16>, vector<1x128xf32> -> vector<1x128xf32>
    %556 = arith.addf %551, %555 : vector<1x128xf32>
    %557 = vector.extract_strided_slice %541 {offsets = [3, 0], sizes = [1, 16], strides = [1, 1]} : vector<7x128xf32> to vector<1x16xf32>
    %558 = arith.truncf %557 : vector<1x16xf32> to vector<1x16xbf16>
    %c720 = arith.constant 720 : index
    %c0_335 = arith.constant 0 : index
    %559 = vector.load %arg6[%c720, %c0_335] : memref<784x128xbf16, #tpu.memory_space<vmem>>, vector<16x128xbf16>
    %cst_336 = arith.constant dense<0.000000e+00> : vector<1x128xf32>
    %560 = tpu.matmul %558, %559, %cst_336 {dimension_numbers = #tpu.dot_dimension_numbers<[1], [0], [0], [1], [0, 0, 1, 1], [], []>} : vector<1x16xbf16>, vector<16x128xbf16>, vector<1x128xf32> -> vector<1x128xf32>
    %561 = arith.addf %556, %560 : vector<1x128xf32>
    %562 = vector.extract_strided_slice %541 {offsets = [4, 0], sizes = [1, 16], strides = [1, 1]} : vector<7x128xf32> to vector<1x16xf32>
    %563 = arith.truncf %562 : vector<1x16xf32> to vector<1x16xbf16>
    %c736 = arith.constant 736 : index
    %c0_337 = arith.constant 0 : index
    %564 = vector.load %arg6[%c736, %c0_337] : memref<784x128xbf16, #tpu.memory_space<vmem>>, vector<16x128xbf16>
    %cst_338 = arith.constant dense<0.000000e+00> : vector<1x128xf32>
    %565 = tpu.matmul %563, %564, %cst_338 {dimension_numbers = #tpu.dot_dimension_numbers<[1], [0], [0], [1], [0, 0, 1, 1], [], []>} : vector<1x16xbf16>, vector<16x128xbf16>, vector<1x128xf32> -> vector<1x128xf32>
    %566 = arith.addf %561, %565 : vector<1x128xf32>
    %567 = vector.extract_strided_slice %541 {offsets = [5, 0], sizes = [1, 16], strides = [1, 1]} : vector<7x128xf32> to vector<1x16xf32>
    %568 = arith.truncf %567 : vector<1x16xf32> to vector<1x16xbf16>
    %c752_339 = arith.constant 752 : index
    %c0_340 = arith.constant 0 : index
    %569 = vector.load %arg6[%c752_339, %c0_340] : memref<784x128xbf16, #tpu.memory_space<vmem>>, vector<16x128xbf16>
    %cst_341 = arith.constant dense<0.000000e+00> : vector<1x128xf32>
    %570 = tpu.matmul %568, %569, %cst_341 {dimension_numbers = #tpu.dot_dimension_numbers<[1], [0], [0], [1], [0, 0, 1, 1], [], []>} : vector<1x16xbf16>, vector<16x128xbf16>, vector<1x128xf32> -> vector<1x128xf32>
    %571 = arith.addf %566, %570 : vector<1x128xf32>
    %572 = vector.extract_strided_slice %541 {offsets = [6, 0], sizes = [1, 16], strides = [1, 1]} : vector<7x128xf32> to vector<1x16xf32>
    %573 = arith.truncf %572 : vector<1x16xf32> to vector<1x16xbf16>
    %c768 = arith.constant 768 : index
    %c0_342 = arith.constant 0 : index
    %574 = vector.load %arg6[%c768, %c0_342] : memref<784x128xbf16, #tpu.memory_space<vmem>>, vector<16x128xbf16>
    %cst_343 = arith.constant dense<0.000000e+00> : vector<1x128xf32>
    %575 = tpu.matmul %573, %574, %cst_343 {dimension_numbers = #tpu.dot_dimension_numbers<[1], [0], [0], [1], [0, 0, 1, 1], [], []>} : vector<1x16xbf16>, vector<16x128xbf16>, vector<1x128xf32> -> vector<1x128xf32>
    %576 = arith.addf %571, %575 : vector<1x128xf32>
    %c0_344 = arith.constant 0 : index
    %c0_345 = arith.constant 0 : index
    %577 = vector.load %arg7[%c0_344, %c0_345] : memref<1x128xf32, #tpu.memory_space<vmem>>, vector<1x128xf32>
    %578 = arith.addf %576, %577 : vector<1x128xf32>
    %cst_346 = arith.constant 0.000000e+00 : f32
    %579 = vector.broadcast %cst_346 : f32 to vector<1x128xf32>
    %580 = arith.maximumf %578, %579 : vector<1x128xf32>
    %581 = arith.truncf %580 : vector<1x128xf32> to vector<1x128xbf16>
    %c0_347 = arith.constant 0 : index
    %c0_348 = arith.constant 0 : index
    %582 = vector.load %arg8[%c0_347, %c0_348] : memref<128x128xbf16, #tpu.memory_space<vmem>>, vector<128x128xbf16>
    %cst_349 = arith.constant dense<0.000000e+00> : vector<1x128xf32>
    %583 = tpu.matmul %581, %582, %cst_349 {dimension_numbers = #tpu.dot_dimension_numbers<[1], [0], [0], [1], [0, 0, 1, 1], [], []>} : vector<1x128xbf16>, vector<128x128xbf16>, vector<1x128xf32> -> vector<1x128xf32>
    %c0_350 = arith.constant 0 : index
    %c0_351 = arith.constant 0 : index
    %584 = vector.load %arg9[%c0_350, %c0_351] : memref<1x128xf32, #tpu.memory_space<vmem>>, vector<1x128xf32>
    %585 = arith.addf %583, %584 : vector<1x128xf32>
    %cst_352 = arith.constant 0.000000e+00 : f32
    %586 = vector.broadcast %cst_352 : f32 to vector<1x128xf32>
    %587 = arith.maximumf %585, %586 : vector<1x128xf32>
    %588 = arith.truncf %587 : vector<1x128xf32> to vector<1x128xbf16>
    %c0_353 = arith.constant 0 : index
    %c0_354 = arith.constant 0 : index
    %589 = vector.load %arg10[%c0_353, %c0_354] : memref<128x128xbf16, #tpu.memory_space<vmem>>, vector<128x128xbf16>
    %cst_355 = arith.constant dense<0.000000e+00> : vector<1x128xf32>
    %590 = tpu.matmul %588, %589, %cst_355 {dimension_numbers = #tpu.dot_dimension_numbers<[1], [0], [0], [1], [0, 0, 1, 1], [], []>} : vector<1x128xbf16>, vector<128x128xbf16>, vector<1x128xf32> -> vector<1x128xf32>
    %c0_356 = arith.constant 0 : index
    %c0_357 = arith.constant 0 : index
    %591 = vector.load %arg11[%c0_356, %c0_357] : memref<1x128xf32, #tpu.memory_space<vmem>>, vector<1x128xf32>
    %592 = arith.addf %590, %591 : vector<1x128xf32>
    %c0_358 = arith.constant 0 : index
    %c0_359 = arith.constant 0 : index
    %c0_360 = arith.constant 0 : index
    %593 = vector.load %arg12[%c0_358, %c0_359, %c0_360] : memref<1x1x128xf32, #tpu.memory_space<vmem>>, vector<1x1x128xf32>
    %594 = vector.shape_cast %593 : vector<1x1x128xf32> to vector<1x128xf32>
    %595 = vector.shape_cast %592 : vector<1x128xf32> to vector<1x1x128xf32>
    tpu.vector_store %arg12[%c0_358, %c0_359, %c0_360], %595 {strides = array<i32>} : memref<1x1x128xf32, #tpu.memory_space<vmem>>, vector<1x1x128xf32>,
    return
  }
  func.func @transform_0(%arg0: i32) -> (i32, i32, i32) {
    %c0_i32 = arith.constant 0 : i32
    %c0_i32_0 = arith.constant 0 : i32
    %c0_i32_1 = arith.constant 0 : i32
    return %arg0, %c0_i32, %c0_i32_0 : i32, i32, i32
  }
  func.func @transform_1(%arg0: i32) -> (i32, i32) {
    %c0_i32 = arith.constant 0 : i32
    %c0_i32_0 = arith.constant 0 : i32
    %c0_i32_1 = arith.constant 0 : i32
    return %c0_i32, %c0_i32_0 : i32, i32
  }
  func.func @transform_2(%arg0: i32) -> (i32, i32) {
    %c0_i32 = arith.constant 0 : i32
    %c0_i32_0 = arith.constant 0 : i32
    %c0_i32_1 = arith.constant 0 : i32
    return %c0_i32, %c0_i32_0 : i32, i32
  }
  func.func @transform_3(%arg0: i32) -> (i32, i32) {
    %c0_i32 = arith.constant 0 : i32
    %c0_i32_0 = arith.constant 0 : i32
    %c0_i32_1 = arith.constant 0 : i32
    return %c0_i32, %c0_i32_0 : i32, i32
  }
  func.func @transform_4(%arg0: i32) -> (i32, i32) {
    %c0_i32 = arith.constant 0 : i32
    %c0_i32_0 = arith.constant 0 : i32
    %c0_i32_1 = arith.constant 0 : i32
    return %c0_i32, %c0_i32_0 : i32, i32
  }
  func.func @transform_5(%arg0: i32) -> (i32, i32) {
    %c0_i32 = arith.constant 0 : i32
    %c0_i32_0 = arith.constant 0 : i32
    %c0_i32_1 = arith.constant 0 : i32
    return %c0_i32, %c0_i32_0 : i32, i32
  }
  func.func @transform_6(%arg0: i32) -> (i32, i32) {
    %c0_i32 = arith.constant 0 : i32
    %c0_i32_0 = arith.constant 0 : i32
    %c0_i32_1 = arith.constant 0 : i32
    return %c0_i32, %c0_i32_0 : i32, i32
  }
  func.func @transform_7(%arg0: i32) -> (i32, i32) {
    %c0_i32 = arith.constant 0 : i32
    %c0_i32_0 = arith.constant 0 : i32
    %c0_i32_1 = arith.constant 0 : i32
    return %c0_i32, %c0_i32_0 : i32, i32
  }
  func.func @transform_8(%arg0: i32) -> (i32, i32) {
    %c0_i32 = arith.constant 0 : i32
    %c0_i32_0 = arith.constant 0 : i32
    %c0_i32_1 = arith.constant 0 : i32
    return %c0_i32, %c0_i32_0 : i32, i32
  }
  func.func @transform_9(%arg0: i32) -> (i32, i32) {
    %c0_i32 = arith.constant 0 : i32
    %c0_i32_0 = arith.constant 0 : i32
    %c0_i32_1 = arith.constant 0 : i32
    return %c0_i32, %c0_i32_0 : i32, i32
  }
  func.func @transform_10(%arg0: i32) -> (i32, i32) {
    %c0_i32 = arith.constant 0 : i32
    %c0_i32_0 = arith.constant 0 : i32
    %c0_i32_1 = arith.constant 0 : i32
    return %c0_i32, %c0_i32_0 : i32, i32
  }
  func.func @transform_11(%arg0: i32) -> (i32, i32, i32) {
    %c0_i32 = arith.constant 0 : i32
    %c0_i32_0 = arith.constant 0 : i32
    %c0_i32_1 = arith.constant 0 : i32
    return %arg0, %c0_i32, %c0_i32_0 : i32, i32, i32
  }
}

</mosaic_0001>

<bundles_post_ra>
// kernel: lenet_forward.1
= control target key start
LH: loop header
LB: loop body
LE: loop exit
PB: predicated region body
PF: predicated region fallthrough
CT: control target
= control target key end

     0   :  { %16 = vsyncpa [#allocation6], 0  ;;  %s12505_s0 = inlined_call_operand.vmem [shape: bf16[2,900,16], index: 0, kind: input, shape index: {}]   ;;  %s12506_s1 = inlined_call_operand.vmem [shape: bf16[16,128], index: 1, kind: input, shape index: {}]   ;;  %s12507_s2 = inlined_call_operand.vmem [shape: f32[1,128], index: 2, kind: input, shape index: {}]   ;;  %s12508_s3 = inlined_call_operand.vmem [shape: bf16[72,128], index: 3, kind: input, shape index: {}]   ;;  %s12509_s4 = inlined_call_operand.vmem [shape: f32[1,128], index: 4, kind: input, shape index: {}]   ;;  %s12510_s5 = inlined_call_operand.vmem [shape: bf16[784,128], index: 5, kind: input, shape index: {}]   ;;  %s12511_s6 = inlined_call_operand.vmem [shape: f32[1,128], index: 6, kind: input, shape index: {}]   ;;  %s12512_s7 = inlined_call_operand.vmem [shape: bf16[128,128], index: 7, kind: input, shape index: {}]   ;;  %s12513_s8 = inlined_call_operand.vmem [shape: f32[1,128], index: 8, kind: input, shape index: {}]   ;;  %s12514_s9 = inlined_call_operand.vmem [shape: bf16[128,128], index: 9, kind: input, shape index: {}]   ;;  %s12515_s10 = inlined_call_operand.vmem [shape: f32[1,128], index: 10, kind: input, shape index: {}]   ;;  %s12516_s11 = inlined_call_operand.hbm [shape: f32[2,1,128], index: 11, kind: output, shape index: {}]  }
   0x1   :  { %18 = vsyncpa [#allocation6 + $0x1], 0  ;;  %s10085_s17 = smov 0   ;;  %s10087_s18 = smov 0  }
   0x2   :  { %s10089_s19 = smov 0   ;;  %s10091_s20 = smov 0  }
   0x3 LB: > { %s10106_s21 = sadd.s32 4294967295, %s10020_s20   ;;  %s7995_s22 = sadd.s32 4294967294, %s10020_s20   ;;  %s10020_s20 = sphi %s10091_s20, %s12522_s20   ;;  %s10016_s19 = sphi %s10089_s19, %s12521_s19   ;;  %s10012_s18 = sphi %s10087_s18, %s12520_s18   ;;  %s10008_s17 = sphi %s10085_s17, %s12519_s17  }
   0x4   : > { %s10110_s23 = sadd.s32 1, %s10020_s20   ;;  %s267_s24 = sadd.s32 1, %s10016_s19 }
   0x5   : > { %s264_s25 = ssub.s32 %s10020_s20, %s10110_s23  ;;  %p277_p0 = scmp.ne.s32.totalorder %s10016_s19, %s10012_s18 }
   0x6   : > { %p265_p1 = scmp.eq.s32.totalorder %s264_s25, 0  ;;  %p278_p2 = scmp.eq.s32.totalorder %s10106_s21, 1 }
   0x7   : > { %p283_p3 = scmp.ne.s32.totalorder %s10012_s18, %s10008_s17  ;;  %p284_p4 = scmp.eq.s32.totalorder %s7995_s22, 1 }
   0x8   : > { %s10121_s26 = scalar_select %p265_p1, %s10016_s19, %s267_s24  }
   0x9   : > { %p10123_p5 = por %p278_p2, %p277_p0  ;;  %p10127_p6 = por %p284_p4, %p283_p3 }
   0xa   : > { %p7998_p7 = scmp.ge.s32.totalorder %s10020_s20, 1  ;;  %p340_p8 = scmp.lt.s32.totalorder %s10020_s20, 3 }
   0xc   : > { %p341_p9 = pnand %p7998_p7, %p340_p8 }
   0xd   : > { %v9831_v0 = vld [vmem:[%s12506_s1] sm:$0xff] (!%p341_p9)   ;;  %v10022_v1 = vmov (!%p341_p9), 0.0   ;;  %vm10023_vm0 = vmmov (!%p341_p9), 0   ;;  %p379_p10 = scmp.lt.s32.totalorder (!%p341_p9), %s10106_s21, 1  ;;  %vm471_vm1 = vcmask (!%p341_p9), 1044480   ;;  %vm499_vm2 = vcmask (!%p341_p9), 130048  }
   0xe   : > { %344 = sbr.rel (%p341_p9) target bundleno = 1836 (0x72c), region = 64  ;;  %8685 = vmatprep.subr.bf16.mxu0 (!%p341_p9), %v10022_v1  ;;  %8731 = vmatprep.subr.bf16.mxu1 (!%p341_p9), %v10022_v1  ;;  %v9832_v2 = vld [vmem:[%s12506_s1] sm:$0xff] (!%p341_p9)   ;;  %vm2364_vm3 = vcmask (!%p341_p9), 1043456   ;;  %vm1927_vm4 = vcmask (!%p341_p9), 64512   ;;  %vm1985_vm5 = vcmask (!%p341_p9), 62464   ;;  %s377_s22 = sand.u32 (!%p341_p9), 1, %s10012_s18  }
   0xf   : > { %8686 = vmatpush3.bf16.msra.mxu0 (!%p341_p9), %v9831_v0  ;;  %8687 = vmatprep.mubr.msk.bf16.mxu0 (!%p341_p9), %vm10023_vm0, %v10022_v1  ;;  %v9839_v5 = vld [vmem:[%s12506_s1] sm:$0xff] (!%p341_p9)   ;;  %1929 = vst.msk [vmem:[#allocation3 + $0x8] sm:$0xff] (!%p341_p9), %vm1927_vm4, %v10022_v1  ;;  %1930 = vst.msk [vmem:[#allocation3 + $0x10] sm:$0xff] (!%p341_p9), %vm1927_vm4, %v10022_v1  ;;  %s8362_s30 = sshll.u32 (!%p341_p9), %s10106_s21, 4  ;;  %s378_s12 = scalar_lea.vmem (!%p341_p9), [#allocation5], %s377_s22 }
  0x10   : > { %8732 = vmatpush3.bf16.msra.mxu1 (!%p341_p9), %v9832_v2  ;;  %8733 = vmatprep.mubr.msk.bf16.mxu1 (!%p341_p9), %vm10023_vm0, %v10022_v1  ;;  %v9861_v10 = vld [vmem:[%s12506_s1] sm:$0xff] (!%p341_p9)   ;;  %1928 = vst.msk [vmem:[#allocation3] sm:$0xff] (!%p341_p9), %vm1927_vm4, %v10022_v1  ;;  %1931 = vst.msk [vmem:[#allocation3 + $0x18] sm:$0xff] (!%p341_p9), %vm1927_vm4, %v10022_v1  ;;  %s7940_s13 = sshll.u32 (!%p341_p9), %s378_s12, 4  ;;  %s7928_s16 = scalar_lea.sflag (!%p341_p9), [#allocation6], %s377_s22  ;;  %s12465_s13 = int_to_ptr.vmem [resolvable:$true] %s7940_s13 }
  0x11   : > { %8777 = vmatprep.subr.bf16.mxu0 (!%p341_p9), %v10022_v1  ;;  %8823 = vmatprep.subr.bf16.mxu1 (!%p341_p9), %v10022_v1  ;;  %1932 = vst.msk [vmem:[#allocation3 + $0x20] sm:$0xff] (!%p341_p9), %vm1927_vm4, %v10022_v1  ;;  %1933 = vst.msk [vmem:[#allocation3 + $0x28] sm:$0xff] (!%p341_p9), %vm1927_vm4, %v10022_v1  ;;  %s10024_s25 = smov (!%p341_p9), [#allocation5]  }
  0x12   : > { %1934 = vst.msk [vmem:[#allocation3 + $0x30] sm:$0xff] (!%p341_p9), %vm1927_vm4, %v10022_v1  ;;  %1935 = vst.msk [vmem:[#allocation3 + $0x38] sm:$0xff] (!%p341_p9), %vm1927_vm4, %v10022_v1  ;;  %s9962_s29 = sshll.u32 (!%p341_p9), %s10024_s25, 4  ;;  %s9963_s29 = int_to_ptr.vmem [resolvable:$false] %s9962_s29 }
  0x13   : > { %1936 = vst.msk [vmem:[#allocation3 + $0x40] sm:$0xff] (!%p341_p9), %vm1927_vm4, %v10022_v1  ;;  %1937 = vst.msk [vmem:[#allocation3 + $0x48] sm:$0xff] (!%p341_p9), %vm1927_vm4, %v10022_v1  ;;  %p9965_p0 = scmp.lt.s32.totalorder (!%p341_p9), %s12465_s13, %s9963_s29 }
  0x14   : > { %1938 = vst.msk [vmem:[#allocation3 + $0x50] sm:$0xff] (!%p341_p9), %vm1927_vm4, %v10022_v1  ;;  %1939 = vst.msk [vmem:[#allocation3 + $0x58] sm:$0xff] (!%p341_p9), %vm1927_vm4, %v10022_v1 }
  0x15   : > { %s380_s14 = scalar_select %p379_p10, %s10106_s21, 1  ;;  %1940 = vst.msk [vmem:[#allocation3 + $0x60] sm:$0xff] %vm1927_vm4, %v10022_v1  ;;  %1941 = vst.msk [vmem:[#allocation3 + $0x68] sm:$0xff] %vm1927_vm4, %v10022_v1 }
  0x16   : > { %1942 = vst.msk [vmem:[#allocation3 + $0x70] sm:$0xff] %vm1927_vm4, %v10022_v1  ;;  %1943 = vst.msk [vmem:[#allocation3 + $0x78] sm:$0xff] %vm1927_vm4, %v10022_v1  ;;  %s9958_s21 = scalar_lea.vmem %s12465_s13, 16 }
  0x17   : > { %s9789_s15 = smul.u32 452, %s380_s14  ;;  %1944 = vst.msk [vmem:[#allocation3 + $0x80] sm:$0xff] %vm1927_vm4, %v10022_v1  ;;  %1945 = vst.msk [vmem:[#allocation3 + $0x88] sm:$0xff] %vm1927_vm4, %v10022_v1  ;;  %p9959_p11 = scmp.ne.s32.totalorder %s12465_s13, %s9958_s21 }
  0x18   : > { %1946 = vst.msk [vmem:[#allocation3 + $0x90] sm:$0xff] %vm1927_vm4, %v10022_v1  ;;  %1947 = vst.msk [vmem:[#allocation3 + $0x98] sm:$0xff] %vm1927_vm4, %v10022_v1 }
  0x19   : > { %s10152_s24 = scalar_lea.vmem %s12505_s0, %s9789_s15  ;;  %1948 = vst.msk [vmem:[#allocation3 + $0xa0] sm:$0xff] %vm1927_vm4, %v10022_v1  ;;  %1949 = vst.msk [vmem:[#allocation3 + $0xa8] sm:$0xff] %vm1927_vm4, %v10022_v1  ;;  %s12463_s15 = scalar_lea.hbm %s12516_s11, %s8362_s30 }
  0x1a   : > { %v9833_v3 = vld [vmem:[%s10152_s24 + $0xc] sm:$0xf8]   ;;  %v9834_v4 = vld [vmem:[%s10152_s24 + $0x14] sm:$0xff]   ;;  %v9835_v8 = vld [vmem:[%s10152_s24 + $0x60] sm:$0xf8]   ;;  %1950 = vst.msk [vmem:[#allocation3 + $0xb0] sm:$0xff] %vm1927_vm4, %v10022_v1  ;;  %p9960_p12 = pnand %p9959_p11, %p10123_p5 }
  0x1b   : > { %v472_v6 = vrot.slane %v9833_v3, 3  ;;  %v473_v7 = vrot.slane %v9834_v4, 3  ;;  %v9836_v9 = vld [vmem:[%s10152_s24 + $0x68] sm:$0xff]   ;;  %v781_v12 = vrot.slane %v9835_v8, 3  ;;  %v9837_v13 = vld [vmem:[%s10152_s24 + $0x1c] sm:$0xff]   ;;  %v9838_v15 = vld [vmem:[%s10152_s24 + $0x70] sm:$0xff]  }
  0x1c   : > { %v782_v14 = vrot.slane %v9836_v9, 3  ;;  %v475_v16 = vrot.slane %v9837_v13, 3  ;;  %v784_v18 = vrot.slane %v9838_v15, 3  ;;  %v9840_v20 = vld [vmem:[%s10152_s24 + $0x24] sm:$0xff]   ;;  %v9841_v22 = vld [vmem:[%s10152_s24 + $0x78] sm:$0xff]   ;;  %v9842_v26 = vld [vmem:[%s10152_s24 + $0x2c] sm:$0xff]   ;;  %p9961_p13 = pneg %p9960_p12 }
  0x1d   : > { %v474_v11 = vsel %vm471_vm1, %v472_v6, %v473_v7  ;;  %v477_v23 = vrot.slane %v9840_v20, 3  ;;  %v786_v24 = vrot.slane %v9841_v22, 3  ;;  %v9843_v28 = vld [vmem:[%s10152_s24 + $0x80] sm:$0xff]   ;;  %v479_v29 = vrot.slane %v9842_v26, 3  ;;  %v9844_v32 = vld [vmem:[%s10152_s24 + $0x34] sm:$0xff]   ;;  %v9845_v34 = vld [vmem:[%s10152_s24 + $0x88] sm:$0xff]  }
  0x1e   : > { %8688 = vmatmul.mubr.msk.bf16.vlgmr.msra.gmra.mrb[0].mxu0 %vm499_vm2, %v474_v11  ;;  %v783_v17 = vsel %vm471_vm1, %v781_v12, %v782_v14  ;;  %v476_v19 = vsel %vm471_vm1, %v473_v7, %v475_v16  ;;  %v785_v21 = vsel %vm471_vm1, %v782_v14, %v784_v18  ;;  %v788_v30 = vrot.slane %v9843_v28, 3  ;;  %v9846_v36 = vld [vmem:[%s10152_s24 + $0x3c] sm:$0xff]   ;;  %v9847_v37 = vld [vmem:[%s10152_s24 + $0x90] sm:$0xff]   ;;  %v9848_v43 = vld [vmem:[%s10152_s24 + $0x44] sm:$0xff]   ;;  %1951 = vst.msk [vmem:[#allocation3 + $0xb8] sm:$0xff] %vm1927_vm4, %v10022_v1 }
  0x1f   : > { %8691 = vmatprep.mubr.msk.bf16.mxu0 %vm10023_vm0, %v10022_v1  ;;  %8778 = vmatpush3.bf16.msra.mxu0 %v9839_v5  ;;  %v478_v25 = vsel %vm471_vm1, %v475_v16, %v477_v23  ;;  %v787_v27 = vsel %vm471_vm1, %v784_v18, %v786_v24  ;;  %v480_v31 = vsel %vm471_vm1, %v477_v23, %v479_v29  ;;  %v481_v35 = vrot.slane %v9844_v32, 3  ;;  %v9849_v45 = vld [vmem:[%s10152_s24 + $0x98] sm:$0xff]   ;;  %v9850_v49 = vld [vmem:[%s10152_s24 + $0x4c] sm:$0xff]   ;;  %v9851_v51 = vld [vmem:[%s10152_s24 + $0xa0] sm:$0xff]  }
  0x20   : > { %8869 = vmatprep.subr.bf16.mxu0 %v10022_v1  ;;  %8734 = vmatmul.mubr.msk.bf16.vlgmr.msra.gmra.mrb[0].mxu1 %vm499_vm2, %v783_v17  ;;  %v789_v33 = vsel %vm471_vm1, %v786_v24, %v788_v30  ;;  %v790_v38 = vrot.slane %v9845_v34, 3  ;;  %v483_v40 = vrot.slane %v9846_v36, 3  ;;  %v792_v41 = vrot.slane %v9847_v37, 3  ;;  %v9852_v55 = vld [vmem:[%s10152_s24 + $0x54] sm:$0xff]   ;;  %v9853_v56 = vld [vmem:[%s10152_s24 + $0xa8] sm:$0xff]   ;;  %v9857_v5 = vld [vmem:[%s10152_s24 + $0xbc] sm:$0xff]  }
  0x21   : > { %8737 = vmatprep.mubr.msk.bf16.mxu1 %vm10023_vm0, %v10022_v1  ;;  %8824 = vmatpush3.bf16.msra.mxu1 %v9861_v10  ;;  %v482_v39 = vsel %vm471_vm1, %v479_v29, %v481_v35  ;;  %v485_v47 = vrot.slane %v9848_v43, 3  ;;  %v794_v48 = vrot.slane %v9849_v45, 3  ;;  %v487_v53 = vrot.slane %v9850_v49, 3  ;;  %v9854_v61 = vld [vmem:[%s10152_s24 + $0x5c] sm:$0x7f]   ;;  %v9869_v11 = vld [vmem:[%s10152_s24 + $0x110] sm:$0xff]  }
  0x22   : > { %8915 = vmatprep.subr.bf16.mxu1 %v10022_v1  ;;  %v791_v42 = vsel %vm471_vm1, %v788_v30, %v790_v38  ;;  %v484_v44 = vsel %vm471_vm1, %v481_v35, %v483_v40  ;;  %v793_v46 = vsel %vm471_vm1, %v790_v38, %v792_v41  ;;  %v796_v54 = vrot.slane %v9851_v51, 3  ;;  %v9855_v62 = vld [vmem:[%s10152_s24 + $0xb0] sm:$0x7f]   ;;  %v9856_v4 = vld [vmem:[%s10152_s24 + $0xb4] sm:$0xf8]   ;;  %v9858_v13 = vld [vmem:[%s10152_s24 + $0xc4] sm:$0xff]  }
  0x23   : > { %v486_v50 = vsel %vm471_vm1, %v483_v40, %v485_v47  ;;  %v795_v52 = vsel %vm471_vm1, %v792_v41, %v794_v48  ;;  %v488_v57 = vsel %vm471_vm1, %v485_v47, %v487_v53  ;;  %v489_v59 = vrot.slane %v9852_v55, 3  ;;  %v9868_v7 = vld [vmem:[%s10152_s24 + $0x108] sm:$0xf8]   ;;  %v9870_v15 = vld [vmem:[%s12506_s1] sm:$0xff]   ;;  %v9871_v20 = vld [vmem:[%s10152_s24 + $0x118] sm:$0xff]   ;;  %1952 = vst.msk [vmem:[#allocation3 + $0xc0] sm:$0xff] %vm1927_vm4, %v10022_v1 }
  0x24   : > { %v797_v58 = vsel %vm471_vm1, %v794_v48, %v796_v54  ;;  %v798_v60 = vrot.slane %v9853_v56, 3  ;;  %v491_v2 = vrot.slane %v9854_v61, 3  ;;  %v800_v3 = vrot.slane %v9855_v62, 3  ;;  %v2342_v16 = vld [vmem:[%s12508_s3 + $0x4] sm:$0xf]  ;;  %v9859_v24 = vld [vmem:[%s10152_s24 + $0xcc] sm:$0xff]  }
  0x25   : > { %v490_v63 = vsel %vm471_vm1, %v487_v53, %v489_v59  ;;  %v1089_v9 = vrot.slane %v9856_v4, 3  ;;  %v1090_v10 = vrot.slane %v9857_v5, 3  ;;  %v1397_v12 = vrot.slane %v9868_v7, 3  ;;  %v9874_v26 = vld [vmem:[%s10152_s24 + $0x120] sm:$0xff]   ;;  %v9860_v30 = vld [vmem:[%s10152_s24 + $0xd4] sm:$0xff]   ;;  %v9876_v32 = vld [vmem:[%s10152_s24 + $0x128] sm:$0xff]  }
  0x26   : > { %8692 = vmatmul.mubr.msk.bf16.gmra.mrb[4].mxu0 %vm499_vm2, %v476_v19  ;;  %v799_v0 = vsel %vm471_vm1, %v796_v54, %v798_v60  ;;  %v492_v6 = vsel %vm471_vm1, %v489_v59, %v491_v2  ;;  %v801_v8 = vsel %vm471_vm1, %v798_v60, %v800_v3  ;;  %v1398_v14 = vrot.slane %v9869_v11, 3  ;;  %v9862_v36 = vld [vmem:[%s10152_s24 + $0xdc] sm:$0xff]   ;;  %v9878_v38 = vld [vmem:[%s10152_s24 + $0x130] sm:$0xff]   ;;  %1953 = vst.msk [vmem:[#allocation3 + $0xc8] sm:$0xff] %vm1927_vm4, %v10022_v1  ;;  %v9884_v56 = vld [vmem:[%s10152_s24 + $0x148] sm:$0xff]  }
  0x27   : > { %8695 = vmatprep.mubr.msk.bf16.mxu0 %vm10023_vm0, %v10022_v1  ;;  %v1091_v17 = vsel %vm471_vm1, %v1089_v9, %v1090_v10  ;;  %v1092_v18 = vrot.slane %v9858_v13, 3  ;;  %v1400_v22 = vrot.slane %v9871_v20, 3  ;;  %v1402_v28 = vrot.slane %v9874_v26, 3  ;;  %1954 = vst.msk [vmem:[#allocation3 + $0xd0] sm:$0xff] %vm1927_vm4, %v10022_v1  ;;  %1955 = vst.msk [vmem:[#allocation3 + $0xd8] sm:$0xff] %vm1927_vm4, %v10022_v1  ;;  %v9864_v48 = vld [vmem:[%s10152_s24 + $0xec] sm:$0xff]  }
  0x28   : > { %8738 = vmatmul.mubr.msk.bf16.gmra.mrb[4].mxu1 %vm499_vm2, %v785_v21  ;;  %v1399_v19 = vsel %vm471_vm1, %v1397_v12, %v1398_v14  ;;  %v2366_v21 = vsel %vm2364_vm3, %v2342_v16, 0  ;;  %v1404_v34 = vrot.slane %v9876_v32, 3  ;;  %v1406_v40 = vrot.slane %v9878_v38, 3  ;;  %1956 = vst.msk [vmem:[#allocation3 + $0xe0] sm:$0xff] %vm1927_vm4, %v10022_v1  ;;  %1957 = vst.msk [vmem:[#allocation3 + $0xe8] sm:$0xff] %vm1927_vm4, %v10022_v1  ;;  %v9865_v54 = vld [vmem:[%s10152_s24 + $0xf4] sm:$0xff]  }
  0x29   : > { %8741 = vmatprep.mubr.msk.bf16.mxu1 %vm10023_vm0, %v10022_v1  ;;  %v1093_v23 = vsel %vm471_vm1, %v1090_v10, %v1092_v18  ;;  %1958 = vst.msk [vmem:[#allocation3 + $0xf0] sm:$0xff] %vm1927_vm4, %v10022_v1  ;;  %1959 = vst.msk [vmem:[#allocation3 + $0xf8] sm:$0xff] %vm1927_vm4, %v10022_v1  ;;  %v1102_v51 = vrot.slane %v9864_v48, 3  ;;  %v9866_v60 = vld [vmem:[%s10152_s24 + $0xfc] sm:$0xff]   ;;  %v9886_v62 = vld [vmem:[%s10152_s24 + $0x150] sm:$0xff]  }
  0x2a   : > { %v1405_v37 = vsel %vm471_vm1, %v1402_v28, %v1404_v34  ;;  %v1407_v43 = vsel %vm471_vm1, %v1404_v34, %v1406_v40  ;;  %1960 = vst.msk [vmem:[#allocation3 + $0x100] sm:$0xff] %vm1927_vm4, %v10022_v1  ;;  %1961 = vst.msk [vmem:[#allocation3 + $0x108] sm:$0xff] %vm1927_vm4, %v10022_v1  ;;  %v9888_v5 = vld [vmem:[%s10152_s24 + $0x158] sm:$0x7f]   ;;  %v9872_v10 = vld [vmem:[%s10152_s24 + $0x15c] sm:$0xf8]  }
  0x2b   : > { %v1416_v7 = vrot.slane %v9888_v5, 3  ;;  %v9873_v11 = vld [vmem:[%s10152_s24 + $0x164] sm:$0xff]   ;;  %v1705_v12 = vrot.slane %v9872_v10, 3  ;;  %v2322_v16 = vld [vmem:[#allocation3 + $0x10] sm:$0xff]  ;;  %v9883_v34 = vld [vmem:[%s10152_s24 + $0x18c] sm:$0xff]  }
  0x2c   : > { %v1706_v13 = vrot.slane %v9873_v11, 3 }
  0x2e   : > { %8696 = vmatmul.mubr.msk.bf16.gmra.mrb[8].mxu0 %vm499_vm2, %v478_v25  ;;  %v1401_v25 = vsel %vm471_vm1, %v1398_v14, %v1400_v22  ;;  %v2591_v14 = vld [vmem:[%s12508_s3 + $0x8] sm:$0xf] }
  0x2f   : > { %8699 = vmatprep.mubr.msk.bf16.mxu0 %vm10023_vm0, %v10022_v1 }
  0x30   : > { %8742 = vmatmul.mubr.msk.bf16.gmra.mrb[8].mxu1 %vm499_vm2, %v787_v27  ;;  %v1094_v27 = vrot.slane %v9859_v24, 3  ;;  %v2320_v24 = vld [vmem:[%s12508_s3] sm:$0xf] }
  0x31   : > { %8745 = vmatprep.mubr.msk.bf16.mxu1 %vm10023_vm0, %v10022_v1 }
  0x32   : > { %v1095_v29 = vsel %vm471_vm1, %v1092_v18, %v1094_v27  ;;  %v9875_v18 = vld [vmem:[%s10152_s24 + $0x16c] sm:$0xff]  }
  0x36   : > { %8700 = vmatmul.mubr.msk.bf16.gmra.mrb[12].mxu0 %vm499_vm2, %v480_v31  ;;  %v1403_v31 = vsel %vm471_vm1, %v1400_v22, %v1402_v28  ;;  %v9879_v28 = vld [vmem:[%s10152_s24 + $0x17c] sm:$0xff]  }
  0x37   : > { %8703 = vmatprep.mubr.msk.bf16.mxu0 %vm10023_vm0, %v10022_v1 }
  0x38   : > { %8746 = vmatmul.mubr.msk.bf16.gmra.mrb[12].mxu1 %vm499_vm2, %v789_v33  ;;  %v1096_v33 = vrot.slane %v9860_v30, 3 }
  0x39   : > { %8749 = vmatprep.mubr.msk.bf16.mxu1 %vm10023_vm0, %v10022_v1 }
  0x3a   : > { %v1097_v35 = vsel %vm471_vm1, %v1094_v27, %v1096_v33 }
  0x3e   : > { %8704 = vmatmul.mubr.msk.bf16.gmra.mrb[16].mxu0 %vm499_vm2, %v482_v39  ;;  %v1098_v39 = vrot.slane %v9862_v36, 3  ;;  %v1716_v36 = vrot.slane %v9883_v34, 3  ;;  %v10529_v34 = vld [vmem:[%s10152_s24 + $0x1ac] sm:$0x7f]  }
  0x3f   : > { %8707 = vmatprep.mubr.msk.bf16.mxu0 %vm10023_vm0, %v10022_v1 }
  0x40   : > { %8750 = vmatmul.mubr.msk.bf16.gmra.mrb[16].mxu1 %vm499_vm2, %v791_v42  ;;  %v1099_v41 = vsel %vm471_vm1, %v1096_v33, %v1098_v39  ;;  %v9863_v42 = vld [vmem:[%s10152_s24 + $0xe4] sm:$0xff]  }
  0x41   : > { %8753 = vmatprep.mubr.msk.bf16.mxu1 %vm10023_vm0, %v10022_v1  ;;  %v1100_v45 = vrot.slane %v9863_v42, 3  ;;  %v9885_v42 = vld [vmem:[%s10152_s24 + $0x194] sm:$0xff]  }
  0x43   : > { %v1101_v47 = vsel %vm471_vm1, %v1098_v39, %v1100_v45  ;;  %v1103_v53 = vsel %vm471_vm1, %v1100_v45, %v1102_v51 }
  0x46   : > { %8708 = vmatmul.mubr.msk.bf16.gmra.mrb[20].mxu0 %vm499_vm2, %v484_v44  ;;  %v9880_v44 = vld [vmem:[%s10152_s24 + $0x138] sm:$0xff]  }
  0x47   : > { %8711 = vmatprep.mubr.msk.bf16.mxu0 %vm10023_vm0, %v10022_v1 }
  0x48   : > { %8754 = vmatmul.mubr.msk.bf16.gmra.mrb[20].mxu1 %vm499_vm2, %v793_v46  ;;  %v1408_v46 = vrot.slane %v9880_v44, 3 }
  0x49   : > { %8757 = vmatprep.mubr.msk.bf16.mxu1 %vm10023_vm0, %v10022_v1 }
  0x4a   : > { %v1409_v49 = vsel %vm471_vm1, %v1406_v40, %v1408_v46 }
  0x4e   : > { %8712 = vmatmul.mubr.msk.bf16.gmra.mrb[24].mxu0 %vm499_vm2, %v486_v50  ;;  %v9882_v50 = vld [vmem:[%s10152_s24 + $0x140] sm:$0xff]  }
  0x4f   : > { %8715 = vmatprep.mubr.msk.bf16.mxu0 %vm10023_vm0, %v10022_v1 }
  0x50   : > { %8758 = vmatmul.mubr.msk.bf16.gmra.mrb[24].mxu1 %vm499_vm2, %v795_v52  ;;  %v1410_v52 = vrot.slane %v9882_v50, 3 }
  0x51   : > { %8761 = vmatprep.mubr.msk.bf16.mxu1 %vm10023_vm0, %v10022_v1 }
  0x52   : > { %v1411_v55 = vsel %vm471_vm1, %v1408_v46, %v1410_v52 }
  0x56   : > { %8716 = vmatmul.mubr.msk.bf16.gmra.mrb[28].mxu0 %vm499_vm2, %v488_v57  ;;  %v1104_v57 = vrot.slane %v9865_v54, 3 }
  0x57   : > { %8719 = vmatprep.mubr.msk.bf16.mxu0 %vm10023_vm0, %v10022_v1 }
  0x58   : > { %8762 = vmatmul.mubr.msk.bf16.gmra.mrb[28].mxu1 %vm499_vm2, %v797_v58  ;;  %v1412_v58 = vrot.slane %v9884_v56, 3  ;;  %v1105_v59 = vsel %vm471_vm1, %v1102_v51, %v1104_v57 }
  0x59   : > { %8765 = vmatprep.mubr.msk.bf16.mxu1 %vm10023_vm0, %v10022_v1 }
  0x5a   : > { %v1413_v61 = vsel %vm471_vm1, %v1410_v52, %v1412_v58  ;;  %v1718_v52 = vrot.slane %v9885_v42, 3 }
  0x5e   : > { %8720 = vmatmul.mubr.msk.bf16.gmra.mrb[32].mxu0 %vm499_vm2, %v490_v63  ;;  %v1106_v63 = vrot.slane %v9866_v60, 3  ;;  %v1719_v60 = vsel %vm471_vm1, %v1716_v36, %v1718_v52 }
  0x5f   : > { %8723 = vmatprep.mubr.msk.bf16.mxu0 %vm10023_vm0, %v10022_v1 }
  0x60   : > { %8766 = vmatmul.mubr.msk.bf16.gmra.mrb[32].mxu1 %vm499_vm2, %v799_v0  ;;  %v1414_v0 = vrot.slane %v9886_v62, 3 }
  0x61   : > { %8769 = vmatprep.mubr.msk.bf16.mxu1 %vm10023_vm0, %v10022_v1 }
  0x62   : > { %v1415_v4 = vsel %vm471_vm1, %v1412_v58, %v1414_v0  ;;  %v1417_v9 = vsel %vm471_vm1, %v1414_v0, %v1416_v7 }
  0x66   : > { %8724 = vmatmul.mubr.msk.bf16.gmra.mrb[36].mxu0 %vm499_vm2, %v492_v6 }
  0x67   : > { %8727 = vmatprep.mubr.msk.bf16.mxu0 %vm10023_vm0, %v10022_v1 }
  0x68   : > { %8770 = vmatmul.mubr.msk.bf16.gmra.mrb[36].mxu1 %vm499_vm2, %v801_v8 }
  0x69   : > { %8773 = vmatprep.mubr.msk.bf16.mxu1 %vm10023_vm0, %v10022_v1 }
  0x6e   : > { %8728 = vmatmul.mubr.msk.bf16.gmra.mrb[40].mxu0 %vm499_vm2, %v491_v2  ;;  %v1107_v2 = vsel %vm471_vm1, %v1104_v57, %v1106_v63 }
  0x6f   : > { %8779 = vmatprep.mubr.msk.bf16.mxu0 %vm10023_vm0, %v10022_v1 }
  0x70   : > { %8774 = vmatmul.mubr.msk.bf16.gmra.mrb[40].mxu1 %vm499_vm2, %v800_v3  ;;  %v9867_v3 = vld [vmem:[%s10152_s24 + $0x104] sm:$0x7f]  }
  0x71   : > { %8825 = vmatprep.mubr.msk.bf16.mxu1 %vm10023_vm0, %v10022_v1  ;;  %v1108_v6 = vrot.slane %v9867_v3, 3 }
  0x73   : > { %v1109_v8 = vsel %vm471_vm1, %v1106_v63, %v1108_v6 }
  0x76   : > { %8780 = vmatmul.mubr.msk.bf16.vlgmr.msra.gmra.mrb[44].mxu0 %vm499_vm2, %v1091_v17  ;;  %v1707_v17 = vsel %vm471_vm1, %v1705_v12, %v1706_v13 }
  0x77   : > { %8783 = vmatprep.mubr.msk.bf16.mxu0 %vm10023_vm0, %v10022_v1  ;;  %8870 = vmatpush3.bf16.msra.mxu0 %v9870_v15  ;;  %v2321_v15 = vld [vmem:[#allocation3 + $0x8] sm:$0xff] }
  0x78   : > { %8975 = vmatprep.subr.bf16.mxu0 %v10022_v1  ;;  %8826 = vmatmul.mubr.msk.bf16.vlgmr.msra.gmra.mrb[44].mxu1 %vm499_vm2, %v1399_v19  ;;  %v2614_v19 = vsel %vm2364_vm3, %v2591_v14, 0  ;;  %v2335_v20 = vpack.c.bf16 %v2322_v16, %v2321_v15 }
  0x79   : > { %8829 = vmatprep.mubr.msk.bf16.mxu1 %vm10023_vm0, %v10022_v1  ;;  %8916 = vmatpush3.bf16.msra.mxu1 %v2366_v21  ;;  %v1708_v21 = vrot.slane %v9875_v18, 3 }
  0x7a   : > { %8945 = vmatprep.subr.bf16.mxu1 %v10022_v1 }
  0x7b   : > { %v1709_v22 = vsel %vm471_vm1, %v1706_v13, %v1708_v21 }
  0x7e   : > { %8784 = vmatmul.mubr.msk.bf16.gmra.mrb[48].mxu0 %vm499_vm2, %v1093_v23  ;;  %v9877_v23 = vld [vmem:[%s10152_s24 + $0x174] sm:$0xff]  }
  0x7f   : > { %8787 = vmatprep.mubr.msk.bf16.mxu0 %vm10023_vm0, %v10022_v1  ;;  %v1710_v26 = vrot.slane %v9877_v23, 3 }
  0x80   : > { %8830 = vmatmul.mubr.msk.bf16.gmra.mrb[48].mxu1 %vm499_vm2, %v1401_v25  ;;  %v2479_v25 = vsel %vm2364_vm3, %v2320_v24, 0 }
  0x81   : > { %8833 = vmatprep.mubr.msk.bf16.mxu1 %vm10023_vm0, %v10022_v1  ;;  %v1711_v27 = vsel %vm471_vm1, %v1708_v21, %v1710_v26 }
  0x86   : > { %8788 = vmatmul.mubr.msk.bf16.gmra.mrb[52].mxu0 %vm499_vm2, %v1095_v29  ;;  %v1712_v29 = vrot.slane %v9879_v28, 3 }
  0x87   : > { %8791 = vmatprep.mubr.msk.bf16.mxu0 %vm10023_vm0, %v10022_v1 }
  0x88   : > { %8834 = vmatmul.mubr.msk.bf16.gmra.mrb[52].mxu1 %vm499_vm2, %v1403_v31  ;;  %v1713_v30 = vsel %vm471_vm1, %v1710_v26, %v1712_v29  ;;  %v9881_v31 = vld [vmem:[%s10152_s24 + $0x184] sm:$0xff]  }
  0x89   : > { %8837 = vmatprep.mubr.msk.bf16.mxu1 %vm10023_vm0, %v10022_v1  ;;  %v1714_v32 = vrot.slane %v9881_v31, 3 }
  0x8b   : > { %v1715_v33 = vsel %vm471_vm1, %v1712_v29, %v1714_v32 }
  0x8e   : > { %8792 = vmatmul.mubr.msk.bf16.gmra.mrb[56].mxu0 %vm499_vm2, %v1097_v35  ;;  %v10496_v35 = vld [vmem:[%s12507_s2] ss:$0 sm:$0xff] }
  0x8f   : > { %8795 = vmatprep.mubr.msk.bf16.mxu0 %vm10023_vm0, %v10022_v1 }
  0x90   : > { %8838 = vmatmul.mubr.msk.bf16.gmra.mrb[56].mxu1 %vm499_vm2, %v1405_v37 }
  0x91   : > { %8841 = vmatprep.mubr.msk.bf16.mxu1 %vm10023_vm0, %v10022_v1 }
  0x96   : > { %8796 = vmatmul.mubr.msk.bf16.gmra.mrb[60].mxu0 %vm499_vm2, %v1099_v41  ;;  %v1717_v41 = vsel %vm471_vm1, %v1714_v32, %v1716_v36 }
  0x97   : > { %8799 = vmatprep.mubr.msk.bf16.mxu0 %vm10023_vm0, %v10022_v1 }
  0x98   : > { %8842 = vmatmul.mubr.msk.bf16.gmra.mrb[60].mxu1 %vm499_vm2, %v1407_v43 }
  0x99   : > { %8845 = vmatprep.mubr.msk.bf16.mxu1 %vm10023_vm0, %v10022_v1 }
  0x9e   : > { %8800 = vmatmul.mubr.msk.bf16.gmra.mrb[64].mxu0 %vm499_vm2, %v1101_v47 }
  0x9f   : > { %8803 = vmatprep.mubr.msk.bf16.mxu0 %vm10023_vm0, %v10022_v1 }
  0xa0   : > { %8846 = vmatmul.mubr.msk.bf16.gmra.mrb[64].mxu1 %vm499_vm2, %v1409_v49 }
  0xa1   : > { %8849 = vmatprep.mubr.msk.bf16.mxu1 %vm10023_vm0, %v10022_v1 }
  0xa6   : > { %8804 = vmatmul.mubr.msk.bf16.gmra.mrb[68].mxu0 %vm499_vm2, %v1103_v53 }
  0xa7   : > { %8807 = vmatprep.mubr.msk.bf16.mxu0 %vm10023_vm0, %v10022_v1 }
  0xa8   : > { %8850 = vmatmul.mubr.msk.bf16.gmra.mrb[68].mxu1 %vm499_vm2, %v1411_v55 }
  0xa9   : > { %8853 = vmatprep.mubr.msk.bf16.mxu1 %vm10023_vm0, %v10022_v1 }
  0xae   : > { %8808 = vmatmul.mubr.msk.bf16.gmra.mrb[72].mxu0 %vm499_vm2, %v1105_v59 }
  0xaf   : > { %8811 = vmatprep.mubr.msk.bf16.mxu0 %vm10023_vm0, %v10022_v1 }
  0xb0   : > { %8854 = vmatmul.mubr.msk.bf16.gmra.mrb[72].mxu1 %vm499_vm2, %v1413_v61  ;;  %v9887_v61 = vld [vmem:[%s10152_s24 + $0x19c] sm:$0xff]  }
  0xb1   : > { %8857 = vmatprep.mubr.msk.bf16.mxu1 %vm10023_vm0, %v10022_v1  ;;  %v1720_v10 = vrot.slane %v9887_v61, 3 }
  0xb3   : > { %v1721_v16 = vsel %vm471_vm1, %v1718_v52, %v1720_v10 }
  0xb6   : > { %8812 = vmatmul.mubr.msk.bf16.gmra.mrb[76].mxu0 %vm499_vm2, %v1107_v2 }
  0xb7   : > { %8815 = vmatprep.mubr.msk.bf16.mxu0 %vm10023_vm0, %v10022_v1 }
  0xb8   : > { %8858 = vmatmul.mubr.msk.bf16.gmra.mrb[76].mxu1 %vm499_vm2, %v1415_v4 }
  0xb9   : > { %8861 = vmatprep.mubr.msk.bf16.mxu1 %vm10023_vm0, %v10022_v1 }
  0xbe   : > { %8816 = vmatmul.mubr.msk.bf16.gmra.mrb[80].mxu0 %vm499_vm2, %v1109_v8 }
  0xbf   : > { %8819 = vmatprep.mubr.msk.bf16.mxu0 %vm10023_vm0, %v10022_v1 }
  0xc0   : > { %8862 = vmatmul.mubr.msk.bf16.gmra.mrb[80].mxu1 %vm499_vm2, %v1417_v9 }
  0xc1   : > { %8865 = vmatprep.mubr.msk.bf16.mxu1 %vm10023_vm0, %v10022_v1 }
  0xc6   : > { %8820 = vmatmul.mubr.msk.bf16.gmra.mrb[84].mxu0 %vm499_vm2, %v1108_v6 }
  0xc7   : > { %8871 = vmatprep.mubr.msk.bf16.mxu0 %vm10023_vm0, %v10022_v1 }
  0xc8   : > { %8866 = vmatmul.mubr.msk.bf16.gmra.mrb[84].mxu1 %vm499_vm2, %v1416_v7 }
  0xc9   : > { %8917 = vmatprep.mubr.msk.bf16.mxu1 %vm10023_vm0, %v10022_v1 }
  0xce   : > { %8872 = vmatmul.mubr.msk.bf16.vlgmr.msra.gmra.mrb[88].mxu0 %vm499_vm2, %v1707_v17  ;;  %v9889_v17 = vld [vmem:[%s10152_s24 + $0x1a4] sm:$0xff]   ;;  %s9964_s24 = scalar_lea.vmem %s9963_s29, 32 }
  0xcf   : > { %8875 = vmatprep.mubr.msk.bf16.mxu0 %vm10023_vm0, %v10022_v1  ;;  %8976 = vmatpush3.bf16.msra.mxu0 %v2614_v19  ;;  %p9966_p1 = scmp.lt.s32.totalorder %s9964_s24, %s9958_s21 }
  0xd0   : > { %9035 = vmatprep.subr.bf16.mxu0 %v10022_v1  ;;  %8918 = vmatmul.mubr.msk.bf16.vlgmr.msra.gmra.mrb[88].mxu1 %vm1927_vm4, %v2335_v20 }
  0xd1   : > { %8921 = vmatprep.mubr.msk.bf16.mxu1 %vm10023_vm0, %v10022_v1  ;;  %8946 = vmatpush3.bf16.msra.mxu1 %v2479_v25  ;;  %p9967_p2 = por %p9966_p1, %p9965_p0 }
  0xd2   : > { %9005 = vmatprep.subr.bf16.mxu1 %v10022_v1 }
  0xd3   : > { %p9968_p3 = pnand %p9967_p2, %p9961_p13 }
  0xd6   : > { %8876 = vmatmul.mubr.msk.bf16.gmra.mrb[92].mxu0 %vm499_vm2, %v1709_v22 }
  0xd7   : > { %8879 = vmatprep.mubr.msk.bf16.mxu0 %vm10023_vm0, %v10022_v1 }
  0xde   : > { %8880 = vmatmul.mubr.msk.bf16.gmra.mrb[96].mxu0 %vm499_vm2, %v1711_v27  ;;  %v1722_v27 = vrot.slane %v9889_v17, 3 }
  0xdf   : > { %8883 = vmatprep.mubr.msk.bf16.mxu0 %vm10023_vm0, %v10022_v1 }
  0xe6   : > { %8884 = vmatmul.mubr.msk.bf16.gmra.mrb[100].mxu0 %vm499_vm2, %v1713_v30 }
  0xe7   : > { %8887 = vmatprep.mubr.msk.bf16.mxu0 %vm10023_vm0, %v10022_v1 }
  0xee   : > { %8888 = vmatmul.mubr.msk.bf16.gmra.mrb[104].mxu0 %vm499_vm2, %v1715_v33 }
  0xef   : > { %8891 = vmatprep.mubr.msk.bf16.mxu0 %vm10023_vm0, %v10022_v1 }
  0xf1   : > { %v567_v37 = vpop.f32.mrb[0].mxu0 }
  0xf2   : > { %v568_v38 = vadd.f32 %v10496_v35, %v567_v37  ;;  %v8689_v39 = vpop.f32.mrb[1].mxu0  ;;  %v1723_v37 = vsel %vm471_vm1, %v1720_v10, %v1722_v27 }
  0xf3   : > { %v570_v40 = vpop.f32.mrb[2].mxu0  ;;  %v875_v46 = vpop.f32.mrb[0].mxu1 }
  0xf4   : > { %v653_v43 = vmax.f32 %v568_v38, 0.0  ;;  %v571_v44 = vadd.f32 %v10496_v35, %v570_v40  ;;  %v8690_v45 = vpop.f32.mrb[3].mxu0  ;;  %v876_v47 = vadd.f32 %v10496_v35, %v875_v46  ;;  %v8735_v48 = vpop.f32.mrb[1].mxu1 }
  0xf5   : > { %v878_v50 = vpop.f32.mrb[2].mxu1  ;;  %v1724_v48 = vrot.slane %v10529_v34, 3 }
  0xf6   : > { %674 = vst [vmem:[#allocation2] sm:$0xff] %v653_v43  ;;  %v654_v49 = vmax.f32 %v571_v44, 0.0  ;;  %8892 = vmatmul.mubr.msk.bf16.gmra.mrb[108].mxu0 %vm499_vm2, %v1717_v41  ;;  %v961_v51 = vmax.f32 %v876_v47, 0.0  ;;  %v879_v53 = vadd.f32 %v10496_v35, %v878_v50  ;;  %v8736_v54 = vpop.f32.mrb[3].mxu1 }
  0xf7   : > { %8895 = vmatprep.mubr.msk.bf16.mxu0 %vm10023_vm0, %v10022_v1 }
  0xf8   : > { %675 = vst [vmem:[#allocation2 + $0x8] sm:$0xff] %v654_v49  ;;  %982 = vst [vmem:[#allocation2 + $0xa8] sm:$0xff] %v961_v51  ;;  %v962_v56 = vmax.f32 %v879_v53, 0.0 }
  0xf9   : > { %v575_v55 = vpop.f32.mrb[4].mxu0 }
  0xfa   : > { %v576_v57 = vadd.f32 %v10496_v35, %v575_v55  ;;  %v8693_v58 = vpop.f32.mrb[5].mxu0  ;;  %983 = vst [vmem:[#allocation2 + $0xb0] sm:$0xff] %v962_v56 }
  0xfb   : > { %v578_v59 = vpop.f32.mrb[6].mxu0  ;;  %v883_v2 = vpop.f32.mrb[4].mxu1 }
  0xfc   : > { %v655_v62 = vmax.f32 %v576_v57, 0.0  ;;  %v579_v63 = vadd.f32 %v10496_v35, %v578_v59  ;;  %v8694_v0 = vpop.f32.mrb[7].mxu0  ;;  %v884_v3 = vadd.f32 %v10496_v35, %v883_v2  ;;  %v8739_v4 = vpop.f32.mrb[5].mxu1 }
  0xfd   : > { %v886_v6 = vpop.f32.mrb[6].mxu1 }
  0xfe   : > { %676 = vst [vmem:[#allocation2 + $0x10] sm:$0xff] %v655_v62  ;;  %v656_v5 = vmax.f32 %v579_v63, 0.0  ;;  %8896 = vmatmul.mubr.msk.bf16.gmra.mrb[112].mxu0 %vm499_vm2, %v1719_v60  ;;  %v963_v7 = vmax.f32 %v884_v3, 0.0  ;;  %v887_v8 = vadd.f32 %v10496_v35, %v886_v6  ;;  %v8740_v9 = vpop.f32.mrb[7].mxu1  ;;  %v1725_v62 = vsel %vm471_vm1, %v1722_v27, %v1724_v48 }
  0xff   : > { %8899 = vmatprep.mubr.msk.bf16.mxu0 %vm10023_vm0, %v10022_v1  ;;  %v1963_v45 = vld [vmem:[#allocation2 + $0x1] ss:$2 sm:$0xff] }
 0x100   : > { %677 = vst [vmem:[#allocation2 + $0x18] sm:$0xff] %v656_v5  ;;  %984 = vst [vmem:[#allocation2 + $0xb8] sm:$0xff] %v963_v7  ;;  %v964_v12 = vmax.f32 %v887_v8, 0.0 }
 0x101   : > { %v583_v11 = vpop.f32.mrb[8].mxu0 }
 0x102   : > { %v584_v13 = vadd.f32 %v10496_v35, %v583_v11  ;;  %v8697_v14 = vpop.f32.mrb[9].mxu0  ;;  %985 = vst [vmem:[#allocation2 + $0xc0] sm:$0xff] %v964_v12 }
 0x103   : > { %v586_v15 = vpop.f32.mrb[10].mxu0  ;;  %v891_v21 = vpop.f32.mrb[8].mxu1 }
 0x104   : > { %v657_v18 = vmax.f32 %v584_v13, 0.0  ;;  %v587_v19 = vadd.f32 %v10496_v35, %v586_v15  ;;  %v8698_v20 = vpop.f32.mrb[11].mxu0  ;;  %v892_v22 = vadd.f32 %v10496_v35, %v891_v21  ;;  %v8743_v23 = vpop.f32.mrb[9].mxu1 }
 0x105   : > { %v894_v25 = vpop.f32.mrb[10].mxu1  ;;  %v1967_v42 = vld [vmem:[#allocation2 + $0x2] ss:$2 sm:$0xff] }
 0x106   : > { %678 = vst [vmem:[#allocation2 + $0x20] sm:$0xff] %v657_v18  ;;  %v658_v24 = vmax.f32 %v587_v19, 0.0  ;;  %8900 = vmatmul.mubr.msk.bf16.gmra.mrb[116].mxu0 %vm499_vm2, %v1721_v16  ;;  %v895_v26 = vadd.f32 %v10496_v35, %v894_v25  ;;  %v965_v28 = vmax.f32 %v892_v22, 0.0  ;;  %v8744_v29 = vpop.f32.mrb[11].mxu1  ;;  %v1970_v54 = vmax.f32 %v1963_v45, %v1967_v42  ;;  %v2570_v45 = vld [vmem:[#allocation3 + $0x9] sm:$0xff] }
 0x107   : > { %8903 = vmatprep.mubr.msk.bf16.mxu0 %vm10023_vm0, %v10022_v1  ;;  %v1965_v63 = vld [vmem:[#allocation2 + $0x11] ss:$2 sm:$0x3f]  ;;  %v1969_v5 = vld [vmem:[#allocation2 + $0x12] ss:$2 sm:$0x3f] }
 0x108   : > { %679 = vst [vmem:[#allocation2 + $0x28] sm:$0xff] %v658_v24  ;;  %v966_v30 = vmax.f32 %v895_v26, 0.0  ;;  %986 = vst [vmem:[#allocation2 + $0xc8] sm:$0xff] %v965_v28  ;;  %v1971_v13 = vmax.f32 %v1965_v63, %v1969_v5 }
 0x109   : > { %v591_v31 = vpop.f32.mrb[12].mxu0  ;;  %v2036_v14 = vld [vmem:[#allocation2 + $0xb5] ss:$2 sm:$0xff]  ;;  %v2040_v15 = vld [vmem:[#allocation2 + $0xb6] ss:$2 sm:$0xff] }
 0x10a   : > { %v592_v32 = vadd.f32 %v10496_v35, %v591_v31  ;;  %v8701_v33 = vpop.f32.mrb[13].mxu0  ;;  %987 = vst [vmem:[#allocation2 + $0xd0] sm:$0xff] %v966_v30  ;;  %v2043_v26 = vmax.f32 %v2036_v14, %v2040_v15 }
 0x10b   : > { %v594_v36 = vpop.f32.mrb[14].mxu0  ;;  %v899_v39 = vpop.f32.mrb[12].mxu1 }
 0x10c   : > { %v659_v38 = vmax.f32 %v592_v32, 0.0  ;;  %v595_v40 = vadd.f32 %v10496_v35, %v594_v36  ;;  %v8702_v41 = vpop.f32.mrb[15].mxu0  ;;  %v900_v43 = vadd.f32 %v10496_v35, %v899_v39  ;;  %v8747_v44 = vpop.f32.mrb[13].mxu1 }
 0x10d   : > { %v902_v47 = vpop.f32.mrb[14].mxu1 }
 0x10e   : > { %680 = vst [vmem:[#allocation2 + $0x30] sm:$0xff] %v659_v38  ;;  %v660_v46 = vmax.f32 %v595_v40, 0.0  ;;  %8904 = vmatmul.mubr.msk.bf16.gmra.mrb[120].mxu0 %vm499_vm2, %v1723_v37  ;;  %v967_v51 = vmax.f32 %v900_v43, 0.0  ;;  %v903_v52 = vadd.f32 %v10496_v35, %v902_v47  ;;  %v8748_v53 = vpop.f32.mrb[15].mxu1 }
 0x10f   : > { %v1973_v49 = vld [vmem:[#allocation2 + $0x1f] ss:$2 sm:$0xff]  ;;  %v1977_v50 = vld [vmem:[#allocation2 + $0x20] ss:$2 sm:$0xff]  ;;  %8907 = vmatprep.mubr.msk.bf16.mxu0 %vm10023_vm0, %v10022_v1  ;;  %v2889_v53 = vld [vmem:[%s12508_s3 + $0x10] sm:$0xf] }
 0x110   : > { %v1980_v55 = vmax.f32 %v1973_v49, %v1977_v50  ;;  %681 = vst [vmem:[#allocation2 + $0x38] sm:$0xff] %v660_v46  ;;  %988 = vst [vmem:[#allocation2 + $0xd8] sm:$0xff] %v967_v51  ;;  %v968_v56 = vmax.f32 %v903_v52, 0.0  ;;  %v2038_v29 = vld [vmem:[#allocation2 + $0xc5] ss:$2 sm:$0x3f] }
 0x111   : > { %v599_v57 = vpop.f32.mrb[16].mxu0  ;;  %v2042_v36 = vld [vmem:[#allocation2 + $0xc6] ss:$2 sm:$0x3f]  ;;  %v2571_v46 = vld [vmem:[#allocation3 + $0x11] sm:$0xff] }
 0x112   : > { %v1982_v58 = vmax.f32 %v1970_v54, %v1980_v55  ;;  %v600_v59 = vadd.f32 %v10496_v35, %v599_v57  ;;  %v8705_v60 = vpop.f32.mrb[17].mxu0  ;;  %989 = vst [vmem:[#allocation2 + $0xe0] sm:$0xff] %v968_v56  ;;  %v2044_v47 = vmax.f32 %v2038_v29, %v2042_v36  ;;  %v2584_v52 = vpack.c.bf16 %v2571_v46, %v2570_v45 }
 0x113   : > { %v602_v61 = vpop.f32.mrb[18].mxu0  ;;  %v907_v2 = vpop.f32.mrb[16].mxu1 }
 0x114   : > { %v661_v0 = vmax.f32 %v600_v59, 0.0  ;;  %v603_v3 = vadd.f32 %v10496_v35, %v602_v61  ;;  %v8706_v4 = vpop.f32.mrb[19].mxu0  ;;  %1984 = vst.msk [vmem:[#allocation3 + $0x19] sm:$0xff] %vm1927_vm4, %v1982_v58  ;;  %v908_v6 = vadd.f32 %v10496_v35, %v907_v2  ;;  %v8751_v7 = vpop.f32.mrb[17].mxu1 }
 0x115   : > { %v910_v9 = vpop.f32.mrb[18].mxu1  ;;  %v2912_v4 = vsel %vm2364_vm3, %v2889_v53, 0 }
 0x116   : > { %682 = vst [vmem:[#allocation2 + $0x40] sm:$0xff] %v661_v0  ;;  %v662_v8 = vmax.f32 %v603_v3, 0.0  ;;  %8908 = vmatmul.mubr.msk.bf16.gmra.mrb[124].mxu0 %vm499_vm2, %v1725_v62  ;;  %v911_v12 = vadd.f32 %v10496_v35, %v910_v9  ;;  %v969_v17 = vmax.f32 %v908_v6, 0.0  ;;  %v8752_v18 = vpop.f32.mrb[19].mxu1 }
 0x117   : > { %v1975_v10 = vld [vmem:[#allocation2 + $0x2f] ss:$2 sm:$0x3f]  ;;  %v1979_v11 = vld [vmem:[#allocation2 + $0x30] ss:$2 sm:$0x3f]  ;;  %8911 = vmatprep.mubr.msk.bf16.mxu0 %vm10023_vm0, %v10022_v1 }
 0x118   : > { %v1981_v16 = vmax.f32 %v1975_v10, %v1979_v11  ;;  %683 = vst [vmem:[#allocation2 + $0x48] sm:$0xff] %v662_v8  ;;  %v970_v20 = vmax.f32 %v911_v12, 0.0  ;;  %990 = vst [vmem:[#allocation2 + $0xe8] sm:$0xff] %v969_v17 }
 0x119   : > { %v607_v19 = vpop.f32.mrb[20].mxu0  ;;  %v2046_v22 = vld [vmem:[#allocation2 + $0xd3] ss:$2 sm:$0xff]  ;;  %v2050_v23 = vld [vmem:[#allocation2 + $0xd4] ss:$2 sm:$0xff] }
 0x11a   : > { %v1983_v21 = vmax.f32 %v1971_v13, %v1981_v16  ;;  %v608_v24 = vadd.f32 %v10496_v35, %v607_v19  ;;  %v8709_v25 = vpop.f32.mrb[21].mxu0  ;;  %v2053_v27 = vmax.f32 %v2046_v22, %v2050_v23  ;;  %991 = vst [vmem:[#allocation2 + $0xf0] sm:$0xff] %v970_v20 }
 0x11b   : > { %v610_v28 = vpop.f32.mrb[22].mxu0  ;;  %v915_v33 = vpop.f32.mrb[20].mxu1  ;;  %v2323_v56 = vld [vmem:[#allocation3 + $0x18] sm:$0xff] }
 0x11c   : > { %v663_v30 = vmax.f32 %v608_v24, 0.0  ;;  %v611_v31 = vadd.f32 %v10496_v35, %v610_v28  ;;  %v8710_v32 = vpop.f32.mrb[23].mxu0  ;;  %1986 = vst.msk [vmem:[#allocation3 + $0x21] sm:$0x3f] %vm1985_vm5, %v1983_v21  ;;  %v2055_v37 = vmax.f32 %v2043_v26, %v2053_v27  ;;  %v916_v38 = vadd.f32 %v10496_v35, %v915_v33  ;;  %v8755_v39 = vpop.f32.mrb[21].mxu1  ;;  %v2572_v16 = vld [vmem:[#allocation3 + $0x19] sm:$0xff] }
 0x11d   : > { %v918_v41 = vpop.f32.mrb[22].mxu1 }
 0x11e   : > { %684 = vst [vmem:[#allocation2 + $0x50] sm:$0xff] %v663_v30  ;;  %v664_v40 = vmax.f32 %v611_v31, 0.0  ;;  %8912 = vmatmul.mubr.msk.bf16.gmra.mrb[128].mxu0 %vm499_vm2, %v1724_v48  ;;  %2057 = vst.msk [vmem:[#allocation3 + $0x49] sm:$0xff] %vm1927_vm4, %v2055_v37  ;;  %v971_v42 = vmax.f32 %v916_v38, 0.0  ;;  %v919_v43 = vadd.f32 %v10496_v35, %v918_v41  ;;  %v8756_v44 = vpop.f32.mrb[23].mxu1 }
 0x11f   : > { %8977 = vmatprep.mubr.msk.bf16.mxu0 %vm10023_vm0, %v10022_v1  ;;  %v2048_v49 = vld [vmem:[#allocation2 + $0xe3] ss:$2 sm:$0x3f]  ;;  %v2052_v50 = vld [vmem:[#allocation2 + $0xe4] ss:$2 sm:$0x3f] }
 0x120   : > { %685 = vst [vmem:[#allocation2 + $0x58] sm:$0xff] %v664_v40  ;;  %992 = vst [vmem:[#allocation2 + $0xf8] sm:$0xff] %v971_v42  ;;  %v2054_v34 = vmax.f32 %v2048_v49, %v2052_v50  ;;  %v972_v48 = vmax.f32 %v919_v43, 0.0  ;;  %v1988_v24 = vld [vmem:[#allocation2 + $0x3d] ss:$2 sm:$0xff] }
 0x121   : > { %v615_v51 = vpop.f32.mrb[24].mxu0  ;;  %v1992_v25 = vld [vmem:[#allocation2 + $0x3e] ss:$2 sm:$0xff] }
 0x122   : > { %v616_v54 = vadd.f32 %v10496_v35, %v615_v51  ;;  %v8713_v55 = vpop.f32.mrb[25].mxu0  ;;  %v2056_v58 = vmax.f32 %v2044_v47, %v2054_v34  ;;  %993 = vst [vmem:[#allocation2 + $0x100] sm:$0xff] %v972_v48  ;;  %v1995_v33 = vmax.f32 %v1988_v24, %v1992_v25 }
 0x123   : > { %v2324_v57 = vld [vmem:[#allocation3 + $0x20] sm:$0xff]  ;;  %v618_v59 = vpop.f32.mrb[26].mxu0  ;;  %v923_v60 = vpop.f32.mrb[24].mxu1 }
 0x124   : > { %v10565_v61 = vpack.c.bf16 %v2324_v57, %v2323_v56  ;;  %v665_v62 = vmax.f32 %v616_v54, 0.0  ;;  %v619_v63 = vadd.f32 %v10496_v35, %v618_v59  ;;  %v8714_v0 = vpop.f32.mrb[27].mxu0  ;;  %v924_v2 = vadd.f32 %v10496_v35, %v923_v60  ;;  %v8759_v3 = vpop.f32.mrb[25].mxu1  ;;  %2058 = vst.msk [vmem:[#allocation3 + $0x51] sm:$0x3f] %vm1985_vm5, %v2056_v58  ;;  %v2573_v12 = vld [vmem:[#allocation3 + $0x21] sm:$0xff] }
 0x125   : > { %v926_v5 = vpop.f32.mrb[26].mxu1  ;;  %v2585_v21 = vpack.c.bf16 %v2573_v12, %v2572_v16  ;;  %v1990_v39 = vld [vmem:[#allocation2 + $0x4d] ss:$2 sm:$0x3f] }
 0x126   : > { %8922 = vmatmul.mubr.msk.bf16.gmra.mrb[92].mxu1 %vm1927_vm4, %v10565_v61  ;;  %8978 = vmatmul.mubr.msk.bf16.vlgmr.msra.gmra.mrb[132].mxu0 %vm1927_vm4, %v2584_v52  ;;  %686 = vst [vmem:[#allocation2 + $0x60] sm:$0xff] %v665_v62  ;;  %v666_v6 = vmax.f32 %v619_v63, 0.0  ;;  %v973_v7 = vmax.f32 %v924_v2, 0.0  ;;  %v927_v8 = vadd.f32 %v10496_v35, %v926_v5  ;;  %v8760_v9 = vpop.f32.mrb[27].mxu1 }
 0x127   : > { %8981 = vmatprep.mubr.msk.bf16.mxu0 %vm10023_vm0, %v10022_v1  ;;  %8925 = vmatprep.mubr.msk.bf16.mxu1 %vm10023_vm0, %v10022_v1  ;;  %v1994_v40 = vld [vmem:[#allocation2 + $0x4e] ss:$2 sm:$0x3f]  ;;  %v2060_v44 = vld [vmem:[#allocation2 + $0xf1] ss:$2 sm:$0xff] }
 0x128   : > { %9036 = vmatpush3.bf16.msra.mxu0 %v2912_v4  ;;  %687 = vst [vmem:[#allocation2 + $0x68] sm:$0xff] %v666_v6  ;;  %994 = vst [vmem:[#allocation2 + $0x108] sm:$0xff] %v973_v7  ;;  %v974_v10 = vmax.f32 %v927_v8, 0.0  ;;  %v1996_v48 = vmax.f32 %v1990_v39, %v1994_v40 }
 0x129   : > { %v623_v11 = vpop.f32.mrb[28].mxu0  ;;  %9095 = vmatprep.subr.bf16.mxu0 %v10022_v1  ;;  %v2064_v45 = vld [vmem:[#allocation2 + $0xf2] ss:$2 sm:$0xff] }
 0x12a   : > { %v624_v13 = vadd.f32 %v10496_v35, %v623_v11  ;;  %v8717_v14 = vpop.f32.mrb[29].mxu0  ;;  %995 = vst [vmem:[#allocation2 + $0x110] sm:$0xff] %v974_v10  ;;  %v2067_v56 = vmax.f32 %v2060_v44, %v2064_v45 }
 0x12b   : > { %v626_v15 = vpop.f32.mrb[30].mxu0  ;;  %v931_v18 = vpop.f32.mrb[28].mxu1 }
 0x12c   : > { %v667_v17 = vmax.f32 %v624_v13, 0.0  ;;  %v627_v19 = vadd.f32 %v10496_v35, %v626_v15  ;;  %v8718_v20 = vpop.f32.mrb[31].mxu0  ;;  %v932_v22 = vadd.f32 %v10496_v35, %v931_v18  ;;  %v8763_v23 = vpop.f32.mrb[29].mxu1 }
 0x12d   : > { %v934_v27 = vpop.f32.mrb[30].mxu1 }
 0x12e   : > { %688 = vst [vmem:[#allocation2 + $0x70] sm:$0xff] %v667_v17  ;;  %v668_v26 = vmax.f32 %v627_v19, 0.0  ;;  %8982 = vmatmul.mubr.msk.bf16.gmra.mrb[136].mxu0 %vm1927_vm4, %v2585_v21  ;;  %v975_v28 = vmax.f32 %v932_v22, 0.0  ;;  %v935_v29 = vadd.f32 %v10496_v35, %v934_v27  ;;  %v8764_v30 = vpop.f32.mrb[31].mxu1 }
 0x12f   : > { %8985 = vmatprep.mubr.msk.bf16.mxu0 %vm10023_vm0, %v10022_v1  ;;  %v1998_v31 = vld [vmem:[#allocation2 + $0x5b] ss:$2 sm:$0xff]  ;;  %v2002_v32 = vld [vmem:[#allocation2 + $0x5c] ss:$2 sm:$0xff] }
 0x130   : > { %689 = vst [vmem:[#allocation2 + $0x78] sm:$0xff] %v668_v26  ;;  %v2005_v36 = vmax.f32 %v1998_v31, %v2002_v32  ;;  %996 = vst [vmem:[#allocation2 + $0x118] sm:$0xff] %v975_v28  ;;  %v976_v37 = vmax.f32 %v935_v29, 0.0  ;;  %v2062_v8 = vld [vmem:[#allocation2 + $0x101] ss:$2 sm:$0x3f] }
 0x131   : > { %v631_v38 = vpop.f32.mrb[32].mxu0  ;;  %v2066_v11 = vld [vmem:[#allocation2 + $0x102] ss:$2 sm:$0x3f] }
 0x132   : > { %v2007_v41 = vmax.f32 %v1995_v33, %v2005_v36  ;;  %v632_v42 = vadd.f32 %v10496_v35, %v631_v38  ;;  %v8721_v43 = vpop.f32.mrb[33].mxu0  ;;  %997 = vst [vmem:[#allocation2 + $0x120] sm:$0xff] %v976_v37  ;;  %v2068_v20 = vmax.f32 %v2062_v8, %v2066_v11 }
 0x133   : > { %v939_v46 = vpop.f32.mrb[32].mxu1  ;;  %v634_v47 = vpop.f32.mrb[34].mxu0 }
 0x134   : > { %2009 = vst.msk [vmem:[#allocation3 + $0x29] sm:$0xff] %vm1927_vm4, %v2007_v41  ;;  %v940_v34 = vadd.f32 %v10496_v35, %v939_v46  ;;  %v635_v51 = vadd.f32 %v10496_v35, %v634_v47  ;;  %v669_v53 = vmax.f32 %v632_v42, 0.0  ;;  %v8722_v54 = vpop.f32.mrb[35].mxu0  ;;  %v8767_v55 = vpop.f32.mrb[33].mxu1 }
 0x135   : > { %v2000_v49 = vld [vmem:[#allocation2 + $0x6b] ss:$2 sm:$0x3f]  ;;  %v2004_v50 = vld [vmem:[#allocation2 + $0x6c] ss:$2 sm:$0x3f] }
 0x136   : > { %v2006_v52 = vmax.f32 %v2000_v49, %v2004_v50  ;;  %v977_v57 = vmax.f32 %v940_v34, 0.0  ;;  %v670_v58 = vmax.f32 %v635_v51, 0.0  ;;  %v942_v59 = vpop.f32.mrb[34].mxu1  ;;  %690 = vst [vmem:[#allocation2 + $0x80] sm:$0xff] %v669_v53 }
 0x137   : > { %v2070_v62 = vld [vmem:[#allocation2 + $0x10f] ss:$2 sm:$0xff]  ;;  %v2074_v63 = vld [vmem:[#allocation2 + $0x110] ss:$2 sm:$0xff]  ;;  %v943_v0 = vadd.f32 %v10496_v35, %v942_v59  ;;  %v8768_v2 = vpop.f32.mrb[35].mxu1 }
 0x138   : > { %v2008_v60 = vmax.f32 %v1996_v48, %v2006_v52  ;;  %v2077_v3 = vmax.f32 %v2070_v62, %v2074_v63  ;;  %998 = vst [vmem:[#allocation2 + $0x128] sm:$0xff] %v977_v57  ;;  %691 = vst [vmem:[#allocation2 + $0x88] sm:$0xff] %v670_v58  ;;  %v10614_v52 = vld [vmem:[%s12507_s2] ss:$0 sm:$0xff] }
 0x139   : > { %v639_v4 = vpop.f32.mrb[36].mxu0  ;;  %v978_v7 = vmax.f32 %v943_v0, 0.0  ;;  %v2028_v53 = vld [vmem:[#allocation2 + $0xa8] ss:$2 sm:$0x3f] }
 0x13a   : > { %2010 = vst.msk [vmem:[#allocation3 + $0x31] sm:$0x3f] %vm1985_vm5, %v2008_v60  ;;  %v640_v5 = vadd.f32 %v10496_v35, %v639_v4  ;;  %v8725_v6 = vpop.f32.mrb[37].mxu0  ;;  %v2079_v9 = vmax.f32 %v2067_v56, %v2077_v3 }
 0x13b   : > { %v642_v10 = vpop.f32.mrb[38].mxu0  ;;  %999 = vst [vmem:[#allocation2 + $0x130] sm:$0xff] %v978_v7  ;;  %v947_v15 = vpop.f32.mrb[36].mxu1  ;;  %v2325_v21 = vld [vmem:[#allocation3 + $0x28] sm:$0xff] }
 0x13c   : > { %v671_v12 = vmax.f32 %v640_v5, 0.0  ;;  %v643_v13 = vadd.f32 %v10496_v35, %v642_v10  ;;  %v8726_v14 = vpop.f32.mrb[39].mxu0  ;;  %2081 = vst.msk [vmem:[#allocation3 + $0x59] sm:$0xff] %vm1927_vm4, %v2079_v9  ;;  %v948_v16 = vadd.f32 %v10496_v35, %v947_v15  ;;  %v8771_v17 = vpop.f32.mrb[37].mxu1  ;;  %v2574_v30 = vld [vmem:[#allocation3 + $0x29] sm:$0xff] }
 0x13d   : > { %v950_v19 = vpop.f32.mrb[38].mxu1  ;;  %v2012_v3 = vld [vmem:[#allocation2 + $0x79] ss:$2 sm:$0xff] }
 0x13e   : > { %692 = vst [vmem:[#allocation2 + $0x90] sm:$0xff] %v671_v12  ;;  %v672_v18 = vmax.f32 %v643_v13, 0.0  ;;  %v979_v22 = vmax.f32 %v948_v16, 0.0  ;;  %v951_v23 = vadd.f32 %v10496_v35, %v950_v19  ;;  %v8772_v24 = vpop.f32.mrb[39].mxu1 }
 0x13f   : > { %v2072_v25 = vld [vmem:[#allocation2 + $0x11f] ss:$2 sm:$0x3f]  ;;  %v2076_v26 = vld [vmem:[#allocation2 + $0x120] ss:$2 sm:$0x3f] }
 0x140   : > { %693 = vst [vmem:[#allocation2 + $0x98] sm:$0xff] %v672_v18  ;;  %v2078_v27 = vmax.f32 %v2072_v25, %v2076_v26  ;;  %1000 = vst [vmem:[#allocation2 + $0x138] sm:$0xff] %v979_v22  ;;  %v980_v32 = vmax.f32 %v951_v23, 0.0  ;;  %v2016_v56 = vld [vmem:[#allocation2 + $0x7a] ss:$2 sm:$0xff] }
 0x141   : > { %v647_v28 = vpop.f32.mrb[40].mxu0  ;;  %v2326_v29 = vld [vmem:[#allocation3 + $0x30] sm:$0xff]  ;;  %v2019_v9 = vmax.f32 %v2012_v3, %v2016_v56 }
 0x142   : > { %v2575_v31 = vld [vmem:[#allocation3 + $0x31] sm:$0xff]  ;;  %v648_v33 = vadd.f32 %v10496_v35, %v647_v28  ;;  %v8729_v36 = vpop.f32.mrb[41].mxu0  ;;  %v10599_v37 = vpack.c.bf16 %v2326_v29, %v2325_v21  ;;  %v2080_v39 = vmax.f32 %v2068_v20, %v2078_v27  ;;  %1001 = vst [vmem:[#allocation2 + $0x140] sm:$0xff] %v980_v32 }
 0x143   : > { %v2586_v38 = vpack.c.bf16 %v2575_v31, %v2574_v30  ;;  %v650_v40 = vpop.f32.mrb[42].mxu0  ;;  %v955_v43 = vpop.f32.mrb[40].mxu1 }
 0x144   : > { %v673_v41 = vmax.f32 %v648_v33, 0.0  ;;  %v8730_v42 = vpop.f32.mrb[43].mxu0  ;;  %8926 = vmatmul.mubr.msk.bf16.gmra.mrb[96].mxu1 %vm1927_vm4, %v10599_v37  ;;  %2082 = vst.msk [vmem:[#allocation3 + $0x61] sm:$0x3f] %vm1985_vm5, %v2080_v39  ;;  %v956_v44 = vadd.f32 %v10496_v35, %v955_v43  ;;  %v8775_v45 = vpop.f32.mrb[41].mxu1 }
 0x145   : > { %8986 = vmatmul.mubr.msk.bf16.gmra.mrb[140].mxu0 %vm1927_vm4, %v2586_v38  ;;  %8929 = vmatprep.mubr.msk.bf16.mxu1 %vm10023_vm0, %v10022_v1  ;;  %v958_v47 = vpop.f32.mrb[42].mxu1  ;;  %v2014_v34 = vld [vmem:[#allocation2 + $0x89] ss:$2 sm:$0x3f] }
 0x146   : > { %8989 = vmatprep.mubr.msk.bf16.mxu0 %vm10023_vm0, %v10022_v1  ;;  %694 = vst [vmem:[#allocation2 + $0xa0] sm:$0xff] %v673_v41  ;;  %v981_v46 = vmax.f32 %v956_v44, 0.0  ;;  %v8776_v49 = vpop.f32.mrb[43].mxu1  ;;  %v2018_v54 = vld [vmem:[#allocation2 + $0x8a] ss:$2 sm:$0x3f] }
 0x147   : > { %v2020_v4 = vmax.f32 %v2014_v34, %v2018_v54  ;;  %v2084_v25 = vld [vmem:[#allocation2 + $0x12d] ss:$2 sm:$0xff]  ;;  %v2088_v26 = vld [vmem:[#allocation2 + $0x12e] ss:$2 sm:$0xff] }
 0x148   : > { %1002 = vst [vmem:[#allocation2 + $0x148] sm:$0xff] %v981_v46  ;;  %v2091_v39 = vmax.f32 %v2084_v25, %v2088_v26 }
 0x149   : > { %v1183_v50 = vpop.f32.mrb[44].mxu0  ;;  %v2086_v40 = vld [vmem:[#allocation2 + $0x13d] ss:$2 sm:$0x3f] }
 0x14a   : > { %v1184_v51 = vadd.f32 %v10496_v35, %v1183_v50  ;;  %v8781_v48 = vpop.f32.mrb[45].mxu0 }
 0x14b   : > { %v1186_v55 = vpop.f32.mrb[46].mxu0  ;;  %v1491_v60 = vpop.f32.mrb[44].mxu1 }
 0x14c   : > { %v1269_v57 = vmax.f32 %v1184_v51, 0.0  ;;  %v1187_v58 = vadd.f32 %v10496_v35, %v1186_v55  ;;  %v8782_v59 = vpop.f32.mrb[47].mxu0  ;;  %v1492_v0 = vadd.f32 %v10614_v52, %v1491_v60  ;;  %v8827_v2 = vpop.f32.mrb[45].mxu1 }
 0x14d   : > { %v2022_v62 = vld [vmem:[#allocation2 + $0x97] ss:$2 sm:$0xff]  ;;  %v2024_v63 = vld [vmem:[#allocation2 + $0xa7] ss:$2 sm:$0x3f]  ;;  %v1494_v8 = vpop.f32.mrb[46].mxu1 }
 0x14e   : > { %v2026_v5 = vld [vmem:[#allocation2 + $0x98] ss:$2 sm:$0xff]  ;;  %v2030_v6 = vmax.f32 %v2024_v63, %v2028_v53  ;;  %1290 = vst [vmem:[#allocation2 + $0x150] sm:$0xff] %v1269_v57  ;;  %v1270_v7 = vmax.f32 %v1187_v58, 0.0  ;;  %v1577_v11 = vmax.f32 %v1492_v0, 0.0  ;;  %v1495_v12 = vadd.f32 %v10614_v52, %v1494_v8  ;;  %v8828_v13 = vpop.f32.mrb[47].mxu1 }
 0x14f   : > { %v2029_v10 = vmax.f32 %v2022_v62, %v2026_v5  ;;  %v2090_v42 = vld [vmem:[#allocation2 + $0x13e] ss:$2 sm:$0x3f]  ;;  %v2578_v13 = vld [vmem:[#allocation3 + $0x49] sm:$0xff] }
 0x150   : > { %v2032_v14 = vmax.f32 %v2020_v4, %v2030_v6  ;;  %1291 = vst [vmem:[#allocation2 + $0x158] sm:$0xff] %v1270_v7  ;;  %1598 = vst [vmem:[#allocation2 + $0x1f8] sm:$0xff] %v1577_v11  ;;  %v1578_v17 = vmax.f32 %v1495_v12, 0.0  ;;  %v2092_v55 = vmax.f32 %v2086_v40, %v2090_v42  ;;  %v2330_v7 = vld [vmem:[#allocation3 + $0x50] sm:$0xff]  ;;  %v2329_v12 = vld [vmem:[#allocation3 + $0x48] sm:$0xff] }
 0x151   : > { %v2031_v15 = vmax.f32 %v2019_v9, %v2029_v10  ;;  %v1191_v16 = vpop.f32.mrb[48].mxu0  ;;  %v2579_v8 = vld [vmem:[#allocation3 + $0x51] sm:$0xff]  ;;  %v2580_v40 = vld [vmem:[#allocation3 + $0x59] sm:$0xff] }
 0x152   : > { %2034 = vst.msk [vmem:[#allocation3 + $0x41] sm:$0x3f] %vm1985_vm5, %v2032_v14  ;;  %v1192_v18 = vadd.f32 %v10496_v35, %v1191_v16  ;;  %v8785_v19 = vpop.f32.mrb[49].mxu0  ;;  %1599 = vst [vmem:[#allocation2 + $0x200] sm:$0xff] %v1578_v17  ;;  %v10641_v17 = vpack.c.bf16 %v2330_v7, %v2329_v12 }
 0x153   : > { %2033 = vst.msk [vmem:[#allocation3 + $0x39] sm:$0xff] %vm1927_vm4, %v2031_v15  ;;  %v1194_v20 = vpop.f32.mrb[50].mxu0  ;;  %v1499_v24 = vpop.f32.mrb[48].mxu1 }
 0x154   : > { %v1271_v21 = vmax.f32 %v1192_v18, 0.0  ;;  %v1195_v22 = vadd.f32 %v10496_v35, %v1194_v20  ;;  %v8786_v23 = vpop.f32.mrb[51].mxu0  ;;  %v1500_v27 = vadd.f32 %v10614_v52, %v1499_v24  ;;  %v8831_v28 = vpop.f32.mrb[49].mxu1  ;;  %v2588_v18 = vpack.c.bf16 %v2579_v8, %v2578_v13 }
 0x155   : > { %v1502_v30 = vpop.f32.mrb[50].mxu1 }
 0x156   : > { %1292 = vst [vmem:[#allocation2 + $0x160] sm:$0xff] %v1271_v21  ;;  %v1272_v29 = vmax.f32 %v1195_v22, 0.0  ;;  %v1579_v33 = vmax.f32 %v1500_v27, 0.0  ;;  %v1503_v36 = vadd.f32 %v10614_v52, %v1502_v30  ;;  %v8832_v38 = vpop.f32.mrb[51].mxu1 }
 0x157   : > { %v2094_v31 = vld [vmem:[#allocation2 + $0x14b] ss:$2 sm:$0xff]  ;;  %v2098_v32 = vld [vmem:[#allocation2 + $0x14c] ss:$2 sm:$0xff] }
 0x158   : > { %v2101_v41 = vmax.f32 %v2094_v31, %v2098_v32  ;;  %1293 = vst [vmem:[#allocation2 + $0x168] sm:$0xff] %v1272_v29  ;;  %1600 = vst [vmem:[#allocation2 + $0x208] sm:$0xff] %v1579_v33  ;;  %v1580_v45 = vmax.f32 %v1503_v36, 0.0  ;;  %v2332_v31 = vld [vmem:[#allocation3 + $0x60] sm:$0xff] }
 0x159   : > { %v1199_v43 = vpop.f32.mrb[52].mxu0  ;;  %v2577_v44 = vld [vmem:[#allocation3 + $0x41] sm:$0xff] }
 0x15a   : > { %v2103_v46 = vmax.f32 %v2091_v39, %v2101_v41  ;;  %v1200_v47 = vadd.f32 %v10496_v35, %v1199_v43  ;;  %v8789_v49 = vpop.f32.mrb[53].mxu0  ;;  %v2327_v50 = vld [vmem:[#allocation3 + $0x38] sm:$0xff]  ;;  %v2328_v34 = vld [vmem:[#allocation3 + $0x40] sm:$0xff]  ;;  %1601 = vst [vmem:[#allocation2 + $0x210] sm:$0xff] %v1580_v45 }
 0x15b   : > { %v2576_v51 = vld [vmem:[#allocation3 + $0x39] sm:$0xff]  ;;  %v1202_v48 = vpop.f32.mrb[54].mxu0  ;;  %v10626_v53 = vpack.c.bf16 %v2328_v34, %v2327_v50  ;;  %v1507_v59 = vpop.f32.mrb[52].mxu1  ;;  %v2581_v32 = vld [vmem:[#allocation3 + $0x61] sm:$0xff] }
 0x15c   : > { %v2587_v54 = vpack.c.bf16 %v2577_v44, %v2576_v51  ;;  %2105 = vst.msk [vmem:[#allocation3 + $0x69] sm:$0xff] %vm1927_vm4, %v2103_v46  ;;  %v1273_v56 = vmax.f32 %v1200_v47, 0.0  ;;  %v1203_v57 = vadd.f32 %v10496_v35, %v1202_v48  ;;  %v8790_v58 = vpop.f32.mrb[55].mxu0  ;;  %v1508_v63 = vadd.f32 %v10614_v52, %v1507_v59  ;;  %v8835_v3 = vpop.f32.mrb[53].mxu1  ;;  %v2331_v39 = vld [vmem:[#allocation3 + $0x58] sm:$0xff] }
 0x15d   : > { %v2096_v60 = vld [vmem:[#allocation2 + $0x15b] ss:$2 sm:$0x3f]  ;;  %v2100_v62 = vld [vmem:[#allocation2 + $0x15c] ss:$2 sm:$0x3f]  ;;  %8930 = vmatmul.mubr.msk.bf16.gmra.mrb[100].mxu1 %vm1927_vm4, %v10626_v53  ;;  %v10654_v42 = vpack.c.bf16 %v2332_v31, %v2331_v39  ;;  %v2589_v43 = vpack.c.bf16 %v2581_v32, %v2580_v40 }
 0x15e   : > { %8990 = vmatmul.mubr.msk.bf16.gmra.mrb[144].mxu0 %vm1927_vm4, %v2587_v54  ;;  %v2102_v0 = vmax.f32 %v2096_v60, %v2100_v62  ;;  %1294 = vst [vmem:[#allocation2 + $0x170] sm:$0xff] %v1273_v56  ;;  %v1274_v2 = vmax.f32 %v1203_v57, 0.0  ;;  %8933 = vmatprep.mubr.msk.bf16.mxu1 %vm10023_vm0, %v10022_v1  ;;  %v1581_v4 = vmax.f32 %v1508_v63, 0.0  ;;  %v1510_v5 = vpop.f32.mrb[54].mxu1 }
 0x15f   : > { %8993 = vmatprep.mubr.msk.bf16.mxu0 %vm10023_vm0, %v10022_v1  ;;  %v1511_v9 = vadd.f32 %v10614_v52, %v1510_v5  ;;  %v8836_v10 = vpop.f32.mrb[55].mxu1 }
 0x160   : > { %v2104_v6 = vmax.f32 %v2092_v55, %v2102_v0  ;;  %1295 = vst [vmem:[#allocation2 + $0x178] sm:$0xff] %v1274_v2  ;;  %1602 = vst [vmem:[#allocation2 + $0x218] sm:$0xff] %v1581_v4 }
 0x161   : > { %v1207_v11 = vpop.f32.mrb[56].mxu0  ;;  %v1582_v16 = vmax.f32 %v1511_v9, 0.0 }
 0x162   : > { %2106 = vst.msk [vmem:[#allocation3 + $0x71] sm:$0x3f] %vm1985_vm5, %v2104_v6  ;;  %v1208_v14 = vadd.f32 %v10496_v35, %v1207_v11  ;;  %v8793_v15 = vpop.f32.mrb[57].mxu0 }
 0x163   : > { %v1210_v19 = vpop.f32.mrb[58].mxu0  ;;  %1603 = vst [vmem:[#allocation2 + $0x220] sm:$0xff] %v1582_v16  ;;  %v1515_v23 = vpop.f32.mrb[56].mxu1  ;;  %v2333_v62 = vld [vmem:[#allocation3 + $0x68] sm:$0xff] }
 0x164   : > { %v1275_v20 = vmax.f32 %v1208_v14, 0.0  ;;  %v1211_v21 = vadd.f32 %v10496_v35, %v1210_v19  ;;  %v8794_v22 = vpop.f32.mrb[59].mxu0  ;;  %v1516_v24 = vadd.f32 %v10614_v52, %v1515_v23  ;;  %v8839_v25 = vpop.f32.mrb[57].mxu1  ;;  %v2582_v63 = vld [vmem:[#allocation3 + $0x69] sm:$0xff] }
 0x165   : > { %8934 = vmatmul.mubr.msk.bf16.gmra.mrb[104].mxu1 %vm1927_vm4, %v10641_v17  ;;  %v1518_v27 = vpop.f32.mrb[58].mxu1  ;;  %v2108_v7 = vld [vmem:[#allocation2 + $0x169] ss:$2 sm:$0xff] }
 0x166   : > { %8994 = vmatmul.mubr.msk.bf16.gmra.mrb[148].mxu0 %vm1927_vm4, %v2588_v18  ;;  %1296 = vst [vmem:[#allocation2 + $0x180] sm:$0xff] %v1275_v20  ;;  %v1276_v26 = vmax.f32 %v1211_v21, 0.0  ;;  %8937 = vmatprep.mubr.msk.bf16.mxu1 %vm10023_vm0, %v10022_v1  ;;  %v1583_v28 = vmax.f32 %v1516_v24, 0.0  ;;  %v1519_v29 = vadd.f32 %v10614_v52, %v1518_v27  ;;  %v8840_v30 = vpop.f32.mrb[59].mxu1  ;;  %v2300_v19 = vld [vmem:[#allocation3 + $0xf] sm:$0xff] }
 0x167   : > { %8997 = vmatprep.mubr.msk.bf16.mxu0 %vm10023_vm0, %v10022_v1  ;;  %v2112_v3 = vld [vmem:[#allocation2 + $0x16a] ss:$2 sm:$0xff] }
 0x168   : > { %1297 = vst [vmem:[#allocation2 + $0x188] sm:$0xff] %v1276_v26  ;;  %1604 = vst [vmem:[#allocation2 + $0x228] sm:$0xff] %v1583_v28  ;;  %v1584_v36 = vmax.f32 %v1519_v29, 0.0  ;;  %v2115_v16 = vmax.f32 %v2108_v7, %v2112_v3  ;;  %v2740_v22 = vld [vmem:[%s12508_s3 + $0xc] sm:$0xf] }
 0x169   : > { %v1215_v33 = vpop.f32.mrb[60].mxu0  ;;  %v2334_v55 = vld [vmem:[#allocation3 + $0x70] sm:$0xff]  ;;  %v2763_v39 = vsel %vm2364_vm3, %v2740_v22, 0 }
 0x16a   : > { %v1216_v38 = vadd.f32 %v10496_v35, %v1215_v33  ;;  %v8797_v41 = vpop.f32.mrb[61].mxu0  ;;  %1605 = vst [vmem:[#allocation2 + $0x230] sm:$0xff] %v1584_v36  ;;  %v2583_v56 = vld [vmem:[#allocation3 + $0x71] sm:$0xff]  ;;  %v10667_v4 = vpack.c.bf16 %v2334_v55, %v2333_v62 }
 0x16b   : > { %v1218_v44 = vpop.f32.mrb[62].mxu0  ;;  %v1523_v49 = vpop.f32.mrb[60].mxu1  ;;  %v2590_v5 = vpack.c.bf16 %v2583_v56, %v2582_v63  ;;  %v3187_v28 = vld [vmem:[%s12508_s3 + $0x18] sm:$0xf]  ;;  %v10689_v33 = vld [vmem:[%s12507_s2] ss:$0 sm:$0xff] }
 0x16c   : > { %v1277_v45 = vmax.f32 %v1216_v38, 0.0  ;;  %v1219_v46 = vadd.f32 %v10496_v35, %v1218_v44  ;;  %v8798_v47 = vpop.f32.mrb[63].mxu0  ;;  %v1524_v50 = vadd.f32 %v10614_v52, %v1523_v49  ;;  %v8843_v51 = vpop.f32.mrb[61].mxu1  ;;  %v2302_v63 = vld [vmem:[#allocation3 + $0x1f] sm:$0xff] }
 0x16d   : > { %8938 = vmatmul.mubr.msk.bf16.gmra.mrb[108].mxu1 %vm1927_vm4, %v10654_v42  ;;  %v1526_v54 = vpop.f32.mrb[62].mxu1  ;;  %v2110_v26 = vld [vmem:[#allocation2 + $0x179] ss:$2 sm:$0x3f] }
 0x16e   : > { %8998 = vmatmul.mubr.msk.bf16.gmra.mrb[152].mxu0 %vm1927_vm4, %v2589_v43  ;;  %1298 = vst [vmem:[#allocation2 + $0x190] sm:$0xff] %v1277_v45  ;;  %v1278_v34 = vmax.f32 %v1219_v46, 0.0  ;;  %8941 = vmatprep.mubr.msk.bf16.mxu1 %vm10023_vm0, %v10022_v1  ;;  %v1585_v48 = vmax.f32 %v1524_v50, 0.0  ;;  %v1527_v57 = vadd.f32 %v10614_v52, %v1526_v54  ;;  %v8844_v58 = vpop.f32.mrb[63].mxu1  ;;  %v3210_v46 = vsel %vm2364_vm3, %v3187_v28, 0 }
 0x16f   : > { %9001 = vmatprep.mubr.msk.bf16.mxu0 %vm10023_vm0, %v10022_v1  ;;  %v2114_v29 = vld [vmem:[#allocation2 + $0x17a] ss:$2 sm:$0x3f]  ;;  %v2180_v41 = vld [vmem:[#allocation2 + $0x21d] ss:$2 sm:$0xff] }
 0x170   : > { %1299 = vst [vmem:[#allocation2 + $0x198] sm:$0xff] %v1278_v34  ;;  %1606 = vst [vmem:[#allocation2 + $0x238] sm:$0xff] %v1585_v48  ;;  %v1586_v2 = vmax.f32 %v1527_v57, 0.0  ;;  %v2116_v43 = vmax.f32 %v2110_v26, %v2114_v29  ;;  %v2184_v49 = vld [vmem:[#allocation2 + $0x21e] ss:$2 sm:$0xff] }
 0x171   : > { %v1223_v59 = vpop.f32.mrb[64].mxu0  ;;  %v2182_v56 = vld [vmem:[#allocation2 + $0x22d] ss:$2 sm:$0x3f]  ;;  %v2187_v58 = vmax.f32 %v2180_v41, %v2184_v49 }
 0x172   : > { %v1224_v60 = vadd.f32 %v10496_v35, %v1223_v59  ;;  %v8801_v0 = vpop.f32.mrb[65].mxu0  ;;  %1607 = vst [vmem:[#allocation2 + $0x240] sm:$0xff] %v1586_v2 }
 0x173   : > { %v1226_v6 = vpop.f32.mrb[66].mxu0  ;;  %v1531_v11 = vpop.f32.mrb[64].mxu1 }
 0x174   : > { %v1279_v8 = vmax.f32 %v1224_v60, 0.0  ;;  %v1227_v9 = vadd.f32 %v10496_v35, %v1226_v6  ;;  %v8802_v10 = vpop.f32.mrb[67].mxu0  ;;  %v1532_v14 = vadd.f32 %v10614_v52, %v1531_v11  ;;  %v8847_v15 = vpop.f32.mrb[65].mxu1  ;;  %v2299_v35 = vld [vmem:[#allocation3 + $0x7] sm:$0xff] }
 0x175   : > { %v2118_v12 = vld [vmem:[#allocation2 + $0x187] ss:$2 sm:$0xff]  ;;  %v2122_v13 = vld [vmem:[#allocation2 + $0x188] ss:$2 sm:$0xff]  ;;  %8942 = vmatmul.mubr.msk.bf16.gmra.mrb[112].mxu1 %vm1927_vm4, %v10667_v4  ;;  %v1534_v21 = vpop.f32.mrb[66].mxu1  ;;  %v2313_v30 = vpack.c.bf16 %v2300_v19, %v2299_v35 }
 0x176   : > { %9002 = vmatmul.mubr.msk.bf16.gmra.mrb[156].mxu0 %vm1927_vm4, %v2590_v5  ;;  %v2125_v18 = vmax.f32 %v2118_v12, %v2122_v13  ;;  %1300 = vst [vmem:[#allocation2 + $0x1a0] sm:$0xff] %v1279_v8  ;;  %8947 = vmatprep.mubr.msk.bf16.mxu1 %vm10023_vm0, %v10022_v1  ;;  %v1280_v20 = vmax.f32 %v1227_v9, 0.0  ;;  %v1587_v23 = vmax.f32 %v1532_v14, 0.0  ;;  %v1535_v24 = vadd.f32 %v10614_v52, %v1534_v21  ;;  %v8848_v25 = vpop.f32.mrb[67].mxu1  ;;  %v2301_v8 = vld [vmem:[#allocation3 + $0x17] sm:$0xff] }
 0x177   : > { %9037 = vmatprep.mubr.msk.bf16.mxu0 %vm10023_vm0, %v10022_v1  ;;  %v2186_v59 = vld [vmem:[#allocation2 + $0x22e] ss:$2 sm:$0x3f]  ;;  %v10708_v14 = vpack.c.bf16 %v2302_v63, %v2301_v8 }
 0x178   : > { %v2127_v27 = vmax.f32 %v2115_v16, %v2125_v18  ;;  %1301 = vst [vmem:[#allocation2 + $0x1a8] sm:$0xff] %v1280_v20  ;;  %1608 = vst [vmem:[#allocation2 + $0x248] sm:$0xff] %v1587_v23  ;;  %v1588_v32 = vmax.f32 %v1535_v24, 0.0  ;;  %v2188_v11 = vmax.f32 %v2182_v56, %v2186_v59  ;;  %v2306_v56 = vld [vmem:[#allocation3 + $0x3f] sm:$0xff] }
 0x179   : > { %v1231_v31 = vpop.f32.mrb[68].mxu0 }
 0x17a   : > { %2129 = vst.msk [vmem:[#allocation3 + $0x79] sm:$0xff] %vm1927_vm4, %v2127_v27  ;;  %v1232_v36 = vadd.f32 %v10689_v33, %v1231_v31  ;;  %v8805_v38 = vpop.f32.mrb[69].mxu0  ;;  %1609 = vst [vmem:[#allocation2 + $0x250] sm:$0xff] %v1588_v32 }
 0x17b   : > { %v1234_v40 = vpop.f32.mrb[70].mxu0  ;;  %v1539_v50 = vpop.f32.mrb[68].mxu1 }
 0x17c   : > { %v1281_v44 = vmax.f32 %v1232_v36, 0.0  ;;  %v1235_v45 = vadd.f32 %v10689_v33, %v1234_v40  ;;  %v8806_v47 = vpop.f32.mrb[71].mxu0  ;;  %v1540_v48 = vadd.f32 %v10614_v52, %v1539_v50  ;;  %v8851_v57 = vpop.f32.mrb[69].mxu1  ;;  %v2303_v36 = vld [vmem:[#allocation3 + $0x27] sm:$0xff] }
 0x17d   : > { %v2120_v34 = vld [vmem:[#allocation2 + $0x197] ss:$2 sm:$0x3f]  ;;  %v2124_v51 = vld [vmem:[#allocation2 + $0x198] ss:$2 sm:$0x3f]  ;;  %8948 = vmatmul.mubr.msk.bf16.vlgmr.msra.gmra.mrb[116].mxu1 %vm1927_vm4, %v2313_v30 }
 0x17e   : > { %9038 = vmatmul.mubr.msk.bf16.vlgmr.msra.gmra.mrb[160].mxu0 %vm1927_vm4, %v10565_v61  ;;  %v2126_v54 = vmax.f32 %v2120_v34, %v2124_v51  ;;  %9006 = vmatpush3.bf16.msra.mxu1 %v2763_v39  ;;  %1302 = vst [vmem:[#allocation2 + $0x1b0] sm:$0xff] %v1281_v44  ;;  %v1282_v55 = vmax.f32 %v1235_v45, 0.0  ;;  %v1589_v60 = vmax.f32 %v1540_v48, 0.0  ;;  %v1542_v62 = vpop.f32.mrb[70].mxu1 }
 0x17f   : > { %8951 = vmatprep.mubr.msk.bf16.mxu1 %vm10023_vm0, %v10022_v1  ;;  %9041 = vmatprep.mubr.msk.bf16.mxu0 %vm10023_vm0, %v10022_v1  ;;  %v2190_v0 = vld [vmem:[#allocation2 + $0x23b] ss:$2 sm:$0xff]  ;;  %v2194_v2 = vld [vmem:[#allocation2 + $0x23c] ss:$2 sm:$0xff]  ;;  %v1543_v3 = vadd.f32 %v10614_v52, %v1542_v62  ;;  %v8852_v5 = vpop.f32.mrb[71].mxu1 }
 0x180   : > { %9096 = vmatpush3.bf16.msra.mxu0 %v3210_v46  ;;  %v2128_v61 = vmax.f32 %v2116_v43, %v2126_v54  ;;  %1303 = vst [vmem:[#allocation2 + $0x1b8] sm:$0xff] %v1282_v55  ;;  %9065 = vmatprep.subr.bf16.mxu1 %v10022_v1  ;;  %v2197_v7 = vmax.f32 %v2190_v0, %v2194_v2  ;;  %1610 = vst [vmem:[#allocation2 + $0x258] sm:$0xff] %v1589_v60  ;;  %v2305_v55 = vld [vmem:[#allocation3 + $0x37] sm:$0xff] }
 0x181   : > { %9155 = vmatprep.subr.bf16.mxu0 %v10022_v1  ;;  %v1239_v6 = vpop.f32.mrb[72].mxu0  ;;  %v2192_v12 = vld [vmem:[#allocation2 + $0x24b] ss:$2 sm:$0x3f]  ;;  %v1590_v13 = vmax.f32 %v1543_v3, 0.0  ;;  %v10738_v63 = vpack.c.bf16 %v2306_v56, %v2305_v55 }
 0x182   : > { %2130 = vst.msk [vmem:[#allocation3 + $0x81] sm:$0x3f] %vm1985_vm5, %v2128_v61  ;;  %v1240_v9 = vadd.f32 %v10689_v33, %v1239_v6  ;;  %v8809_v10 = vpop.f32.mrb[73].mxu0  ;;  %v2199_v16 = vmax.f32 %v2187_v58, %v2197_v7  ;;  %v2196_v18 = vld [vmem:[#allocation2 + $0x24c] ss:$2 sm:$0x3f] }
 0x183   : > { %v1242_v15 = vpop.f32.mrb[74].mxu0  ;;  %v2198_v21 = vmax.f32 %v2192_v12, %v2196_v18  ;;  %1611 = vst [vmem:[#allocation2 + $0x260] sm:$0xff] %v1590_v13  ;;  %v1547_v22 = vpop.f32.mrb[72].mxu1  ;;  %v2310_v55 = vld [vmem:[#allocation3 + $0x5f] sm:$0xff] }
 0x184   : > { %v1283_v35 = vmax.f32 %v1240_v9, 0.0  ;;  %v1243_v19 = vadd.f32 %v10689_v33, %v1242_v15  ;;  %v8810_v20 = vpop.f32.mrb[75].mxu0  ;;  %2201 = vst.msk [vmem:[#allocation3 + $0xa9] sm:$0xff] %vm1927_vm4, %v2199_v16  ;;  %v1548_v23 = vadd.f32 %v10614_v52, %v1547_v22  ;;  %v8855_v24 = vpop.f32.mrb[73].mxu1  ;;  %v2308_v22 = vld [vmem:[#allocation3 + $0x4f] sm:$0xff] }
 0x185   : > { %8952 = vmatmul.mubr.msk.bf16.gmra.mrb[120].mxu1 %vm1927_vm4, %v10708_v14  ;;  %v2200_v26 = vmax.f32 %v2188_v11, %v2198_v21  ;;  %v1550_v27 = vpop.f32.mrb[74].mxu1  ;;  %v2136_v57 = vld [vmem:[#allocation2 + $0x1a6] ss:$2 sm:$0xff]  ;;  %v2168_v56 = vld [vmem:[#allocation2 + $0x20f] ss:$2 sm:$0x3f] }
 0x186   : > { %9042 = vmatmul.mubr.msk.bf16.gmra.mrb[164].mxu0 %vm1927_vm4, %v10599_v37  ;;  %8955 = vmatprep.mubr.msk.bf16.mxu1 %vm10023_vm0, %v10022_v1  ;;  %1304 = vst [vmem:[#allocation2 + $0x1c0] sm:$0xff] %v1283_v35  ;;  %v1284_v25 = vmax.f32 %v1243_v19, 0.0  ;;  %v1591_v28 = vmax.f32 %v1548_v23, 0.0  ;;  %v1551_v29 = vadd.f32 %v10614_v52, %v1550_v27  ;;  %v8856_v30 = vpop.f32.mrb[75].mxu1  ;;  %v2304_v37 = vld [vmem:[#allocation3 + $0x2f] sm:$0xff] }
 0x187   : > { %9045 = vmatprep.mubr.msk.bf16.mxu0 %vm10023_vm0, %v10022_v1  ;;  %2202 = vst.msk [vmem:[#allocation3 + $0xb1] sm:$0x3f] %vm1985_vm5, %v2200_v26  ;;  %v10724_v40 = vpack.c.bf16 %v2304_v37, %v2303_v36  ;;  %v2134_v60 = vld [vmem:[#allocation2 + $0x1b5] ss:$2 sm:$0x3f] }
 0x188   : > { %1305 = vst [vmem:[#allocation2 + $0x1c8] sm:$0xff] %v1284_v25  ;;  %1612 = vst [vmem:[#allocation2 + $0x268] sm:$0xff] %v1591_v28  ;;  %v1592_v32 = vmax.f32 %v1551_v29, 0.0  ;;  %v2307_v30 = vld [vmem:[#allocation3 + $0x47] sm:$0xff] }
 0x189   : > { %v1247_v31 = vpop.f32.mrb[76].mxu0 }
 0x18a   : > { %v1248_v38 = vadd.f32 %v10689_v33, %v1247_v31  ;;  %v8813_v39 = vpop.f32.mrb[77].mxu0  ;;  %1613 = vst [vmem:[#allocation2 + $0x270] sm:$0xff] %v1592_v32  ;;  %v2204_v18 = vld [vmem:[#allocation2 + $0x259] ss:$2 sm:$0xff] }
 0x18b   : > { %v1250_v41 = vpop.f32.mrb[78].mxu0  ;;  %v1555_v46 = vpop.f32.mrb[76].mxu1  ;;  %v10753_v39 = vpack.c.bf16 %v2308_v22, %v2307_v30 }
 0x18c   : > { %v1285_v43 = vmax.f32 %v1248_v38, 0.0  ;;  %v1251_v44 = vadd.f32 %v10689_v33, %v1250_v41  ;;  %v8814_v45 = vpop.f32.mrb[79].mxu0  ;;  %v1556_v47 = vadd.f32 %v10614_v52, %v1555_v46  ;;  %v8859_v49 = vpop.f32.mrb[77].mxu1 }
 0x18d   : > { %8956 = vmatmul.mubr.msk.bf16.gmra.mrb[124].mxu1 %vm1927_vm4, %v10724_v40  ;;  %v1558_v34 = vpop.f32.mrb[78].mxu1  ;;  %v2138_v0 = vld [vmem:[#allocation2 + $0x1b6] ss:$2 sm:$0x3f] }
 0x18e   : > { %9046 = vmatmul.mubr.msk.bf16.gmra.mrb[168].mxu0 %vm1927_vm4, %v10626_v53  ;;  %8959 = vmatprep.mubr.msk.bf16.mxu1 %vm10023_vm0, %v10022_v1  ;;  %1306 = vst [vmem:[#allocation2 + $0x1d0] sm:$0xff] %v1285_v43  ;;  %v1286_v50 = vmax.f32 %v1251_v44, 0.0  ;;  %v1593_v51 = vmax.f32 %v1556_v47, 0.0  ;;  %v1559_v48 = vadd.f32 %v10614_v52, %v1558_v34  ;;  %v8860_v54 = vpop.f32.mrb[79].mxu1  ;;  %v2132_v53 = vld [vmem:[#allocation2 + $0x1a5] ss:$2 sm:$0xff]  ;;  %v2140_v13 = vmax.f32 %v2134_v60, %v2138_v0 }
 0x18f   : > { %9049 = vmatprep.mubr.msk.bf16.mxu0 %vm10023_vm0, %v10022_v1  ;;  %v2139_v3 = vmax.f32 %v2132_v53, %v2136_v57  ;;  %v2208_v35 = vld [vmem:[#allocation2 + $0x25a] ss:$2 sm:$0xff] }
 0x190   : > { %1307 = vst [vmem:[#allocation2 + $0x1d8] sm:$0xff] %v1286_v50  ;;  %1614 = vst [vmem:[#allocation2 + $0x278] sm:$0xff] %v1593_v51  ;;  %v1594_v59 = vmax.f32 %v1559_v48, 0.0  ;;  %v2211_v28 = vmax.f32 %v2204_v18, %v2208_v35  ;;  %v2170_v53 = vld [vmem:[#allocation2 + $0x200] ss:$2 sm:$0xff] }
 0x191   : > { %v1255_v58 = vpop.f32.mrb[80].mxu0  ;;  %v2206_v50 = vld [vmem:[#allocation2 + $0x269] ss:$2 sm:$0x3f] }
 0x192   : > { %v1256_v62 = vadd.f32 %v10689_v33, %v1255_v58  ;;  %v8817_v61 = vpop.f32.mrb[81].mxu0  ;;  %1615 = vst [vmem:[#allocation2 + $0x280] sm:$0xff] %v1594_v59  ;;  %v2210_v51 = vld [vmem:[#allocation2 + $0x26a] ss:$2 sm:$0x3f]  ;;  %v2309_v59 = vld [vmem:[#allocation3 + $0x57] sm:$0xff] }
 0x193   : > { %v1258_v2 = vpop.f32.mrb[82].mxu0  ;;  %v1563_v8 = vpop.f32.mrb[80].mxu1  ;;  %v2172_v57 = vld [vmem:[#allocation2 + $0x210] ss:$2 sm:$0x3f]  ;;  %v2212_v61 = vmax.f32 %v2206_v50, %v2210_v51 }
 0x194   : > { %v1287_v5 = vmax.f32 %v1256_v62, 0.0  ;;  %v1259_v6 = vadd.f32 %v10689_v33, %v1258_v2  ;;  %v8818_v7 = vpop.f32.mrb[83].mxu0  ;;  %v1564_v11 = vadd.f32 %v10614_v52, %v1563_v8  ;;  %v8863_v12 = vpop.f32.mrb[81].mxu1  ;;  %v10767_v2 = vpack.c.bf16 %v2310_v55, %v2309_v59 }
 0x195   : > { %8960 = vmatmul.mubr.msk.bf16.gmra.mrb[128].mxu1 %vm1927_vm4, %v10738_v63  ;;  %v2142_v9 = vld [vmem:[#allocation2 + $0x1c3] ss:$2 sm:$0xff]  ;;  %v2146_v10 = vld [vmem:[#allocation2 + $0x1c4] ss:$2 sm:$0xff]  ;;  %v1566_v19 = vpop.f32.mrb[82].mxu1 }
 0x196   : > { %9050 = vmatmul.mubr.msk.bf16.gmra.mrb[172].mxu0 %vm1927_vm4, %v10641_v17  ;;  %8963 = vmatprep.mubr.msk.bf16.mxu1 %vm10023_vm0, %v10022_v1  ;;  %v2149_v15 = vmax.f32 %v2142_v9, %v2146_v10  ;;  %1308 = vst [vmem:[#allocation2 + $0x1e0] sm:$0xff] %v1287_v5  ;;  %v1288_v16 = vmax.f32 %v1259_v6, 0.0  ;;  %v1567_v21 = vadd.f32 %v10614_v52, %v1566_v19  ;;  %v1595_v25 = vmax.f32 %v1564_v11, 0.0  ;;  %v8864_v26 = vpop.f32.mrb[83].mxu1 }
 0x197   : > { %9053 = vmatprep.mubr.msk.bf16.mxu0 %vm10023_vm0, %v10022_v1  ;;  %v2144_v20 = vld [vmem:[#allocation2 + $0x1d3] ss:$2 sm:$0x3f]  ;;  %v2148_v17 = vld [vmem:[#allocation2 + $0x1d4] ss:$2 sm:$0x3f] }
 0x198   : > { %v2151_v23 = vmax.f32 %v2139_v3, %v2149_v15  ;;  %v2150_v24 = vmax.f32 %v2144_v20, %v2148_v17  ;;  %1309 = vst [vmem:[#allocation2 + $0x1e8] sm:$0xff] %v1288_v16  ;;  %v1596_v29 = vmax.f32 %v1567_v21, 0.0  ;;  %1616 = vst [vmem:[#allocation2 + $0x288] sm:$0xff] %v1595_v25  ;;  %v2174_v16 = vmax.f32 %v2168_v56, %v2172_v57 }
 0x199   : > { %v1263_v27 = vpop.f32.mrb[84].mxu0  ;;  %v2214_v36 = vld [vmem:[#allocation2 + $0x277] ss:$2 sm:$0xff]  ;;  %v2218_v38 = vld [vmem:[#allocation2 + $0x278] ss:$2 sm:$0xff] }
 0x19a   : > { %2153 = vst.msk [vmem:[#allocation3 + $0x89] sm:$0xff] %vm1927_vm4, %v2151_v23  ;;  %v2152_v37 = vmax.f32 %v2140_v13, %v2150_v24  ;;  %v1264_v31 = vadd.f32 %v10689_v33, %v1263_v27  ;;  %v8821_v32 = vpop.f32.mrb[85].mxu0  ;;  %v2221_v43 = vmax.f32 %v2214_v36, %v2218_v38  ;;  %1617 = vst [vmem:[#allocation2 + $0x290] sm:$0xff] %v1596_v29  ;;  %v2881_v24 = vld [vmem:[#allocation3 + $0x80] sm:$0xff]  ;;  %v2880_v29 = vld [vmem:[#allocation3 + $0x78] sm:$0xff] }
 0x19b   : > { %v1266_v41 = vpop.f32.mrb[86].mxu0  ;;  %v1571_v46 = vpop.f32.mrb[84].mxu1  ;;  %v2888_v32 = vpack.c.bf16 %v2881_v24, %v2880_v29 }
 0x19c   : > { %2154 = vst.msk [vmem:[#allocation3 + $0x91] sm:$0x3f] %vm1985_vm5, %v2152_v37  ;;  %v1289_v44 = vmax.f32 %v1264_v31, 0.0  ;;  %v8822_v45 = vpop.f32.mrb[87].mxu0  ;;  %v2223_v33 = vmax.f32 %v2211_v28, %v2221_v43  ;;  %v1572_v47 = vadd.f32 %v10614_v52, %v1571_v46  ;;  %v8867_v49 = vpop.f32.mrb[85].mxu1  ;;  %v2311_v28 = vld [vmem:[#allocation3 + $0x67] sm:$0xff] }
 0x19d   : > { %8964 = vmatmul.mubr.msk.bf16.gmra.mrb[132].mxu1 %vm1927_vm4, %v10753_v39  ;;  %v1574_v34 = vpop.f32.mrb[86].mxu1  ;;  %v3038_v45 = vld [vmem:[%s12508_s3 + $0x14] sm:$0xf] }
 0x19e   : > { %9054 = vmatmul.mubr.msk.bf16.gmra.mrb[176].mxu0 %vm1927_vm4, %v10654_v42  ;;  %8967 = vmatprep.mubr.msk.bf16.mxu1 %vm10023_vm0, %v10022_v1  ;;  %1310 = vst [vmem:[#allocation2 + $0x1f0] sm:$0xff] %v1289_v44  ;;  %2225 = vst.msk [vmem:[#allocation3 + $0xb9] sm:$0xff] %vm1927_vm4, %v2223_v33  ;;  %v1597_v48 = vmax.f32 %v1572_v47, 0.0  ;;  %v8868_v54 = vpop.f32.mrb[87].mxu1  ;;  %v2166_v42 = vld [vmem:[#allocation2 + $0x1ff] ss:$2 sm:$0xff] }
 0x19f   : > { %9057 = vmatprep.mubr.msk.bf16.mxu0 %vm10023_vm0, %v10022_v1  ;;  %v2156_v3 = vld [vmem:[#allocation2 + $0x1e1] ss:$2 sm:$0xff]  ;;  %v2173_v7 = vmax.f32 %v2166_v42, %v2170_v53  ;;  %v3061_v50 = vsel %vm2364_vm3, %v3038_v45, 0 }
 0x1a0   : > { %1618 = vst [vmem:[#allocation2 + $0x298] sm:$0xff] %v1597_v48  ;;  %v3485_v33 = vld [vmem:[%s12508_s3 + $0x20] sm:$0xf] }
 0x1a1   : > { %v1799_v58 = vpop.f32.mrb[88].mxu0  ;;  %v2216_v0 = vld [vmem:[#allocation2 + $0x287] ss:$2 sm:$0x3f]  ;;  %v3508_v55 = vsel %vm2364_vm3, %v3485_v33, 0 }
 0x1a2   : > { %v1800_v60 = vadd.f32 %v10614_v52, %v1799_v58  ;;  %v8873_v62 = vpop.f32.mrb[89].mxu0  ;;  %v2220_v6 = vld [vmem:[#allocation2 + $0x288] ss:$2 sm:$0x3f] }
 0x1a3   : > { %v1802_v5 = vpop.f32.mrb[90].mxu0  ;;  %v2222_v11 = vmax.f32 %v2216_v0, %v2220_v6  ;;  %v10770_v12 = vpop.f32.mrb[88].mxu1 }
 0x1a4   : > { %v1885_v8 = vmax.f32 %v1800_v60, 0.0  ;;  %v1803_v9 = vadd.f32 %v10614_v52, %v1802_v5  ;;  %v8874_v10 = vpop.f32.mrb[91].mxu0  ;;  %v8919_v18 = vpop.f32.mrb[89].mxu1 }
 0x1a5   : > { %8968 = vmatmul.mubr.msk.bf16.gmra.mrb[136].mxu1 %vm1927_vm4, %v10767_v2  ;;  %v2158_v13 = vld [vmem:[#allocation2 + $0x1f1] ss:$2 sm:$0x3f]  ;;  %v2160_v15 = vld [vmem:[#allocation2 + $0x1e2] ss:$2 sm:$0xff]  ;;  %v2224_v17 = vmax.f32 %v2212_v61, %v2222_v11  ;;  %v10780_v21 = vpop.f32.mrb[90].mxu1 }
 0x1a6   : > { %9058 = vmatmul.mubr.msk.bf16.gmra.mrb[180].mxu0 %vm1927_vm4, %v10667_v4  ;;  %8971 = vmatprep.mubr.msk.bf16.mxu1 %vm10023_vm0, %v10022_v1  ;;  %v2162_v35 = vld [vmem:[#allocation2 + $0x1f2] ss:$2 sm:$0x3f]  ;;  %v2163_v19 = vmax.f32 %v2156_v3, %v2160_v15  ;;  %1906 = vst [vmem:[#allocation2 + $0x2a0] sm:$0xff] %v1885_v8  ;;  %v1886_v20 = vmax.f32 %v1803_v9, 0.0  ;;  %v8920_v23 = vpop.f32.mrb[91].mxu1 }
 0x1a7   : > { %9061 = vmatprep.mubr.msk.bf16.mxu0 %vm10023_vm0, %v10022_v1  ;;  %v2164_v22 = vmax.f32 %v2158_v13, %v2162_v35  ;;  %v2312_v4 = vld [vmem:[#allocation3 + $0x6f] sm:$0xff]  ;;  %2226 = vst.msk [vmem:[#allocation3 + $0xc1] sm:$0x3f] %vm1985_vm5, %v2224_v17 }
 0x1a8   : > { %v2175_v25 = vmax.f32 %v2163_v19, %v2173_v7  ;;  %1907 = vst [vmem:[#allocation2 + $0x2a8] sm:$0xff] %v1886_v20  ;;  %v10785_v31 = vpack.c.bf16 %v2312_v4, %v2311_v28 }
 0x1a9   : > { %v2176_v26 = vmax.f32 %v2164_v22, %v2174_v16  ;;  %v1807_v27 = vpop.f32.mrb[92].mxu0 }
 0x1aa   : > { %2177 = vst.msk [vmem:[#allocation3 + $0x99] sm:$0xff] %vm1927_vm4, %v2175_v25  ;;  %v1808_v30 = vadd.f32 %v10614_v52, %v1807_v27  ;;  %v8877_v37 = vpop.f32.mrb[93].mxu0 }
 0x1ab   : > { %2178 = vst.msk [vmem:[#allocation3 + $0xa1] sm:$0x3f] %vm1985_vm5, %v2176_v26  ;;  %v1810_v36 = vpop.f32.mrb[94].mxu0 }
 0x1ac   : > { %v1887_v38 = vmax.f32 %v1808_v30, 0.0  ;;  %v1811_v41 = vadd.f32 %v10614_v52, %v1810_v36  ;;  %v8878_v43 = vpop.f32.mrb[95].mxu0 }
 0x1ad   : > { %8972 = vmatmul.mubr.msk.bf16.gmra.mrb[140].mxu1 %vm1927_vm4, %v10785_v31  ;;  %v2232_v53 = vld [vmem:[#allocation2 + $0x296] ss:$2 sm:$0xff] }
 0x1ae   : > { %9062 = vmatmul.mubr.msk.bf16.gmra.mrb[184].mxu0 %vm1927_vm4, %v2888_v32  ;;  %9007 = vmatprep.mubr.msk.bf16.mxu1 %vm10023_vm0, %v10022_v1  ;;  %1908 = vst [vmem:[#allocation2 + $0x2b0] sm:$0xff] %v1887_v38  ;;  %v1888_v44 = vmax.f32 %v1811_v41, 0.0 }
 0x1af   : > { %9097 = vmatprep.mubr.msk.bf16.mxu0 %vm10023_vm0, %v10022_v1  ;;  %v2230_v57 = vld [vmem:[#allocation2 + $0x2a5] ss:$2 sm:$0x3f] }
 0x1b0   : > { %1909 = vst [vmem:[#allocation2 + $0x2b8] sm:$0xff] %v1888_v44 }
 0x1b1   : > { %v1815_v46 = vpop.f32.mrb[96].mxu0 }
 0x1b2   : > { %v1816_v47 = vadd.f32 %v10614_v52, %v1815_v46  ;;  %v8881_v49 = vpop.f32.mrb[97].mxu0 }
 0x1b3   : > { %v1818_v34 = vpop.f32.mrb[98].mxu0 }
 0x1b4   : > { %v1889_v51 = vmax.f32 %v1816_v47, 0.0  ;;  %v1819_v48 = vadd.f32 %v10614_v52, %v1818_v34  ;;  %v8882_v54 = vpop.f32.mrb[99].mxu0 }
 0x1b5   : > { %9008 = vmatmul.mubr.msk.bf16.vlgmr.msra.gmra.mrb[144].mxu1 %vm1927_vm4, %v10708_v14  ;;  %v2228_v14 = vld [vmem:[#allocation2 + $0x295] ss:$2 sm:$0xff]  ;;  %v2234_v60 = vld [vmem:[#allocation2 + $0x2a6] ss:$2 sm:$0x3f] }
 0x1b6   : > { %9098 = vmatmul.mubr.msk.bf16.vlgmr.msra.gmra.mrb[188].mxu0 %vm1927_vm4, %v10724_v40  ;;  %9066 = vmatpush3.bf16.msra.mxu1 %v3061_v50  ;;  %1910 = vst [vmem:[#allocation2 + $0x2c0] sm:$0xff] %v1889_v51  ;;  %v1890_v42 = vmax.f32 %v1819_v48, 0.0  ;;  %v2235_v5 = vmax.f32 %v2228_v14, %v2232_v53  ;;  %v2236_v8 = vmax.f32 %v2230_v57, %v2234_v60  ;;  %v3177_v50 = vld [vmem:[#allocation3 + $0x7f] sm:$0xff]  ;;  %v3176_v48 = vld [vmem:[#allocation3 + $0x77] sm:$0xff] }
 0x1b7   : > { %9011 = vmatprep.mubr.msk.bf16.mxu1 %vm10023_vm0, %v10022_v1  ;;  %9101 = vmatprep.mubr.msk.bf16.mxu0 %vm10023_vm0, %v10022_v1 }
 0x1b8   : > { %9156 = vmatpush3.bf16.msra.mxu0 %v3508_v55  ;;  %1911 = vst [vmem:[#allocation2 + $0x2c8] sm:$0xff] %v1890_v42  ;;  %9125 = vmatprep.subr.bf16.mxu1 %v10022_v1 }
 0x1b9   : > { %9215 = vmatprep.subr.bf16.mxu0 %v10022_v1  ;;  %v1823_v56 = vpop.f32.mrb[100].mxu0 }
 0x1ba   : > { %v1824_v58 = vadd.f32 %v10614_v52, %v1823_v56  ;;  %v8885_v59 = vpop.f32.mrb[101].mxu0  ;;  %v10864_v56 = vpack.c.bf16 %v3177_v50, %v3176_v48 }
 0x1bb   : > { %v1826_v62 = vpop.f32.mrb[102].mxu0 }
 0x1bc   : > { %v1891_v61 = vmax.f32 %v1824_v58, 0.0  ;;  %v1827_v0 = vadd.f32 %v10614_v52, %v1826_v62  ;;  %v8886_v3 = vpop.f32.mrb[103].mxu0  ;;  %v3178_v62 = vld [vmem:[#allocation3 + $0x87] sm:$0xff] }
 0x1bd   : > { %9012 = vmatmul.mubr.msk.bf16.gmra.mrb[148].mxu1 %vm1927_vm4, %v10724_v40  ;;  %v2238_v6 = vld [vmem:[#allocation2 + $0x2b3] ss:$2 sm:$0xff]  ;;  %v2242_v7 = vld [vmem:[#allocation2 + $0x2b4] ss:$2 sm:$0xff] }
 0x1be   : > { %9102 = vmatmul.mubr.msk.bf16.gmra.mrb[192].mxu0 %vm1927_vm4, %v10738_v63  ;;  %9015 = vmatprep.mubr.msk.bf16.mxu1 %vm10023_vm0, %v10022_v1  ;;  %v2245_v9 = vmax.f32 %v2238_v6, %v2242_v7  ;;  %1912 = vst [vmem:[#allocation2 + $0x2d0] sm:$0xff] %v1891_v61  ;;  %v1892_v10 = vmax.f32 %v1827_v0, 0.0  ;;  %v3179_v61 = vld [vmem:[#allocation3 + $0x8f] sm:$0xff] }
 0x1bf   : > { %9105 = vmatprep.mubr.msk.bf16.mxu0 %vm10023_vm0, %v10022_v1  ;;  %v2240_v11 = vld [vmem:[#allocation2 + $0x2c3] ss:$2 sm:$0x3f]  ;;  %v2244_v13 = vld [vmem:[#allocation2 + $0x2c4] ss:$2 sm:$0x3f]  ;;  %v10876_v7 = vpack.c.bf16 %v3179_v61, %v3178_v62 }
 0x1c0   : > { %v2246_v15 = vmax.f32 %v2240_v11, %v2244_v13  ;;  %1913 = vst [vmem:[#allocation2 + $0x2d8] sm:$0xff] %v1892_v10  ;;  %v2247_v40 = vmax.f32 %v2235_v5, %v2245_v9 }
 0x1c1   : > { %v1831_v16 = vpop.f32.mrb[104].mxu0 }
 0x1c2   : > { %v2248_v18 = vmax.f32 %v2236_v8, %v2246_v15  ;;  %v1832_v35 = vadd.f32 %v10614_v52, %v1831_v16  ;;  %v8889_v19 = vpop.f32.mrb[105].mxu0  ;;  %2249 = vst.msk [vmem:[#allocation3 + $0xc9] sm:$0xff] %vm1927_vm4, %v2247_v40 }
 0x1c3   : > { %v1834_v20 = vpop.f32.mrb[106].mxu0  ;;  %v3465_v19 = vld [vmem:[#allocation3 + $0x31] sm:$0xff] }
 0x1c4   : > { %2250 = vst.msk [vmem:[#allocation3 + $0xd1] sm:$0x3f] %vm1985_vm5, %v2248_v18  ;;  %v1893_v17 = vmax.f32 %v1832_v35, 0.0  ;;  %v1835_v22 = vadd.f32 %v10614_v52, %v1834_v20  ;;  %v8890_v23 = vpop.f32.mrb[107].mxu0  ;;  %v10841_v52 = vld [vmem:[%s12507_s2] ss:$0 sm:$0xff] }
 0x1c5   : > { %9016 = vmatmul.mubr.msk.bf16.gmra.mrb[152].mxu1 %vm1927_vm4, %v10738_v63  ;;  %v3018_v18 = vld [vmem:[#allocation3 + $0x21] sm:$0xff]  ;;  %v3336_v35 = vld [vmem:[%s12508_s3 + $0x1c] sm:$0xf]  ;;  %v3464_v23 = vld [vmem:[#allocation3 + $0x29] sm:$0xff] }
 0x1c6   : > { %9106 = vmatmul.mubr.msk.bf16.gmra.mrb[196].mxu0 %vm1927_vm4, %v10753_v39  ;;  %9019 = vmatprep.mubr.msk.bf16.mxu1 %vm10023_vm0, %v10022_v1  ;;  %1914 = vst [vmem:[#allocation2 + $0x2e0] sm:$0xff] %v1893_v17  ;;  %v1894_v4 = vmax.f32 %v1835_v22, 0.0  ;;  %v3683_v17 = vld [vmem:[%s12508_s3] sm:$0xf] }
 0x1c7   : > { %9109 = vmatprep.mubr.msk.bf16.mxu0 %vm10023_vm0, %v10022_v1  ;;  %v2252_v38 = vld [vmem:[#allocation2 + $0x2d1] ss:$2 sm:$0xff]  ;;  %v3017_v22 = vld [vmem:[#allocation3 + $0x19] sm:$0xff] }
 0x1c8   : > { %1915 = vst [vmem:[#allocation2 + $0x2e8] sm:$0xff] %v1894_v4 }
 0x1c9   : > { %v1839_v24 = vpop.f32.mrb[108].mxu0 }
 0x1ca   : > { %v1840_v63 = vadd.f32 %v10841_v52, %v1839_v24  ;;  %v8893_v25 = vpop.f32.mrb[109].mxu0 }
 0x1cb   : > { %v1842_v26 = vpop.f32.mrb[110].mxu0  ;;  %v3359_v25 = vsel %vm2364_vm3, %v3336_v35, 0  ;;  %v3472_v35 = vld [vmem:[#allocation3 + $0x69] sm:$0xff] }
 0x1cc   : > { %v1895_v27 = vmax.f32 %v1840_v63, 0.0  ;;  %v1843_v28 = vadd.f32 %v10841_v52, %v1842_v26  ;;  %v8894_v29 = vpop.f32.mrb[111].mxu0  ;;  %v3031_v63 = vpack.c.bf16 %v3018_v18, %v3017_v22  ;;  %v3478_v26 = vpack.c.bf16 %v3465_v19, %v3464_v23  ;;  %v3473_v18 = vld [vmem:[#allocation3 + $0x71] sm:$0xff] }
 0x1cd   : > { %9020 = vmatmul.mubr.msk.bf16.gmra.mrb[156].mxu1 %vm1927_vm4, %v10753_v39  ;;  %v2256_v41 = vld [vmem:[#allocation2 + $0x2d2] ss:$2 sm:$0xff]  ;;  %v3482_v19 = vpack.c.bf16 %v3473_v18, %v3472_v35 }
 0x1ce   : > { %9110 = vmatmul.mubr.msk.bf16.gmra.mrb[200].mxu0 %vm1927_vm4, %v10767_v2  ;;  %9023 = vmatprep.mubr.msk.bf16.mxu1 %vm10023_vm0, %v10022_v1  ;;  %1916 = vst [vmem:[#allocation2 + $0x2f0] sm:$0xff] %v1895_v27  ;;  %v1896_v30 = vmax.f32 %v1843_v28, 0.0  ;;  %v2259_v46 = vmax.f32 %v2252_v38, %v2256_v41  ;;  %v3467_v38 = vld [vmem:[#allocation3 + $0x41] sm:$0xff] }
 0x1cf   : > { %9113 = vmatprep.mubr.msk.bf16.mxu0 %vm10023_vm0, %v10022_v1  ;;  %v2258_v14 = vld [vmem:[#allocation2 + $0x2e2] ss:$2 sm:$0x3f] }
 0x1d0   : > { %1917 = vst [vmem:[#allocation2 + $0x2f8] sm:$0xff] %v1896_v30 }
 0x1d1   : > { %v1847_v37 = vpop.f32.mrb[112].mxu0 }
 0x1d2   : > { %v1848_v32 = vadd.f32 %v10841_v52, %v1847_v37  ;;  %v8897_v36 = vpop.f32.mrb[113].mxu0  ;;  %v3841_v37 = vsel %vm2364_vm3, %v3683_v17, 0  ;;  %v3474_v17 = vld [vmem:[#allocation3 + $0x79] sm:$0xff] }
 0x1d3   : > { %v1850_v43 = vpop.f32.mrb[114].mxu0  ;;  %v3466_v36 = vld [vmem:[#allocation3 + $0x39] sm:$0xff] }
 0x1d4   : > { %v1897_v39 = vmax.f32 %v1848_v32, 0.0  ;;  %v1851_v44 = vadd.f32 %v10841_v52, %v1850_v43  ;;  %v8898_v45 = vpop.f32.mrb[115].mxu0 }
 0x1d5   : > { %9024 = vmatmul.mubr.msk.bf16.gmra.mrb[160].mxu1 %vm1927_vm4, %v10767_v2  ;;  %v2254_v2 = vld [vmem:[#allocation2 + $0x2e1] ss:$2 sm:$0x3f] }
 0x1d6   : > { %9114 = vmatmul.mubr.msk.bf16.gmra.mrb[204].mxu0 %vm1927_vm4, %v10785_v31  ;;  %9027 = vmatprep.mubr.msk.bf16.mxu1 %vm10023_vm0, %v10022_v1  ;;  %1918 = vst [vmem:[#allocation2 + $0x300] sm:$0xff] %v1897_v39  ;;  %v1898_v33 = vmax.f32 %v1851_v44, 0.0  ;;  %v2260_v60 = vmax.f32 %v2254_v2, %v2258_v14  ;;  %v3469_v2 = vld [vmem:[#allocation3 + $0x51] sm:$0xff] }
 0x1d7   : > { %9117 = vmatprep.mubr.msk.bf16.mxu0 %vm10023_vm0, %v10022_v1  ;;  %v2262_v47 = vld [vmem:[#allocation2 + $0x2ef] ss:$2 sm:$0xff]  ;;  %v2266_v49 = vld [vmem:[#allocation2 + $0x2f0] ss:$2 sm:$0xff] }
 0x1d8   : > { %v2269_v34 = vmax.f32 %v2262_v47, %v2266_v49  ;;  %1919 = vst [vmem:[#allocation2 + $0x308] sm:$0xff] %v1898_v33 }
 0x1d9   : > { %v1855_v51 = vpop.f32.mrb[116].mxu0 }
 0x1da   : > { %v2271_v54 = vmax.f32 %v2259_v46, %v2269_v34  ;;  %v1856_v55 = vadd.f32 %v10841_v52, %v1855_v51  ;;  %v8901_v42 = vpop.f32.mrb[117].mxu0  ;;  %v3479_v46 = vpack.c.bf16 %v3467_v38, %v3466_v36  ;;  %v3705_v36 = vld [vmem:[%s12508_s3 + $0x4] sm:$0xf]  ;;  %v4102_v38 = vld [vmem:[%s12508_s3 + $0xc] sm:$0xf] }
 0x1db   : > { %v1858_v53 = vpop.f32.mrb[118].mxu0 }
 0x1dc   : > { %2273 = vst.msk [vmem:[#allocation3 + $0xd9] sm:$0xff] %vm1927_vm4, %v2271_v54  ;;  %v1899_v57 = vmax.f32 %v1856_v55, 0.0  ;;  %v1859_v58 = vadd.f32 %v10841_v52, %v1858_v53  ;;  %v8902_v59 = vpop.f32.mrb[119].mxu0 }
 0x1dd   : > { %9028 = vmatmul.mubr.msk.bf16.gmra.mrb[164].mxu1 %vm1927_vm4, %v10785_v31 }
 0x1de   : > { %9118 = vmatmul.mubr.msk.bf16.gmra.mrb[208].mxu0 %vm1927_vm4, %v10864_v56  ;;  %9031 = vmatprep.mubr.msk.bf16.mxu1 %vm10023_vm0, %v10022_v1  ;;  %1920 = vst [vmem:[#allocation2 + $0x310] sm:$0xff] %v1899_v57  ;;  %v1900_v0 = vmax.f32 %v1859_v58, 0.0  ;;  %v3468_v57 = vld [vmem:[#allocation3 + $0x49] sm:$0xff] }
 0x1df   : > { %9121 = vmatprep.mubr.msk.bf16.mxu0 %vm10023_vm0, %v10022_v1  ;;  %v2264_v3 = vld [vmem:[#allocation2 + $0x2ff] ss:$2 sm:$0x3f]  ;;  %v2268_v5 = vld [vmem:[#allocation2 + $0x300] ss:$2 sm:$0x3f] }
 0x1e0   : > { %v2270_v6 = vmax.f32 %v2264_v3, %v2268_v5  ;;  %1921 = vst [vmem:[#allocation2 + $0x318] sm:$0xff] %v1900_v0 }
 0x1e1   : > { %v1863_v31 = vpop.f32.mrb[120].mxu0 }
 0x1e2   : > { %v2272_v8 = vmax.f32 %v2260_v60, %v2270_v6  ;;  %v1864_v9 = vadd.f32 %v10841_v52, %v1863_v31  ;;  %v8905_v10 = vpop.f32.mrb[121].mxu0  ;;  %v3480_v60 = vpack.c.bf16 %v3469_v2, %v3468_v57 }
 0x1e3   : > { %v1866_v11 = vpop.f32.mrb[122].mxu0 }
 0x1e4   : > { %2274 = vst.msk [vmem:[#allocation3 + $0xe1] sm:$0x3f] %vm1985_vm5, %v2272_v8  ;;  %v1901_v13 = vmax.f32 %v1864_v9, 0.0  ;;  %v1867_v15 = vadd.f32 %v10841_v52, %v1866_v11  ;;  %v8906_v40 = vpop.f32.mrb[123].mxu0  ;;  %v3471_v9 = vld [vmem:[#allocation3 + $0x61] sm:$0xff] }
 0x1e5   : > { %9032 = vmatmul.mubr.msk.bf16.gmra.mrb[168].mxu1 %vm1927_vm4, %v10864_v56 }
 0x1e6   : > { %9122 = vmatmul.mubr.msk.bf16.gmra.mrb[212].mxu0 %vm1927_vm4, %v10876_v7  ;;  %9067 = vmatprep.mubr.msk.bf16.mxu1 %vm10023_vm0, %v10022_v1  ;;  %1922 = vst [vmem:[#allocation2 + $0x320] sm:$0xff] %v1901_v13  ;;  %v1902_v16 = vmax.f32 %v1867_v15, 0.0  ;;  %v3470_v13 = vld [vmem:[#allocation3 + $0x59] sm:$0xff] }
 0x1e7   : > { %9157 = vmatprep.mubr.msk.bf16.mxu0 %vm10023_vm0, %v10022_v1  ;;  %v2276_v44 = vld [vmem:[#allocation2 + $0x30d] ss:$2 sm:$0xff]  ;;  %v2280_v45 = vld [vmem:[#allocation2 + $0x30e] ss:$2 sm:$0xff]  ;;  %v3481_v40 = vpack.c.bf16 %v3471_v9, %v3470_v13 }
 0x1e8   : > { %1923 = vst [vmem:[#allocation2 + $0x328] sm:$0xff] %v1902_v16  ;;  %v2283_v50 = vmax.f32 %v2276_v44, %v2280_v45  ;;  %v4125_v44 = vsel %vm2364_vm3, %v4102_v38, 0  ;;  %v3317_v45 = vld [vmem:[#allocation3 + $0x38] sm:$0xff] }
 0x1e9   : > { %v1871_v20 = vpop.f32.mrb[124].mxu0 }
 0x1ea   : > { %v1872_v4 = vadd.f32 %v10841_v52, %v1871_v20  ;;  %v8909_v24 = vpop.f32.mrb[125].mxu0  ;;  %v3475_v20 = vld [vmem:[#allocation3 + $0x81] sm:$0xff] }
 0x1eb   : > { %v1874_v27 = vpop.f32.mrb[126].mxu0  ;;  %v10946_v22 = vpack.c.bf16 %v3475_v20, %v3474_v17  ;;  %v3324_v20 = vld [vmem:[#allocation3 + $0x70] sm:$0xff] }
 0x1ec   : > { %v1903_v28 = vmax.f32 %v1872_v4, 0.0  ;;  %v1875_v29 = vadd.f32 %v10841_v52, %v1874_v27  ;;  %v8910_v30 = vpop.f32.mrb[127].mxu0  ;;  %v3670_v17 = vld [vmem:[#allocation3 + $0xb7] sm:$0xff] }
 0x1ed   : > { %9068 = vmatmul.mubr.msk.bf16.vlgmr.msra.gmra.mrb[172].mxu1 %vm1927_vm4, %v3031_v63  ;;  %v2278_v51 = vld [vmem:[#allocation2 + $0x31d] ss:$2 sm:$0x3f] }
 0x1ee   : > { %9158 = vmatmul.mubr.msk.bf16.vlgmr.msra.gmra.mrb[216].mxu0 %vm1927_vm4, %v3478_v26  ;;  %9126 = vmatpush3.bf16.msra.mxu1 %v3359_v25  ;;  %1924 = vst [vmem:[#allocation2 + $0x330] sm:$0xff] %v1903_v28  ;;  %v1904_v32 = vmax.f32 %v1875_v29, 0.0  ;;  %v3476_v25 = vld [vmem:[#allocation3 + $0x89] sm:$0xff] }
 0x1ef   : > { %9071 = vmatprep.mubr.msk.bf16.mxu1 %vm10023_vm0, %v10022_v1  ;;  %9161 = vmatprep.mubr.msk.bf16.mxu0 %vm10023_vm0, %v10022_v1  ;;  %v2282_v54 = vld [vmem:[#allocation2 + $0x31e] ss:$2 sm:$0x3f] }
 0x1f0   : > { %9216 = vmatpush3.bf16.msra.mxu0 %v3841_v37  ;;  %1925 = vst [vmem:[#allocation2 + $0x338] sm:$0xff] %v1904_v32  ;;  %9185 = vmatprep.subr.bf16.mxu1 %v10022_v1  ;;  %v2284_v61 = vmax.f32 %v2278_v51, %v2282_v54  ;;  %v3316_v32 = vld [vmem:[#allocation3 + $0x30] sm:$0xff]  ;;  %v3319_v54 = vld [vmem:[#allocation3 + $0x48] sm:$0xff] }
 0x1f1   : > { %9275 = vmatprep.subr.bf16.mxu0 %v10022_v1  ;;  %v1879_v41 = vpop.f32.mrb[128].mxu0 }
 0x1f2   : > { %v1880_v43 = vadd.f32 %v10841_v52, %v1879_v41  ;;  %v8913_v39 = vpop.f32.mrb[129].mxu0  ;;  %v3315_v41 = vld [vmem:[#allocation3 + $0x28] sm:$0xff] }
 0x1f3   : > { %v1882_v33 = vpop.f32.mrb[130].mxu0  ;;  %v3728_v39 = vsel %vm2364_vm3, %v3705_v36, 0 }
 0x1f4   : > { %v1905_v47 = vmax.f32 %v1880_v43, 0.0  ;;  %v8914_v49 = vpop.f32.mrb[131].mxu0  ;;  %v3329_v43 = vpack.c.bf16 %v3316_v32, %v3315_v41 }
 0x1f5   : > { %9072 = vmatmul.mubr.msk.bf16.gmra.mrb[176].mxu1 %vm1927_vm4, %v3478_v26  ;;  %v3477_v26 = vld [vmem:[#allocation3 + $0x91] sm:$0xff] }
 0x1f6   : > { %9162 = vmatmul.mubr.msk.bf16.gmra.mrb[220].mxu0 %vm1927_vm4, %v3479_v46  ;;  %1926 = vst [vmem:[#allocation2 + $0x340] sm:$0xff] %v1905_v47  ;;  %9075 = vmatprep.mubr.msk.bf16.mxu1 %vm10023_vm0, %v10022_v1  ;;  %v10963_v37 = vpack.c.bf16 %v3477_v26, %v3476_v25  ;;  %v3320_v49 = vld [vmem:[#allocation3 + $0x50] sm:$0xff] }
 0x1f7   : > { %9165 = vmatprep.mubr.msk.bf16.mxu0 %vm10023_vm0, %v10022_v1  ;;  %v2286_v52 = vld [vmem:[#allocation2 + $0x32b] ss:$2 sm:$0xff]  ;;  %v2290_v34 = vld [vmem:[#allocation2 + $0x32c] ss:$2 sm:$0xff]  ;;  %v3331_v57 = vpack.c.bf16 %v3320_v49, %v3319_v54 }
 0x1f8   : > { %v2293_v48 = vmax.f32 %v2286_v52, %v2290_v34  ;;  %v3667_v52 = vld [vmem:[#allocation3 + $0x9f] sm:$0xff] }
 0x1f9   : > { %v10914_v55 = vpop.f32.mrb[92].mxu1  ;;  %v10916_v42 = vpop.f32.mrb[132].mxu0 }
 0x1fa   : > { %v2295_v14 = vmax.f32 %v2283_v50, %v2293_v48  ;;  %v8923_v53 = vpop.f32.mrb[93].mxu1  ;;  %v8979_v58 = vpop.f32.mrb[133].mxu0  ;;  %v3666_v50 = vld [vmem:[#allocation3 + $0x97] sm:$0xff] }
 0x1fb   : > { %v10918_v59 = vpop.f32.mrb[94].mxu1  ;;  %v10920_v62 = vpop.f32.mrb[134].mxu0  ;;  %v11005_v58 = vpack.c.bf16 %v3667_v52, %v3666_v50 }
 0x1fc   : > { %2297 = vst.msk [vmem:[#allocation3 + $0xe9] sm:$0xff] %vm1927_vm4, %v2295_v14  ;;  %v8924_v0 = vpop.f32.mrb[95].mxu1  ;;  %v8980_v3 = vpop.f32.mrb[135].mxu0 }
 0x1fd   : > { %v2288_v5 = vld [vmem:[#allocation2 + $0x33b] ss:$2 sm:$0x3f]  ;;  %v2292_v6 = vld [vmem:[#allocation2 + $0x33c] ss:$2 sm:$0x3f]  ;;  %9076 = vmatmul.mubr.msk.bf16.gmra.mrb[180].mxu1 %vm1927_vm4, %v3479_v46 }
 0x1fe   : > { %9166 = vmatmul.mubr.msk.bf16.gmra.mrb[224].mxu0 %vm1927_vm4, %v3480_v60  ;;  %v2294_v31 = vmax.f32 %v2288_v5, %v2292_v6  ;;  %9079 = vmatprep.mubr.msk.bf16.mxu1 %vm10023_vm0, %v10022_v1  ;;  %v3318_v46 = vld [vmem:[#allocation3 + $0x40] sm:$0xff]  ;;  %v3669_v5 = vld [vmem:[#allocation3 + $0xaf] sm:$0xff] }
 0x1ff   : > { %9169 = vmatprep.mubr.msk.bf16.mxu0 %vm10023_vm0, %v10022_v1  ;;  %v3330_v33 = vpack.c.bf16 %v3318_v46, %v3317_v45  ;;  %v3322_v0 = vld [vmem:[#allocation3 + $0x60] sm:$0xff]  ;;  %v3673_v46 = vld [vmem:[#allocation3 + $0xcf] sm:$0xff] }
 0x200   : > { %v2296_v8 = vmax.f32 %v2284_v61, %v2294_v31  ;;  %v3668_v3 = vld [vmem:[#allocation3 + $0xa7] sm:$0xff] }
 0x201   : > { %v10929_v10 = vpop.f32.mrb[136].mxu0  ;;  %v11022_v18 = vpack.c.bf16 %v3669_v5, %v3668_v3  ;;  %v3672_v45 = vld [vmem:[#allocation3 + $0xc7] sm:$0xff] }
 0x202   : > { %2298 = vst.msk [vmem:[#allocation3 + $0xf1] sm:$0x3f] %vm1985_vm5, %v2296_v8  ;;  %v8983_v11 = vpop.f32.mrb[137].mxu0 }
 0x203   : > { %v10932_v15 = vpop.f32.mrb[138].mxu0  ;;  %v3321_v11 = vld [vmem:[#allocation3 + $0x58] sm:$0xff] }
 0x204   : > { %v8984_v16 = vpop.f32.mrb[139].mxu0 }
 0x205   : > { %9080 = vmatmul.mubr.msk.bf16.gmra.mrb[184].mxu1 %vm1927_vm4, %v3480_v60  ;;  %v3332_v16 = vpack.c.bf16 %v3322_v0, %v3321_v11  ;;  %v3675_v0 = vld [vmem:[#allocation3 + $0xdf] sm:$0xff] }
 0x206   : > { %9170 = vmatmul.mubr.msk.bf16.gmra.mrb[228].mxu0 %vm1927_vm4, %v3481_v40  ;;  %9083 = vmatprep.mubr.msk.bf16.mxu1 %vm10023_vm0, %v10022_v1 }
 0x207   : > { %9173 = vmatprep.mubr.msk.bf16.mxu0 %vm10023_vm0, %v10022_v1 }
 0x20d   : > { %9084 = vmatmul.mubr.msk.bf16.gmra.mrb[188].mxu1 %vm1927_vm4, %v3481_v40 }
 0x20e   : > { %9174 = vmatmul.mubr.msk.bf16.gmra.mrb[232].mxu0 %vm1927_vm4, %v3482_v19  ;;  %9087 = vmatprep.mubr.msk.bf16.mxu1 %vm10023_vm0, %v10022_v1 }
 0x20f   : > { %9177 = vmatprep.mubr.msk.bf16.mxu0 %vm10023_vm0, %v10022_v1 }
 0x215   : > { %9088 = vmatmul.mubr.msk.bf16.gmra.mrb[192].mxu1 %vm1927_vm4, %v3482_v19 }
 0x216   : > { %9178 = vmatmul.mubr.msk.bf16.gmra.mrb[236].mxu0 %vm1927_vm4, %v10946_v22  ;;  %9091 = vmatprep.mubr.msk.bf16.mxu1 %vm10023_vm0, %v10022_v1 }
 0x217   : > { %9181 = vmatprep.mubr.msk.bf16.mxu0 %vm10023_vm0, %v10022_v1  ;;  %v10955_v23 = vpop.f32.mrb[96].mxu1 }
 0x218   : > { %v10957_v4 = vpop.f32.mrb[140].mxu0  ;;  %v8927_v24 = vpop.f32.mrb[97].mxu1 }
 0x219   : > { %v8987_v63 = vpop.f32.mrb[141].mxu0  ;;  %v10959_v27 = vpop.f32.mrb[98].mxu1  ;;  %v3671_v24 = vld [vmem:[#allocation3 + $0xbf] sm:$0xff] }
 0x21a   : > { %v10961_v28 = vpop.f32.mrb[142].mxu0  ;;  %v8928_v29 = vpop.f32.mrb[99].mxu1  ;;  %v11039_v41 = vpack.c.bf16 %v3671_v24, %v3670_v17 }
 0x21b   : > { %v8988_v30 = vpop.f32.mrb[143].mxu0 }
 0x21c   : > { %v3323_v30 = vld [vmem:[#allocation3 + $0x68] sm:$0xff] }
 0x21d   : > { %9092 = vmatmul.mubr.msk.bf16.gmra.mrb[196].mxu1 %vm1927_vm4, %v10946_v22  ;;  %v3333_v38 = vpack.c.bf16 %v3324_v20, %v3323_v30 }
 0x21e   : > { %9182 = vmatmul.mubr.msk.bf16.gmra.mrb[240].mxu0 %vm1927_vm4, %v10963_v37  ;;  %9127 = vmatprep.mubr.msk.bf16.mxu1 %vm10023_vm0, %v10022_v1 }
 0x21f   : > { %9217 = vmatprep.mubr.msk.bf16.mxu0 %vm10023_vm0, %v10022_v1 }
 0x225   : > { %9128 = vmatmul.mubr.msk.bf16.vlgmr.msra.gmra.mrb[200].mxu1 %vm1927_vm4, %v3329_v43 }
 0x226   : > { %9218 = vmatmul.mubr.msk.bf16.vlgmr.msra.gmra.mrb[244].mxu0 %vm1927_vm4, %v10864_v56  ;;  %9186 = vmatpush3.bf16.msra.mxu1 %v3728_v39 }
 0x227   : > { %9131 = vmatprep.mubr.msk.bf16.mxu1 %vm10023_vm0, %v10022_v1  ;;  %9221 = vmatprep.mubr.msk.bf16.mxu0 %vm10023_vm0, %v10022_v1 }
 0x228   : > { %9276 = vmatpush3.bf16.msra.mxu0 %v4125_v44  ;;  %9245 = vmatprep.subr.bf16.mxu1 %v10022_v1  ;;  %v3326_v44 = vld [vmem:[#allocation3 + $0x80] sm:$0xff] }
 0x229   : > { %9335 = vmatprep.subr.bf16.mxu0 %v10022_v1 }
 0x22d   : > { %9132 = vmatmul.mubr.msk.bf16.gmra.mrb[204].mxu1 %vm1927_vm4, %v3330_v33 }
 0x22e   : > { %9222 = vmatmul.mubr.msk.bf16.gmra.mrb[248].mxu0 %vm1927_vm4, %v10876_v7  ;;  %9135 = vmatprep.mubr.msk.bf16.mxu1 %vm10023_vm0, %v10022_v1 }
 0x22f   : > { %9225 = vmatprep.mubr.msk.bf16.mxu0 %vm10023_vm0, %v10022_v1 }
 0x230   : > { %v10997_v56 = vpop.f32.mrb[100].mxu1 }
 0x231   : > { %v10999_v47 = vpop.f32.mrb[144].mxu0  ;;  %v8931_v34 = vpop.f32.mrb[101].mxu1 }
 0x232   : > { %v8991_v51 = vpop.f32.mrb[145].mxu0  ;;  %v11001_v48 = vpop.f32.mrb[102].mxu1  ;;  %v3325_v34 = vld [vmem:[#allocation3 + $0x78] sm:$0xff] }
 0x233   : > { %v11003_v2 = vpop.f32.mrb[146].mxu0  ;;  %v8932_v14 = vpop.f32.mrb[103].mxu1 }
 0x234   : > { %v8992_v53 = vpop.f32.mrb[147].mxu0  ;;  %v3334_v14 = vpack.c.bf16 %v3326_v44, %v3325_v34 }
 0x235   : > { %9136 = vmatmul.mubr.msk.bf16.gmra.mrb[208].mxu1 %vm1927_vm4, %v3331_v57  ;;  %v11056_v53 = vpack.c.bf16 %v3673_v46, %v3672_v45  ;;  %v3674_v57 = vld [vmem:[#allocation3 + $0xd7] sm:$0xff] }
 0x236   : > { %9226 = vmatmul.mubr.msk.bf16.gmra.mrb[252].mxu0 %vm1927_vm4, %v11005_v58  ;;  %9139 = vmatprep.mubr.msk.bf16.mxu1 %vm10023_vm0, %v10022_v1 }
 0x237   : > { %9229 = vmatprep.mubr.msk.bf16.mxu0 %vm10023_vm0, %v10022_v1 }
 0x238   : > { %v11014_v60 = vpop.f32.mrb[104].mxu1 }
 0x239   : > { %v11016_v61 = vpop.f32.mrb[148].mxu0  ;;  %v8935_v6 = vpop.f32.mrb[105].mxu1 }
 0x23a   : > { %v8995_v31 = vpop.f32.mrb[149].mxu0  ;;  %v11018_v8 = vpop.f32.mrb[106].mxu1  ;;  %v3327_v6 = vld [vmem:[#allocation3 + $0x88] sm:$0xff] }
 0x23b   : > { %v11020_v9 = vpop.f32.mrb[150].mxu0  ;;  %v8936_v13 = vpop.f32.mrb[107].mxu1  ;;  %v3328_v31 = vld [vmem:[#allocation3 + $0x90] sm:$0xff] }
 0x23c   : > { %v8996_v40 = vpop.f32.mrb[151].mxu0  ;;  %v11073_v30 = vpack.c.bf16 %v3328_v31, %v3327_v6 }
 0x23d   : > { %9140 = vmatmul.mubr.msk.bf16.gmra.mrb[212].mxu1 %vm1927_vm4, %v3332_v16  ;;  %v11068_v16 = vpack.c.bf16 %v3675_v0, %v3674_v57 }
 0x23e   : > { %9230 = vmatmul.mubr.msk.bf16.gmra.mrb[0].mxu0 %vm1927_vm4, %v11022_v18  ;;  %9143 = vmatprep.mubr.msk.bf16.mxu1 %vm10023_vm0, %v10022_v1 }
 0x23f   : > { %9233 = vmatprep.mubr.msk.bf16.mxu0 %vm10023_vm0, %v10022_v1 }
 0x240   : > { %v11031_v35 = vpop.f32.mrb[108].mxu1 }
 0x241   : > { %v11033_v19 = vpop.f32.mrb[152].mxu0  ;;  %v8939_v63 = vpop.f32.mrb[109].mxu1 }
 0x242   : > { %v8999_v25 = vpop.f32.mrb[153].mxu0  ;;  %v11035_v26 = vpop.f32.mrb[110].mxu1 }
 0x243   : > { %v11037_v29 = vpop.f32.mrb[154].mxu0  ;;  %v8940_v32 = vpop.f32.mrb[111].mxu1 }
 0x244   : > { %v9000_v36 = vpop.f32.mrb[155].mxu0 }
 0x245   : > { %9144 = vmatmul.mubr.msk.bf16.gmra.mrb[216].mxu1 %vm1927_vm4, %v3333_v38 }
 0x246   : > { %9234 = vmatmul.mubr.msk.bf16.gmra.mrb[4].mxu0 %vm1927_vm4, %v11039_v41  ;;  %9147 = vmatprep.mubr.msk.bf16.mxu1 %vm10023_vm0, %v10022_v1 }
 0x247   : > { %9237 = vmatprep.mubr.msk.bf16.mxu0 %vm10023_vm0, %v10022_v1 }
 0x248   : > { %v11048_v43 = vpop.f32.mrb[112].mxu1 }
 0x249   : > { %v11050_v39 = vpop.f32.mrb[156].mxu0  ;;  %v8943_v33 = vpop.f32.mrb[113].mxu1 }
 0x24a   : > { %v9003_v49 = vpop.f32.mrb[157].mxu0  ;;  %v11052_v50 = vpop.f32.mrb[114].mxu1 }
 0x24b   : > { %v11054_v52 = vpop.f32.mrb[158].mxu0  ;;  %v8944_v51 = vpop.f32.mrb[115].mxu1 }
 0x24c   : > { %v9004_v54 = vpop.f32.mrb[159].mxu0 }
 0x24d   : > { %9148 = vmatmul.mubr.msk.bf16.gmra.mrb[220].mxu1 %vm1927_vm4, %v3334_v14 }
 0x24e   : > { %9238 = vmatmul.mubr.msk.bf16.gmra.mrb[8].mxu0 %vm1927_vm4, %v11056_v53  ;;  %9151 = vmatprep.mubr.msk.bf16.mxu1 %vm10023_vm0, %v10022_v1 }
 0x24f   : > { %9241 = vmatprep.mubr.msk.bf16.mxu0 %vm10023_vm0, %v10022_v1 }
 0x250   : > { %v2515_v3 = vpop.f32.mrb[116].mxu1 }
 0x251   : > { %v11065_v5 = vpop.f32.mrb[160].mxu0  ;;  %v2516_v11 = vadd.f32 %v2515_v3, %v10770_v12  ;;  %v8949_v13 = vpop.f32.mrb[117].mxu1 }
 0x252   : > { %v9039_v40 = vpop.f32.mrb[161].mxu0  ;;  %v2518_v20 = vpop.f32.mrb[118].mxu1 }
 0x253   : > { %v11070_v17 = vpop.f32.mrb[162].mxu0  ;;  %v2519_v24 = vadd.f32 %v2518_v20, %v10780_v21  ;;  %v8950_v63 = vpop.f32.mrb[119].mxu1  ;;  %v11076_v32 = vadd.f32 %v10916_v42, %v2516_v11  ;;  %v3953_v42 = vld [vmem:[%s12508_s3 + $0x8] sm:$0xf] }
 0x254   : > { %v9040_v25 = vpop.f32.mrb[163].mxu0  ;;  %v3976_v54 = vsel %vm2364_vm3, %v3953_v42, 0 }
 0x255   : > { %9152 = vmatmul.mubr.msk.bf16.gmra.mrb[224].mxu1 %vm1927_vm4, %v11073_v30  ;;  %v11083_v12 = vadd.f32 %v10920_v62, %v2519_v24  ;;  %v4400_v62 = vld [vmem:[%s12508_s3 + $0x14] sm:$0xf]  ;;  %v3689_v24 = vld [vmem:[#allocation3 + $0xa0] sm:$0xff] }
 0x256   : > { %9242 = vmatmul.mubr.msk.bf16.gmra.mrb[12].mxu0 %vm1927_vm4, %v11068_v16  ;;  %9187 = vmatprep.mubr.msk.bf16.mxu1 %vm10023_vm0, %v10022_v1 }
 0x257   : > { %9277 = vmatprep.mubr.msk.bf16.mxu0 %vm10023_vm0, %v10022_v1 }
 0x258   : > { %v2523_v21 = vpop.f32.mrb[120].mxu1 }
 0x259   : > { %v11089_v36 = vpop.f32.mrb[164].mxu0  ;;  %v2524_v38 = vadd.f32 %v2523_v21, %v10914_v55  ;;  %v8953_v44 = vpop.f32.mrb[121].mxu1  ;;  %v4423_v55 = vsel %vm2364_vm3, %v4400_v62, 0 }
 0x25a   : > { %v9043_v45 = vpop.f32.mrb[165].mxu0  ;;  %v2526_v46 = vpop.f32.mrb[122].mxu1 }
 0x25b   : > { %v11098_v33 = vpop.f32.mrb[166].mxu0  ;;  %v2527_v49 = vadd.f32 %v2526_v46, %v10918_v59  ;;  %v8954_v34 = vpop.f32.mrb[123].mxu1  ;;  %v11103_v57 = vadd.f32 %v10929_v10, %v2524_v38 }
 0x25c   : > { %v9044_v51 = vpop.f32.mrb[167].mxu0 }
 0x25d   : > { %9188 = vmatmul.mubr.msk.bf16.vlgmr.msra.gmra.mrb[228].mxu1 %vm1927_vm4, %v3334_v14  ;;  %v11110_v0 = vadd.f32 %v10932_v15, %v2527_v49  ;;  %v3691_v49 = vld [vmem:[#allocation3 + $0xb0] sm:$0xff] }
 0x25e   : > { %9278 = vmatmul.mubr.msk.bf16.vlgmr.msra.gmra.mrb[16].mxu0 %vm1927_vm4, %v10876_v7  ;;  %9246 = vmatpush3.bf16.msra.mxu1 %v3976_v54 }
 0x25f   : > { %9191 = vmatprep.mubr.msk.bf16.mxu1 %vm10023_vm0, %v10022_v1  ;;  %9281 = vmatprep.mubr.msk.bf16.mxu0 %vm10023_vm0, %v10022_v1 }
 0x260   : > { %9336 = vmatpush3.bf16.msra.mxu0 %v4423_v55  ;;  %v2531_v59 = vpop.f32.mrb[124].mxu1  ;;  %9305 = vmatprep.subr.bf16.mxu1 %v10022_v1 }
 0x261   : > { %v11116_v10 = vpop.f32.mrb[168].mxu0  ;;  %9395 = vmatprep.subr.bf16.mxu0 %v10022_v1  ;;  %v2532_v7 = vadd.f32 %v2531_v59, %v10955_v23  ;;  %v8957_v14 = vpop.f32.mrb[125].mxu1 }
 0x262   : > { %v9047_v15 = vpop.f32.mrb[169].mxu0  ;;  %v2534_v3 = vpop.f32.mrb[126].mxu1 }
 0x263   : > { %v11121_v6 = vpop.f32.mrb[170].mxu0  ;;  %v2535_v31 = vadd.f32 %v2534_v3, %v10959_v27  ;;  %v8958_v11 = vpop.f32.mrb[127].mxu1  ;;  %v11125_v40 = vadd.f32 %v10957_v4, %v2532_v7  ;;  %v3688_v4 = vld [vmem:[#allocation3 + $0x98] sm:$0xff] }
 0x264   : > { %v9048_v13 = vpop.f32.mrb[171].mxu0  ;;  %v11144_v45 = vpack.c.bf16 %v3689_v24, %v3688_v4 }
 0x265   : > { %9192 = vmatmul.mubr.msk.bf16.gmra.mrb[232].mxu1 %vm1927_vm4, %v11073_v30  ;;  %v11132_v23 = vadd.f32 %v10961_v28, %v2535_v31  ;;  %v3693_v31 = vld [vmem:[#allocation3 + $0xc0] sm:$0xff] }
 0x266   : > { %9282 = vmatmul.mubr.msk.bf16.gmra.mrb[20].mxu0 %vm1927_vm4, %v11005_v58  ;;  %9195 = vmatprep.mubr.msk.bf16.mxu1 %vm10023_vm0, %v10022_v1 }
 0x267   : > { %9285 = vmatprep.mubr.msk.bf16.mxu0 %vm10023_vm0, %v10022_v1 }
 0x268   : > { %v2539_v27 = vpop.f32.mrb[128].mxu1 }
 0x269   : > { %v11138_v20 = vpop.f32.mrb[172].mxu0  ;;  %v2540_v63 = vadd.f32 %v2539_v27, %v10997_v56  ;;  %v8961_v25 = vpop.f32.mrb[129].mxu1 }
 0x26a   : > { %v9051_v21 = vpop.f32.mrb[173].mxu0  ;;  %v2542_v42 = vpop.f32.mrb[130].mxu1 }
 0x26b   : > { %v11141_v58 = vpop.f32.mrb[174].mxu0  ;;  %v2543_v28 = vadd.f32 %v2542_v42, %v11001_v48  ;;  %v8962_v38 = vpop.f32.mrb[131].mxu1  ;;  %v11147_v62 = vadd.f32 %v10999_v47, %v2540_v63  ;;  %v3690_v47 = vld [vmem:[#allocation3 + $0xa8] sm:$0xff] }
 0x26c   : > { %v9052_v44 = vpop.f32.mrb[175].mxu0  ;;  %v11166_v14 = vpack.c.bf16 %v3691_v49, %v3690_v47 }
 0x26d   : > { %9196 = vmatmul.mubr.msk.bf16.gmra.mrb[236].mxu1 %vm1927_vm4, %v11144_v45  ;;  %v11154_v56 = vadd.f32 %v11003_v2, %v2543_v28  ;;  %v3695_v28 = vld [vmem:[#allocation3 + $0xd0] sm:$0xff] }
 0x26e   : > { %9286 = vmatmul.mubr.msk.bf16.gmra.mrb[24].mxu0 %vm1927_vm4, %v11022_v18  ;;  %9199 = vmatprep.mubr.msk.bf16.mxu1 %vm10023_vm0, %v10022_v1 }
 0x26f   : > { %9289 = vmatprep.mubr.msk.bf16.mxu0 %vm10023_vm0, %v10022_v1 }
 0x270   : > { %v2547_v48 = vpop.f32.mrb[132].mxu1 }
 0x271   : > { %v11160_v46 = vpop.f32.mrb[176].mxu0  ;;  %v2548_v34 = vadd.f32 %v2547_v48, %v11014_v60  ;;  %v8965_v51 = vpop.f32.mrb[133].mxu1 }
 0x272   : > { %v9055_v54 = vpop.f32.mrb[177].mxu0  ;;  %v2550_v55 = vpop.f32.mrb[134].mxu1 }
 0x273   : > { %v11163_v18 = vpop.f32.mrb[178].mxu0  ;;  %v2551_v2 = vadd.f32 %v2550_v55, %v11018_v8  ;;  %v8966_v59 = vpop.f32.mrb[135].mxu1  ;;  %v11169_v15 = vadd.f32 %v11016_v61, %v2548_v34  ;;  %v3692_v61 = vld [vmem:[#allocation3 + $0xb8] sm:$0xff] }
 0x274   : > { %v9056_v7 = vpop.f32.mrb[179].mxu0  ;;  %v11188_v25 = vpack.c.bf16 %v3693_v31, %v3692_v61  ;;  %v4093_v59 = vld [vmem:[#allocation3 + $0xe7] sm:$0xff] }
 0x275   : > { %9200 = vmatmul.mubr.msk.bf16.gmra.mrb[240].mxu1 %vm1927_vm4, %v11166_v14  ;;  %v11176_v60 = vadd.f32 %v11020_v9, %v2551_v2  ;;  %v4094_v7 = vld [vmem:[#allocation3 + $0xef] sm:$0xff] }
 0x276   : > { %9290 = vmatmul.mubr.msk.bf16.gmra.mrb[28].mxu0 %vm1927_vm4, %v11039_v41  ;;  %9203 = vmatprep.mubr.msk.bf16.mxu1 %vm10023_vm0, %v10022_v1 }
 0x277   : > { %9293 = vmatprep.mubr.msk.bf16.mxu0 %vm10023_vm0, %v10022_v1 }
 0x278   : > { %v2555_v8 = vpop.f32.mrb[136].mxu1 }
 0x279   : > { %v11182_v3 = vpop.f32.mrb[180].mxu0  ;;  %v2556_v11 = vadd.f32 %v2555_v8, %v11031_v35  ;;  %v8969_v13 = vpop.f32.mrb[137].mxu1 }
 0x27a   : > { %v9059_v27 = vpop.f32.mrb[181].mxu0  ;;  %v2558_v4 = vpop.f32.mrb[138].mxu1 }
 0x27b   : > { %v11185_v41 = vpop.f32.mrb[182].mxu0  ;;  %v2559_v9 = vadd.f32 %v2558_v4, %v11035_v26  ;;  %v8970_v24 = vpop.f32.mrb[139].mxu1  ;;  %v11191_v21 = vadd.f32 %v11033_v19, %v2556_v11  ;;  %v3694_v19 = vld [vmem:[#allocation3 + $0xc8] sm:$0xff] }
 0x27c   : > { %v9060_v63 = vpop.f32.mrb[183].mxu0  ;;  %v11210_v51 = vpack.c.bf16 %v3695_v28, %v3694_v19 }
 0x27d   : > { %9204 = vmatmul.mubr.msk.bf16.gmra.mrb[244].mxu1 %vm1927_vm4, %v11188_v25  ;;  %v11198_v35 = vadd.f32 %v11037_v29, %v2559_v9  ;;  %v4101_v9 = vpack.c.bf16 %v4094_v7, %v4093_v59 }
 0x27e   : > { %9294 = vmatmul.mubr.msk.bf16.gmra.mrb[32].mxu0 %vm1927_vm4, %v11056_v53  ;;  %9207 = vmatprep.mubr.msk.bf16.mxu1 %vm10023_vm0, %v10022_v1 }
 0x27f   : > { %9297 = vmatprep.mubr.msk.bf16.mxu0 %vm10023_vm0, %v10022_v1 }
 0x280   : > { %v2563_v26 = vpop.f32.mrb[140].mxu1 }
 0x281   : > { %v11204_v42 = vpop.f32.mrb[184].mxu0  ;;  %v2564_v38 = vadd.f32 %v2563_v26, %v11048_v43  ;;  %v8973_v44 = vpop.f32.mrb[141].mxu1 }
 0x282   : > { %v9063_v48 = vpop.f32.mrb[185].mxu0  ;;  %v2566_v47 = vpop.f32.mrb[142].mxu1 }
 0x283   : > { %v11207_v53 = vpop.f32.mrb[186].mxu0  ;;  %v2567_v29 = vadd.f32 %v2566_v47, %v11052_v50  ;;  %v8974_v49 = vpop.f32.mrb[143].mxu1  ;;  %v11213_v54 = vadd.f32 %v11050_v39, %v2564_v38  ;;  %v3696_v50 = vld [vmem:[#allocation3 + $0xd8] sm:$0xff]  ;;  %v3697_v39 = vld [vmem:[#allocation3 + $0xe0] sm:$0xff] }
 0x284   : > { %v9064_v34 = vpop.f32.mrb[187].mxu0  ;;  %v11232_v4 = vpack.c.bf16 %v3697_v39, %v3696_v50  ;;  %v4382_v39 = vld [vmem:[#allocation3 + $0xa1] sm:$0xff] }
 0x285   : > { %9208 = vmatmul.mubr.msk.bf16.gmra.mrb[248].mxu1 %vm1927_vm4, %v11210_v51  ;;  %v11220_v43 = vadd.f32 %v11054_v52, %v2567_v29 }
 0x286   : > { %9298 = vmatmul.mubr.msk.bf16.gmra.mrb[36].mxu0 %vm1927_vm4, %v11068_v16  ;;  %9211 = vmatprep.mubr.msk.bf16.mxu1 %vm10023_vm0, %v10022_v1 }
 0x287   : > { %9301 = vmatprep.mubr.msk.bf16.mxu0 %vm10023_vm0, %v10022_v1 }
 0x288   : > { %v2799_v55 = vpop.f32.mrb[144].mxu1 }
 0x289   : > { %v11226_v2 = vpop.f32.mrb[188].mxu0  ;;  %v2854_v8 = vadd.f32 %v2799_v55, %v11076_v32  ;;  %v9009_v61 = vpop.f32.mrb[145].mxu1  ;;  %v4381_v55 = vld [vmem:[#allocation3 + $0x99] sm:$0xff] }
 0x28a   : > { %v9099_v16 = vpop.f32.mrb[189].mxu0  ;;  %v2802_v31 = vpop.f32.mrb[146].mxu1 }
 0x28b   : > { %v11229_v52 = vpop.f32.mrb[190].mxu0  ;;  %v2855_v11 = vadd.f32 %v2802_v31, %v11083_v12  ;;  %v9010_v13 = vpop.f32.mrb[147].mxu1  ;;  %v11235_v24 = vadd.f32 %v11065_v5, %v2854_v8  ;;  %v4251_v5 = vld [vmem:[%s12508_s3 + $0x10] sm:$0xf] }
 0x28c   : > { %v9100_v27 = vpop.f32.mrb[191].mxu0  ;;  %v4274_v49 = vsel %vm2364_vm3, %v4251_v5, 0 }
 0x28d   : > { %9212 = vmatmul.mubr.msk.bf16.gmra.mrb[252].mxu1 %vm1927_vm4, %v11232_v4  ;;  %v11241_v32 = vadd.f32 %v11070_v17, %v2855_v11  ;;  %v4698_v17 = vld [vmem:[%s12508_s3 + $0x1c] sm:$0xf]  ;;  %v4394_v11 = vpack.c.bf16 %v4382_v39, %v4381_v55 }
 0x28e   : > { %9302 = vmatmul.mubr.msk.bf16.gmra.mrb[40].mxu0 %vm1927_vm4, %v4101_v9  ;;  %9247 = vmatprep.mubr.msk.bf16.mxu1 %vm10023_vm0, %v10022_v1  ;;  %v4383_v9 = vld [vmem:[#allocation3 + $0xa9] sm:$0xff] }
 0x28f   : > { %9337 = vmatprep.mubr.msk.bf16.mxu0 %vm10023_vm0, %v10022_v1 }
 0x290   : > { %v2807_v12 = vpop.f32.mrb[148].mxu1 }
 0x291   : > { %v11247_v63 = vpop.f32.mrb[192].mxu0  ;;  %v2856_v26 = vadd.f32 %v2807_v12, %v11103_v57  ;;  %v9013_v19 = vpop.f32.mrb[149].mxu1  ;;  %v4721_v57 = vsel %vm2364_vm3, %v4698_v17, 0 }
 0x292   : > { %v9103_v28 = vpop.f32.mrb[193].mxu0  ;;  %v2810_v38 = vpop.f32.mrb[150].mxu1 }
 0x293   : > { %v11256_v44 = vpop.f32.mrb[194].mxu0  ;;  %v2857_v48 = vadd.f32 %v2810_v38, %v11110_v0  ;;  %v9014_v47 = vpop.f32.mrb[151].mxu1  ;;  %v11261_v34 = vadd.f32 %v11089_v36, %v2856_v26 }
 0x294   : > { %v9104_v29 = vpop.f32.mrb[195].mxu0 }
 0x295   : > { %9248 = vmatmul.mubr.msk.bf16.vlgmr.msra.gmra.mrb[0].mxu1 %vm1927_vm4, %v10946_v22  ;;  %v11269_v50 = vadd.f32 %v11098_v33, %v2857_v48  ;;  %v4385_v29 = vld [vmem:[#allocation3 + $0xb9] sm:$0xff] }
 0x296   : > { %9338 = vmatmul.mubr.msk.bf16.vlgmr.msra.gmra.mrb[44].mxu0 %vm1927_vm4, %v10963_v37  ;;  %9306 = vmatpush3.bf16.msra.mxu1 %v4274_v49  ;;  %v4386_v49 = vld [vmem:[#allocation3 + $0xc1] sm:$0xff] }
 0x297   : > { %9251 = vmatprep.mubr.msk.bf16.mxu1 %vm10023_vm0, %v10022_v1  ;;  %9341 = vmatprep.mubr.msk.bf16.mxu0 %vm10023_vm0, %v10022_v1 }
 0x298   : > { %9396 = vmatpush3.bf16.msra.mxu0 %v4721_v57  ;;  %v2815_v36 = vpop.f32.mrb[152].mxu1  ;;  %9365 = vmatprep.subr.bf16.mxu1 %v10022_v1 }
 0x299   : > { %v11275_v0 = vpop.f32.mrb[196].mxu0  ;;  %9455 = vmatprep.subr.bf16.mxu0 %v10022_v1  ;;  %v2858_v22 = vadd.f32 %v2815_v36, %v11125_v40  ;;  %v9017_v33 = vpop.f32.mrb[153].mxu1 }
 0x29a   : > { %v9107_v59 = vpop.f32.mrb[197].mxu0  ;;  %v2818_v7 = vpop.f32.mrb[154].mxu1 }
 0x29b   : > { %v11280_v8 = vpop.f32.mrb[198].mxu0  ;;  %v2859_v61 = vadd.f32 %v2818_v7, %v11132_v23  ;;  %v9018_v16 = vpop.f32.mrb[155].mxu1  ;;  %v11284_v13 = vadd.f32 %v11116_v10, %v2858_v22  ;;  %v4384_v10 = vld [vmem:[#allocation3 + $0xb1] sm:$0xff]  ;;  %v4396_v59 = vpack.c.bf16 %v4386_v49, %v4385_v29 }
 0x29c   : > { %v9108_v31 = vpop.f32.mrb[199].mxu0  ;;  %v4395_v38 = vpack.c.bf16 %v4384_v10, %v4383_v9  ;;  %v4387_v16 = vld [vmem:[#allocation3 + $0xc9] sm:$0xff] }
 0x29d   : > { %9252 = vmatmul.mubr.msk.bf16.gmra.mrb[4].mxu1 %vm1927_vm4, %v10963_v37  ;;  %v11290_v40 = vadd.f32 %v11121_v6, %v2859_v61  ;;  %v4388_v31 = vld [vmem:[#allocation3 + $0xd1] sm:$0xff] }
 0x29e   : > { %9342 = vmatmul.mubr.msk.bf16.gmra.mrb[48].mxu0 %vm1927_vm4, %v4394_v11  ;;  %9255 = vmatprep.mubr.msk.bf16.mxu1 %vm10023_vm0, %v10022_v1 }
 0x29f   : > { %9345 = vmatprep.mubr.msk.bf16.mxu0 %vm10023_vm0, %v10022_v1 }
 0x2a0   : > { %v2823_v23 = vpop.f32.mrb[156].mxu1 }
 0x2a1   : > { %v11296_v27 = vpop.f32.mrb[200].mxu0  ;;  %v2860_v12 = vadd.f32 %v2823_v23, %v11147_v62  ;;  %v9021_v5 = vpop.f32.mrb[157].mxu1 }
 0x2a2   : > { %v9111_v37 = vpop.f32.mrb[201].mxu0  ;;  %v2826_v26 = vpop.f32.mrb[158].mxu1 }
 0x2a3   : > { %v11299_v19 = vpop.f32.mrb[202].mxu0  ;;  %v2861_v6 = vadd.f32 %v2826_v26, %v11154_v56  ;;  %v9022_v28 = vpop.f32.mrb[159].mxu1  ;;  %v11303_v48 = vadd.f32 %v11138_v20, %v2860_v12  ;;  %v4397_v37 = vpack.c.bf16 %v4388_v31, %v4387_v16 }
 0x2a4   : > { %v9112_v17 = vpop.f32.mrb[203].mxu0  ;;  %v4389_v28 = vld [vmem:[#allocation3 + $0xd9] sm:$0xff] }
 0x2a5   : > { %9256 = vmatmul.mubr.msk.bf16.gmra.mrb[8].mxu1 %vm1927_vm4, %v4394_v11  ;;  %v11308_v47 = vadd.f32 %v11141_v58, %v2861_v6  ;;  %v4390_v17 = vld [vmem:[#allocation3 + $0xe1] sm:$0xff] }
 0x2a6   : > { %9346 = vmatmul.mubr.msk.bf16.gmra.mrb[52].mxu0 %vm1927_vm4, %v4395_v38  ;;  %9259 = vmatprep.mubr.msk.bf16.mxu1 %vm10023_vm0, %v10022_v1 }
 0x2a7   : > { %9349 = vmatprep.mubr.msk.bf16.mxu0 %vm10023_vm0, %v10022_v1 }
 0x2a8   : > { %v2831_v62 = vpop.f32.mrb[160].mxu1 }
 0x2a9   : > { %v11314_v56 = vpop.f32.mrb[204].mxu0  ;;  %v2862_v20 = vadd.f32 %v2831_v62, %v11169_v15  ;;  %v9025_v57 = vpop.f32.mrb[161].mxu1 }
 0x2aa   : > { %v9115_v36 = vpop.f32.mrb[205].mxu0  ;;  %v2834_v55 = vpop.f32.mrb[162].mxu1 }
 0x2ab   : > { %v11317_v39 = vpop.f32.mrb[206].mxu0  ;;  %v2863_v58 = vadd.f32 %v2834_v55, %v11176_v60  ;;  %v9026_v22 = vpop.f32.mrb[163].mxu1  ;;  %v11321_v7 = vadd.f32 %v11160_v46, %v2862_v20  ;;  %v4398_v36 = vpack.c.bf16 %v4390_v17, %v4389_v28 }
 0x2ac   : > { %v9116_v33 = vpop.f32.mrb[207].mxu0  ;;  %v4391_v22 = vld [vmem:[#allocation3 + $0xe9] sm:$0xff] }
 0x2ad   : > { %9260 = vmatmul.mubr.msk.bf16.gmra.mrb[12].mxu1 %vm1927_vm4, %v4395_v38  ;;  %v11326_v61 = vadd.f32 %v11163_v18, %v2863_v58  ;;  %v4392_v33 = vld [vmem:[#allocation3 + $0xf1] sm:$0xff] }
 0x2ae   : > { %9350 = vmatmul.mubr.msk.bf16.gmra.mrb[56].mxu0 %vm1927_vm4, %v4396_v59  ;;  %9263 = vmatprep.mubr.msk.bf16.mxu1 %vm10023_vm0, %v10022_v1 }
 0x2af   : > { %9353 = vmatprep.mubr.msk.bf16.mxu0 %vm10023_vm0, %v10022_v1 }
 0x2b0   : > { %v2839_v15 = vpop.f32.mrb[164].mxu1 }
 0x2b1   : > { %v11332_v60 = vpop.f32.mrb[208].mxu0  ;;  %v2864_v46 = vadd.f32 %v2839_v15, %v11191_v21  ;;  %v9029_v11 = vpop.f32.mrb[165].mxu1 }
 0x2b2   : > { %v9119_v23 = vpop.f32.mrb[209].mxu0  ;;  %v2842_v9 = vpop.f32.mrb[166].mxu1 }
 0x2b3   : > { %v11335_v10 = vpop.f32.mrb[210].mxu0  ;;  %v2865_v18 = vadd.f32 %v2842_v9, %v11198_v35  ;;  %v9030_v12 = vpop.f32.mrb[167].mxu1  ;;  %v11339_v26 = vadd.f32 %v11182_v3, %v2864_v46  ;;  %v4399_v23 = vpack.c.bf16 %v4392_v33, %v4391_v22 }
 0x2b4   : > { %v9120_v5 = vpop.f32.mrb[211].mxu0 }
 0x2b5   : > { %9264 = vmatmul.mubr.msk.bf16.gmra.mrb[16].mxu1 %vm1927_vm4, %v4396_v59  ;;  %v11344_v6 = vadd.f32 %v11185_v41, %v2865_v18 }
 0x2b6   : > { %9354 = vmatmul.mubr.msk.bf16.gmra.mrb[60].mxu0 %vm1927_vm4, %v4397_v37  ;;  %9267 = vmatprep.mubr.msk.bf16.mxu1 %vm10023_vm0, %v10022_v1 }
 0x2b7   : > { %9357 = vmatprep.mubr.msk.bf16.mxu0 %vm10023_vm0, %v10022_v1 }
 0x2b8   : > { %v2847_v21 = vpop.f32.mrb[168].mxu1 }
 0x2b9   : > { %v11350_v35 = vpop.f32.mrb[212].mxu0  ;;  %v2866_v3 = vadd.f32 %v2847_v21, %v11213_v54  ;;  %v9033_v38 = vpop.f32.mrb[169].mxu1 }
 0x2ba   : > { %v9123_v62 = vpop.f32.mrb[213].mxu0  ;;  %v2850_v29 = vpop.f32.mrb[170].mxu1 }
 0x2bb   : > { %v11353_v49 = vpop.f32.mrb[214].mxu0  ;;  %v2867_v41 = vadd.f32 %v2850_v29, %v11220_v43  ;;  %v9034_v20 = vpop.f32.mrb[171].mxu1  ;;  %v11357_v55 = vadd.f32 %v11204_v42, %v2866_v3  ;;  %v9891_v29 = vld [vmem:[%s12510_s5 + $0x8] sm:$0xff]  }
 0x2bc   : > { %v9124_v57 = vpop.f32.mrb[215].mxu0 }
 0x2bd   : > { %9268 = vmatmul.mubr.msk.bf16.gmra.mrb[20].mxu1 %vm1927_vm4, %v4397_v37  ;;  %v11362_v58 = vadd.f32 %v11207_v53, %v2867_v41 }
 0x2be   : > { %9358 = vmatmul.mubr.msk.bf16.gmra.mrb[64].mxu0 %vm1927_vm4, %v4398_v36  ;;  %9271 = vmatprep.mubr.msk.bf16.mxu1 %vm10023_vm0, %v10022_v1 }
 0x2bf   : > { %9361 = vmatprep.mubr.msk.bf16.mxu0 %vm10023_vm0, %v10022_v1 }
 0x2c0   : > { %v3097_v54 = vpop.f32.mrb[172].mxu1 }
 0x2c1   : > { %v11368_v43 = vpop.f32.mrb[216].mxu0  ;;  %v3152_v42 = vadd.f32 %v3097_v54, %v11235_v24  ;;  %v9069_v59 = vpop.f32.mrb[173].mxu1 }
 0x2c2   : > { %v9159_v15 = vpop.f32.mrb[217].mxu0  ;;  %v3100_v16 = vpop.f32.mrb[174].mxu1 }
 0x2c3   : > { %v11371_v31 = vpop.f32.mrb[218].mxu0  ;;  %v3153_v53 = vadd.f32 %v3100_v16, %v11241_v32  ;;  %v9070_v46 = vpop.f32.mrb[175].mxu1  ;;  %v11375_v9 = vadd.f32 %v11226_v2, %v3152_v42  ;;  %v4549_v2 = vld [vmem:[%s12508_s3 + $0x18] sm:$0xf] }
 0x2c4   : > { %v9160_v11 = vpop.f32.mrb[219].mxu0  ;;  %v4572_v38 = vsel %vm2364_vm3, %v4549_v2, 0 }
 0x2c5   : > { %9272 = vmatmul.mubr.msk.bf16.gmra.mrb[24].mxu1 %vm1927_vm4, %v4398_v36  ;;  %v11380_v18 = vadd.f32 %v11229_v52, %v3153_v53 }
 0x2c6   : > { %9362 = vmatmul.mubr.msk.bf16.gmra.mrb[68].mxu0 %vm1927_vm4, %v4399_v23  ;;  %9307 = vmatprep.mubr.msk.bf16.mxu1 %vm10023_vm0, %v10022_v1 }
 0x2c7   : > { %9397 = vmatprep.mubr.msk.bf16.mxu0 %vm10023_vm0, %v10022_v1 }
 0x2c8   : > { %v3105_v24 = vpop.f32.mrb[176].mxu1 }
 0x2c9   : > { %v11386_v32 = vpop.f32.mrb[220].mxu0  ;;  %v3154_v12 = vadd.f32 %v3105_v24, %v11261_v34  ;;  %v9073_v5 = vpop.f32.mrb[177].mxu1 }
 0x2ca   : > { %v9163_v37 = vpop.f32.mrb[221].mxu0  ;;  %v3108_v21 = vpop.f32.mrb[178].mxu1 }
 0x2cb   : > { %v11392_v52 = vpop.f32.mrb[222].mxu0  ;;  %v3155_v28 = vadd.f32 %v3108_v21, %v11269_v50  ;;  %v9074_v17 = vpop.f32.mrb[179].mxu1  ;;  %v11397_v62 = vadd.f32 %v11247_v63, %v3154_v12 }
 0x2cc   : > { %v9164_v3 = vpop.f32.mrb[223].mxu0 }
 0x2cd   : > { %9308 = vmatmul.mubr.msk.bf16.vlgmr.msra.gmra.mrb[28].mxu1 %vm1927_vm4, %v11073_v30  ;;  %v11407_v34 = vadd.f32 %v11256_v44, %v3155_v28 }
 0x2ce   : > { %9398 = vmatmul.mubr.msk.bf16.vlgmr.msra.gmra.mrb[72].mxu0 %vm1927_vm4, %v11144_v45  ;;  %9366 = vmatpush3.bf16.msra.mxu1 %v4572_v38 }
 0x2cf   : > { %9311 = vmatprep.mubr.msk.bf16.mxu1 %vm10023_vm0, %v10022_v1  ;;  %9401 = vmatprep.mubr.msk.bf16.mxu0 %vm10023_vm0, %v10022_v1 }
 0x2d0   : > { %9425 = vmatprep.subr.bf16.mxu1 %v10022_v1  ;;  %v3113_v63 = vpop.f32.mrb[180].mxu1  ;;  %9456 = vmatpush3.bf16.msra.mxu0 %v9891_v29 }
 0x2d1   : > { %v11414_v50 = vpop.f32.mrb[224].mxu0  ;;  %v3156_v30 = vadd.f32 %v3113_v63, %v11284_v13  ;;  %v9077_v41 = vpop.f32.mrb[181].mxu1  ;;  %9461 = vmatprep.subr.bf16.mxu0 %v10022_v1 }
 0x2d2   : > { %v9167_v20 = vpop.f32.mrb[225].mxu0  ;;  %v3116_v44 = vpop.f32.mrb[182].mxu1 }
 0x2d3   : > { %v11418_v57 = vpop.f32.mrb[226].mxu0  ;;  %v3157_v36 = vadd.f32 %v3116_v44, %v11290_v40  ;;  %v9078_v54 = vpop.f32.mrb[183].mxu1  ;;  %v11422_v33 = vadd.f32 %v11275_v0, %v3156_v30  ;;  %v4688_v20 = vld [vmem:[#allocation3 + $0xf0] sm:$0xff] }
 0x2d4   : > { %v9168_v22 = vpop.f32.mrb[227].mxu0 }
 0x2d5   : > { %9312 = vmatmul.mubr.msk.bf16.gmra.mrb[32].mxu1 %vm1927_vm4, %v11144_v45  ;;  %v11429_v13 = vadd.f32 %v11280_v8, %v3157_v36 }
 0x2d6   : > { %9402 = vmatmul.mubr.msk.bf16.gmra.mrb[76].mxu0 %vm1927_vm4, %v11166_v14  ;;  %9315 = vmatprep.mubr.msk.bf16.mxu1 %vm10023_vm0, %v10022_v1 }
 0x2d7   : > { %9405 = vmatprep.mubr.msk.bf16.mxu0 %vm10023_vm0, %v10022_v1 }
 0x2d8   : > { %v3121_v40 = vpop.f32.mrb[184].mxu1 }
 0x2d9   : > { %v11435_v42 = vpop.f32.mrb[228].mxu0  ;;  %v3158_v0 = vadd.f32 %v3121_v40, %v11303_v48  ;;  %v9081_v59 = vpop.f32.mrb[185].mxu1 }
 0x2da   : > { %v9171_v15 = vpop.f32.mrb[229].mxu0  ;;  %v3124_v45 = vpop.f32.mrb[186].mxu1 }
 0x2db   : > { %v11438_v16 = vpop.f32.mrb[230].mxu0  ;;  %v3159_v53 = vadd.f32 %v3124_v45, %v11308_v47  ;;  %v9082_v8 = vpop.f32.mrb[187].mxu1  ;;  %v11442_v11 = vadd.f32 %v11296_v27, %v3158_v0  ;;  %v4690_v45 = vld [vmem:[#allocation3 + $0x100] sm:$0xff] }
 0x2dc   : > { %v9172_v46 = vpop.f32.mrb[231].mxu0 }
 0x2dd   : > { %9316 = vmatmul.mubr.msk.bf16.gmra.mrb[36].mxu1 %vm1927_vm4, %v11166_v14  ;;  %v11449_v48 = vadd.f32 %v11299_v19, %v3159_v53 }
 0x2de   : > { %9406 = vmatmul.mubr.msk.bf16.gmra.mrb[80].mxu0 %vm1927_vm4, %v11188_v25  ;;  %9319 = vmatprep.mubr.msk.bf16.mxu1 %vm10023_vm0, %v10022_v1 }
 0x2df   : > { %9409 = vmatprep.mubr.msk.bf16.mxu0 %vm10023_vm0, %v10022_v1 }
 0x2e0   : > { %v3129_v47 = vpop.f32.mrb[188].mxu1 }
 0x2e1   : > { %v11455_v23 = vpop.f32.mrb[232].mxu0  ;;  %v3160_v27 = vadd.f32 %v3129_v47, %v11321_v7  ;;  %v9085_v24 = vpop.f32.mrb[189].mxu1 }
 0x2e2   : > { %v9175_v2 = vpop.f32.mrb[233].mxu0  ;;  %v3132_v14 = vpop.f32.mrb[190].mxu1 }
 0x2e3   : > { %v11458_v12 = vpop.f32.mrb[234].mxu0  ;;  %v3161_v5 = vadd.f32 %v3132_v14, %v11326_v61  ;;  %v9086_v19 = vpop.f32.mrb[191].mxu1  ;;  %v11462_v21 = vadd.f32 %v11314_v56, %v3160_v27 }
 0x2e4   : > { %v9176_v37 = vpop.f32.mrb[235].mxu0 }
 0x2e5   : > { %9320 = vmatmul.mubr.msk.bf16.gmra.mrb[40].mxu1 %vm1927_vm4, %v11188_v25  ;;  %v11469_v7 = vadd.f32 %v11317_v39, %v3161_v5 }
 0x2e6   : > { %9410 = vmatmul.mubr.msk.bf16.gmra.mrb[84].mxu0 %vm1927_vm4, %v11210_v51  ;;  %9323 = vmatprep.mubr.msk.bf16.mxu1 %vm10023_vm0, %v10022_v1 }
 0x2e7   : > { %9413 = vmatprep.mubr.msk.bf16.mxu0 %vm10023_vm0, %v10022_v1 }
 0x2e8   : > { %v3137_v61 = vpop.f32.mrb[192].mxu1 }
 0x2e9   : > { %v11475_v28 = vpop.f32.mrb[236].mxu0  ;;  %v3162_v56 = vadd.f32 %v3137_v61, %v11339_v26  ;;  %v9089_v17 = vpop.f32.mrb[193].mxu1 }
 0x2ea   : > { %v9179_v3 = vpop.f32.mrb[237].mxu0  ;;  %v3140_v25 = vpop.f32.mrb[194].mxu1  ;;  %v4528_v17 = vld [vmem:[#allocation3 + $0x97] sm:$0xff] }
 0x2eb   : > { %v11478_v38 = vpop.f32.mrb[238].mxu0  ;;  %v3163_v29 = vadd.f32 %v3140_v25, %v11344_v6  ;;  %v9090_v39 = vpop.f32.mrb[195].mxu1  ;;  %v11482_v30 = vadd.f32 %v11332_v60, %v3162_v56  ;;  %v4687_v60 = vld [vmem:[#allocation3 + $0xe8] sm:$0xff]  ;;  %v4529_v3 = vld [vmem:[#allocation3 + $0x9f] sm:$0xff] }
 0x2ec   : > { %v9180_v63 = vpop.f32.mrb[239].mxu0  ;;  %v4696_v59 = vpack.c.bf16 %v4688_v20, %v4687_v60 }
 0x2ed   : > { %9324 = vmatmul.mubr.msk.bf16.gmra.mrb[44].mxu1 %vm1927_vm4, %v11210_v51  ;;  %v11489_v26 = vadd.f32 %v11335_v10, %v3163_v29 }
 0x2ee   : > { %9414 = vmatmul.mubr.msk.bf16.gmra.mrb[88].mxu0 %vm1927_vm4, %v11232_v4  ;;  %9327 = vmatprep.mubr.msk.bf16.mxu1 %vm10023_vm0, %v10022_v1 }
 0x2ef   : > { %9417 = vmatprep.mubr.msk.bf16.mxu0 %vm10023_vm0, %v10022_v1 }
 0x2f0   : > { %v3145_v6 = vpop.f32.mrb[196].mxu1 }
 0x2f1   : > { %v11495_v41 = vpop.f32.mrb[240].mxu0  ;;  %v3164_v44 = vadd.f32 %v3145_v6, %v11357_v55  ;;  %v9093_v51 = vpop.f32.mrb[197].mxu1 }
 0x2f2   : > { %v9183_v36 = vpop.f32.mrb[241].mxu0  ;;  %v3148_v54 = vpop.f32.mrb[198].mxu1 }
 0x2f3   : > { %v11498_v22 = vpop.f32.mrb[242].mxu0  ;;  %v3165_v10 = vadd.f32 %v3148_v54, %v11362_v58  ;;  %v9094_v40 = vpop.f32.mrb[199].mxu1  ;;  %v11502_v15 = vadd.f32 %v11350_v35, %v3164_v44  ;;  %v4689_v58 = vld [vmem:[#allocation3 + $0xf8] sm:$0xff]  ;;  %v4542_v54 = vpack.c.bf16 %v4529_v3, %v4528_v17 }
 0x2f4   : > { %v9184_v0 = vpop.f32.mrb[243].mxu0  ;;  %v4697_v47 = vpack.c.bf16 %v4690_v45, %v4689_v58  ;;  %v4530_v58 = vld [vmem:[#allocation3 + $0xa7] sm:$0xff]  ;;  %v4531_v45 = vld [vmem:[#allocation3 + $0xaf] sm:$0xff] }
 0x2f5   : > { %9328 = vmatmul.mubr.msk.bf16.gmra.mrb[48].mxu1 %vm1927_vm4, %v11232_v4  ;;  %v11508_v55 = vadd.f32 %v11353_v49, %v3165_v10  ;;  %v11520_v49 = vld [vmem:[%s12509_s4] ss:$0 sm:$0xff] }
 0x2f6   : > { %9418 = vmatmul.mubr.msk.bf16.gmra.mrb[92].mxu0 %vm1927_vm4, %v4696_v59  ;;  %9331 = vmatprep.mubr.msk.bf16.mxu1 %vm10023_vm0, %v10022_v1 }
 0x2f7   : > { %9421 = vmatprep.mubr.msk.bf16.mxu0 %vm10023_vm0, %v10022_v1 }
 0x2f8   : > { %v3395_v53 = vpop.f32.mrb[200].mxu1 }
 0x2f9   : > { %v11514_v8 = vpop.f32.mrb[244].mxu0  ;;  %v3450_v35 = vadd.f32 %v3395_v53, %v11375_v9  ;;  %v9129_v46 = vpop.f32.mrb[201].mxu1 }
 0x2fa   : > { %v9219_v4 = vpop.f32.mrb[245].mxu0  ;;  %v3398_v27 = vpop.f32.mrb[202].mxu1 }
 0x2fb   : > { %v11522_v24 = vpop.f32.mrb[246].mxu0  ;;  %v3599_v2 = vadd.f32 %v11368_v43, %v3450_v35  ;;  %v3451_v14 = vadd.f32 %v3398_v27, %v11380_v18  ;;  %v9130_v5 = vpop.f32.mrb[203].mxu1 }
 0x2fc   : > { %v9220_v19 = vpop.f32.mrb[247].mxu0 }
 0x2fd   : > { %v3620_v37 = vadd.f32 %v11520_v49, %v3599_v2  ;;  %v3600_v9 = vadd.f32 %v11371_v31, %v3451_v14  ;;  %9332 = vmatmul.mubr.msk.bf16.gmra.mrb[52].mxu1 %vm1927_vm4, %v4696_v59  ;;  %v4847_v31 = vld [vmem:[%s12508_s3 + $0x20] sm:$0xf]  ;;  %v4543_v2 = vpack.c.bf16 %v4531_v45, %v4530_v58 }
 0x2fe   : > { %9422 = vmatmul.mubr.msk.bf16.gmra.mrb[96].mxu0 %vm1927_vm4, %v4697_v47  ;;  %9367 = vmatprep.mubr.msk.bf16.mxu1 %vm10023_vm0, %v10022_v1  ;;  %v4870_v10 = vsel %vm2364_vm3, %v4847_v31, 0 }
 0x2ff   : > { %9457 = vmatprep.mubr.msk.bf16.mxu0 %vm10023_vm0, %v10022_v1  ;;  %v3634_v61 = vmax.f32 %v3620_v37, 0.0  ;;  %v3621_v43 = vadd.f32 %v11520_v49, %v3600_v9 }
 0x300   : > { %v3403_v18 = vpop.f32.mrb[204].mxu1 }
 0x301   : > { %v11535_v56 = vpop.f32.mrb[248].mxu0  ;;  %3648 = vst [vmem:[#allocation4] sm:$0xff] %v3634_v61  ;;  %v3635_v25 = vmax.f32 %v3621_v43, 0.0  ;;  %v3452_v29 = vadd.f32 %v3403_v18, %v11397_v62  ;;  %v9133_v39 = vpop.f32.mrb[205].mxu1  ;;  %v4533_v43 = vld [vmem:[#allocation3 + $0xbf] sm:$0xff] }
 0x302   : > { %v9223_v63 = vpop.f32.mrb[249].mxu0  ;;  %v3406_v6 = vpop.f32.mrb[206].mxu1 }
 0x303   : > { %v11541_v60 = vpop.f32.mrb[250].mxu0  ;;  %3649 = vst [vmem:[#allocation4 + $0x8] sm:$0xff] %v3635_v25  ;;  %v3601_v20 = vadd.f32 %v11386_v32, %v3452_v29  ;;  %v3453_v44 = vadd.f32 %v3406_v6, %v11407_v34  ;;  %v9134_v51 = vpop.f32.mrb[207].mxu1 }
 0x304   : > { %v9224_v36 = vpop.f32.mrb[251].mxu0 }
 0x305   : > { %v3622_v40 = vadd.f32 %v11520_v49, %v3601_v20  ;;  %v3602_v0 = vadd.f32 %v11392_v52, %v3453_v44  ;;  %9368 = vmatmul.mubr.msk.bf16.vlgmr.msra.gmra.mrb[56].mxu1 %vm1927_vm4, %v4542_v54 }
 0x306   : > { %9426 = vmatpush3.bf16.msra.mxu1 %v4870_v10  ;;  %9371 = vmatprep.mubr.msk.bf16.mxu1 %vm10023_vm0, %v10022_v1 }
 0x307   : > { %v3636_v62 = vmax.f32 %v3622_v40, 0.0  ;;  %v3623_v32 = vadd.f32 %v11520_v49, %v3602_v0  ;;  %9479 = vmatprep.subr.bf16.mxu1 %v10022_v1 }
 0x308   : > { %v3411_v34 = vpop.f32.mrb[208].mxu1 }
 0x309   : > { %v11553_v59 = vpop.f32.mrb[252].mxu0  ;;  %3650 = vst [vmem:[#allocation4 + $0x10] sm:$0xff] %v3636_v62  ;;  %v3637_v53 = vmax.f32 %v3623_v32, 0.0  ;;  %v3454_v52 = vadd.f32 %v3411_v34, %v11422_v33  ;;  %v9137_v35 = vpop.f32.mrb[209].mxu1 }
 0x30a   : > { %v9227_v46 = vpop.f32.mrb[253].mxu0  ;;  %v3414_v47 = vpop.f32.mrb[210].mxu1  ;;  %v5025_v33 = vld [vmem:[#allocation4 + $0x1] ss:$2 sm:$0x7f] }
 0x30b   : > { %3651 = vst [vmem:[#allocation4 + $0x18] sm:$0xff] %v3637_v53  ;;  %v3603_v4 = vadd.f32 %v11414_v50, %v3454_v52  ;;  %v11557_v27 = vpop.f32.mrb[254].mxu0  ;;  %v3455_v14 = vadd.f32 %v3414_v47, %v11429_v13  ;;  %v9138_v5 = vpop.f32.mrb[211].mxu1  ;;  %v4532_v50 = vld [vmem:[#allocation3 + $0xb7] sm:$0xff]  ;;  %v4534_v53 = vld [vmem:[#allocation3 + $0xc7] sm:$0xff]  ;;  %v4535_v52 = vld [vmem:[#allocation3 + $0xcf] sm:$0xff] }
 0x30c   : > { %v9228_v19 = vpop.f32.mrb[255].mxu0  ;;  %v5027_v18 = vld [vmem:[#allocation4 + $0x2] ss:$2 sm:$0x7f]  ;;  %v4544_v63 = vpack.c.bf16 %v4533_v43, %v4532_v50 }
 0x30d   : > { %v3624_v37 = vadd.f32 %v11520_v49, %v3603_v4  ;;  %9372 = vmatmul.mubr.msk.bf16.gmra.mrb[60].mxu1 %vm1927_vm4, %v4543_v2  ;;  %v3604_v9 = vadd.f32 %v11418_v57, %v3455_v14  ;;  %v5028_v6 = vmax.f32 %v5025_v33, %v5027_v18  ;;  %v9892_v35 = vld [vmem:[%s12510_s5] sm:$0xff]  }
 0x30e   : > { %9375 = vmatprep.mubr.msk.bf16.mxu1 %vm10023_vm0, %v10022_v1 }
 0x30f   : > { %v3638_v61 = vmax.f32 %v3624_v37, 0.0  ;;  %v3625_v17 = vadd.f32 %v11520_v49, %v3604_v9 }
 0x310   : > { %v3419_v3 = vpop.f32.mrb[212].mxu1 }
 0x311   : > { %v11566_v13 = vpop.f32.mrb[0].mxu0  ;;  %3652 = vst [vmem:[#allocation4 + $0x20] sm:$0xff] %v3638_v61  ;;  %v3456_v31 = vadd.f32 %v3419_v3, %v11442_v11  ;;  %v9141_v25 = vpop.f32.mrb[213].mxu1  ;;  %v3639_v44 = vmax.f32 %v3625_v17, 0.0  ;;  %v4545_v61 = vpack.c.bf16 %v4535_v52, %v4534_v53  ;;  %v4536_v17 = vld [vmem:[#allocation3 + $0xd7] sm:$0xff]  ;;  %v4537_v3 = vld [vmem:[#allocation3 + $0xdf] sm:$0xff] }
 0x312   : > { %v9231_v29 = vpop.f32.mrb[1].mxu0  ;;  %v5030_v39 = vld [vmem:[#allocation4 + $0x11] ss:$2 sm:$0x7f]  ;;  %v3422_v36 = vpop.f32.mrb[214].mxu1 }
 0x313   : > { %v5032_v57 = vld [vmem:[#allocation4 + $0x12] ss:$2 sm:$0x7f]  ;;  %v3605_v51 = vadd.f32 %v11435_v42, %v3456_v31  ;;  %v11570_v54 = vpop.f32.mrb[2].mxu0  ;;  %v3457_v10 = vadd.f32 %v3422_v36, %v11449_v48  ;;  %v9142_v40 = vpop.f32.mrb[215].mxu1  ;;  %3653 = vst [vmem:[#allocation4 + $0x28] sm:$0xff] %v3639_v44  ;;  %v4546_v44 = vpack.c.bf16 %v4537_v3, %v4536_v17 }
 0x314   : > { %v5033_v20 = vmax.f32 %v5030_v39, %v5032_v57  ;;  %v9232_v0 = vpop.f32.mrb[3].mxu0  ;;  %v9893_v31 = vld [vmem:[%s12510_s5 + $0x10] sm:$0xff]  }
 0x315   : > { %v3626_v11 = vadd.f32 %v11520_v49, %v3605_v51  ;;  %9376 = vmatmul.mubr.msk.bf16.gmra.mrb[64].mxu1 %vm1927_vm4, %v4544_v63  ;;  %v3606_v32 = vadd.f32 %v11438_v16, %v3457_v10 }
 0x316   : > { %v5034_v62 = vmax.f32 %v5028_v6, %v5033_v20  ;;  %9379 = vmatprep.mubr.msk.bf16.mxu1 %vm10023_vm0, %v10022_v1 }
 0x317   : > { %v3640_v42 = vmax.f32 %v3626_v11, 0.0  ;;  %v3627_v58 = vadd.f32 %v11520_v49, %v3606_v32  ;;  %v4539_v11 = vld [vmem:[#allocation3 + $0xef] sm:$0xff] }
 0x318   : > { %v11578_v34 = vpack.c.bf16 %v5034_v62, %v5034_v62  ;;  %v3427_v45 = vpop.f32.mrb[216].mxu1  ;;  %v4538_v62 = vld [vmem:[#allocation3 + $0xe7] sm:$0xff]  ;;  %v9894_v32 = vld [vmem:[%s12510_s5 + $0x18] sm:$0xff]  }
 0x319   : > { %v11581_v48 = vpop.f32.mrb[4].mxu0  ;;  %3654 = vst [vmem:[#allocation4 + $0x30] sm:$0xff] %v3640_v42  ;;  %v3458_v16 = vadd.f32 %v3427_v45, %v11462_v21  ;;  %v9145_v46 = vpop.f32.mrb[217].mxu1  ;;  %v3641_v2 = vmax.f32 %v3627_v58, 0.0 }
 0x31a   : > { %v9235_v4 = vpop.f32.mrb[5].mxu0  ;;  %v11588_v47 = vshrl.u32 %v11578_v34, 16  ;;  %v3430_v14 = vpop.f32.mrb[218].mxu1  ;;  %v5143_v45 = vrot.slane %v11578_v34, 1 }
 0x31b   : > { %v11590_v5 = vpop.f32.mrb[6].mxu0  ;;  %v3607_v19 = vadd.f32 %v11455_v23, %v3458_v16  ;;  %v3459_v37 = vadd.f32 %v3430_v14, %v11469_v7  ;;  %v9146_v9 = vpop.f32.mrb[219].mxu1  ;;  %3655 = vst [vmem:[#allocation4 + $0x38] sm:$0xff] %v3641_v2  ;;  %v4547_v16 = vpack.c.bf16 %v4539_v11, %v4538_v62  ;;  %v9903_v11 = vld [vmem:[%s12510_s5 + $0x20] sm:$0xff]  }
 0x31c   : > { %v9236_v33 = vpop.f32.mrb[7].mxu0  ;;  %9458 = vmatmul.mubr.msk.bf16.vlgmr.msra.gmra.mrb[100].mxu0 %vm499_vm2, %v11588_v47 }
 0x31d   : > { %9462 = vmatpush3.bf16.msra.mxu0 %v9892_v35  ;;  %9463 = vmatprep.mubr.msk.bf16.mxu0 %vm10023_vm0, %v10022_v1  ;;  %v3628_v21 = vadd.f32 %v11520_v49, %v3607_v19  ;;  %v3608_v50 = vadd.f32 %v11458_v12, %v3459_v37  ;;  %v4540_v19 = vld [vmem:[#allocation3 + $0xf7] sm:$0xff]  ;;  %v4541_v37 = vld [vmem:[#allocation3 + $0xff] sm:$0xff] }
 0x31e   : > { %9380 = vmatmul.mubr.msk.bf16.gmra.mrb[68].mxu1 %vm1927_vm4, %v4545_v61  ;;  %9467 = vmatprep.subr.bf16.mxu0 %v10022_v1 }
 0x31f   : > { %9383 = vmatprep.mubr.msk.bf16.mxu1 %vm10023_vm0, %v10022_v1  ;;  %v3642_v23 = vmax.f32 %v3628_v21, 0.0  ;;  %v3629_v7 = vadd.f32 %v11520_v49, %v3608_v50  ;;  %v9895_v21 = vld [vmem:[%s12510_s5 + $0x28] sm:$0xff]  }
 0x320   : > { %v3435_v43 = vpop.f32.mrb[220].mxu1 }
 0x321   : > { %v11605_v18 = vpop.f32.mrb[8].mxu0  ;;  %3656 = vst [vmem:[#allocation4 + $0x40] sm:$0xff] %v3642_v23  ;;  %v3643_v12 = vmax.f32 %v3629_v7, 0.0  ;;  %v3460_v25 = vadd.f32 %v3435_v43, %v11482_v30  ;;  %v9149_v29 = vpop.f32.mrb[221].mxu1  ;;  %v5196_v7 = vrot.slane %v11588_v47, 1  ;;  %v4548_v43 = vpack.c.bf16 %v4541_v37, %v4540_v19 }
 0x322   : > { %v9239_v39 = vpop.f32.mrb[9].mxu0  ;;  %v3438_v57 = vpop.f32.mrb[222].mxu1  ;;  %v5414_v29 = vld [vmem:[#allocation4 + $0x32] ss:$2 sm:$0x7f] }
 0x323   : > { %v11611_v63 = vpop.f32.mrb[10].mxu0  ;;  %3657 = vst [vmem:[#allocation4 + $0x48] sm:$0xff] %v3643_v12  ;;  %v3609_v6 = vadd.f32 %v11475_v28, %v3460_v25  ;;  %v3461_v20 = vadd.f32 %v3438_v57, %v11489_v26  ;;  %v9150_v51 = vpop.f32.mrb[223].mxu1  ;;  %v5407_v39 = vld [vmem:[#allocation4 + $0x21] ss:$2 sm:$0x7f] }
 0x324   : > { %9464 = vmatmul.mubr.msk.bf16.vlgmr.msra.gmra.mrb[104].mxu0 %vm499_vm2, %v11578_v34  ;;  %v9240_v36 = vpop.f32.mrb[11].mxu0  ;;  %v4826_v57 = vld [vmem:[#allocation3 + $0x99] sm:$0xff]  ;;  %v9896_v51 = vld [vmem:[%s12510_s5 + $0x38] sm:$0xff]  }
 0x325   : > { %9468 = vmatpush3.bf16.msra.mxu0 %v9893_v31  ;;  %9469 = vmatprep.mubr.msk.bf16.mxu0 %vm10023_vm0, %v10022_v1  ;;  %v3630_v30 = vadd.f32 %v11520_v49, %v3609_v6  ;;  %v3610_v10 = vadd.f32 %v11478_v38, %v3461_v20  ;;  %v5409_v6 = vld [vmem:[#allocation4 + $0x22] ss:$2 sm:$0x7f] }
 0x326   : > { %9384 = vmatmul.mubr.msk.bf16.gmra.mrb[72].mxu1 %vm1927_vm4, %v4546_v44  ;;  %9473 = vmatprep.subr.bf16.mxu0 %v10022_v1 }
 0x327   : > { %9387 = vmatprep.mubr.msk.bf16.mxu1 %vm10023_vm0, %v10022_v1  ;;  %v3644_v28 = vmax.f32 %v3630_v30, 0.0  ;;  %v3631_v26 = vadd.f32 %v11520_v49, %v3610_v10 }
 0x328   : > { %v3443_v40 = vpop.f32.mrb[224].mxu1 }
 0x329   : > { %v11626_v0 = vpop.f32.mrb[12].mxu0  ;;  %3658 = vst [vmem:[#allocation4 + $0x50] sm:$0xff] %v3644_v28  ;;  %v3645_v38 = vmax.f32 %v3631_v26, 0.0  ;;  %v3462_v42 = vadd.f32 %v3443_v40, %v11502_v15  ;;  %v9153_v58 = vpop.f32.mrb[225].mxu1  ;;  %v5302_v26 = vrot.slane %v11588_v47, 2 }
 0x32a   : > { %v9243_v53 = vpop.f32.mrb[13].mxu0  ;;  %v3446_v35 = vpop.f32.mrb[226].mxu1 }
 0x32b   : > { %3659 = vst [vmem:[#allocation4 + $0x58] sm:$0xff] %v3645_v38  ;;  %v3611_v52 = vadd.f32 %v11495_v41, %v3462_v42  ;;  %v11635_v46 = vpop.f32.mrb[14].mxu0  ;;  %v3463_v4 = vadd.f32 %v3446_v35, %v11508_v55  ;;  %v9154_v2 = vpop.f32.mrb[227].mxu1  ;;  %v4828_v53 = vld [vmem:[#allocation3 + $0xa9] sm:$0xff]  ;;  %v9897_v35 = vld [vmem:[%s12510_s5 + $0x48] sm:$0xff]  }
 0x32c   : > { %9470 = vmatmul.mubr.msk.bf16.vlgmr.msra.gmra.mrb[108].mxu0 %vm499_vm2, %v5143_v45  ;;  %v9244_v14 = vpop.f32.mrb[15].mxu0 }
 0x32d   : > { %9474 = vmatpush3.bf16.msra.mxu0 %v9894_v32  ;;  %9475 = vmatprep.mubr.msk.bf16.mxu0 %vm10023_vm0, %v10022_v1  ;;  %v3632_v15 = vadd.f32 %v11520_v49, %v3611_v52  ;;  %v3612_v41 = vadd.f32 %v11498_v22, %v3463_v4  ;;  %v5410_v32 = vmax.f32 %v5407_v39, %v5409_v6  ;;  %v4829_v52 = vld [vmem:[#allocation3 + $0xb1] sm:$0xff]  ;;  %v9899_v6 = vld [vmem:[%s12510_s5 + $0x68] sm:$0xff]  }
 0x32e   : > { %9388 = vmatmul.mubr.msk.bf16.gmra.mrb[76].mxu1 %vm1927_vm4, %v4547_v16  ;;  %9485 = vmatprep.subr.bf16.mxu0 %v10022_v1 }
 0x32f   : > { %9391 = vmatprep.mubr.msk.bf16.mxu1 %vm10023_vm0, %v10022_v1  ;;  %v3646_v55 = vmax.f32 %v3632_v15, 0.0  ;;  %v3633_v9 = vadd.f32 %v11520_v49, %v3612_v41 }
 0x330   : > { %v3764_v33 = vpop.f32.mrb[228].mxu1 }
 0x331   : > { %v11647_v61 = vpop.f32.mrb[16].mxu0  ;;  %3660 = vst [vmem:[#allocation4 + $0x60] sm:$0xff] %v3646_v55  ;;  %v11653_v50 = vadd.f32 %v11514_v8, %v3764_v33  ;;  %v9189_v22 = vpop.f32.mrb[229].mxu1  ;;  %v3647_v17 = vmax.f32 %v3633_v9, 0.0  ;;  %v4841_v9 = vpack.c.bf16 %v4829_v52, %v4828_v53  ;;  %v4830_v33 = vld [vmem:[#allocation3 + $0xb9] sm:$0xff] }
 0x332   : > { %v9279_v23 = vpop.f32.mrb[17].mxu0  ;;  %v3767_v3 = vpop.f32.mrb[230].mxu1  ;;  %v5412_v8 = vld [vmem:[#allocation4 + $0x31] ss:$2 sm:$0x7f]  ;;  %v9898_v22 = vld [vmem:[%s12510_s5 + $0x58] sm:$0xff]  }
 0x333   : > { %v11656_v31 = vpop.f32.mrb[18].mxu0  ;;  %v11660_v49 = vadd.f32 %v11522_v24, %v3767_v3  ;;  %v9190_v12 = vpop.f32.mrb[231].mxu1  ;;  %3661 = vst [vmem:[#allocation4 + $0x68] sm:$0xff] %v3647_v17  ;;  %v4827_v24 = vld [vmem:[#allocation3 + $0xa1] sm:$0xff]  ;;  %v5415_v36 = vmax.f32 %v5412_v8, %v5414_v29 }
 0x334   : > { %9476 = vmatmul.mubr.msk.bf16.vlgmr.msra.gmra.mrb[112].mxu0 %vm499_vm2, %v5196_v7  ;;  %v9280_v25 = vpop.f32.mrb[19].mxu0 }
 0x335   : > { %9486 = vmatpush3.bf16.msra.mxu0 %v9895_v21  ;;  %9487 = vmatprep.mubr.msk.bf16.mxu0 %vm10023_vm0, %v10022_v1  ;;  %v5416_v47 = vmax.f32 %v5410_v32, %v5415_v36  ;;  %v4831_v21 = vld [vmem:[#allocation3 + $0xc1] sm:$0xff] }
 0x336   : > { %9392 = vmatmul.mubr.msk.bf16.gmra.mrb[80].mxu1 %vm1927_vm4, %v4548_v43  ;;  %9497 = vmatprep.subr.bf16.mxu0 %v10022_v1  ;;  %v4842_v39 = vpack.c.bf16 %v4831_v21, %v4830_v33 }
 0x337   : > { %9427 = vmatprep.mubr.msk.bf16.mxu1 %vm10023_vm0, %v10022_v1  ;;  %v11701_v14 = vpack.c.bf16 %v5416_v47, %v5416_v47  ;;  %v5791_v47 = vld [vmem:[#allocation4 + $0x41] ss:$2 sm:$0x7f] }
 0x338   : > { %v3772_v20 = vpop.f32.mrb[232].mxu1 }
 0x339   : > { %v11668_v44 = vpop.f32.mrb[20].mxu0  ;;  %v11674_v30 = vadd.f32 %v11535_v56, %v3772_v20  ;;  %v9193_v10 = vpop.f32.mrb[233].mxu1  ;;  %v4840_v56 = vpack.c.bf16 %v4827_v24, %v4826_v57  ;;  %v5527_v17 = vrot.slane %v11701_v14, 1  ;;  %v4833_v24 = vld [vmem:[#allocation3 + $0xd1] sm:$0xff] }
 0x33a   : > { %v9283_v28 = vpop.f32.mrb[21].mxu0  ;;  %v3775_v40 = vpop.f32.mrb[234].mxu1  ;;  %v5796_v20 = vld [vmem:[#allocation4 + $0x51] ss:$2 sm:$0x7f] }
 0x33b   : > { %v11677_v62 = vpop.f32.mrb[22].mxu0  ;;  %v11683_v38 = vadd.f32 %v11541_v60, %v3775_v40  ;;  %v9194_v42 = vpop.f32.mrb[235].mxu1  ;;  %v5633_v28 = vrot.slane %v11701_v14, 2 }
 0x33c   : > { %v9284_v58 = vpop.f32.mrb[23].mxu0  ;;  %9488 = vmatmul.mubr.msk.bf16.vlgmr.msra.gmra.mrb[116].mxu0 %vm499_vm2, %v5302_v26  ;;  %v5798_v26 = vld [vmem:[#allocation4 + $0x52] ss:$2 sm:$0x7f] }
 0x33d   : > { %9498 = vmatpush3.bf16.msra.mxu0 %v9896_v51  ;;  %9499 = vmatprep.mubr.msk.bf16.mxu0 %vm10023_vm0, %v10022_v1 }
 0x33e   : > { %9428 = vmatmul.mubr.msk.bf16.vlgmr.msra.gmra.mrb[84].mxu1 %vm1927_vm4, %v4840_v56  ;;  %9509 = vmatprep.subr.bf16.mxu0 %v10022_v1 }
 0x33f   : > { %9431 = vmatprep.mubr.msk.bf16.mxu1 %vm10023_vm0, %v10022_v1  ;;  %9480 = vmatpush3.bf16.msra.mxu1 %v9903_v11 }
 0x340   : > { %9491 = vmatprep.subr.bf16.mxu1 %v10022_v1  ;;  %v3780_v60 = vpop.f32.mrb[236].mxu1 }
 0x341   : > { %v11693_v45 = vpop.f32.mrb[24].mxu0  ;;  %v11699_v16 = vadd.f32 %v11553_v59, %v3780_v60  ;;  %v9197_v4 = vpop.f32.mrb[237].mxu1  ;;  %v5793_v60 = vld [vmem:[#allocation4 + $0x42] ss:$2 sm:$0x7f] }
 0x342   : > { %v9287_v2 = vpop.f32.mrb[25].mxu0  ;;  %v3783_v15 = vpop.f32.mrb[238].mxu1  ;;  %v4835_v4 = vld [vmem:[#allocation3 + $0xe1] sm:$0xff] }
 0x343   : > { %v11703_v41 = vpop.f32.mrb[26].mxu0  ;;  %v11706_v19 = vadd.f32 %v11557_v27, %v3783_v15  ;;  %v9198_v37 = vpop.f32.mrb[239].mxu1  ;;  %v9900_v2 = vld [vmem:[%s12510_s5 + $0x78] sm:$0xff]  }
 0x344   : > { %v9288_v55 = vpop.f32.mrb[27].mxu0  ;;  %9500 = vmatmul.mubr.msk.bf16.vlgmr.msra.gmra.mrb[120].mxu0 %vm499_vm2, %v11701_v14 }
 0x345   : > { %9510 = vmatpush3.bf16.msra.mxu0 %v9897_v35  ;;  %9511 = vmatprep.mubr.msk.bf16.mxu0 %vm10023_vm0, %v10022_v1  ;;  %v4834_v35 = vld [vmem:[#allocation3 + $0xd9] sm:$0xff] }
 0x346   : > { %9432 = vmatmul.mubr.msk.bf16.gmra.mrb[88].mxu1 %vm1927_vm4, %v4841_v9  ;;  %9521 = vmatprep.subr.bf16.mxu0 %v10022_v1 }
 0x347   : > { %9435 = vmatprep.mubr.msk.bf16.mxu1 %vm10023_vm0, %v10022_v1 }
 0x348   : > { %v3788_v59 = vpop.f32.mrb[240].mxu1 }
 0x349   : > { %v11716_v27 = vpop.f32.mrb[28].mxu0  ;;  %v11722_v23 = vadd.f32 %v11566_v13, %v3788_v59  ;;  %v9201_v7 = vpop.f32.mrb[241].mxu1  ;;  %v5739_v59 = vrot.slane %v11701_v14, 3 }
 0x34a   : > { %v9291_v43 = vpop.f32.mrb[29].mxu0  ;;  %v3791_v3 = vpop.f32.mrb[242].mxu1 }
 0x34b   : > { %v11725_v12 = vpop.f32.mrb[30].mxu0  ;;  %v11728_v25 = vadd.f32 %v11570_v54, %v3791_v3  ;;  %v9202_v8 = vpop.f32.mrb[243].mxu1  ;;  %v4832_v54 = vld [vmem:[#allocation3 + $0xc9] sm:$0xff] }
 0x34c   : > { %v9292_v29 = vpop.f32.mrb[31].mxu0  ;;  %9512 = vmatmul.mubr.msk.bf16.vlgmr.msra.gmra.mrb[124].mxu0 %vm499_vm2, %v5527_v17  ;;  %v4843_v56 = vpack.c.bf16 %v4833_v24, %v4832_v54  ;;  %v4844_v17 = vpack.c.bf16 %v4835_v4, %v4834_v35  ;;  %v4836_v8 = vld [vmem:[#allocation3 + $0xe9] sm:$0xff] }
 0x34d   : > { %9522 = vmatpush3.bf16.msra.mxu0 %v9898_v22  ;;  %9523 = vmatprep.mubr.msk.bf16.mxu0 %vm10023_vm0, %v10022_v1  ;;  %v4837_v29 = vld [vmem:[#allocation3 + $0xf1] sm:$0xff] }
 0x34e   : > { %9436 = vmatmul.mubr.msk.bf16.gmra.mrb[92].mxu1 %vm1927_vm4, %v4842_v39  ;;  %9533 = vmatprep.subr.bf16.mxu0 %v10022_v1  ;;  %v9901_v39 = vld [vmem:[%s12510_s5 + $0x88] sm:$0xff]  }
 0x34f   : > { %9439 = vmatprep.mubr.msk.bf16.mxu1 %vm10023_vm0, %v10022_v1 }
 0x350   : > { %v3796_v13 = vpop.f32.mrb[244].mxu1 }
 0x351   : > { %v11737_v57 = vpop.f32.mrb[32].mxu0  ;;  %v11743_v51 = vadd.f32 %v11581_v48, %v3796_v13  ;;  %v9205_v36 = vpop.f32.mrb[245].mxu1  ;;  %v5799_v48 = vmax.f32 %v5796_v20, %v5798_v26 }
 0x352   : > { %v9295_v10 = vpop.f32.mrb[33].mxu0  ;;  %v3799_v40 = vpop.f32.mrb[246].mxu1 }
 0x353   : > { %v11746_v11 = vpop.f32.mrb[34].mxu0  ;;  %v11749_v32 = vadd.f32 %v11590_v5, %v3799_v40  ;;  %v9206_v42 = vpop.f32.mrb[247].mxu1  ;;  %v5794_v5 = vmax.f32 %v5791_v47, %v5793_v60  ;;  %v4845_v40 = vpack.c.bf16 %v4837_v29, %v4836_v8 }
 0x354   : > { %v9296_v58 = vpop.f32.mrb[35].mxu0  ;;  %9524 = vmatmul.mubr.msk.bf16.vlgmr.msra.gmra.mrb[128].mxu0 %vm499_vm2, %v5633_v28  ;;  %v4839_v42 = vld [vmem:[#allocation3 + $0x101] sm:$0xff] }
 0x355   : > { %9534 = vmatpush3.bf16.msra.mxu0 %v9899_v6  ;;  %9535 = vmatprep.mubr.msk.bf16.mxu0 %vm10023_vm0, %v10022_v1  ;;  %v5800_v15 = vmax.f32 %v5794_v5, %v5799_v48 }
 0x356   : > { %9440 = vmatmul.mubr.msk.bf16.gmra.mrb[96].mxu1 %vm1927_vm4, %v4843_v56  ;;  %9545 = vmatprep.subr.bf16.mxu0 %v10022_v1  ;;  %v9902_v56 = vld [vmem:[%s12510_s5 + $0x98] sm:$0xff]  }
 0x357   : > { %9443 = vmatprep.mubr.msk.bf16.mxu1 %vm10023_vm0, %v10022_v1 }
 0x358   : > { %v3804_v53 = vpop.f32.mrb[248].mxu1 }
 0x359   : > { %v11758_v52 = vpop.f32.mrb[36].mxu0  ;;  %v11764_v37 = vadd.f32 %v11605_v18, %v3804_v53  ;;  %v9209_v55 = vpop.f32.mrb[249].mxu1  ;;  %v11775_v18 = vpack.c.bf16 %v5800_v15, %v5800_v15 }
 0x35a   : > { %v9299_v9 = vpop.f32.mrb[37].mxu0  ;;  %v3807_v33 = vpop.f32.mrb[250].mxu1 }
 0x35b   : > { %v11767_v21 = vpop.f32.mrb[38].mxu0  ;;  %v11770_v22 = vadd.f32 %v11611_v63, %v3807_v33  ;;  %v9210_v7 = vpop.f32.mrb[251].mxu1  ;;  %v5856_v6 = vshrl.u32 %v11775_v18, 16 }
 0x35c   : > { %v9300_v43 = vpop.f32.mrb[39].mxu0  ;;  %9536 = vmatmul.mubr.msk.bf16.vlgmr.msra.gmra.mrb[132].mxu0 %vm499_vm2, %v5739_v59 }
 0x35d   : > { %9546 = vmatpush3.bf16.msra.mxu0 %v9900_v2  ;;  %9547 = vmatprep.mubr.msk.bf16.mxu0 %vm10023_vm0, %v10022_v1  ;;  %v5964_v5 = vrot.slane %v5856_v6, 1  ;;  %v6070_v43 = vrot.slane %v5856_v6, 2 }
 0x35e   : > { %9444 = vmatmul.mubr.msk.bf16.gmra.mrb[100].mxu1 %vm1927_vm4, %v4844_v17  ;;  %9557 = vmatprep.subr.bf16.mxu0 %v10022_v1 }
 0x35f   : > { %9447 = vmatprep.mubr.msk.bf16.mxu1 %vm10023_vm0, %v10022_v1 }
 0x360   : > { %v3812_v63 = vpop.f32.mrb[252].mxu1 }
 0x361   : > { %v11781_v3 = vpop.f32.mrb[40].mxu0  ;;  %v11787_v13 = vadd.f32 %v11626_v0, %v3812_v63  ;;  %v9213_v54 = vpop.f32.mrb[253].mxu1  ;;  %v4838_v0 = vld [vmem:[#allocation3 + $0xf9] sm:$0xff] }
 0x362   : > { %v9303_v24 = vpop.f32.mrb[41].mxu0  ;;  %v3815_v20 = vpop.f32.mrb[254].mxu1  ;;  %v4846_v53 = vpack.c.bf16 %v4839_v42, %v4838_v0  ;;  %v5249_v54 = vrot.slane %v11578_v34, 2 }
 0x363   : > { %v11790_v36 = vpop.f32.mrb[42].mxu0  ;;  %v11793_v10 = vadd.f32 %v11635_v46, %v3815_v20  ;;  %v9214_v28 = vpop.f32.mrb[255].mxu1 }
 0x364   : > { %v9304_v26 = vpop.f32.mrb[43].mxu0  ;;  %9548 = vmatmul.mubr.msk.bf16.vlgmr.msra.gmra.mrb[136].mxu0 %vm499_vm2, %v5856_v6 }
 0x365   : > { %9558 = vmatpush3.bf16.msra.mxu0 %v9901_v39  ;;  %9559 = vmatprep.mubr.msk.bf16.mxu0 %vm10023_vm0, %v10022_v1 }
 0x366   : > { %9448 = vmatmul.mubr.msk.bf16.gmra.mrb[104].mxu1 %vm1927_vm4, %v4845_v40  ;;  %9569 = vmatprep.subr.bf16.mxu0 %v10022_v1 }
 0x367   : > { %9451 = vmatprep.mubr.msk.bf16.mxu1 %vm10023_vm0, %v10022_v1 }
 0x368   : > { %v4012_v46 = vpop.f32.mrb[0].mxu1 }
 0x369   : > { %v11802_v58 = vpop.f32.mrb[44].mxu0  ;;  %v4067_v47 = vadd.f32 %v4012_v46, %v11653_v50  ;;  %v9249_v60 = vpop.f32.mrb[1].mxu1 }
 0x36a   : > { %v9339_v48 = vpop.f32.mrb[45].mxu0  ;;  %v4015_v35 = vpop.f32.mrb[2].mxu1 }
 0x36b   : > { %v11808_v4 = vpop.f32.mrb[46].mxu0  ;;  %v4068_v2 = vadd.f32 %v4015_v35, %v11660_v49  ;;  %v9250_v15 = vpop.f32.mrb[3].mxu1  ;;  %v11813_v9 = vadd.f32 %v11647_v61, %v4067_v47 }
 0x36c   : > { %v9340_v55 = vpop.f32.mrb[47].mxu0  ;;  %9560 = vmatmul.mubr.msk.bf16.vlgmr.msra.gmra.mrb[140].mxu0 %vm499_vm2, %v5964_v5 }
 0x36d   : > { %9570 = vmatpush3.bf16.msra.mxu0 %v9902_v56  ;;  %9571 = vmatprep.mubr.msk.bf16.mxu0 %vm10023_vm0, %v10022_v1  ;;  %v11819_v50 = vadd.f32 %v11656_v31, %v4068_v2  ;;  %v9904_v31 = vld [vmem:[%s12510_s5 + $0x30] sm:$0xff]   ;;  %v5355_v56 = vrot.slane %v11578_v34, 3  ;;  %v5472_v55 = vshrl.u32 %v11701_v14, 16 }
 0x36e   : > { %9452 = vmatmul.mubr.msk.bf16.gmra.mrb[108].mxu1 %vm1927_vm4, %v4846_v53  ;;  %9581 = vmatprep.subr.bf16.mxu0 %v10022_v1 }
 0x36f   : > { %9481 = vmatprep.mubr.msk.bf16.mxu1 %vm10023_vm0, %v10022_v1 }
 0x370   : > { %v4020_v49 = vpop.f32.mrb[4].mxu1 }
 0x371   : > { %v11824_v59 = vpop.f32.mrb[48].mxu0  ;;  %v4069_v61 = vadd.f32 %v4020_v49, %v11674_v30  ;;  %v9253_v33 = vpop.f32.mrb[5].mxu1 }
 0x372   : > { %v9343_v7 = vpop.f32.mrb[49].mxu0  ;;  %v4023_v17 = vpop.f32.mrb[6].mxu1 }
 0x373   : > { %v11827_v63 = vpop.f32.mrb[50].mxu0  ;;  %v4070_v8 = vadd.f32 %v4023_v17, %v11683_v38  ;;  %v9254_v29 = vpop.f32.mrb[7].mxu1  ;;  %v11836_v30 = vadd.f32 %v11668_v44, %v4069_v61 }
 0x374   : > { %v9344_v39 = vpop.f32.mrb[51].mxu0  ;;  %9572 = vmatmul.mubr.msk.bf16.vlgmr.msra.gmra.mrb[144].mxu0 %vm499_vm2, %v6070_v43  ;;  %v5580_v29 = vrot.slane %v5472_v55, 1 }
 0x375   : > { %9583 = vmatprep.mubr.msk.bf16.mxu0 %vm10023_vm0, %v10022_v1  ;;  %v11842_v24 = vadd.f32 %v11677_v62, %v4070_v8  ;;  %v9905_v62 = vld [vmem:[%s12510_s5 + $0x40] sm:$0xff]  }
 0x376   : > { %9482 = vmatmul.mubr.msk.bf16.vlgmr.msra.gmra.mrb[112].mxu1 %vm499_vm2, %v5249_v54 }
 0x377   : > { %9492 = vmatpush3.bf16.msra.mxu1 %v9904_v31  ;;  %9493 = vmatprep.mubr.msk.bf16.mxu1 %vm10023_vm0, %v10022_v1 }
 0x378   : > { %9503 = vmatprep.subr.bf16.mxu1 %v10022_v1  ;;  %v4028_v38 = vpop.f32.mrb[8].mxu1 }
 0x379   : > { %v11847_v6 = vpop.f32.mrb[52].mxu0  ;;  %v4071_v44 = vadd.f32 %v4028_v38, %v11699_v16  ;;  %v9257_v20 = vpop.f32.mrb[9].mxu1 }
 0x37a   : > { %v9347_v28 = vpop.f32.mrb[53].mxu0  ;;  %v4031_v26 = vpop.f32.mrb[10].mxu1 }
 0x37b   : > { %v11850_v40 = vpop.f32.mrb[54].mxu0  ;;  %v4072_v0 = vadd.f32 %v4031_v26, %v11706_v19  ;;  %v9258_v42 = vpop.f32.mrb[11].mxu1  ;;  %v11858_v47 = vadd.f32 %v11693_v45, %v4071_v44 }
 0x37c   : > { %v9348_v46 = vpop.f32.mrb[55].mxu0  ;;  %v5686_v42 = vrot.slane %v5472_v55, 2 }
 0x37d   : > { %v11862_v16 = vadd.f32 %v11703_v41, %v4072_v0  ;;  %v9906_v41 = vld [vmem:[%s12510_s5 + $0x50] sm:$0xff]  }
 0x37e   : > { %9494 = vmatmul.mubr.msk.bf16.vlgmr.msra.gmra.mrb[116].mxu1 %vm499_vm2, %v5355_v56 }
 0x37f   : > { %9504 = vmatpush3.bf16.msra.mxu1 %v9905_v62  ;;  %9505 = vmatprep.mubr.msk.bf16.mxu1 %vm10023_vm0, %v10022_v1 }
 0x380   : > { %9515 = vmatprep.subr.bf16.mxu1 %v10022_v1  ;;  %v4036_v60 = vpop.f32.mrb[12].mxu1 }
 0x381   : > { %v11867_v19 = vpop.f32.mrb[56].mxu0  ;;  %v4073_v48 = vadd.f32 %v4036_v60, %v11722_v23  ;;  %v9261_v34 = vpop.f32.mrb[13].mxu1 }
 0x382   : > { %v9351_v5 = vpop.f32.mrb[57].mxu0  ;;  %v4039_v45 = vpop.f32.mrb[14].mxu1 }
 0x383   : > { %v11870_v53 = vpop.f32.mrb[58].mxu0  ;;  %v4074_v35 = vadd.f32 %v4039_v45, %v11728_v25  ;;  %v9262_v2 = vpop.f32.mrb[15].mxu1  ;;  %v11878_v49 = vadd.f32 %v11716_v27, %v4073_v48 }
 0x384   : > { %v9352_v15 = vpop.f32.mrb[59].mxu0 }
 0x385   : > { %v11882_v23 = vadd.f32 %v11725_v12, %v4074_v35  ;;  %v9907_v12 = vld [vmem:[%s12510_s5 + $0x60] sm:$0xff]  }
 0x386   : > { %9506 = vmatmul.mubr.msk.bf16.vlgmr.msra.gmra.mrb[120].mxu1 %vm499_vm2, %v5472_v55 }
 0x387   : > { %9516 = vmatpush3.bf16.msra.mxu1 %v9906_v41  ;;  %9517 = vmatprep.mubr.msk.bf16.mxu1 %vm10023_vm0, %v10022_v1 }
 0x388   : > { %9527 = vmatprep.subr.bf16.mxu1 %v10022_v1  ;;  %v4044_v61 = vpop.f32.mrb[16].mxu1 }
 0x389   : > { %v11887_v25 = vpop.f32.mrb[60].mxu0  ;;  %v4075_v33 = vadd.f32 %v4044_v61, %v11743_v51  ;;  %v9265_v14 = vpop.f32.mrb[17].mxu1 }
 0x38a   : > { %v9355_v7 = vpop.f32.mrb[61].mxu0  ;;  %v4047_v27 = vpop.f32.mrb[18].mxu1 }
 0x38b   : > { %v11890_v43 = vpop.f32.mrb[62].mxu0  ;;  %v4076_v17 = vadd.f32 %v4047_v27, %v11749_v32  ;;  %v9266_v31 = vpop.f32.mrb[19].mxu1  ;;  %v11897_v39 = vadd.f32 %v11737_v57, %v4075_v33 }
 0x38c   : > { %v9356_v8 = vpop.f32.mrb[63].mxu0 }
 0x38d   : > { %v11901_v51 = vadd.f32 %v11746_v11, %v4076_v17  ;;  %v9908_v11 = vld [vmem:[%s12510_s5 + $0x70] sm:$0xff]   ;;  %v5911_v17 = vrot.slane %v11775_v18, 1 }
 0x38e   : > { %9518 = vmatmul.mubr.msk.bf16.vlgmr.msra.gmra.mrb[124].mxu1 %vm499_vm2, %v5580_v29 }
 0x38f   : > { %9528 = vmatpush3.bf16.msra.mxu1 %v9907_v12  ;;  %9529 = vmatprep.mubr.msk.bf16.mxu1 %vm10023_vm0, %v10022_v1 }
 0x390   : > { %9539 = vmatprep.subr.bf16.mxu1 %v10022_v1  ;;  %v4052_v54 = vpop.f32.mrb[20].mxu1 }
 0x391   : > { %v11906_v38 = vpop.f32.mrb[64].mxu0  ;;  %v4077_v32 = vadd.f32 %v4052_v54, %v11764_v37  ;;  %v9269_v44 = vpop.f32.mrb[21].mxu1 }
 0x392   : > { %v9359_v20 = vpop.f32.mrb[65].mxu0  ;;  %v4055_v57 = vpop.f32.mrb[22].mxu1 }
 0x393   : > { %v11909_v28 = vpop.f32.mrb[66].mxu0  ;;  %v4078_v26 = vadd.f32 %v4055_v57, %v11770_v22  ;;  %v9270_v62 = vpop.f32.mrb[23].mxu1  ;;  %v11916_v46 = vadd.f32 %v11758_v52, %v4077_v32  ;;  %v9911_v20 = vld [vmem:[%s12510_s5 + $0xa0] sm:$0xff]  }
 0x394   : > { %v9360_v0 = vpop.f32.mrb[67].mxu0  ;;  %v6017_v62 = vrot.slane %v11775_v18, 2 }
 0x395   : > { %v11920_v37 = vadd.f32 %v11767_v21, %v4078_v26  ;;  %v9909_v21 = vld [vmem:[%s12510_s5 + $0x80] sm:$0xff]  }
 0x396   : > { %9530 = vmatmul.mubr.msk.bf16.vlgmr.msra.gmra.mrb[128].mxu1 %vm499_vm2, %v5686_v42 }
 0x397   : > { %9540 = vmatpush3.bf16.msra.mxu1 %v9908_v11  ;;  %9541 = vmatprep.mubr.msk.bf16.mxu1 %vm10023_vm0, %v10022_v1 }
 0x398   : > { %9551 = vmatprep.subr.bf16.mxu1 %v10022_v1  ;;  %v4060_v56 = vpop.f32.mrb[24].mxu1 }
 0x399   : > { %v11925_v60 = vpop.f32.mrb[68].mxu0  ;;  %v4079_v22 = vadd.f32 %v4060_v56, %v11787_v13  ;;  %v9273_v48 = vpop.f32.mrb[25].mxu1 }
 0x39a   : > { %v9363_v34 = vpop.f32.mrb[69].mxu0  ;;  %v4063_v52 = vpop.f32.mrb[26].mxu1 }
 0x39b   : > { %v11928_v5 = vpop.f32.mrb[70].mxu0  ;;  %v4080_v45 = vadd.f32 %v4063_v52, %v11793_v10  ;;  %v9274_v41 = vpop.f32.mrb[27].mxu1  ;;  %v11935_v2 = vadd.f32 %v11781_v3, %v4079_v22 }
 0x39c   : > { %v9364_v35 = vpop.f32.mrb[71].mxu0  ;;  %v6123_v41 = vrot.slane %v11775_v18, 3 }
 0x39d   : > { %v11940_v13 = vadd.f32 %v11790_v36, %v4080_v45  ;;  %v9910_v36 = vld [vmem:[%s12510_s5 + $0x90] sm:$0xff]  }
 0x39e   : > { %9542 = vmatmul.mubr.msk.bf16.vlgmr.msra.gmra.mrb[132].mxu1 %vm499_vm2, %v11775_v18 }
 0x39f   : > { %9552 = vmatpush3.bf16.msra.mxu1 %v9909_v21  ;;  %9553 = vmatprep.mubr.msk.bf16.mxu1 %vm10023_vm0, %v10022_v1 }
 0x3a0   : > { %9563 = vmatprep.subr.bf16.mxu1 %v10022_v1  ;;  %v4310_v15 = vpop.f32.mrb[28].mxu1 }
 0x3a1   : > { %v11945_v55 = vpop.f32.mrb[72].mxu0  ;;  %v4365_v10 = vadd.f32 %v4310_v15, %v11813_v9  ;;  %v9309_v61 = vpop.f32.mrb[29].mxu1 }
 0x3a2   : > { %v9399_v3 = vpop.f32.mrb[73].mxu0  ;;  %v4313_v33 = vpop.f32.mrb[30].mxu1 }
 0x3a3   : > { %v11948_v14 = vpop.f32.mrb[74].mxu0  ;;  %v4366_v7 = vadd.f32 %v4313_v33, %v11819_v50  ;;  %v9310_v27 = vpop.f32.mrb[31].mxu1  ;;  %v11956_v31 = vadd.f32 %v11802_v58, %v4365_v10  ;;  %v9912_v50 = vld [vmem:[%s12510_s5 + $0xa8] sm:$0xff]  }
 0x3a4   : > { %v9400_v12 = vpop.f32.mrb[75].mxu0  ;;  %9582 = vmatpush3.bf16.msra.mxu0 %v9912_v50 }
 0x3a5   : > { %v11960_v9 = vadd.f32 %v11808_v4, %v4366_v7  ;;  %9593 = vmatprep.subr.bf16.mxu0 %v10022_v1 }
 0x3a6   : > { %9554 = vmatmul.mubr.msk.bf16.vlgmr.msra.gmra.mrb[136].mxu1 %vm499_vm2, %v5911_v17 }
 0x3a7   : > { %9564 = vmatpush3.bf16.msra.mxu1 %v9910_v36  ;;  %9565 = vmatprep.mubr.msk.bf16.mxu1 %vm10023_vm0, %v10022_v1 }
 0x3a8   : > { %9575 = vmatprep.subr.bf16.mxu1 %v10022_v1  ;;  %v4318_v8 = vpop.f32.mrb[32].mxu1 }
 0x3a9   : > { %v11968_v29 = vpop.f32.mrb[76].mxu0  ;;  %v4367_v58 = vadd.f32 %v4318_v8, %v11836_v30  ;;  %v9313_v54 = vpop.f32.mrb[33].mxu1 }
 0x3aa   : > { %v9403_v32 = vpop.f32.mrb[77].mxu0  ;;  %v4321_v4 = vpop.f32.mrb[34].mxu1 }
 0x3ab   : > { %v11971_v44 = vpop.f32.mrb[78].mxu0  ;;  %v4368_v57 = vadd.f32 %v4321_v4, %v11842_v24  ;;  %v9314_v11 = vpop.f32.mrb[35].mxu1  ;;  %v11980_v30 = vadd.f32 %v11824_v59, %v4367_v58 }
 0x3ac   : > { %v9404_v26 = vpop.f32.mrb[79].mxu0 }
 0x3ad   : > { %v11984_v0 = vadd.f32 %v11827_v63, %v4368_v57  ;;  %v9913_v63 = vld [vmem:[%s12510_s5 + $0xb0] sm:$0xff]  }
 0x3ae   : > { %9566 = vmatmul.mubr.msk.bf16.vlgmr.msra.gmra.mrb[140].mxu1 %vm499_vm2, %v6017_v62 }
 0x3af   : > { %9576 = vmatpush3.bf16.msra.mxu1 %v9911_v20  ;;  %9577 = vmatprep.mubr.msk.bf16.mxu1 %vm10023_vm0, %v10022_v1 }
 0x3b0   : > { %9587 = vmatprep.subr.bf16.mxu1 %v10022_v1  ;;  %v4326_v42 = vpop.f32.mrb[36].mxu1 }
 0x3b1   : > { %v11989_v24 = vpop.f32.mrb[80].mxu0  ;;  %v4369_v56 = vadd.f32 %v4326_v42, %v11858_v47  ;;  %v9317_v22 = vpop.f32.mrb[37].mxu1 }
 0x3b2   : > { %v9407_v48 = vpop.f32.mrb[81].mxu0  ;;  %v4329_v59 = vpop.f32.mrb[38].mxu1 }
 0x3b3   : > { %v11992_v34 = vpop.f32.mrb[82].mxu0  ;;  %v4370_v52 = vadd.f32 %v4329_v59, %v11862_v16  ;;  %v9318_v21 = vpop.f32.mrb[39].mxu1  ;;  %v12000_v35 = vadd.f32 %v11847_v6, %v4369_v56 }
 0x3b4   : > { %v9408_v45 = vpop.f32.mrb[83].mxu0 }
 0x3b5   : > { %v12004_v47 = vadd.f32 %v11850_v40, %v4370_v52 }
 0x3b6   : > { %9578 = vmatmul.mubr.msk.bf16.vlgmr.msra.gmra.mrb[144].mxu1 %vm499_vm2, %v6123_v41 }
 0x3b7   : > { %9588 = vmatpush3.bf16.msra.mxu1 %v9913_v63  ;;  %9589 = vmatprep.mubr.msk.bf16.mxu1 %vm10023_vm0, %v10022_v1 }
 0x3b8   : > { %9599 = vmatprep.subr.bf16.mxu1 %v10022_v1  ;;  %v4334_v15 = vpop.f32.mrb[40].mxu1 }
 0x3b9   : > { %v12009_v16 = vpop.f32.mrb[84].mxu0  ;;  %v4371_v10 = vadd.f32 %v4334_v15, %v11878_v49  ;;  %v9321_v18 = vpop.f32.mrb[41].mxu1 }
 0x3ba   : > { %v9411_v61 = vpop.f32.mrb[85].mxu0  ;;  %v4337_v6 = vpop.f32.mrb[42].mxu1 }
 0x3bb   : > { %v12012_v3 = vpop.f32.mrb[86].mxu0  ;;  %v4372_v33 = vadd.f32 %v4337_v6, %v11882_v23  ;;  %v9322_v40 = vpop.f32.mrb[43].mxu1  ;;  %v12016_v7 = vadd.f32 %v11867_v19, %v4371_v10 }
 0x3bc   : > { %v9412_v36 = vpop.f32.mrb[87].mxu0 }
 0x3bd   : > { %v12019_v27 = vadd.f32 %v11870_v53, %v4372_v33 }
 0x3c0   : > { %v4342_v12 = vpop.f32.mrb[44].mxu1 }
 0x3c1   : > { %v12021_v17 = vpop.f32.mrb[88].mxu0  ;;  %v4373_v49 = vadd.f32 %v4342_v12, %v11897_v39  ;;  %v9325_v50 = vpop.f32.mrb[45].mxu1 }
 0x3c2   : > { %v9415_v8 = vpop.f32.mrb[89].mxu0  ;;  %v4345_v58 = vpop.f32.mrb[46].mxu1 }
 0x3c3   : > { %v12024_v54 = vpop.f32.mrb[90].mxu0  ;;  %v4374_v23 = vadd.f32 %v4345_v58, %v11901_v51  ;;  %v9326_v32 = vpop.f32.mrb[47].mxu1  ;;  %v12028_v19 = vadd.f32 %v11887_v25, %v4373_v49 }
 0x3c4   : > { %v9416_v4 = vpop.f32.mrb[91].mxu0 }
 0x3c5   : > { %v12031_v53 = vadd.f32 %v11890_v43, %v4374_v23 }
 0x3c8   : > { %v4350_v20 = vpop.f32.mrb[48].mxu1 }
 0x3c9   : > { %v12033_v57 = vpop.f32.mrb[92].mxu0  ;;  %v4375_v39 = vadd.f32 %v4350_v20, %v11916_v46  ;;  %v9329_v11 = vpop.f32.mrb[49].mxu1 }
 0x3ca   : > { %v9419_v26 = vpop.f32.mrb[93].mxu0  ;;  %v4353_v62 = vpop.f32.mrb[50].mxu1 }
 0x3cb   : > { %v12036_v42 = vpop.f32.mrb[94].mxu0  ;;  %v4376_v51 = vadd.f32 %v4353_v62, %v11920_v37  ;;  %v9330_v56 = vpop.f32.mrb[51].mxu1  ;;  %v12040_v25 = vadd.f32 %v11906_v38, %v4375_v39 }
 0x3cc   : > { %v9420_v22 = vpop.f32.mrb[95].mxu0 }
 0x3cd   : > { %v12043_v43 = vadd.f32 %v11909_v28, %v4376_v51 }
 0x3d0   : > { %v4358_v48 = vpop.f32.mrb[52].mxu1 }
 0x3d1   : > { %v12045_v59 = vpop.f32.mrb[96].mxu0  ;;  %v4377_v46 = vadd.f32 %v4358_v48, %v11935_v2  ;;  %v9333_v63 = vpop.f32.mrb[53].mxu1 }
 0x3d2   : > { %v9423_v52 = vpop.f32.mrb[97].mxu0  ;;  %v4361_v21 = vpop.f32.mrb[54].mxu1 }
 0x3d3   : > { %v12048_v45 = vpop.f32.mrb[98].mxu0  ;;  %v4378_v37 = vadd.f32 %v4361_v21, %v11940_v13  ;;  %v9334_v41 = vpop.f32.mrb[55].mxu1  ;;  %v12052_v38 = vadd.f32 %v11925_v60, %v4377_v46 }
 0x3d4   : > { %v9424_v15 = vpop.f32.mrb[99].mxu0 }
 0x3d5   : > { %v12055_v28 = vadd.f32 %v11928_v5, %v4378_v37 }
 0x3d8   : > { %v4608_v10 = vpop.f32.mrb[56].mxu1 }
 0x3d9   : > { %v4663_v18 = vadd.f32 %v4608_v10, %v11956_v31  ;;  %v9369_v61 = vpop.f32.mrb[57].mxu1 }
 0x3da   : > { %v4611_v2 = vpop.f32.mrb[58].mxu1 }
 0x3db   : > { %v4664_v6 = vadd.f32 %v4611_v2, %v11960_v9  ;;  %v9370_v33 = vpop.f32.mrb[59].mxu1  ;;  %v12060_v40 = vadd.f32 %v11945_v55, %v4663_v18 }
 0x3dd   : > { %v12063_v13 = vadd.f32 %v11948_v14, %v4664_v6 }
 0x3e0   : > { %v4616_v36 = vpop.f32.mrb[60].mxu1 }
 0x3e1   : > { %v4665_v60 = vadd.f32 %v4616_v36, %v11980_v30  ;;  %v9373_v12 = vpop.f32.mrb[61].mxu1 }
 0x3e2   : > { %v4619_v5 = vpop.f32.mrb[62].mxu1 }
 0x3e3   : > { %v4666_v49 = vadd.f32 %v4619_v5, %v11984_v0  ;;  %v9374_v50 = vpop.f32.mrb[63].mxu1  ;;  %v12068_v31 = vadd.f32 %v11968_v29, %v4665_v60 }
 0x3e5   : > { %v12071_v9 = vadd.f32 %v11971_v44, %v4666_v49 }
 0x3e8   : > { %v4624_v8 = vpop.f32.mrb[64].mxu1 }
 0x3e9   : > { %v4667_v55 = vadd.f32 %v4624_v8, %v12000_v35  ;;  %v9377_v58 = vpop.f32.mrb[65].mxu1 }
 0x3ea   : > { %v4627_v14 = vpop.f32.mrb[66].mxu1 }
 0x3eb   : > { %v4668_v23 = vadd.f32 %v4627_v14, %v12004_v47  ;;  %v9378_v32 = vpop.f32.mrb[67].mxu1  ;;  %v12076_v30 = vadd.f32 %v11989_v24, %v4667_v55 }
 0x3ed   : > { %v12079_v0 = vadd.f32 %v11992_v34, %v4668_v23 }
 0x3ef   : > { %v5086_v4 = vpop.f32.mrb[100].mxu0 }
 0x3f0   : > { %v9459_v29 = vpop.f32.mrb[101].mxu0 }
 0x3f1   : > { %v4632_v20 = vpop.f32.mrb[68].mxu1  ;;  %v5089_v39 = vpop.f32.mrb[102].mxu0 }
 0x3f2   : > { %v4669_v44 = vadd.f32 %v4632_v20, %v12016_v7  ;;  %v9381_v11 = vpop.f32.mrb[69].mxu1  ;;  %v9460_v26 = vpop.f32.mrb[103].mxu0 }
 0x3f3   : > { %v4635_v35 = vpop.f32.mrb[70].mxu1 }
 0x3f4   : > { %v4670_v62 = vadd.f32 %v4635_v35, %v12019_v27  ;;  %v9382_v51 = vpop.f32.mrb[71].mxu1  ;;  %v12084_v47 = vadd.f32 %v12009_v16, %v4669_v44 }
 0x3f6   : > { %v12087_v24 = vadd.f32 %v12012_v3, %v4670_v62 }
 0x3f7   : > { %v5134_v34 = vpop.f32.mrb[104].mxu0 }
 0x3f8   : > { %v5135_v56 = vadd.f32 %v5134_v34, %v5086_v4  ;;  %v9465_v22 = vpop.f32.mrb[105].mxu0 }
 0x3f9   : > { %v4640_v48 = vpop.f32.mrb[72].mxu1  ;;  %v5137_v46 = vpop.f32.mrb[106].mxu0 }
 0x3fa   : > { %v4671_v63 = vadd.f32 %v4640_v48, %v12028_v19  ;;  %v9385_v7 = vpop.f32.mrb[73].mxu1  ;;  %v9466_v52 = vpop.f32.mrb[107].mxu0 }
 0x3fb   : > { %v4643_v21 = vpop.f32.mrb[74].mxu1 }
 0x3fc   : > { %v4672_v37 = vadd.f32 %v4643_v21, %v12031_v53  ;;  %v9386_v27 = vpop.f32.mrb[75].mxu1  ;;  %v12092_v41 = vadd.f32 %v12021_v17, %v4671_v63  ;;  %v6175_v21 = vld [vmem:[#allocation4 + $0x61] ss:$2 sm:$0x7f] }
 0x3fe   : > { %v12095_v16 = vadd.f32 %v12024_v54, %v4672_v37 }
 0x3ff   : > { %v5187_v3 = vpop.f32.mrb[108].mxu0 }
 0x400   : > { %v5193_v15 = vadd.f32 %v5187_v3, %v5135_v56  ;;  %v9471_v10 = vpop.f32.mrb[109].mxu0  ;;  %v6177_v3 = vld [vmem:[#allocation4 + $0x62] ss:$2 sm:$0x7f] }
 0x401   : > { %v4648_v18 = vpop.f32.mrb[76].mxu1  ;;  %v5190_v61 = vpop.f32.mrb[110].mxu0 }
 0x402   : > { %v4673_v2 = vadd.f32 %v4648_v18, %v12040_v25  ;;  %v9389_v19 = vpop.f32.mrb[77].mxu1  ;;  %v9472_v6 = vpop.f32.mrb[111].mxu0 }
 0x403   : > { %v4651_v33 = vpop.f32.mrb[78].mxu1 }
 0x404   : > { %v4674_v36 = vadd.f32 %v4651_v33, %v12043_v43  ;;  %v9390_v53 = vpop.f32.mrb[79].mxu1  ;;  %v12100_v60 = vadd.f32 %v12033_v57, %v4673_v2  ;;  %v6178_v2 = vmax.f32 %v6175_v21, %v6177_v3 }
 0x406   : > { %v12103_v17 = vadd.f32 %v12036_v42, %v4674_v36 }
 0x407   : > { %v5240_v54 = vpop.f32.mrb[112].mxu0 }
 0x408   : > { %v12105_v12 = vadd.f32 %v5240_v54, %v5193_v15  ;;  %v9477_v5 = vpop.f32.mrb[113].mxu0 }
 0x409   : > { %v4656_v49 = vpop.f32.mrb[80].mxu1  ;;  %v5243_v50 = vpop.f32.mrb[114].mxu0 }
 0x40a   : > { %v4675_v25 = vadd.f32 %v4656_v49, %v12052_v38  ;;  %v9393_v8 = vpop.f32.mrb[81].mxu1  ;;  %v9478_v55 = vpop.f32.mrb[115].mxu0  ;;  %v12120_v38 = vld [vmem:[%s12509_s4] ss:$0 sm:$0xff] }
 0x40b   : > { %v4659_v58 = vpop.f32.mrb[82].mxu1  ;;  %v9914_v8 = vld [vmem:[%s12510_s5 + $0xb8] sm:$0xff]  }
 0x40c   : > { %v4676_v43 = vadd.f32 %v4659_v58, %v12055_v28  ;;  %v9394_v14 = vpop.f32.mrb[83].mxu1  ;;  %v12110_v57 = vadd.f32 %v12045_v59, %v4675_v25 }
 0x40e   : > { %v12113_v42 = vadd.f32 %v12048_v45, %v4676_v43 }
 0x40f   : > { %v12115_v23 = vpop.f32.mrb[116].mxu0 }
 0x410   : > { %v9489_v32 = vpop.f32.mrb[117].mxu0 }
 0x411   : > { %v4906_v4 = vpop.f32.mrb[84].mxu1  ;;  %v5349_v29 = vpop.f32.mrb[118].mxu0 }
 0x412   : > { %v4961_v20 = vadd.f32 %v4906_v4, %v12060_v40  ;;  %v9429_v28 = vpop.f32.mrb[85].mxu1  ;;  %v9490_v39 = vpop.f32.mrb[119].mxu0 }
 0x413   : > { %v4909_v44 = vpop.f32.mrb[86].mxu1 }
 0x414   : > { %v4982_v59 = vadd.f32 %v12120_v38, %v4961_v20  ;;  %v4962_v45 = vadd.f32 %v4909_v44, %v12063_v13  ;;  %v9430_v11 = vpop.f32.mrb[87].mxu1 }
 0x416   : > { %v4996_v26 = vmax.f32 %v4982_v59, 0.0  ;;  %v4983_v35 = vadd.f32 %v12120_v38, %v4962_v45 }
 0x417   : > { %v12126_v62 = vpop.f32.mrb[120].mxu0 }
 0x418   : > { %5010 = vst [vmem:[#allocation4 + $0x70] sm:$0xff] %v4996_v26  ;;  %v4997_v51 = vmax.f32 %v4983_v35, 0.0  ;;  %v9501_v34 = vpop.f32.mrb[121].mxu0  ;;  %v9916_v35 = vld [vmem:[%s12510_s5 + $0xc8] sm:$0xff]  }
 0x419   : > { %v4914_v56 = vpop.f32.mrb[88].mxu1  ;;  %v5466_v22 = vpop.f32.mrb[122].mxu0 }
 0x41a   : > { %5011 = vst [vmem:[#allocation4 + $0x78] sm:$0xff] %v4997_v51  ;;  %v4963_v40 = vadd.f32 %v4914_v56, %v12068_v31  ;;  %v9433_v48 = vpop.f32.mrb[89].mxu1  ;;  %v9502_v46 = vpop.f32.mrb[123].mxu0  ;;  %v9917_v22 = vld [vmem:[%s12510_s5 + $0xd0] sm:$0xff]  }
 0x41b   : > { %v4917_v63 = vpop.f32.mrb[90].mxu1 }
 0x41c   : > { %v4984_v7 = vadd.f32 %v12120_v38, %v4963_v40  ;;  %v4964_v13 = vadd.f32 %v4917_v63, %v12071_v9  ;;  %v9434_v52 = vpop.f32.mrb[91].mxu1 }
 0x41e   : > { %v4998_v37 = vmax.f32 %v4984_v7, 0.0  ;;  %v4985_v27 = vadd.f32 %v12120_v38, %v4964_v13 }
 0x41f   : > { %v12132_v15 = vpop.f32.mrb[124].mxu0 }
 0x420   : > { %5012 = vst [vmem:[#allocation4 + $0x80] sm:$0xff] %v4998_v37  ;;  %v4999_v10 = vmax.f32 %v4985_v27, 0.0  ;;  %v9513_v18 = vpop.f32.mrb[125].mxu0 }
 0x421   : > { %v6180_v61 = vld [vmem:[#allocation4 + $0x71] ss:$2 sm:$0x7f]  ;;  %v6182_v31 = vld [vmem:[#allocation4 + $0x72] ss:$2 sm:$0x7f] }
 0x422   : > { %v6183_v19 = vmax.f32 %v6180_v61, %v6182_v31  ;;  %5013 = vst [vmem:[#allocation4 + $0x88] sm:$0xff] %v4999_v10  ;;  %v4922_v6 = vpop.f32.mrb[92].mxu1  ;;  %v5574_v33 = vpop.f32.mrb[126].mxu0  ;;  %v9918_v18 = vld [vmem:[%s12510_s5 + $0xd8] sm:$0xff]  }
 0x423   : > { %v4965_v9 = vadd.f32 %v4922_v6, %v12076_v30  ;;  %v9437_v36 = vpop.f32.mrb[93].mxu1  ;;  %v9514_v53 = vpop.f32.mrb[127].mxu0  ;;  %v9915_v30 = vld [vmem:[%s12510_s5 + $0xc0] sm:$0xff]  }
 0x424   : > { %v6184_v54 = vmax.f32 %v6178_v2, %v6183_v19  ;;  %v4925_v5 = vpop.f32.mrb[94].mxu1 }
 0x425   : > { %v4986_v49 = vadd.f32 %v12120_v38, %v4965_v9  ;;  %v4966_v50 = vadd.f32 %v4925_v5, %v12079_v0  ;;  %v9438_v25 = vpop.f32.mrb[95].mxu1  ;;  %v9919_v9 = vld [vmem:[%s12510_s5 + $0xe0] sm:$0xff]  }
 0x426   : > { %v12140_v55 = vpack.c.bf16 %v6184_v54, %v6184_v54 }
 0x427   : > { %v5000_v58 = vmax.f32 %v4986_v49, 0.0  ;;  %v4987_v43 = vadd.f32 %v12120_v38, %v4966_v50  ;;  %v12143_v14 = vpop.f32.mrb[128].mxu0 }
 0x428   : > { %v9525_v32 = vpop.f32.mrb[129].mxu0  ;;  %9584 = vmatmul.mubr.msk.bf16.vlgmr.msra.gmra.mrb[148].mxu0 %vm499_vm2, %v12140_v55  ;;  %v12151_v0 = vshrl.u32 %v12140_v55, 16  ;;  %v6401_v2 = vrot.slane %v12140_v55, 2 }
 0x429   : > { %5014 = vst [vmem:[#allocation4 + $0x90] sm:$0xff] %v5000_v58  ;;  %9594 = vmatpush3.bf16.msra.mxu0 %v9914_v8  ;;  %9595 = vmatprep.mubr.msk.bf16.mxu0 %vm10023_vm0, %v10022_v1  ;;  %v5001_v4 = vmax.f32 %v4987_v43, 0.0  ;;  %v4930_v29 = vpop.f32.mrb[96].mxu1  ;;  %v5680_v20 = vpop.f32.mrb[130].mxu0 }
 0x42a   : > { %9590 = vmatmul.mubr.msk.bf16.vlgmr.msra.gmra.mrb[148].mxu1 %vm499_vm2, %v12151_v0  ;;  %9605 = vmatprep.subr.bf16.mxu0 %v10022_v1  ;;  %v4967_v28 = vadd.f32 %v4930_v29, %v12084_v47  ;;  %v9441_v39 = vpop.f32.mrb[97].mxu1  ;;  %v9526_v44 = vpop.f32.mrb[131].mxu0  ;;  %v6295_v47 = vrot.slane %v12140_v55, 1  ;;  %v6559_v61 = vld [vmem:[#allocation4 + $0x81] ss:$2 sm:$0x7f] }
 0x42b   : > { %9600 = vmatpush3.bf16.msra.mxu1 %v9915_v30  ;;  %9601 = vmatprep.mubr.msk.bf16.mxu1 %vm10023_vm0, %v10022_v1  ;;  %5015 = vst [vmem:[#allocation4 + $0x98] sm:$0xff] %v5001_v4  ;;  %v4933_v59 = vpop.f32.mrb[98].mxu1  ;;  %v6561_v19 = vld [vmem:[#allocation4 + $0x82] ss:$2 sm:$0x7f]  ;;  %v6454_v53 = vrot.slane %v12151_v0, 2 }
 0x42c   : > { %9611 = vmatprep.subr.bf16.mxu1 %v10022_v1  ;;  %v4988_v45 = vadd.f32 %v12120_v38, %v4967_v28  ;;  %v4968_v11 = vadd.f32 %v4933_v59, %v12087_v24  ;;  %v9442_v26 = vpop.f32.mrb[99].mxu1  ;;  %v6348_v24 = vrot.slane %v12151_v0, 1  ;;  %v6562_v50 = vmax.f32 %v6559_v61, %v6561_v19  ;;  %v9920_v4 = vld [vmem:[%s12510_s5 + $0xe8] sm:$0xff]   ;;  %v9921_v44 = vld [vmem:[%s12510_s5 + $0xf0] sm:$0xff]  }
 0x42d   : > { %v6507_v20 = vrot.slane %v12140_v55, 3 }
 0x42e   : > { %v5002_v51 = vmax.f32 %v4988_v45, 0.0  ;;  %v4989_v34 = vadd.f32 %v12120_v38, %v4968_v11 }
 0x42f   : > { %v12169_v56 = vpop.f32.mrb[132].mxu0 }
 0x430   : > { %v9537_v40 = vpop.f32.mrb[133].mxu0  ;;  %9596 = vmatmul.mubr.msk.bf16.vlgmr.msra.gmra.mrb[152].mxu0 %vm499_vm2, %v6295_v47  ;;  %5016 = vst [vmem:[#allocation4 + $0xa0] sm:$0xff] %v5002_v51  ;;  %v5003_v48 = vmax.f32 %v4989_v34, 0.0 }
 0x431   : > { %9606 = vmatpush3.bf16.msra.mxu0 %v9916_v35  ;;  %v4938_v46 = vpop.f32.mrb[100].mxu1  ;;  %v5786_v63 = vpop.f32.mrb[134].mxu0  ;;  %9607 = vmatprep.mubr.msk.bf16.mxu0 %vm10023_vm0, %v10022_v1  ;;  %v9922_v40 = vld [vmem:[%s12510_s5 + $0xf8] sm:$0xff]  }
 0x432   : > { %v4969_v7 = vadd.f32 %v4938_v46, %v12092_v41  ;;  %v9445_v13 = vpop.f32.mrb[101].mxu1  ;;  %v9538_v52 = vpop.f32.mrb[135].mxu0  ;;  %9602 = vmatmul.mubr.msk.bf16.vlgmr.msra.gmra.mrb[152].mxu1 %vm499_vm2, %v6348_v24  ;;  %9617 = vmatprep.subr.bf16.mxu0 %v10022_v1  ;;  %5017 = vst [vmem:[#allocation4 + $0xa8] sm:$0xff] %v5003_v48  ;;  %v6564_v21 = vld [vmem:[#allocation4 + $0x91] ss:$2 sm:$0x7f] }
 0x433   : > { %9612 = vmatpush3.bf16.msra.mxu1 %v9917_v22  ;;  %9613 = vmatprep.mubr.msk.bf16.mxu1 %vm10023_vm0, %v10022_v1  ;;  %v4941_v27 = vpop.f32.mrb[102].mxu1  ;;  %v6566_v3 = vld [vmem:[#allocation4 + $0x92] ss:$2 sm:$0x7f] }
 0x434   : > { %v4990_v37 = vadd.f32 %v12120_v38, %v4969_v7  ;;  %9623 = vmatprep.subr.bf16.mxu1 %v10022_v1  ;;  %v4970_v41 = vadd.f32 %v4941_v27, %v12095_v16  ;;  %v9446_v10 = vpop.f32.mrb[103].mxu1  ;;  %v6567_v36 = vmax.f32 %v6564_v21, %v6566_v3  ;;  %v9923_v7 = vld [vmem:[%s12510_s5 + $0x100] sm:$0xff]  }
 0x436   : > { %v5004_v31 = vmax.f32 %v4990_v37, 0.0  ;;  %v4991_v6 = vadd.f32 %v12120_v38, %v4970_v41  ;;  %v6568_v43 = vmax.f32 %v6562_v50, %v6567_v36 }
 0x437   : > { %v12191_v33 = vpop.f32.mrb[136].mxu0 }
 0x438   : > { %5018 = vst [vmem:[#allocation4 + $0xb0] sm:$0xff] %v5004_v31  ;;  %v9549_v16 = vpop.f32.mrb[137].mxu0  ;;  %9608 = vmatmul.mubr.msk.bf16.vlgmr.msra.gmra.mrb[156].mxu0 %vm499_vm2, %v6401_v2  ;;  %v5005_v54 = vmax.f32 %v4991_v6, 0.0  ;;  %v12218_v59 = vpack.c.bf16 %v6568_v43, %v6568_v43  ;;  %v9925_v31 = vld [vmem:[%s12510_s5 + $0x110] sm:$0xff]   ;;  %v9927_v43 = vld [vmem:[%s12510_s5 + $0x120] sm:$0xff]  }
 0x439   : > { %9618 = vmatpush3.bf16.msra.mxu0 %v9918_v18  ;;  %v4946_v5 = vpop.f32.mrb[104].mxu1  ;;  %v5904_v49 = vpop.f32.mrb[138].mxu0  ;;  %9619 = vmatprep.mubr.msk.bf16.mxu0 %vm10023_vm0, %v10022_v1  ;;  %v6945_v16 = vld [vmem:[#allocation4 + $0xa2] ss:$2 sm:$0x7f] }
 0x43a   : > { %v4971_v25 = vadd.f32 %v4946_v5, %v12100_v60  ;;  %9614 = vmatmul.mubr.msk.bf16.vlgmr.msra.gmra.mrb[156].mxu1 %vm499_vm2, %v6454_v53  ;;  %9629 = vmatprep.subr.bf16.mxu0 %v10022_v1  ;;  %5019 = vst [vmem:[#allocation4 + $0xb8] sm:$0xff] %v5005_v54  ;;  %v9449_v8 = vpop.f32.mrb[105].mxu1  ;;  %v9550_v58 = vpop.f32.mrb[139].mxu0  ;;  %v6624_v48 = vshrl.u32 %v12218_v59, 16  ;;  %v6785_v19 = vrot.slane %v12218_v59, 2 }
 0x43b   : > { %9624 = vmatpush3.bf16.msra.mxu1 %v9919_v9  ;;  %9625 = vmatprep.mubr.msk.bf16.mxu1 %vm10023_vm0, %v10022_v1  ;;  %v4949_v32 = vpop.f32.mrb[106].mxu1  ;;  %v6943_v9 = vld [vmem:[#allocation4 + $0xa1] ss:$2 sm:$0x7f] }
 0x43c   : > { %v4992_v30 = vadd.f32 %v12120_v38, %v4971_v25  ;;  %9635 = vmatprep.subr.bf16.mxu1 %v10022_v1  ;;  %v4972_v0 = vadd.f32 %v4949_v32, %v12103_v17  ;;  %v9450_v60 = vpop.f32.mrb[107].mxu1  ;;  %v6732_v61 = vrot.slane %v6624_v48, 1  ;;  %v9926_v25 = vld [vmem:[%s12510_s5 + $0x118] sm:$0xff]   ;;  %v6946_v8 = vmax.f32 %v6943_v9, %v6945_v16 }
 0x43d   : > { %v6838_v58 = vrot.slane %v6624_v48, 2  ;;  %v6891_v32 = vrot.slane %v12218_v59, 3 }
 0x43e   : > { %v5006_v29 = vmax.f32 %v4992_v30, 0.0  ;;  %v4993_v28 = vadd.f32 %v12120_v38, %v4972_v0 }
 0x43f   : > { %v12213_v39 = vpop.f32.mrb[140].mxu0 }
 0x440   : > { %5020 = vst [vmem:[#allocation4 + $0xc0] sm:$0xff] %v5006_v29  ;;  %v9561_v17 = vpop.f32.mrb[141].mxu0  ;;  %9620 = vmatmul.mubr.msk.bf16.vlgmr.msra.gmra.mrb[160].mxu0 %vm499_vm2, %v6507_v20  ;;  %v5007_v45 = vmax.f32 %v4993_v28, 0.0 }
 0x441   : > { %9630 = vmatpush3.bf16.msra.mxu0 %v9920_v4  ;;  %v4954_v11 = vpop.f32.mrb[108].mxu1  ;;  %v6011_v26 = vpop.f32.mrb[142].mxu0  ;;  %9631 = vmatprep.mubr.msk.bf16.mxu0 %vm10023_vm0, %v10022_v1  ;;  %v6948_v2 = vld [vmem:[#allocation4 + $0xb1] ss:$2 sm:$0x7f] }
 0x442   : > { %v4973_v55 = vadd.f32 %v4954_v11, %v12110_v57  ;;  %9626 = vmatmul.mubr.msk.bf16.vlgmr.msra.gmra.mrb[160].mxu1 %vm499_vm2, %v12218_v59  ;;  %9641 = vmatprep.subr.bf16.mxu0 %v10022_v1  ;;  %5021 = vst [vmem:[#allocation4 + $0xc8] sm:$0xff] %v5007_v45  ;;  %v9453_v35 = vpop.f32.mrb[109].mxu1  ;;  %v9562_v47 = vpop.f32.mrb[143].mxu0  ;;  %v6950_v6 = vld [vmem:[#allocation4 + $0xb2] ss:$2 sm:$0x7f] }
 0x443   : > { %9636 = vmatpush3.bf16.msra.mxu1 %v9921_v44  ;;  %9637 = vmatprep.mubr.msk.bf16.mxu1 %vm10023_vm0, %v10022_v1  ;;  %v4957_v34 = vpop.f32.mrb[110].mxu1  ;;  %v6951_v54 = vmax.f32 %v6948_v2, %v6950_v6  ;;  %v9928_v44 = vld [vmem:[%s12510_s5 + $0x128] sm:$0xff]   ;;  %v9930_v47 = vld [vmem:[%s12510_s5 + $0x138] sm:$0xff]  }
 0x444   : > { %v4994_v51 = vadd.f32 %v12120_v38, %v4973_v55  ;;  %9647 = vmatprep.subr.bf16.mxu1 %v10022_v1  ;;  %v4974_v22 = vadd.f32 %v4957_v34, %v12113_v42  ;;  %v9454_v57 = vpop.f32.mrb[111].mxu1  ;;  %v6679_v42 = vrot.slane %v12218_v59, 1  ;;  %v9929_v59 = vld [vmem:[%s12510_s5 + $0x130] sm:$0xff]   ;;  %v9931_v34 = vld [vmem:[%s12510_s5 + $0x140] sm:$0xff]  }
 0x445   : > { %v6952_v30 = vmax.f32 %v6946_v8, %v6951_v54 }
 0x446   : > { %v5008_v24 = vmax.f32 %v4994_v51, 0.0  ;;  %v4995_v46 = vadd.f32 %v12120_v38, %v4974_v22 }
 0x447   : > { %v12237_v63 = vpop.f32.mrb[144].mxu0  ;;  %v12283_v29 = vpack.c.bf16 %v6952_v30, %v6952_v30 }
 0x448   : > { %5022 = vst [vmem:[#allocation4 + $0xd0] sm:$0xff] %v5008_v24  ;;  %v9573_v13 = vpop.f32.mrb[145].mxu0  ;;  %9632 = vmatmul.mubr.msk.bf16.vlgmr.msra.gmra.mrb[164].mxu0 %vm499_vm2, %v6624_v48  ;;  %v5009_v52 = vmax.f32 %v4995_v46, 0.0 }
 0x449   : > { %9642 = vmatpush3.bf16.msra.mxu0 %v9922_v40  ;;  %v5293_v21 = vpop.f32.mrb[112].mxu1  ;;  %v6117_v37 = vpop.f32.mrb[146].mxu0  ;;  %9643 = vmatprep.mubr.msk.bf16.mxu0 %vm10023_vm0, %v10022_v1  ;;  %v7008_v17 = vshrl.u32 %v12283_v29, 16  ;;  %v7063_v51 = vrot.slane %v12283_v29, 1  ;;  %v7275_v6 = vrot.slane %v12283_v29, 3 }
 0x44a   : > { %v5299_v38 = vadd.f32 %v5293_v21, %v12105_v12  ;;  %9638 = vmatmul.mubr.msk.bf16.vlgmr.msra.gmra.mrb[164].mxu1 %vm499_vm2, %v6679_v42  ;;  %9653 = vmatprep.subr.bf16.mxu0 %v10022_v1  ;;  %5023 = vst [vmem:[#allocation4 + $0xd8] sm:$0xff] %v5009_v52  ;;  %v9483_v27 = vpop.f32.mrb[113].mxu1  ;;  %v9574_v3 = vpop.f32.mrb[147].mxu0  ;;  %v9924_v12 = vld [vmem:[%s12510_s5 + $0x108] sm:$0xff]   ;;  %v7169_v52 = vrot.slane %v12283_v29, 2  ;;  %v9933_v21 = vld [vmem:[%s12510_s5 + $0x150] sm:$0xff]  }
 0x44b   : > { %9648 = vmatpush3.bf16.msra.mxu1 %v9923_v7  ;;  %9649 = vmatprep.mubr.msk.bf16.mxu1 %vm10023_vm0, %v10022_v1  ;;  %v5296_v10 = vpop.f32.mrb[114].mxu1  ;;  %v7116_v22 = vrot.slane %v7008_v17, 1  ;;  %v9932_v7 = vld [vmem:[%s12510_s5 + $0x148] sm:$0xff]   ;;  %v7327_v37 = vld [vmem:[#allocation4 + $0xc1] ss:$2 sm:$0x7f] }
 0x44c   : > { %v5352_v41 = vadd.f32 %v12115_v23, %v5299_v38  ;;  %9659 = vmatprep.subr.bf16.mxu1 %v10022_v1  ;;  %v9484_v18 = vpop.f32.mrb[115].mxu1  ;;  %v7329_v38 = vld [vmem:[#allocation4 + $0xc2] ss:$2 sm:$0x7f] }
 0x450   : > { %9644 = vmatmul.mubr.msk.bf16.vlgmr.msra.gmra.mrb[168].mxu0 %vm499_vm2, %v6732_v61 }
 0x451   : > { %9654 = vmatpush3.bf16.msra.mxu0 %v9924_v12  ;;  %v5399_v23 = vpop.f32.mrb[116].mxu1  ;;  %9655 = vmatprep.mubr.msk.bf16.mxu0 %vm10023_vm0, %v10022_v1  ;;  %v7332_v13 = vld [vmem:[#allocation4 + $0xd1] ss:$2 sm:$0x7f] }
 0x452   : > { %v5405_v36 = vadd.f32 %v5399_v23, %v5352_v41  ;;  %9650 = vmatmul.mubr.msk.bf16.vlgmr.msra.gmra.mrb[168].mxu1 %vm499_vm2, %v6785_v19  ;;  %9665 = vmatprep.subr.bf16.mxu0 %v10022_v1  ;;  %v9495_v53 = vpop.f32.mrb[117].mxu1  ;;  %v7334_v42 = vld [vmem:[#allocation4 + $0xd2] ss:$2 sm:$0x7f]  ;;  %v7330_v41 = vmax.f32 %v7327_v37, %v7329_v38  ;;  %v9934_v19 = vld [vmem:[%s12510_s5 + $0x158] sm:$0xff]   ;;  %v9935_v23 = vld [vmem:[%s12510_s5 + $0x160] sm:$0xff]  }
 0x453   : > { %9660 = vmatpush3.bf16.msra.mxu1 %v9925_v31  ;;  %9661 = vmatprep.mubr.msk.bf16.mxu1 %vm10023_vm0, %v10022_v1  ;;  %v5402_v49 = vpop.f32.mrb[118].mxu1  ;;  %v7335_v27 = vmax.f32 %v7332_v13, %v7334_v42 }
 0x454   : > { %v5469_v5 = vadd.f32 %v12126_v62, %v5405_v36  ;;  %9671 = vmatprep.subr.bf16.mxu1 %v10022_v1  ;;  %v9496_v50 = vpop.f32.mrb[119].mxu1  ;;  %v9936_v49 = vld [vmem:[%s12510_s5 + $0x168] sm:$0xff]  }
 0x455   : > { %v7336_v61 = vmax.f32 %v7330_v41, %v7335_v27 }
 0x457   : > { %v7337_v9 = vpack.c.bf16 %v7336_v61, %v7336_v61 }
 0x458   : > { %9656 = vmatmul.mubr.msk.bf16.vlgmr.msra.gmra.mrb[172].mxu0 %vm499_vm2, %v6838_v58 }
 0x459   : > { %9666 = vmatpush3.bf16.msra.mxu0 %v9926_v25  ;;  %v5517_v62 = vpop.f32.mrb[120].mxu1  ;;  %9667 = vmatprep.mubr.msk.bf16.mxu0 %vm10023_vm0, %v10022_v1  ;;  %v7392_v50 = vshrl.u32 %v7337_v9, 16  ;;  %v9937_v25 = vld [vmem:[%s12510_s5 + $0x170] sm:$0xff]   ;;  %v7447_v8 = vrot.slane %v7337_v9, 1 }
 0x45a   : > { %v5523_v0 = vadd.f32 %v5517_v62, %v5469_v5  ;;  %v9507_v60 = vpop.f32.mrb[121].mxu1  ;;  %9662 = vmatmul.mubr.msk.bf16.vlgmr.msra.gmra.mrb[172].mxu1 %vm499_vm2, %v6891_v32  ;;  %9677 = vmatprep.subr.bf16.mxu0 %v10022_v1 }
 0x45b   : > { %9672 = vmatpush3.bf16.msra.mxu1 %v9927_v43  ;;  %v5520_v4 = vpop.f32.mrb[122].mxu1  ;;  %9673 = vmatprep.mubr.msk.bf16.mxu1 %vm10023_vm0, %v10022_v1  ;;  %v7500_v60 = vrot.slane %v7392_v50, 1 }
 0x45c   : > { %v5577_v20 = vadd.f32 %v12132_v15, %v5523_v0  ;;  %v9508_v28 = vpop.f32.mrb[123].mxu1  ;;  %9683 = vmatprep.subr.bf16.mxu1 %v10022_v1  ;;  %v9938_v0 = vld [vmem:[%s12510_s5 + $0x178] sm:$0xff]   ;;  %v9939_v4 = vld [vmem:[%s12510_s5 + $0x180] sm:$0xff]  }
 0x460   : > { %9668 = vmatmul.mubr.msk.bf16.vlgmr.msra.gmra.mrb[176].mxu0 %vm499_vm2, %v12283_v29  ;;  %v7553_v29 = vrot.slane %v7337_v9, 2 }
 0x461   : > { %9678 = vmatpush3.bf16.msra.mxu0 %v9928_v44  ;;  %v5624_v45 = vpop.f32.mrb[124].mxu1  ;;  %9679 = vmatprep.mubr.msk.bf16.mxu0 %vm10023_vm0, %v10022_v1 }
 0x462   : > { %v5630_v15 = vadd.f32 %v5624_v45, %v5577_v20  ;;  %v9519_v11 = vpop.f32.mrb[125].mxu1  ;;  %9674 = vmatmul.mubr.msk.bf16.vlgmr.msra.gmra.mrb[176].mxu1 %vm499_vm2, %v7008_v17  ;;  %9689 = vmatprep.subr.bf16.mxu0 %v10022_v1  ;;  %v7659_v45 = vrot.slane %v7337_v9, 3 }
 0x463   : > { %9684 = vmatpush3.bf16.msra.mxu1 %v9929_v59  ;;  %v5627_v26 = vpop.f32.mrb[126].mxu1  ;;  %9685 = vmatprep.mubr.msk.bf16.mxu1 %vm10023_vm0, %v10022_v1  ;;  %v9941_v11 = vld [vmem:[%s12512_s7 + $0x8] sm:$0xff]  }
 0x464   : > { %v5683_v55 = vadd.f32 %v12143_v14, %v5630_v15  ;;  %v9520_v35 = vpop.f32.mrb[127].mxu1  ;;  %9695 = vmatprep.subr.bf16.mxu1 %v10022_v1  ;;  %v9940_v15 = vld [vmem:[%s12512_s7] sm:$0xff]   ;;  %v9942_v26 = vld [vmem:[%s12512_s7 + $0x10] sm:$0xff]  }
 0x465   : > { %v9944_v35 = vld [vmem:[%s12512_s7 + $0x20] sm:$0xff]  }
 0x468   : > { %9680 = vmatmul.mubr.msk.bf16.vlgmr.msra.gmra.mrb[180].mxu0 %vm499_vm2, %v7063_v51  ;;  %v9946_v51 = vld [vmem:[%s12512_s7 + $0x30] sm:$0xff]  }
 0x469   : > { %9690 = vmatpush3.bf16.msra.mxu0 %v9930_v47  ;;  %v5730_v57 = vpop.f32.mrb[128].mxu1  ;;  %9691 = vmatprep.mubr.msk.bf16.mxu0 %vm10023_vm0, %v10022_v1  ;;  %v9945_v47 = vld [vmem:[%s12512_s7 + $0x28] sm:$0xff]  }
 0x46a   : > { %v5736_v14 = vadd.f32 %v5730_v57, %v5683_v55  ;;  %v9531_v40 = vpop.f32.mrb[129].mxu1  ;;  %9686 = vmatmul.mubr.msk.bf16.vlgmr.msra.gmra.mrb[180].mxu1 %vm499_vm2, %v7116_v22  ;;  %9701 = vmatprep.subr.bf16.mxu0 %v10022_v1  ;;  %v9943_v55 = vld [vmem:[%s12512_s7 + $0x18] sm:$0xff]   ;;  %v9948_v22 = vld [vmem:[%s12514_s9] sm:$0xff]   ;;  %v9949_v57 = vld [vmem:[%s12514_s9 + $0x8] sm:$0xff]  }
 0x46b   : > { %9696 = vmatpush3.bf16.msra.mxu1 %v9931_v34  ;;  %v5733_v24 = vpop.f32.mrb[130].mxu1  ;;  %9697 = vmatprep.mubr.msk.bf16.mxu1 %vm10023_vm0, %v10022_v1  ;;  %v9947_v34 = vld [vmem:[%s12512_s7 + $0x38] sm:$0xff]  }
 0x46c   : > { %v5789_v48 = vadd.f32 %v12169_v56, %v5736_v14  ;;  %v9532_v46 = vpop.f32.mrb[131].mxu1  ;;  %9707 = vmatprep.subr.bf16.mxu1 %v10022_v1  ;;  %v7222_v56 = vrot.slane %v7008_v17, 2  ;;  %v7606_v17 = vrot.slane %v7392_v50, 2  ;;  %v9950_v14 = vld [vmem:[%s12514_s9 + $0x10] sm:$0xff]   ;;  %v9951_v40 = vld [vmem:[%s12514_s9 + $0x18] sm:$0xff]  }
 0x470   : > { %9692 = vmatmul.mubr.msk.bf16.vlgmr.msra.gmra.mrb[184].mxu0 %vm499_vm2, %v7169_v52 }
 0x471   : > { %9702 = vmatpush3.bf16.msra.mxu0 %v9932_v7  ;;  %v5847_v3 = vpop.f32.mrb[132].mxu1  ;;  %9703 = vmatprep.mubr.msk.bf16.mxu0 %vm10023_vm0, %v10022_v1  ;;  %v9952_v7 = vld [vmem:[%s12514_s9 + $0x20] sm:$0xff]  }
 0x472   : > { %v5853_v10 = vadd.f32 %v5847_v3, %v5789_v48  ;;  %v9543_v18 = vpop.f32.mrb[133].mxu1  ;;  %9698 = vmatmul.mubr.msk.bf16.vlgmr.msra.gmra.mrb[184].mxu1 %vm499_vm2, %v7222_v56  ;;  %9713 = vmatprep.subr.bf16.mxu0 %v10022_v1  ;;  %v9953_v56 = vld [vmem:[%s12514_s9 + $0x28] sm:$0xff]  }
 0x473   : > { %9708 = vmatpush3.bf16.msra.mxu1 %v9933_v21  ;;  %v5850_v12 = vpop.f32.mrb[134].mxu1  ;;  %9709 = vmatprep.mubr.msk.bf16.mxu1 %vm10023_vm0, %v10022_v1 }
 0x474   : > { %v5907_v31 = vadd.f32 %v12191_v33, %v5853_v10  ;;  %v9544_v2 = vpop.f32.mrb[135].mxu1  ;;  %9719 = vmatprep.subr.bf16.mxu1 %v10022_v1 }
 0x478   : > { %9704 = vmatmul.mubr.msk.bf16.vlgmr.msra.gmra.mrb[188].mxu0 %vm499_vm2, %v7275_v6 }
 0x479   : > { %9714 = vmatpush3.bf16.msra.mxu0 %v9934_v19  ;;  %v5955_v36 = vpop.f32.mrb[136].mxu1  ;;  %9715 = vmatprep.mubr.msk.bf16.mxu0 %vm10023_vm0, %v10022_v1 }
 0x47a   : > { %v5961_v33 = vadd.f32 %v5955_v36, %v5907_v31  ;;  %v9555_v16 = vpop.f32.mrb[137].mxu1  ;;  %9710 = vmatmul.mubr.msk.bf16.vlgmr.msra.gmra.mrb[188].mxu1 %vm499_vm2, %v7337_v9  ;;  %9725 = vmatprep.subr.bf16.mxu0 %v10022_v1 }
 0x47b   : > { %9720 = vmatpush3.bf16.msra.mxu1 %v9935_v23  ;;  %v5958_v53 = vpop.f32.mrb[138].mxu1  ;;  %9721 = vmatprep.mubr.msk.bf16.mxu1 %vm10023_vm0, %v10022_v1 }
 0x47c   : > { %v6014_v54 = vadd.f32 %v12213_v39, %v5961_v33  ;;  %v9556_v5 = vpop.f32.mrb[139].mxu1  ;;  %9731 = vmatprep.subr.bf16.mxu1 %v10022_v1 }
 0x480   : > { %9716 = vmatmul.mubr.msk.bf16.vlgmr.msra.gmra.mrb[192].mxu0 %vm499_vm2, %v7392_v50 }
 0x481   : > { %9726 = vmatpush3.bf16.msra.mxu0 %v9936_v49  ;;  %v6061_v58 = vpop.f32.mrb[140].mxu1  ;;  %9727 = vmatprep.mubr.msk.bf16.mxu0 %vm10023_vm0, %v10022_v1 }
 0x482   : > { %v6067_v39 = vadd.f32 %v6061_v58, %v6014_v54  ;;  %v9567_v43 = vpop.f32.mrb[141].mxu1  ;;  %9722 = vmatmul.mubr.msk.bf16.vlgmr.msra.gmra.mrb[192].mxu1 %vm499_vm2, %v7447_v8  ;;  %9737 = vmatprep.subr.bf16.mxu0 %v10022_v1 }
 0x483   : > { %9732 = vmatpush3.bf16.msra.mxu1 %v9937_v25  ;;  %v6064_v30 = vpop.f32.mrb[142].mxu1  ;;  %9733 = vmatprep.mubr.msk.bf16.mxu1 %vm10023_vm0, %v10022_v1 }
 0x484   : > { %v9568_v32 = vpop.f32.mrb[143].mxu1  ;;  %v6120_v62 = vadd.f32 %v12237_v63, %v6067_v39  ;;  %9743 = vmatprep.subr.bf16.mxu1 %v10022_v1 }
 0x488   : > { %9728 = vmatmul.mubr.msk.bf16.vlgmr.msra.gmra.mrb[196].mxu0 %vm499_vm2, %v7500_v60 }
 0x489   : > { %9738 = vmatpush3.bf16.msra.mxu0 %v9938_v0  ;;  %v6167_v20 = vpop.f32.mrb[144].mxu1  ;;  %9739 = vmatprep.mubr.msk.bf16.mxu0 %vm10023_vm0, %v10022_v1 }
 0x48a   : > { %v6173_v63 = vadd.f32 %v6167_v20, %v6120_v62  ;;  %v9579_v28 = vpop.f32.mrb[145].mxu1  ;;  %9734 = vmatmul.mubr.msk.bf16.vlgmr.msra.gmra.mrb[196].mxu1 %vm499_vm2, %v7553_v29  ;;  %9749 = vmatprep.subr.bf16.mxu0 %v10022_v1 }
 0x48b   : > { %9744 = vmatpush3.bf16.msra.mxu1 %v9939_v4  ;;  %v6170_v44 = vpop.f32.mrb[146].mxu1  ;;  %9745 = vmatprep.mubr.msk.bf16.mxu1 %vm10023_vm0, %v10022_v1 }
 0x48c   : > { %v9580_v59 = vpop.f32.mrb[147].mxu1  ;;  %9769 = vmatprep.subr.bf16.mxu1 %v10022_v1 }
 0x490   : > { %9740 = vmatmul.mubr.msk.bf16.vlgmr.msra.gmra.mrb[200].mxu0 %vm499_vm2, %v7606_v17 }
 0x491   : > { %9765 = vmatprep.mubr.msk.bf16.mxu0 %vm10023_vm0, %v10022_v1  ;;  %9750 = vmatpush3.bf16.msra.mxu0 %v9940_v15 }
 0x492   : > { %9746 = vmatmul.mubr.msk.bf16.vlgmr.msra.gmra.mrb[200].mxu1 %vm499_vm2, %v7659_v45  ;;  %9751 = vmatprep.subr.bf16.mxu0 %v10022_v1 }
 0x493   : > { %9785 = vmatprep.mubr.msk.bf16.mxu1 %vm10023_vm0, %v10022_v1  ;;  %9770 = vmatpush3.bf16.msra.mxu1 %v9948_v22 }
 0x494   : > { %9771 = vmatprep.subr.bf16.mxu1 %v10022_v1 }
 0x495   : > { %9752 = vmatpush3.bf16.msra.mxu0 %v9941_v11 }
 0x496   : > { %9753 = vmatprep.subr.bf16.mxu0 %v10022_v1 }
 0x497   : > { %9772 = vmatpush3.bf16.msra.mxu1 %v9949_v57 }
 0x498   : > { %9773 = vmatprep.subr.bf16.mxu1 %v10022_v1 }
 0x499   : > { %9754 = vmatpush3.bf16.msra.mxu0 %v9942_v26 }
 0x49a   : > { %9755 = vmatprep.subr.bf16.mxu0 %v10022_v1 }
 0x49b   : > { %9774 = vmatpush3.bf16.msra.mxu1 %v9950_v14 }
 0x49c   : > { %9775 = vmatprep.subr.bf16.mxu1 %v10022_v1 }
 0x49d   : > { %9756 = vmatpush3.bf16.msra.mxu0 %v9943_v55 }
 0x49e   : > { %9757 = vmatprep.subr.bf16.mxu0 %v10022_v1 }
 0x49f   : > { %9776 = vmatpush3.bf16.msra.mxu1 %v9951_v40 }
 0x4a0   : > { %9777 = vmatprep.subr.bf16.mxu1 %v10022_v1 }
 0x4a1   : > { %9758 = vmatpush3.bf16.msra.mxu0 %v9944_v35 }
 0x4a2   : > { %9759 = vmatprep.subr.bf16.mxu0 %v10022_v1 }
 0x4a3   : > { %9778 = vmatpush3.bf16.msra.mxu1 %v9952_v7 }
 0x4a4   : > { %9779 = vmatprep.subr.bf16.mxu1 %v10022_v1 }
 0x4a5   : > { %9760 = vmatpush3.bf16.msra.mxu0 %v9945_v47 }
 0x4a6   : > { %9761 = vmatprep.subr.bf16.mxu0 %v10022_v1 }
 0x4a7   : > { %9780 = vmatpush3.bf16.msra.mxu1 %v9953_v56 }
 0x4a8   : > { %9781 = vmatprep.subr.bf16.mxu1 %v10022_v1 }
 0x4a9   : > { %9762 = vmatpush3.bf16.msra.mxu0 %v9946_v51 }
 0x4aa   : > { %9763 = vmatprep.subr.bf16.mxu0 %v10022_v1 }
 0x4ad   : > { %9764 = vmatpush3.bf16.msra.mxu0 %v9947_v34 }
 0x4fb   : > { %v6231_v24 = vpop.f32.mrb[148].mxu0 }
 0x4fc   : > { %v6237_v48 = vadd.f32 %v6231_v24, %v6173_v63  ;;  %v9585_v46 = vpop.f32.mrb[149].mxu0 }
 0x4fd   : > { %v6234_v13 = vpop.f32.mrb[150].mxu0  ;;  %v6285_v42 = vpop.f32.mrb[148].mxu1 }
 0x4fe   : > { %v6291_v52 = vadd.f32 %v6285_v42, %v6237_v48  ;;  %v9586_v21 = vpop.f32.mrb[151].mxu0  ;;  %v9591_v37 = vpop.f32.mrb[149].mxu1 }
 0x4ff   : > { %v6288_v38 = vpop.f32.mrb[150].mxu1 }
 0x500   : > { %v9592_v27 = vpop.f32.mrb[151].mxu1 }
 0x503   : > { %v6339_v3 = vpop.f32.mrb[152].mxu0 }
 0x504   : > { %v6345_v41 = vadd.f32 %v6339_v3, %v6291_v52  ;;  %v9597_v10 = vpop.f32.mrb[153].mxu0 }
 0x505   : > { %v6342_v18 = vpop.f32.mrb[154].mxu0  ;;  %v6392_v12 = vpop.f32.mrb[152].mxu1 }
 0x506   : > { %v6398_v61 = vadd.f32 %v6392_v12, %v6345_v41  ;;  %v9598_v31 = vpop.f32.mrb[155].mxu0  ;;  %v9603_v2 = vpop.f32.mrb[153].mxu1 }
 0x507   : > { %v6395_v19 = vpop.f32.mrb[154].mxu1 }
 0x508   : > { %v9604_v6 = vpop.f32.mrb[155].mxu1 }
 0x50b   : > { %v6445_v23 = vpop.f32.mrb[156].mxu0 }
 0x50c   : > { %v6451_v9 = vadd.f32 %v6445_v23, %v6398_v61  ;;  %v9609_v36 = vpop.f32.mrb[157].mxu0 }
 0x50d   : > { %v6448_v33 = vpop.f32.mrb[158].mxu0  ;;  %v6498_v16 = vpop.f32.mrb[156].mxu1 }
 0x50e   : > { %v6504_v53 = vadd.f32 %v6498_v16, %v6451_v9  ;;  %v9610_v54 = vpop.f32.mrb[159].mxu0  ;;  %v9615_v5 = vpop.f32.mrb[157].mxu1 }
 0x50f   : > { %v6501_v49 = vpop.f32.mrb[158].mxu1 }
 0x510   : > { %v9616_v50 = vpop.f32.mrb[159].mxu1 }
 0x513   : > { %v6551_v25 = vpop.f32.mrb[160].mxu0 }
 0x514   : > { %v6557_v8 = vadd.f32 %v6551_v25, %v6504_v53  ;;  %v9621_v58 = vpop.f32.mrb[161].mxu0 }
 0x515   : > { %v6554_v39 = vpop.f32.mrb[162].mxu0  ;;  %v6615_v43 = vpop.f32.mrb[160].mxu1 }
 0x516   : > { %v6621_v30 = vadd.f32 %v6615_v43, %v6557_v8  ;;  %v9622_v32 = vpop.f32.mrb[163].mxu0  ;;  %v9627_v62 = vpop.f32.mrb[161].mxu1 }
 0x517   : > { %v6618_v0 = vpop.f32.mrb[162].mxu1 }
 0x518   : > { %v9628_v60 = vpop.f32.mrb[163].mxu1 }
 0x51b   : > { %v6669_v4 = vpop.f32.mrb[164].mxu0 }
 0x51c   : > { %v6675_v29 = vadd.f32 %v6669_v4, %v6621_v30  ;;  %v9633_v20 = vpop.f32.mrb[165].mxu0 }
 0x51d   : > { %v6672_v63 = vpop.f32.mrb[166].mxu0  ;;  %v6723_v28 = vpop.f32.mrb[164].mxu1 }
 0x51e   : > { %v6729_v44 = vadd.f32 %v6723_v28, %v6675_v29  ;;  %v9634_v59 = vpop.f32.mrb[167].mxu0  ;;  %v9639_v17 = vpop.f32.mrb[165].mxu1 }
 0x51f   : > { %v6726_v45 = vpop.f32.mrb[166].mxu1 }
 0x520   : > { %v9640_v15 = vpop.f32.mrb[167].mxu1 }
 0x523   : > { %v6776_v11 = vpop.f32.mrb[168].mxu0 }
 0x524   : > { %v6782_v26 = vadd.f32 %v6776_v11, %v6729_v44  ;;  %v9645_v55 = vpop.f32.mrb[169].mxu0 }
 0x525   : > { %v6779_v35 = vpop.f32.mrb[170].mxu0  ;;  %v6829_v47 = vpop.f32.mrb[168].mxu1 }
 0x526   : > { %v6835_v51 = vadd.f32 %v6829_v47, %v6782_v26  ;;  %v9646_v34 = vpop.f32.mrb[171].mxu0  ;;  %v9651_v22 = vpop.f32.mrb[169].mxu1 }
 0x527   : > { %v6832_v57 = vpop.f32.mrb[170].mxu1 }
 0x528   : > { %v9652_v14 = vpop.f32.mrb[171].mxu1 }
 0x52b   : > { %v6882_v40 = vpop.f32.mrb[172].mxu0 }
 0x52c   : > { %v6888_v24 = vadd.f32 %v6882_v40, %v6835_v51  ;;  %v9657_v48 = vpop.f32.mrb[173].mxu0 }
 0x52d   : > { %v6885_v46 = vpop.f32.mrb[174].mxu0  ;;  %v6935_v7 = vpop.f32.mrb[172].mxu1 }
 0x52e   : > { %v6941_v13 = vadd.f32 %v6935_v7, %v6888_v24  ;;  %v9658_v42 = vpop.f32.mrb[175].mxu0  ;;  %v9663_v52 = vpop.f32.mrb[173].mxu1 }
 0x52f   : > { %v6938_v21 = vpop.f32.mrb[174].mxu1 }
 0x530   : > { %v9664_v37 = vpop.f32.mrb[175].mxu1 }
 0x533   : > { %v6999_v38 = vpop.f32.mrb[176].mxu0 }
 0x534   : > { %v7005_v27 = vadd.f32 %v6999_v38, %v6941_v13  ;;  %v9669_v56 = vpop.f32.mrb[177].mxu0 }
 0x535   : > { %v7002_v3 = vpop.f32.mrb[178].mxu0  ;;  %v7053_v41 = vpop.f32.mrb[176].mxu1  ;;  %v7710_v56 = vld [vmem:[%s12511_s6] sm:$0x1] }
 0x536   : > { %v7059_v10 = vadd.f32 %v7053_v41, %v7005_v27  ;;  %v9670_v18 = vpop.f32.mrb[179].mxu0  ;;  %v9675_v12 = vpop.f32.mrb[177].mxu1 }
 0x537   : > { %v7056_v61 = vpop.f32.mrb[178].mxu1 }
 0x538   : > { %v9676_v31 = vpop.f32.mrb[179].mxu1 }
 0x53b   : > { %v7107_v2 = vpop.f32.mrb[180].mxu0 }
 0x53c   : > { %v7113_v19 = vadd.f32 %v7107_v2, %v7059_v10  ;;  %v9681_v6 = vpop.f32.mrb[181].mxu0 }
 0x53d   : > { %v7110_v23 = vpop.f32.mrb[182].mxu0  ;;  %v7160_v9 = vpop.f32.mrb[180].mxu1  ;;  %v9955_v6 = vld [vmem:[%s12514_s9 + $0x38] sm:$0xff]  }
 0x53e   : > { %v7166_v36 = vadd.f32 %v7160_v9, %v7113_v19  ;;  %v9682_v33 = vpop.f32.mrb[183].mxu0  ;;  %v9687_v16 = vpop.f32.mrb[181].mxu1  ;;  %v9954_v19 = vld [vmem:[%s12514_s9 + $0x30] sm:$0xff]   ;;  %v7730_v23 = vld [vmem:[%s12513_s8] sm:$0x1] }
 0x53f   : > { %v7163_v53 = vpop.f32.mrb[182].mxu1  ;;  %9782 = vmatpush3.bf16.msra.mxu1 %v9954_v19 }
 0x540   : > { %v9688_v54 = vpop.f32.mrb[183].mxu1  ;;  %9783 = vmatprep.subr.bf16.mxu1 %v10022_v1 }
 0x543   : > { %v7213_v5 = vpop.f32.mrb[184].mxu0  ;;  %9784 = vmatpush3.bf16.msra.mxu1 %v9955_v6 }
 0x544   : > { %v7219_v49 = vadd.f32 %v7213_v5, %v7166_v36  ;;  %v9693_v50 = vpop.f32.mrb[185].mxu0 }
 0x545   : > { %v7216_v25 = vpop.f32.mrb[186].mxu0  ;;  %v7266_v8 = vpop.f32.mrb[184].mxu1 }
 0x546   : > { %v7272_v58 = vadd.f32 %v7266_v8, %v7219_v49  ;;  %v9694_v39 = vpop.f32.mrb[187].mxu0  ;;  %v9699_v43 = vpop.f32.mrb[185].mxu1  ;;  %v7837_v49 = vld [vmem:[%s12515_s10] sm:$0x1] }
 0x547   : > { %v7269_v30 = vpop.f32.mrb[186].mxu1 }
 0x548   : > { %v9700_v32 = vpop.f32.mrb[187].mxu1 }
 0x54b   : > { %v7319_v62 = vpop.f32.mrb[188].mxu0 }
 0x54c   : > { %v7325_v0 = vadd.f32 %v7319_v62, %v7272_v58  ;;  %v9705_v60 = vpop.f32.mrb[189].mxu0 }
 0x54d   : > { %v7322_v4 = vpop.f32.mrb[190].mxu0  ;;  %v7383_v29 = vpop.f32.mrb[188].mxu1 }
 0x54e   : > { %v7389_v20 = vadd.f32 %v7383_v29, %v7325_v0  ;;  %v9706_v63 = vpop.f32.mrb[191].mxu0  ;;  %v9711_v28 = vpop.f32.mrb[189].mxu1 }
 0x54f   : > { %v7386_v44 = vpop.f32.mrb[190].mxu1 }
 0x550   : > { %v9712_v59 = vpop.f32.mrb[191].mxu1 }
 0x553   : > { %v7437_v17 = vpop.f32.mrb[192].mxu0 }
 0x554   : > { %v7443_v45 = vadd.f32 %v7437_v17, %v7389_v20  ;;  %v9717_v15 = vpop.f32.mrb[193].mxu0 }
 0x555   : > { %v7440_v11 = vpop.f32.mrb[194].mxu0  ;;  %v7491_v26 = vpop.f32.mrb[192].mxu1 }
 0x556   : > { %v7497_v55 = vadd.f32 %v7491_v26, %v7443_v45  ;;  %v9718_v35 = vpop.f32.mrb[195].mxu0  ;;  %v9723_v47 = vpop.f32.mrb[193].mxu1 }
 0x557   : > { %v7494_v51 = vpop.f32.mrb[194].mxu1 }
 0x558   : > { %v9724_v34 = vpop.f32.mrb[195].mxu1 }
 0x55b   : > { %v7544_v22 = vpop.f32.mrb[196].mxu0 }
 0x55c   : > { %v7550_v57 = vadd.f32 %v7544_v22, %v7497_v55  ;;  %v9729_v14 = vpop.f32.mrb[197].mxu0 }
 0x55d   : > { %v7547_v40 = vpop.f32.mrb[198].mxu0  ;;  %v7597_v24 = vpop.f32.mrb[196].mxu1 }
 0x55e   : > { %v7603_v48 = vadd.f32 %v7597_v24, %v7550_v57  ;;  %v9730_v46 = vpop.f32.mrb[199].mxu0  ;;  %v9735_v7 = vpop.f32.mrb[197].mxu1 }
 0x55f   : > { %v7600_v13 = vpop.f32.mrb[198].mxu1 }
 0x560   : > { %v9736_v42 = vpop.f32.mrb[199].mxu1 }
 0x563   : > { %v7650_v52 = vpop.f32.mrb[200].mxu0 }
 0x564   : > { %v7656_v21 = vadd.f32 %v7650_v52, %v7603_v48  ;;  %v9741_v37 = vpop.f32.mrb[201].mxu0 }
 0x565   : > { %v7653_v38 = vpop.f32.mrb[202].mxu0  ;;  %v7703_v27 = vpop.f32.mrb[200].mxu1 }
 0x566   : > { %v7709_v3 = vadd.f32 %v7703_v27, %v7656_v21  ;;  %v9742_v41 = vpop.f32.mrb[203].mxu0  ;;  %v9747_v10 = vpop.f32.mrb[201].mxu1 }
 0x567   : > { %v7706_v18 = vpop.f32.mrb[202].mxu1 }
 0x568   : > { %v7711_v12 = vadd.f32 %v7710_v56, %v7709_v3  ;;  %v9748_v61 = vpop.f32.mrb[203].mxu1 }
 0x56a   : > { %v7712_v31 = vmax.f32 %v7711_v12, 0.0 }
 0x56c   : > { %v7713_v2 = vpack.c.bf16 %v7712_v31, %v7712_v31 }
 0x56e   : > { %9766 = vmatmul.mubr.bf16.vlgmr.msra.gmra.mrb[204].mxu0 %v7713_v2 }
 0x641   : > { %v7813_v9 = vpop.f32.mrb[204].mxu0 }
 0x642   : > { %v7814_v36 = vadd.f32 %v7813_v9, %v7730_v23  ;;  %v9767_v33 = vpop.f32.mrb[205].mxu0 }
 0x643   : > { %v7816_v16 = vpop.f32.mrb[206].mxu0 }
 0x644   : > { %v7819_v53 = vmax.f32 %v7814_v36, 0.0  ;;  %v9768_v54 = vpop.f32.mrb[207].mxu0 }
 0x646   : > { %v7820_v5 = vpack.c.bf16 %v7819_v53, %v7819_v53 }
 0x648   : > { %9786 = vmatmul.mubr.bf16.vlgmr.msra.gmra.mrb[204].mxu1 %v7820_v5 }
 0x71b   : > { %v7920_v1 = vpop.f32.mrb[204].mxu1 }
 0x71c   : > { %v7921_v50 = vadd.f32 %v7920_v1, %v7837_v49  ;;  %v9787_v25 = vpop.f32.mrb[205].mxu1 }
 0x71d   : > { %v7923_v8 = vpop.f32.mrb[206].mxu1 }
 0x71e   : > { %7926 = vst [vmem:[%s378_s12] sm:$0x1] %v7921_v50  ;;  %v9788_v58 = vpop.f32.mrb[207].mxu1 }
 0x71f   : > { %9971 = shalt.err (!%p9968_p3)
}
 0x720   : > { %s9972_s22 = scalar_lea.hbm %s12463_s15, 16  ;;  %s9976_s14 = scalar_lea.hbm %s12516_s11, 32 }
 0x721   : > { %p9973_p4 = scmp.ne.s32.totalorder %s12463_s15, %s9972_s22  ;;  %p9977_p9 = scmp.lt.u32.totalorder %s12463_s15, %s12516_s11 }
 0x722   : > { %p9978_p10 = scmp.lt.u32.totalorder %s9976_s14, %s9972_s22  ;;  %p9980_p12 = scmp.lt.u32.totalorder %s9972_s22, %s12463_s15 }
 0x723   : > { %p9974_p7 = pnand %p9973_p4, %p10123_p5 }
 0x724   : > { %p9979_p11 = por %p9978_p10, %p9977_p9 }
 0x725   : > { %p9975_p8 = pneg %p9974_p7 }
 0x726   : > { %p9981_p13 = por %p9980_p12, %p9979_p11 }
 0x728   : > { %p9982_p0 = pnand %p9981_p13, %p9975_p8 }
 0x72a   : > { %9985 = shalt.err (!%p9982_p0)
}
 0x72b   : > { %9790 = dma.vmem_to_hbm [thread:$0]  (%p10123_p5), %s12465_s13, 16, %s12463_s15, %s7928_s16  }
 0x72c PF: > { %p9796_p1 = scmp.ge.s32.totalorder %s10020_s20, 2  ;;  %s7952_s21 = sand.u32 1, %s10008_s17  }
 0x72d   : > { %s7953_s24 = scalar_lea.sflag [#allocation6], %s7952_s21 }
 0x72e   : > { %p9793_p2 = pnand %p9796_p1, %p10127_p6 }
 0x730   : > { %10003 = dma.done.wait (!%p9793_p2), %s7953_s24, 16  }
 0x731   : > { %10005 = vsyncadd (!%p9793_p2), %s7953_s24, 4294967280  ;;  %p21_p3 = scmp.ge.s32.totalorder %s10110_s23, 4   ;;  %s12519_s17 = smov %s10012_s18 }
 0x732   : > { %s12520_s18 = smov %s10016_s19  ;;  %s12521_s19 = smov %s10121_s26 }
 0x733   : > { %s12522_s20 = smov %s10110_s23  ;;  %23 = sbr.rel (!%p21_p3) target bundleno = 3 (0x3), region = 239 }
 0x73a   :  { %7957 = vsyncpa [#allocation6], 1 }
 0x73b   :  { %7959 = vsyncpa [#allocation6 + $0x1], 1 }

</bundles_post_ra>
